<compile_context>
chip_gen: v5e
topology: v5e:2x2
jax: 0.10.0
libtpu: 0.0.40
codegen_flags: <defaults>
</compile_context>

<pallas_src>
import functools
import math

import jax
import jax.numpy as jnp
from jax.experimental import pallas as pl
from jax.experimental.pallas import tpu as pltpu


# ----------------------------------------------------------------------------
# In-kernel helpers
# ----------------------------------------------------------------------------

def _ln(x, g, b, eps=1e-5):
    mean = jnp.mean(x, axis=-1, keepdims=True)
    var = jnp.mean((x - mean) ** 2, axis=-1, keepdims=True)
    return (x - mean) * jax.lax.rsqrt(var + eps) * g + b


def _gelu(x):
    # TODO(synk): PyTorch nn.GELU default is erf-based; tanh approximation used
    # here since erf lowering in Mosaic is not guaranteed.
    c = 0.7978845608028654  # sqrt(2/pi)
    return 0.5 * x * (1.0 + jnp.tanh(c * (x + 0.044715 * x * x * x)))


_BF16 = jnp.bfloat16


# ----------------------------------------------------------------------------
# Pallas kernels
# ----------------------------------------------------------------------------

def _transformer_layer_kernel(x_ref, t_ref,
                              a_g_ref, a_b_ref, wqkv_ref, wout_ref, bout_ref,
                              f_g_ref, f_b_ref, w1_ref, b1_ref, w2_ref, b2_ref,
                              o_ref, *, heads, dim_head, scale):
    """One full transformer layer for the whole batch, fully fused.

    Attention: LN -> fused QKV matmul -> per-head softmax(q k^T) v (batched
               over B) -> single out-projection -> residual.
    FeedForward: LN(x + t_emb) -> W1 + GELU -> W2 -> residual.
    Matmul inputs are bf16; accumulation / LN / softmax in f32.
    """
    B, N, D = x_ref.shape
    inner = heads * dim_head

    x = x_ref[...].astype(jnp.float32)                           # (B, N, D)

    # -------- attention sub-block --------
    xn = _ln(x, a_g_ref[...], a_b_ref[...])
    xn2 = xn.reshape(B * N, D).astype(_BF16)
    qkv = jnp.dot(xn2, wqkv_ref[...].astype(_BF16),
                  preferred_element_type=jnp.float32)            # (B*N, 3*inner)
    # Fold the softmax scale into q instead of scaling the (N, N) scores.
    q = (qkv[:, :inner] * scale).reshape(B, N, inner).astype(_BF16)
    k = qkv[:, inner:2 * inner].reshape(B, N, inner).astype(_BF16)
    v = qkv[:, 2 * inner:].reshape(B, N, inner).astype(_BF16)

    head_outs = []
    for h in range(heads):                                       # static loop
        sl = slice(h * dim_head, (h + 1) * dim_head)
        s = jnp.einsum('bqd,bkd->bqk', q[:, :, sl], k[:, :, sl],
                       preferred_element_type=jnp.float32)       # (B, N, N)
        s = s - jnp.max(s, axis=-1, keepdims=True)
        p = jnp.exp(s)
        p = p * pl.reciprocal(jnp.sum(p, axis=-1, keepdims=True), approx=True)
        head_outs.append(
            jnp.einsum('bqk,bkd->bqd', p.astype(_BF16), v[:, :, sl],
                       preferred_element_type=jnp.float32))      # (B, N, dh)
    attn = jnp.concatenate(head_outs, axis=-1)                   # (B, N, inner)
    attn = jnp.dot(attn.reshape(B * N, inner).astype(_BF16),
                   wout_ref[...].astype(_BF16),
                   preferred_element_type=jnp.float32) + bout_ref[...]
    x = x + attn.reshape(B, N, D)                                # residual

    # -------- feed-forward sub-block (timestep-conditioned) --------
    hn = _ln(x + t_ref[...], f_g_ref[...], f_b_ref[...])
    h1 = _gelu(jnp.dot(hn.reshape(B * N, D).astype(_BF16),
                       w1_ref[...].astype(_BF16),
                       preferred_element_type=jnp.float32) + b1_ref[...])
    ff = jnp.dot(h1.astype(_BF16), w2_ref[...].astype(_BF16),
                 preferred_element_type=jnp.float32) + b2_ref[...]
    x = x + ff.reshape(B, N, D)                                  # residual

    o_ref[...] = x.astype(o_ref.dtype)


def _patch_embed_kernel(x_ref, g1_ref, b1_ref, w_ref, b_ref, g2_ref, b2_ref,
                        pos_ref, o_ref):
    # Fused: LN -> Linear -> LN -> + pos_embedding (pos broadcast in-kernel).
    BB, P, Dp = x_ref.shape
    E = w_ref.shape[1]
    x = x_ref[...].astype(jnp.float32)
    xn = _ln(x, g1_ref[...], b1_ref[...])
    h = jnp.dot(xn.reshape(BB * P, Dp).astype(_BF16), w_ref[...].astype(_BF16),
                preferred_element_type=jnp.float32) + b_ref[...]
    hn = _ln(h.reshape(BB, P, E), g2_ref[...], b2_ref[...])
    o_ref[...] = (hn + pos_ref[...]).astype(o_ref.dtype)


def _time_mlp_kernel(t_ref, w1_ref, b1_ref, w2_ref, b2_ref, o_ref):
    # Fused timestep MLP: Linear -> GELU -> Linear.
    h = _gelu(jnp.dot(t_ref[...].astype(_BF16), w1_ref[...].astype(_BF16),
                      preferred_element_type=jnp.float32) + b1_ref[...])
    o_ref[...] = (jnp.dot(h.astype(_BF16), w2_ref[...].astype(_BF16),
                          preferred_element_type=jnp.float32)
                  + b2_ref[...]).astype(o_ref.dtype)


def _linear_kernel(x_ref, w_ref, b_ref, o_ref):
    y = jnp.dot(x_ref[...].astype(_BF16), w_ref[...].astype(_BF16),
                preferred_element_type=jnp.float32)
    o_ref[...] = (y + b_ref[...]).astype(o_ref.dtype)


def _linear_add_kernel(x_ref, w_ref, b_ref, a_ref, o_ref):
    # Linear + bias + extra elementwise addend (e.g. gathered pos emb).
    y = jnp.dot(x_ref[...].astype(_BF16), w_ref[...].astype(_BF16),
                preferred_element_type=jnp.float32)
    o_ref[...] = (y + b_ref[...] + a_ref[...]).astype(o_ref.dtype)


def _layernorm_kernel(x_ref, g_ref, b_ref, o_ref):
    o_ref[...] = _ln(x_ref[...].astype(jnp.float32),
                     g_ref[...], b_ref[...]).astype(o_ref.dtype)


# ----------------------------------------------------------------------------
# Pallas wrappers (no grid: whole batch per invocation; everything in VMEM)
# ----------------------------------------------------------------------------

_VMEM = pl.BlockSpec(memory_space=pltpu.MemorySpace.VMEM)


def transformer_layer(x, t_emb, lp, heads, dim_head):
    B, N, D = x.shape
    ap, fp = lp["attn"], lp["ff"]
    inner = heads * dim_head
    Hff = fp["w1"].shape[1]
    kernel = functools.partial(_transformer_layer_kernel, heads=heads,
                               dim_head=dim_head, scale=dim_head ** (-0.5))
    cost = pl.CostEstimate(
        flops=2 * B * N * (3 * D * inner + inner * D + 2 * D * Hff)
              + 4 * B * heads * N * N * dim_head,
        transcendentals=B * heads * N * N + B * N * Hff,
        bytes_accessed=4 * (2 * B * N * D + B * D + 4 * D + Hff)
                       + 2 * (4 * D * inner + 2 * D * Hff))
    return pl.pallas_call(
        kernel,
        out_shape=jax.ShapeDtypeStruct((B, N, D), jnp.float32),
        in_specs=[_VMEM] * 13,
        out_specs=_VMEM,
        input_output_aliases={0: 0},        # output fully overwrites x
        cost_estimate=cost,
    )(x.astype(jnp.float32),
      t_emb.reshape(B, 1, D).astype(jnp.float32),
      ap["ln_g"].reshape(1, D), ap["ln_b"].reshape(1, D),
      ap["w_qkv"], ap["w_out"], ap["b_out"].reshape(1, D),
      fp["ln_g"].reshape(1, D), fp["ln_b"].reshape(1, D),
      fp["w1"], fp["b1"].reshape(1, Hff), fp["w2"], fp["b2"].reshape(1, D))


def layernorm(x, g, b):
    D = x.shape[-1]
    return pl.pallas_call(
        _layernorm_kernel,
        out_shape=jax.ShapeDtypeStruct(x.shape, jnp.float32),
        in_specs=[_VMEM] * 3,
        out_specs=_VMEM,
    )(x.astype(jnp.float32), g.reshape(1, D).astype(jnp.float32),
      b.reshape(1, D).astype(jnp.float32))


def patch_embed(patches, pe, pos_embedding):
    BB, P, Dp = patches.shape
    E = pe["w"].shape[1]
    return pl.pallas_call(
        _patch_embed_kernel,
        out_shape=jax.ShapeDtypeStruct((BB, P, E), jnp.float32),
        in_specs=[_VMEM] * 8,
        out_specs=_VMEM,
    )(patches.astype(jnp.float32),
      pe["ln1_g"].reshape(1, Dp), pe["ln1_b"].reshape(1, Dp),
      pe["w"], pe["b"].reshape(1, E),
      pe["ln2_g"].reshape(1, E), pe["ln2_b"].reshape(1, E),
      pos_embedding.reshape(P, E).astype(jnp.float32))


def time_mlp(te, p):
    B, D = te.shape
    H = p["te_w1"].shape[1]
    return pl.pallas_call(
        _time_mlp_kernel,
        out_shape=jax.ShapeDtypeStruct((B, D), jnp.float32),
        in_specs=[_VMEM] * 5,
        out_specs=_VMEM,
    )(te.astype(jnp.float32), p["te_w1"], p["te_b1"].reshape(1, H),
      p["te_w2"], p["te_b2"].reshape(1, D))


def linear(x, w, b, add=None):
    orig = x.shape
    Din, Dout = w.shape
    x2 = x.reshape(-1, Din).astype(jnp.float32)
    b2 = b.reshape(1, Dout).astype(jnp.float32)
    if add is None:
        out = pl.pallas_call(
            _linear_kernel,
            out_shape=jax.ShapeDtypeStruct((x2.shape[0], Dout), jnp.float32),
            in_specs=[_VMEM] * 3, out_specs=_VMEM,
        )(x2, w, b2)
    else:
        out = pl.pallas_call(
            _linear_add_kernel,
            out_shape=jax.ShapeDtypeStruct((x2.shape[0], Dout), jnp.float32),
            in_specs=[_VMEM] * 4, out_specs=_VMEM,
        )(x2, w, b2, add.reshape(-1, Dout).astype(jnp.float32))
    return out.reshape(orig[:-1] + (Dout,))


# ----------------------------------------------------------------------------
# Model building blocks (match PyTorch reference semantics)
# ----------------------------------------------------------------------------

def timestep_embedding(timesteps, dim, max_period=10000):
    half = dim // 2
    freqs = jnp.exp(-math.log(max_period) *
                    jnp.arange(half, dtype=jnp.float32) / half)
    args = timesteps[:, None].astype(jnp.float32) * freqs[None]
    emb = jnp.concatenate([jnp.cos(args), jnp.sin(args)], axis=-1)
    if dim % 2:
        emb = jnp.concatenate([emb, jnp.zeros_like(emb[:, :1])], axis=-1)
    return emb


def transformer_fwd(p, x, heads, dim_head, t_emb=None):
    B, _, D = x.shape
    if t_emb is None:
        t_emb = jnp.zeros((B, D), jnp.float32)   # plain transformer: no cond.
    for lp in p["layers"]:
        x = transformer_layer(x, t_emb, lp, heads, dim_head)
    return layernorm(x, p["norm_g"], p["norm_b"])


def diff_transformer_fwd(p, x, timesteps, heads, dim_head):
    dim = x.shape[-1]
    t_emb = time_mlp(timestep_embedding(timesteps, dim), p)
    return transformer_fwd(p, x, heads, dim_head, t_emb=t_emb)


def to_patch(img, cfg):
    # 'b c (h p1) (w p2) -> b (h w) (p1 p2 c)'
    B, C, H, W = img.shape
    p = cfg["patch_size"]
    h, w = H // p, W // p
    x = img.reshape(B, C, h, p, w, p)
    x = x.transpose(0, 2, 4, 3, 5, 1)            # b h w p1 p2 c
    return x.reshape(B, h * w, p * p * C)


def to_image(patches, cfg):
    B, P, D = patches.shape
    p = cfg["patch_size"]
    C = cfg["channels"]
    h = w = cfg["img_size"] // p
    x = patches.reshape(B, h, w, p, p, C)
    x = x.transpose(0, 5, 1, 3, 2, 4)            # b c h p1 w p2
    return x.reshape(B, C, h * p, w * p)


# ----------------------------------------------------------------------------
# MAE forward  (encoder.pool == 'mean' variant)
# ----------------------------------------------------------------------------

def mae_forward(params, cfg, img_clean, img_noise, timesteps, rand_indices=None):
    B = img_clean.shape[0]
    unmasked_patches = to_patch(img_clean, cfg)
    masked_patches = to_patch(img_noise, cfg)
    P = masked_patches.shape[1]

    # Patch embedding once for clean+noise (shared weights, one launch).
    all_patches = jnp.concatenate([unmasked_patches, masked_patches], axis=0)
    all_tokens = patch_embed(all_patches, params["patch_emb"],
                             params["pos_embedding"])
    unmasked_tokens, masked_tokens = all_tokens[:B], all_tokens[B:]

    num_masked = int(cfg["masking_ratio"] * P)
    if rand_indices is None:
        rand_indices = jnp.argsort(
            jax.random.uniform(jax.random.PRNGKey(42), (B, P)), axis=-1)
    masked_indices = rand_indices[:, :num_masked]
    unmasked_indices = rand_indices[:, num_masked:]
    inv_perm = jnp.argsort(rand_indices, axis=-1)      # inverse permutation
    batch_range = jnp.arange(B)[:, None]

    unmasked_sel = unmasked_tokens[batch_range, unmasked_indices]
    masked_sel = masked_tokens[batch_range, masked_indices]

    # unmasked branch: plain transformer encoder
    encoded = transformer_fwd(params["enc_transformer"], unmasked_sel,
                              cfg["enc_heads"], cfg["enc_dim_head"])
    unmasked_dec = linear(encoded, params["enc_to_dec"]["w"],
                          params["enc_to_dec"]["b"],
                          add=params["decoder_pos_emb"][unmasked_indices])

    # masked branch: diffusion transformer encoder
    masked_encoded = diff_transformer_fwd(params["enc_diff_transformer"],
                                          masked_sel, timesteps,
                                          cfg["enc_heads"], cfg["enc_dim_head"])
    masked_dec = linear(masked_encoded, params["enc_to_dec"]["w"],
                        params["enc_to_dec"]["b"],
                        add=params["decoder_pos_emb"][masked_indices])

    # decoder tokens via ONE inverse-permutation gather (no scatters)
    decoder_tokens = jnp.concatenate([masked_dec, unmasked_dec],
                                     axis=1)[batch_range, inv_perm]

    decoded = diff_transformer_fwd(params["decoder"], decoder_tokens, timesteps,
                                   cfg["dec_heads"], cfg["dec_dim_head"])
    mask_toks = decoded[batch_range, masked_indices]
    pred_pixels = linear(mask_toks, params["to_pixels"]["w"],
                         params["to_pixels"]["b"])

    unmasked_patch_sel = unmasked_patches[batch_range, unmasked_indices]
    out_patches = jnp.concatenate(
        [pred_pixels.astype(jnp.float32), unmasked_patch_sel.astype(jnp.float32)],
        axis=1)[batch_range, inv_perm]
    outputs = to_image(out_patches, cfg)

    mask_patches = jnp.broadcast_to(
        (inv_perm < num_masked).astype(jnp.float32)[:, :, None],
        unmasked_patches.shape)
    mask = to_image(mask_patches, cfg)
    return outputs, mask


# ----------------------------------------------------------------------------
# Parameter init + one-time bf16 weight preparation (outside jit)
# ----------------------------------------------------------------------------

_BF16_KEYS = {"w", "w_qkv", "w_out", "w1", "w2", "te_w1", "te_w2"}


def prepare_params(p):
    """Cast matmul weights to bf16 once (outside jit); biases/LN stay f32."""
    if isinstance(p, dict):
        return {k: (v.astype(jnp.bfloat16) if k in _BF16_KEYS
                    else prepare_params(v)) for k, v in p.items()}
    if isinstance(p, (list, tuple)):
        return type(p)(prepare_params(v) for v in p)
    return p


def init_params(key, cfg):
    keys = iter(jax.random.split(key, 256))

    def nrm(shape, scale=0.02):
        return (scale * jax.random.normal(next(keys), shape)).astype(jnp.float32)

    def attn_p(dim, heads, dim_head):
        inner = heads * dim_head
        return dict(ln_g=jnp.ones((dim,), jnp.float32),
                    ln_b=jnp.zeros((dim,), jnp.float32),
                    w_qkv=nrm((dim, 3 * inner)),
                    w_out=nrm((inner, dim)),
                    b_out=jnp.zeros((dim,), jnp.float32))

    def ff_p(dim, hidden):
        return dict(ln_g=jnp.ones((dim,), jnp.float32),
                    ln_b=jnp.zeros((dim,), jnp.float32),
                    w1=nrm((dim, hidden)), b1=jnp.zeros((hidden,), jnp.float32),
                    w2=nrm((hidden, dim)), b2=jnp.zeros((dim,), jnp.float32))

    def transformer_p(dim, depth, heads, dim_head, mlp_dim):
        return dict(layers=[dict(attn=attn_p(dim, heads, dim_head),
                                 ff=ff_p(dim, mlp_dim)) for _ in range(depth)],
                    norm_g=jnp.ones((dim,), jnp.float32),
                    norm_b=jnp.zeros((dim,), jnp.float32))

    def diff_transformer_p(dim, depth, heads, dim_head, mlp_dim):
        p = transformer_p(dim, depth, heads, dim_head, mlp_dim)
        p.update(te_w1=nrm((dim, 4 * dim)),
                 te_b1=jnp.zeros((4 * dim,), jnp.float32),
                 te_w2=nrm((4 * dim, dim)),
                 te_b2=jnp.zeros((dim,), jnp.float32))
        return p

    patch_dim = cfg["patch_size"] ** 2 * cfg["channels"]
    num_patches = (cfg["img_size"] // cfg["patch_size"]) ** 2
    enc_dim, dec_dim = cfg["enc_dim"], cfg["decoder_dim"]

    return dict(
        patch_emb=dict(ln1_g=jnp.ones((patch_dim,), jnp.float32),
                       ln1_b=jnp.zeros((patch_dim,), jnp.float32),
                       w=nrm((patch_dim, enc_dim)),
                       b=jnp.zeros((enc_dim,), jnp.float32),
                       ln2_g=jnp.ones((enc_dim,), jnp.float32),
                       ln2_b=jnp.zeros((enc_dim,), jnp.float32)),
        pos_embedding=nrm((1, num_patches, enc_dim)),
        enc_transformer=transformer_p(enc_dim, cfg["enc_depth"],
                                      cfg["enc_heads"], cfg["enc_dim_head"],
                                      cfg["enc_mlp_dim"]),
        enc_diff_transformer=diff_transformer_p(enc_dim, cfg["enc_depth"],
                                                cfg["enc_heads"],
                                                cfg["enc_dim_head"],
                                                cfg["enc_mlp_dim"]),
        enc_to_dec=dict(w=nrm((enc_dim, dec_dim)),
                        b=jnp.zeros((dec_dim,), jnp.float32)),
        decoder_pos_emb=nrm((num_patches, dec_dim)),
        to_pixels=dict(w=nrm((dec_dim, patch_dim)),
                       b=jnp.zeros((patch_dim,), jnp.float32)),
        decoder=diff_transformer_p(dec_dim, cfg["dec_depth"], cfg["dec_heads"],
                                   cfg["dec_dim_head"], 4 * dec_dim),
        # mask_token / enc_to_dec2 exist in __init__ but are unused in forward.
    )


# ----------------------------------------------------------------------------
# Main
# ----------------------------------------------------------------------------

if __name__ == "__main__":
    cfg = dict(
        img_size=16, patch_size=4, channels=4,
        enc_dim=32, enc_depth=1, enc_heads=4, enc_dim_head=8, enc_mlp_dim=64,
        decoder_dim=48, dec_depth=1, dec_heads=4, dec_dim_head=8,
        masking_ratio=0.75,
    )
    key = jax.random.PRNGKey(0)
    k_p, k_c, k_n, k_idx = jax.random.split(key, 4)

    params = prepare_params(init_params(k_p, cfg))   # bf16 matmul weights, once

    B = 2
    img_clean = jax.random.normal(k_c, (B, cfg["channels"],
                                        cfg["img_size"], cfg["img_size"]),
                                  jnp.float32)
    img_noise = jax.random.normal(k_n, (B, cfg["channels"],
                                        cfg["img_size"], cfg["img_size"]),
                                  jnp.float32)
    timesteps = jnp.array([3.0, 7.0], jnp.float32)

    num_patches = (cfg["img_size"] // cfg["patch_size"]) ** 2
    rand_indices = jnp.argsort(jax.random.uniform(k_idx, (B, num_patches)),
                               axis=-1)

    @jax.jit
    def run(p, ic, inz, ts, ri):
        return mae_forward(p, cfg, ic, inz, ts, ri)

    outputs, mask = run(params, img_clean, img_noise, timesteps, rand_indices)
    jax.block_until_ready((outputs, mask))

    assert outputs.shape == img_clean.shape
    assert mask.shape == img_clean.shape
    print("KERNEL_OK")
</pallas_src>

<mosaic_0001>
module attributes {stable_mosaic.version = 11 : i64} {
  func.func @_patch_embed_kernel(%arg0: memref<4x16x64xf32, #tpu.memory_space<vmem>>, %arg1: memref<1x64xf32, #tpu.memory_space<vmem>>, %arg2: memref<1x64xf32, #tpu.memory_space<vmem>>, %arg3: memref<64x32xbf16, #tpu.memory_space<vmem>>, %arg4: memref<1x32xf32, #tpu.memory_space<vmem>>, %arg5: memref<1x32xf32, #tpu.memory_space<vmem>>, %arg6: memref<1x32xf32, #tpu.memory_space<vmem>>, %arg7: memref<16x32xf32, #tpu.memory_space<vmem>>, %arg8: memref<4x16x32xf32, #tpu.memory_space<vmem>>) attributes {dimension_semantics = [], scalar_prefetch = 0 : i64, scratch_operands = 0 : i64, tpu.core_type = #tpu.core_type<tc>} {
    %c0 = arith.constant 0 : index
    %c0_0 = arith.constant 0 : index
    %c0_1 = arith.constant 0 : index
    %0 = vector.load %arg0[%c0, %c0_0, %c0_1] : memref<4x16x64xf32, #tpu.memory_space<vmem>>, vector<4x16x64xf32>
    %c0_2 = arith.constant 0 : index
    %c0_3 = arith.constant 0 : index
    %1 = vector.load %arg1[%c0_2, %c0_3] : memref<1x64xf32, #tpu.memory_space<vmem>>, vector<1x64xf32>
    %c0_4 = arith.constant 0 : index
    %c0_5 = arith.constant 0 : index
    %2 = vector.load %arg2[%c0_4, %c0_5] : memref<1x64xf32, #tpu.memory_space<vmem>>, vector<1x64xf32>
    %cst = arith.constant dense<0.000000e+00> : vector<4x16xf32>
    %3 = vector.multi_reduction <add>, %0, %cst [2] : vector<4x16x64xf32> to vector<4x16xf32>
    %4 = vector.shape_cast %3 : vector<4x16xf32> to vector<4x16x1xf32>
    %cst_6 = arith.constant 6.400000e+01 : f32
    %5 = vector.broadcast %cst_6 : f32 to vector<4x16x1xf32>
    %6 = arith.divf %4, %5 : vector<4x16x1xf32>
    %7 = vector.broadcast %6 : vector<4x16x1xf32> to vector<4x16x64xf32>
    %8 = arith.subf %0, %7 : vector<4x16x64xf32>
    %9 = arith.mulf %8, %8 : vector<4x16x64xf32>
    %cst_7 = arith.constant dense<0.000000e+00> : vector<4x16xf32>
    %10 = vector.multi_reduction <add>, %9, %cst_7 [2] : vector<4x16x64xf32> to vector<4x16xf32>
    %11 = vector.shape_cast %10 : vector<4x16xf32> to vector<4x16x1xf32>
    %cst_8 = arith.constant 6.400000e+01 : f32
    %12 = vector.broadcast %cst_8 : f32 to vector<4x16x1xf32>
    %13 = arith.divf %11, %12 : vector<4x16x1xf32>
    %14 = vector.broadcast %6 : vector<4x16x1xf32> to vector<4x16x64xf32>
    %15 = arith.subf %0, %14 : vector<4x16x64xf32>
    %cst_9 = arith.constant 9.99999974E-6 : f32
    %16 = vector.broadcast %cst_9 : f32 to vector<4x16x1xf32>
    %17 = arith.addf %13, %16 : vector<4x16x1xf32>
    %18 = math.rsqrt %17 : vector<4x16x1xf32>
    %19 = vector.broadcast %18 : vector<4x16x1xf32> to vector<4x16x64xf32>
    %20 = arith.mulf %15, %19 : vector<4x16x64xf32>
    %21 = vector.shape_cast %1 : vector<1x64xf32> to vector<1x1x64xf32>
    %22 = vector.broadcast %21 : vector<1x1x64xf32> to vector<4x16x64xf32>
    %23 = arith.mulf %20, %22 : vector<4x16x64xf32>
    %24 = vector.shape_cast %2 : vector<1x64xf32> to vector<1x1x64xf32>
    %25 = vector.broadcast %24 : vector<1x1x64xf32> to vector<4x16x64xf32>
    %26 = arith.addf %23, %25 : vector<4x16x64xf32>
    %27 = vector.shape_cast %26 : vector<4x16x64xf32> to vector<64x64xf32>
    %28 = arith.truncf %27 : vector<64x64xf32> to vector<64x64xbf16>
    %c0_10 = arith.constant 0 : index
    %c0_11 = arith.constant 0 : index
    %29 = vector.load %arg3[%c0_10, %c0_11] : memref<64x32xbf16, #tpu.memory_space<vmem>>, vector<64x32xbf16>
    %cst_12 = arith.constant dense<0.000000e+00> : vector<64x32xf32>
    %30 = tpu.matmul %28, %29, %cst_12 {dimension_numbers = #tpu.dot_dimension_numbers<[1], [0], [0], [1], [0, 0, 1, 1], [], []>} : vector<64x64xbf16>, vector<64x32xbf16>, vector<64x32xf32> -> vector<64x32xf32>
    %c0_13 = arith.constant 0 : index
    %c0_14 = arith.constant 0 : index
    %31 = vector.load %arg4[%c0_13, %c0_14] : memref<1x32xf32, #tpu.memory_space<vmem>>, vector<1x32xf32>
    %32 = vector.broadcast %31 : vector<1x32xf32> to vector<64x32xf32>
    %33 = arith.addf %30, %32 : vector<64x32xf32>
    %34 = vector.shape_cast %33 : vector<64x32xf32> to vector<4x16x32xf32>
    %c0_15 = arith.constant 0 : index
    %c0_16 = arith.constant 0 : index
    %35 = vector.load %arg5[%c0_15, %c0_16] : memref<1x32xf32, #tpu.memory_space<vmem>>, vector<1x32xf32>
    %c0_17 = arith.constant 0 : index
    %c0_18 = arith.constant 0 : index
    %36 = vector.load %arg6[%c0_17, %c0_18] : memref<1x32xf32, #tpu.memory_space<vmem>>, vector<1x32xf32>
    %cst_19 = arith.constant dense<0.000000e+00> : vector<4x16xf32>
    %37 = vector.multi_reduction <add>, %34, %cst_19 [2] : vector<4x16x32xf32> to vector<4x16xf32>
    %38 = vector.shape_cast %37 : vector<4x16xf32> to vector<4x16x1xf32>
    %cst_20 = arith.constant 3.200000e+01 : f32
    %39 = vector.broadcast %cst_20 : f32 to vector<4x16x1xf32>
    %40 = arith.divf %38, %39 : vector<4x16x1xf32>
    %41 = vector.broadcast %40 : vector<4x16x1xf32> to vector<4x16x32xf32>
    %42 = arith.subf %34, %41 : vector<4x16x32xf32>
    %43 = arith.mulf %42, %42 : vector<4x16x32xf32>
    %cst_21 = arith.constant dense<0.000000e+00> : vector<4x16xf32>
    %44 = vector.multi_reduction <add>, %43, %cst_21 [2] : vector<4x16x32xf32> to vector<4x16xf32>
    %45 = vector.shape_cast %44 : vector<4x16xf32> to vector<4x16x1xf32>
    %cst_22 = arith.constant 3.200000e+01 : f32
    %46 = vector.broadcast %cst_22 : f32 to vector<4x16x1xf32>
    %47 = arith.divf %45, %46 : vector<4x16x1xf32>
    %48 = vector.broadcast %40 : vector<4x16x1xf32> to vector<4x16x32xf32>
    %49 = arith.subf %34, %48 : vector<4x16x32xf32>
    %cst_23 = arith.constant 9.99999974E-6 : f32
    %50 = vector.broadcast %cst_23 : f32 to vector<4x16x1xf32>
    %51 = arith.addf %47, %50 : vector<4x16x1xf32>
    %52 = math.rsqrt %51 : vector<4x16x1xf32>
    %53 = vector.broadcast %52 : vector<4x16x1xf32> to vector<4x16x32xf32>
    %54 = arith.mulf %49, %53 : vector<4x16x32xf32>
    %55 = vector.shape_cast %35 : vector<1x32xf32> to vector<1x1x32xf32>
    %56 = vector.broadcast %55 : vector<1x1x32xf32> to vector<4x16x32xf32>
    %57 = arith.mulf %54, %56 : vector<4x16x32xf32>
    %58 = vector.shape_cast %36 : vector<1x32xf32> to vector<1x1x32xf32>
    %59 = vector.broadcast %58 : vector<1x1x32xf32> to vector<4x16x32xf32>
    %60 = arith.addf %57, %59 : vector<4x16x32xf32>
    %c0_24 = arith.constant 0 : index
    %c0_25 = arith.constant 0 : index
    %61 = vector.load %arg7[%c0_24, %c0_25] : memref<16x32xf32, #tpu.memory_space<vmem>>, vector<16x32xf32>
    %62 = vector.shape_cast %61 : vector<16x32xf32> to vector<1x16x32xf32>
    %63 = vector.broadcast %62 : vector<1x16x32xf32> to vector<4x16x32xf32>
    %64 = arith.addf %60, %63 : vector<4x16x32xf32>
    %c0_26 = arith.constant 0 : index
    %c0_27 = arith.constant 0 : index
    %c0_28 = arith.constant 0 : index
    %65 = vector.load %arg8[%c0_26, %c0_27, %c0_28] : memref<4x16x32xf32, #tpu.memory_space<vmem>>, vector<4x16x32xf32>
    tpu.vector_store %arg8[%c0_26, %c0_27, %c0_28], %64 {strides = array<i32>} : memref<4x16x32xf32, #tpu.memory_space<vmem>>, vector<4x16x32xf32>,
    return
  }
}

module attributes {stable_mosaic.version = 11 : i64} {
  func.func @_time_mlp_kernel(%arg0: memref<2x32xf32, #tpu.memory_space<vmem>>, %arg1: memref<32x128xbf16, #tpu.memory_space<vmem>>, %arg2: memref<1x128xf32, #tpu.memory_space<vmem>>, %arg3: memref<128x32xbf16, #tpu.memory_space<vmem>>, %arg4: memref<1x32xf32, #tpu.memory_space<vmem>>, %arg5: memref<2x32xf32, #tpu.memory_space<vmem>>) attributes {dimension_semantics = [], scalar_prefetch = 0 : i64, scratch_operands = 0 : i64, tpu.core_type = #tpu.core_type<tc>} {
    %c0 = arith.constant 0 : index
    %c0_0 = arith.constant 0 : index
    %0 = vector.load %arg0[%c0, %c0_0] : memref<2x32xf32, #tpu.memory_space<vmem>>, vector<2x32xf32>
    %1 = arith.truncf %0 : vector<2x32xf32> to vector<2x32xbf16>
    %c0_1 = arith.constant 0 : index
    %c0_2 = arith.constant 0 : index
    %2 = vector.load %arg1[%c0_1, %c0_2] : memref<32x128xbf16, #tpu.memory_space<vmem>>, vector<32x128xbf16>
    %cst = arith.constant dense<0.000000e+00> : vector<2x128xf32>
    %3 = tpu.matmul %1, %2, %cst {dimension_numbers = #tpu.dot_dimension_numbers<[1], [0], [0], [1], [0, 0, 1, 1], [], []>} : vector<2x32xbf16>, vector<32x128xbf16>, vector<2x128xf32> -> vector<2x128xf32>
    %c0_3 = arith.constant 0 : index
    %c0_4 = arith.constant 0 : index
    %4 = vector.load %arg2[%c0_3, %c0_4] : memref<1x128xf32, #tpu.memory_space<vmem>>, vector<1x128xf32>
    %5 = vector.broadcast %4 : vector<1x128xf32> to vector<2x128xf32>
    %6 = arith.addf %3, %5 : vector<2x128xf32>
    %cst_5 = arith.constant 5.000000e-01 : f32
    %7 = vector.broadcast %cst_5 : f32 to vector<2x128xf32>
    %8 = arith.mulf %7, %6 : vector<2x128xf32>
    %cst_6 = arith.constant 4.471500e-02 : f32
    %9 = vector.broadcast %cst_6 : f32 to vector<2x128xf32>
    %10 = arith.mulf %9, %6 : vector<2x128xf32>
    %11 = arith.mulf %10, %6 : vector<2x128xf32>
    %12 = arith.mulf %11, %6 : vector<2x128xf32>
    %13 = arith.addf %6, %12 : vector<2x128xf32>
    %cst_7 = arith.constant 0.797884583 : f32
    %14 = vector.broadcast %cst_7 : f32 to vector<2x128xf32>
    %15 = arith.mulf %14, %13 : vector<2x128xf32>
    %16 = math.tanh %15 : vector<2x128xf32>
    %cst_8 = arith.constant 1.000000e+00 : f32
    %17 = vector.broadcast %cst_8 : f32 to vector<2x128xf32>
    %18 = arith.addf %17, %16 : vector<2x128xf32>
    %19 = arith.mulf %8, %18 : vector<2x128xf32>
    %20 = arith.truncf %19 : vector<2x128xf32> to vector<2x128xbf16>
    %c0_9 = arith.constant 0 : index
    %c0_10 = arith.constant 0 : index
    %21 = vector.load %arg3[%c0_9, %c0_10] : memref<128x32xbf16, #tpu.memory_space<vmem>>, vector<128x32xbf16>
    %cst_11 = arith.constant dense<0.000000e+00> : vector<2x32xf32>
    %22 = tpu.matmul %20, %21, %cst_11 {dimension_numbers = #tpu.dot_dimension_numbers<[1], [0], [0], [1], [0, 0, 1, 1], [], []>} : vector<2x128xbf16>, vector<128x32xbf16>, vector<2x32xf32> -> vector<2x32xf32>
    %c0_12 = arith.constant 0 : index
    %c0_13 = arith.constant 0 : index
    %23 = vector.load %arg4[%c0_12, %c0_13] : memref<1x32xf32, #tpu.memory_space<vmem>>, vector<1x32xf32>
    %24 = vector.broadcast %23 : vector<1x32xf32> to vector<2x32xf32>
    %25 = arith.addf %22, %24 : vector<2x32xf32>
    %c0_14 = arith.constant 0 : index
    %c0_15 = arith.constant 0 : index
    %26 = vector.load %arg5[%c0_14, %c0_15] : memref<2x32xf32, #tpu.memory_space<vmem>>, vector<2x32xf32>
    tpu.vector_store %arg5[%c0_14, %c0_15], %25 {strides = array<i32>} : memref<2x32xf32, #tpu.memory_space<vmem>>, vector<2x32xf32>,
    return
  }
}

module attributes {stable_mosaic.version = 11 : i64} {
  func.func @_transformer_layer_kernel(%arg0: memref<2x12x32xf32, #tpu.memory_space<vmem>>, %arg1: memref<2x1x32xf32, #tpu.memory_space<vmem>>, %arg2: memref<1x32xf32, #tpu.memory_space<vmem>>, %arg3: memref<1x32xf32, #tpu.memory_space<vmem>>, %arg4: memref<32x96xbf16, #tpu.memory_space<vmem>>, %arg5: memref<32x32xbf16, #tpu.memory_space<vmem>>, %arg6: memref<1x32xf32, #tpu.memory_space<vmem>>, %arg7: memref<1x32xf32, #tpu.memory_space<vmem>>, %arg8: memref<1x32xf32, #tpu.memory_space<vmem>>, %arg9: memref<32x64xbf16, #tpu.memory_space<vmem>>, %arg10: memref<1x64xf32, #tpu.memory_space<vmem>>, %arg11: memref<64x32xbf16, #tpu.memory_space<vmem>>, %arg12: memref<1x32xf32, #tpu.memory_space<vmem>>, %arg13: memref<2x12x32xf32, #tpu.memory_space<vmem>>) attributes {dimension_semantics = [], scalar_prefetch = 0 : i64, scratch_operands = 0 : i64, tpu.core_type = #tpu.core_type<tc>} {
    %c0 = arith.constant 0 : index
    %c0_0 = arith.constant 0 : index
    %c0_1 = arith.constant 0 : index
    %0 = vector.load %arg0[%c0, %c0_0, %c0_1] : memref<2x12x32xf32, #tpu.memory_space<vmem>>, vector<2x12x32xf32>
    %c0_2 = arith.constant 0 : index
    %c0_3 = arith.constant 0 : index
    %1 = vector.load %arg2[%c0_2, %c0_3] : memref<1x32xf32, #tpu.memory_space<vmem>>, vector<1x32xf32>
    %c0_4 = arith.constant 0 : index
    %c0_5 = arith.constant 0 : index
    %2 = vector.load %arg3[%c0_4, %c0_5] : memref<1x32xf32, #tpu.memory_space<vmem>>, vector<1x32xf32>
    %cst = arith.constant dense<0.000000e+00> : vector<2x12xf32>
    %3 = vector.multi_reduction <add>, %0, %cst [2] : vector<2x12x32xf32> to vector<2x12xf32>
    %4 = vector.shape_cast %3 : vector<2x12xf32> to vector<2x12x1xf32>
    %cst_6 = arith.constant 3.200000e+01 : f32
    %5 = vector.broadcast %cst_6 : f32 to vector<2x12x1xf32>
    %6 = arith.divf %4, %5 : vector<2x12x1xf32>
    %7 = vector.broadcast %6 : vector<2x12x1xf32> to vector<2x12x32xf32>
    %8 = arith.subf %0, %7 : vector<2x12x32xf32>
    %9 = arith.mulf %8, %8 : vector<2x12x32xf32>
    %cst_7 = arith.constant dense<0.000000e+00> : vector<2x12xf32>
    %10 = vector.multi_reduction <add>, %9, %cst_7 [2] : vector<2x12x32xf32> to vector<2x12xf32>
    %11 = vector.shape_cast %10 : vector<2x12xf32> to vector<2x12x1xf32>
    %cst_8 = arith.constant 3.200000e+01 : f32
    %12 = vector.broadcast %cst_8 : f32 to vector<2x12x1xf32>
    %13 = arith.divf %11, %12 : vector<2x12x1xf32>
    %14 = vector.broadcast %6 : vector<2x12x1xf32> to vector<2x12x32xf32>
    %15 = arith.subf %0, %14 : vector<2x12x32xf32>
    %cst_9 = arith.constant 9.99999974E-6 : f32
    %16 = vector.broadcast %cst_9 : f32 to vector<2x12x1xf32>
    %17 = arith.addf %13, %16 : vector<2x12x1xf32>
    %18 = math.rsqrt %17 : vector<2x12x1xf32>
    %19 = vector.broadcast %18 : vector<2x12x1xf32> to vector<2x12x32xf32>
    %20 = arith.mulf %15, %19 : vector<2x12x32xf32>
    %21 = vector.shape_cast %1 : vector<1x32xf32> to vector<1x1x32xf32>
    %22 = vector.broadcast %21 : vector<1x1x32xf32> to vector<2x12x32xf32>
    %23 = arith.mulf %20, %22 : vector<2x12x32xf32>
    %24 = vector.shape_cast %2 : vector<1x32xf32> to vector<1x1x32xf32>
    %25 = vector.broadcast %24 : vector<1x1x32xf32> to vector<2x12x32xf32>
    %26 = arith.addf %23, %25 : vector<2x12x32xf32>
    %27 = vector.shape_cast %26 : vector<2x12x32xf32> to vector<24x32xf32>
    %28 = arith.truncf %27 : vector<24x32xf32> to vector<24x32xbf16>
    %c0_10 = arith.constant 0 : index
    %c0_11 = arith.constant 0 : index
    %29 = vector.load %arg4[%c0_10, %c0_11] : memref<32x96xbf16, #tpu.memory_space<vmem>>, vector<32x96xbf16>
    %cst_12 = arith.constant dense<0.000000e+00> : vector<24x96xf32>
    %30 = tpu.matmul %28, %29, %cst_12 {dimension_numbers = #tpu.dot_dimension_numbers<[1], [0], [0], [1], [0, 0, 1, 1], [], []>} : vector<24x32xbf16>, vector<32x96xbf16>, vector<24x96xf32> -> vector<24x96xf32>
    %31 = vector.extract_strided_slice %30 {offsets = [0, 0], sizes = [24, 32], strides = [1, 1]} : vector<24x96xf32> to vector<24x32xf32>
    %cst_13 = arith.constant 0.353553385 : f32
    %32 = vector.broadcast %cst_13 : f32 to vector<24x32xf32>
    %33 = arith.mulf %31, %32 : vector<24x32xf32>
    %34 = vector.shape_cast %33 : vector<24x32xf32> to vector<2x12x32xf32>
    %35 = arith.truncf %34 : vector<2x12x32xf32> to vector<2x12x32xbf16>
    %36 = vector.extract_strided_slice %30 {offsets = [0, 32], sizes = [24, 32], strides = [1, 1]} : vector<24x96xf32> to vector<24x32xf32>
    %37 = vector.shape_cast %36 : vector<24x32xf32> to vector<2x12x32xf32>
    %38 = arith.truncf %37 : vector<2x12x32xf32> to vector<2x12x32xbf16>
    %39 = vector.extract_strided_slice %30 {offsets = [0, 64], sizes = [24, 32], strides = [1, 1]} : vector<24x96xf32> to vector<24x32xf32>
    %40 = vector.shape_cast %39 : vector<24x32xf32> to vector<2x12x32xf32>
    %41 = arith.truncf %40 : vector<2x12x32xf32> to vector<2x12x32xbf16>
    %42 = vector.extract_strided_slice %35 {offsets = [0, 0, 0], sizes = [2, 12, 8], strides = [1, 1, 1]} : vector<2x12x32xbf16> to vector<2x12x8xbf16>
    %43 = vector.extract_strided_slice %38 {offsets = [0, 0, 0], sizes = [2, 12, 8], strides = [1, 1, 1]} : vector<2x12x32xbf16> to vector<2x12x8xbf16>
    "tpu.trace_start"() <{level = 10 : i32, message = "bqd,bkd->bqk"}> : () -> ()
    %cst_14 = arith.constant dense<0.000000e+00> : vector<2x12x12xf32>
    %44 = tpu.matmul %42, %43, %cst_14 {dimension_numbers = #tpu.dot_dimension_numbers<[2], [2], [1], [1], [0, 0, 0, 1, 1, 1], [0], [0]>} : vector<2x12x8xbf16>, vector<2x12x8xbf16>, vector<2x12x12xf32> -> vector<2x12x12xf32>
    "tpu.trace_stop"() : () -> ()
    %cst_15 = arith.constant dense<0xFF800000> : vector<2x12xf32>
    %45 = vector.multi_reduction <maximumf>, %44, %cst_15 [2] : vector<2x12x12xf32> to vector<2x12xf32>
    %46 = vector.shape_cast %45 : vector<2x12xf32> to vector<2x12x1xf32>
    %47 = vector.broadcast %46 : vector<2x12x1xf32> to vector<2x12x12xf32>
    %48 = arith.subf %44, %47 : vector<2x12x12xf32>
    %49 = math.exp %48 : vector<2x12x12xf32>
    %cst_16 = arith.constant dense<0.000000e+00> : vector<2x12xf32>
    %50 = vector.multi_reduction <add>, %49, %cst_16 [2] : vector<2x12x12xf32> to vector<2x12xf32>
    %51 = vector.shape_cast %50 : vector<2x12xf32> to vector<2x12x1xf32>
    %52 = tpu.reciprocal %51 {approx = true} : vector<2x12x1xf32> -> vector<2x12x1xf32>
    %53 = vector.broadcast %52 : vector<2x12x1xf32> to vector<2x12x12xf32>
    %54 = arith.mulf %49, %53 : vector<2x12x12xf32>
    %55 = arith.truncf %54 : vector<2x12x12xf32> to vector<2x12x12xbf16>
    %56 = vector.extract_strided_slice %41 {offsets = [0, 0, 0], sizes = [2, 12, 8], strides = [1, 1, 1]} : vector<2x12x32xbf16> to vector<2x12x8xbf16>
    "tpu.trace_start"() <{level = 10 : i32, message = "bqk,bkd->bqd"}> : () -> ()
    %cst_17 = arith.constant dense<0.000000e+00> : vector<2x12x8xf32>
    %57 = tpu.matmul %55, %56, %cst_17 {dimension_numbers = #tpu.dot_dimension_numbers<[2], [1], [1], [2], [0, 0, 0, 1, 1, 2], [0], [0]>} : vector<2x12x12xbf16>, vector<2x12x8xbf16>, vector<2x12x8xf32> -> vector<2x12x8xf32>
    "tpu.trace_stop"() : () -> ()
    %58 = vector.extract_strided_slice %35 {offsets = [0, 0, 8], sizes = [2, 12, 8], strides = [1, 1, 1]} : vector<2x12x32xbf16> to vector<2x12x8xbf16>
    %59 = vector.extract_strided_slice %38 {offsets = [0, 0, 8], sizes = [2, 12, 8], strides = [1, 1, 1]} : vector<2x12x32xbf16> to vector<2x12x8xbf16>
    "tpu.trace_start"() <{level = 10 : i32, message = "bqd,bkd->bqk"}> : () -> ()
    %cst_18 = arith.constant dense<0.000000e+00> : vector<2x12x12xf32>
    %60 = tpu.matmul %58, %59, %cst_18 {dimension_numbers = #tpu.dot_dimension_numbers<[2], [2], [1], [1], [0, 0, 0, 1, 1, 1], [0], [0]>} : vector<2x12x8xbf16>, vector<2x12x8xbf16>, vector<2x12x12xf32> -> vector<2x12x12xf32>
    "tpu.trace_stop"() : () -> ()
    %cst_19 = arith.constant dense<0xFF800000> : vector<2x12xf32>
    %61 = vector.multi_reduction <maximumf>, %60, %cst_19 [2] : vector<2x12x12xf32> to vector<2x12xf32>
    %62 = vector.shape_cast %61 : vector<2x12xf32> to vector<2x12x1xf32>
    %63 = vector.broadcast %62 : vector<2x12x1xf32> to vector<2x12x12xf32>
    %64 = arith.subf %60, %63 : vector<2x12x12xf32>
    %65 = math.exp %64 : vector<2x12x12xf32>
    %cst_20 = arith.constant dense<0.000000e+00> : vector<2x12xf32>
    %66 = vector.multi_reduction <add>, %65, %cst_20 [2] : vector<2x12x12xf32> to vector<2x12xf32>
    %67 = vector.shape_cast %66 : vector<2x12xf32> to vector<2x12x1xf32>
    %68 = tpu.reciprocal %67 {approx = true} : vector<2x12x1xf32> -> vector<2x12x1xf32>
    %69 = vector.broadcast %68 : vector<2x12x1xf32> to vector<2x12x12xf32>
    %70 = arith.mulf %65, %69 : vector<2x12x12xf32>
    %71 = arith.truncf %70 : vector<2x12x12xf32> to vector<2x12x12xbf16>
    %72 = vector.extract_strided_slice %41 {offsets = [0, 0, 8], sizes = [2, 12, 8], strides = [1, 1, 1]} : vector<2x12x32xbf16> to vector<2x12x8xbf16>
    "tpu.trace_start"() <{level = 10 : i32, message = "bqk,bkd->bqd"}> : () -> ()
    %cst_21 = arith.constant dense<0.000000e+00> : vector<2x12x8xf32>
    %73 = tpu.matmul %71, %72, %cst_21 {dimension_numbers = #tpu.dot_dimension_numbers<[2], [1], [1], [2], [0, 0, 0, 1, 1, 2], [0], [0]>} : vector<2x12x12xbf16>, vector<2x12x8xbf16>, vector<2x12x8xf32> -> vector<2x12x8xf32>
    "tpu.trace_stop"() : () -> ()
    %74 = vector.extract_strided_slice %35 {offsets = [0, 0, 16], sizes = [2, 12, 8], strides = [1, 1, 1]} : vector<2x12x32xbf16> to vector<2x12x8xbf16>
    %75 = vector.extract_strided_slice %38 {offsets = [0, 0, 16], sizes = [2, 12, 8], strides = [1, 1, 1]} : vector<2x12x32xbf16> to vector<2x12x8xbf16>
    "tpu.trace_start"() <{level = 10 : i32, message = "bqd,bkd->bqk"}> : () -> ()
    %cst_22 = arith.constant dense<0.000000e+00> : vector<2x12x12xf32>
    %76 = tpu.matmul %74, %75, %cst_22 {dimension_numbers = #tpu.dot_dimension_numbers<[2], [2], [1], [1], [0, 0, 0, 1, 1, 1], [0], [0]>} : vector<2x12x8xbf16>, vector<2x12x8xbf16>, vector<2x12x12xf32> -> vector<2x12x12xf32>
    "tpu.trace_stop"() : () -> ()
    %cst_23 = arith.constant dense<0xFF800000> : vector<2x12xf32>
    %77 = vector.multi_reduction <maximumf>, %76, %cst_23 [2] : vector<2x12x12xf32> to vector<2x12xf32>
    %78 = vector.shape_cast %77 : vector<2x12xf32> to vector<2x12x1xf32>
    %79 = vector.broadcast %78 : vector<2x12x1xf32> to vector<2x12x12xf32>
    %80 = arith.subf %76, %79 : vector<2x12x12xf32>
    %81 = math.exp %80 : vector<2x12x12xf32>
    %cst_24 = arith.constant dense<0.000000e+00> : vector<2x12xf32>
    %82 = vector.multi_reduction <add>, %81, %cst_24 [2] : vector<2x12x12xf32> to vector<2x12xf32>
    %83 = vector.shape_cast %82 : vector<2x12xf32> to vector<2x12x1xf32>
    %84 = tpu.reciprocal %83 {approx = true} : vector<2x12x1xf32> -> vector<2x12x1xf32>
    %85 = vector.broadcast %84 : vector<2x12x1xf32> to vector<2x12x12xf32>
    %86 = arith.mulf %81, %85 : vector<2x12x12xf32>
    %87 = arith.truncf %86 : vector<2x12x12xf32> to vector<2x12x12xbf16>
    %88 = vector.extract_strided_slice %41 {offsets = [0, 0, 16], sizes = [2, 12, 8], strides = [1, 1, 1]} : vector<2x12x32xbf16> to vector<2x12x8xbf16>
    "tpu.trace_start"() <{level = 10 : i32, message = "bqk,bkd->bqd"}> : () -> ()
    %cst_25 = arith.constant dense<0.000000e+00> : vector<2x12x8xf32>
    %89 = tpu.matmul %87, %88, %cst_25 {dimension_numbers = #tpu.dot_dimension_numbers<[2], [1], [1], [2], [0, 0, 0, 1, 1, 2], [0], [0]>} : vector<2x12x12xbf16>, vector<2x12x8xbf16>, vector<2x12x8xf32> -> vector<2x12x8xf32>
    "tpu.trace_stop"() : () -> ()
    %90 = vector.extract_strided_slice %35 {offsets = [0, 0, 24], sizes = [2, 12, 8], strides = [1, 1, 1]} : vector<2x12x32xbf16> to vector<2x12x8xbf16>
    %91 = vector.extract_strided_slice %38 {offsets = [0, 0, 24], sizes = [2, 12, 8], strides = [1, 1, 1]} : vector<2x12x32xbf16> to vector<2x12x8xbf16>
    "tpu.trace_start"() <{level = 10 : i32, message = "bqd,bkd->bqk"}> : () -> ()
    %cst_26 = arith.constant dense<0.000000e+00> : vector<2x12x12xf32>
    %92 = tpu.matmul %90, %91, %cst_26 {dimension_numbers = #tpu.dot_dimension_numbers<[2], [2], [1], [1], [0, 0, 0, 1, 1, 1], [0], [0]>} : vector<2x12x8xbf16>, vector<2x12x8xbf16>, vector<2x12x12xf32> -> vector<2x12x12xf32>
    "tpu.trace_stop"() : () -> ()
    %cst_27 = arith.constant dense<0xFF800000> : vector<2x12xf32>
    %93 = vector.multi_reduction <maximumf>, %92, %cst_27 [2] : vector<2x12x12xf32> to vector<2x12xf32>
    %94 = vector.shape_cast %93 : vector<2x12xf32> to vector<2x12x1xf32>
    %95 = vector.broadcast %94 : vector<2x12x1xf32> to vector<2x12x12xf32>
    %96 = arith.subf %92, %95 : vector<2x12x12xf32>
    %97 = math.exp %96 : vector<2x12x12xf32>
    %cst_28 = arith.constant dense<0.000000e+00> : vector<2x12xf32>
    %98 = vector.multi_reduction <add>, %97, %cst_28 [2] : vector<2x12x12xf32> to vector<2x12xf32>
    %99 = vector.shape_cast %98 : vector<2x12xf32> to vector<2x12x1xf32>
    %100 = tpu.reciprocal %99 {approx = true} : vector<2x12x1xf32> -> vector<2x12x1xf32>
    %101 = vector.broadcast %100 : vector<2x12x1xf32> to vector<2x12x12xf32>
    %102 = arith.mulf %97, %101 : vector<2x12x12xf32>
    %103 = arith.truncf %102 : vector<2x12x12xf32> to vector<2x12x12xbf16>
    %104 = vector.extract_strided_slice %41 {offsets = [0, 0, 24], sizes = [2, 12, 8], strides = [1, 1, 1]} : vector<2x12x32xbf16> to vector<2x12x8xbf16>
    "tpu.trace_start"() <{level = 10 : i32, message = "bqk,bkd->bqd"}> : () -> ()
    %cst_29 = arith.constant dense<0.000000e+00> : vector<2x12x8xf32>
    %105 = tpu.matmul %103, %104, %cst_29 {dimension_numbers = #tpu.dot_dimension_numbers<[2], [1], [1], [2], [0, 0, 0, 1, 1, 2], [0], [0]>} : vector<2x12x12xbf16>, vector<2x12x8xbf16>, vector<2x12x8xf32> -> vector<2x12x8xf32>
    "tpu.trace_stop"() : () -> ()
    %106 = tpu.concatenate %57, %73, %89, %105 in 2 : vector<2x12x8xf32>, vector<2x12x8xf32>, vector<2x12x8xf32>, vector<2x12x8xf32> -> vector<2x12x32xf32>
    %107 = vector.shape_cast %106 : vector<2x12x32xf32> to vector<24x32xf32>
    %108 = arith.truncf %107 : vector<24x32xf32> to vector<24x32xbf16>
    %c0_30 = arith.constant 0 : index
    %c0_31 = arith.constant 0 : index
    %109 = vector.load %arg5[%c0_30, %c0_31] : memref<32x32xbf16, #tpu.memory_space<vmem>>, vector<32x32xbf16>
    %cst_32 = arith.constant dense<0.000000e+00> : vector<24x32xf32>
    %110 = tpu.matmul %108, %109, %cst_32 {dimension_numbers = #tpu.dot_dimension_numbers<[1], [0], [0], [1], [0, 0, 1, 1], [], []>} : vector<24x32xbf16>, vector<32x32xbf16>, vector<24x32xf32> -> vector<24x32xf32>
    %c0_33 = arith.constant 0 : index
    %c0_34 = arith.constant 0 : index
    %111 = vector.load %arg6[%c0_33, %c0_34] : memref<1x32xf32, #tpu.memory_space<vmem>>, vector<1x32xf32>
    %112 = vector.broadcast %111 : vector<1x32xf32> to vector<24x32xf32>
    %113 = arith.addf %110, %112 : vector<24x32xf32>
    %114 = vector.shape_cast %113 : vector<24x32xf32> to vector<2x12x32xf32>
    %115 = arith.addf %0, %114 : vector<2x12x32xf32>
    %c0_35 = arith.constant 0 : index
    %c0_36 = arith.constant 0 : index
    %c0_37 = arith.constant 0 : index
    %116 = vector.load %arg1[%c0_35, %c0_36, %c0_37] : memref<2x1x32xf32, #tpu.memory_space<vmem>>, vector<2x1x32xf32>
    %117 = vector.broadcast %116 : vector<2x1x32xf32> to vector<2x12x32xf32>
    %118 = arith.addf %115, %117 : vector<2x12x32xf32>
    %c0_38 = arith.constant 0 : index
    %c0_39 = arith.constant 0 : index
    %119 = vector.load %arg7[%c0_38, %c0_39] : memref<1x32xf32, #tpu.memory_space<vmem>>, vector<1x32xf32>
    %c0_40 = arith.constant 0 : index
    %c0_41 = arith.constant 0 : index
    %120 = vector.load %arg8[%c0_40, %c0_41] : memref<1x32xf32, #tpu.memory_space<vmem>>, vector<1x32xf32>
    %cst_42 = arith.constant dense<0.000000e+00> : vector<2x12xf32>
    %121 = vector.multi_reduction <add>, %118, %cst_42 [2] : vector<2x12x32xf32> to vector<2x12xf32>
    %122 = vector.shape_cast %121 : vector<2x12xf32> to vector<2x12x1xf32>
    %cst_43 = arith.constant 3.200000e+01 : f32
    %123 = vector.broadcast %cst_43 : f32 to vector<2x12x1xf32>
    %124 = arith.divf %122, %123 : vector<2x12x1xf32>
    %125 = vector.broadcast %124 : vector<2x12x1xf32> to vector<2x12x32xf32>
    %126 = arith.subf %118, %125 : vector<2x12x32xf32>
    %127 = arith.mulf %126, %126 : vector<2x12x32xf32>
    %cst_44 = arith.constant dense<0.000000e+00> : vector<2x12xf32>
    %128 = vector.multi_reduction <add>, %127, %cst_44 [2] : vector<2x12x32xf32> to vector<2x12xf32>
    %129 = vector.shape_cast %128 : vector<2x12xf32> to vector<2x12x1xf32>
    %cst_45 = arith.constant 3.200000e+01 : f32
    %130 = vector.broadcast %cst_45 : f32 to vector<2x12x1xf32>
    %131 = arith.divf %129, %130 : vector<2x12x1xf32>
    %132 = vector.broadcast %124 : vector<2x12x1xf32> to vector<2x12x32xf32>
    %133 = arith.subf %118, %132 : vector<2x12x32xf32>
    %cst_46 = arith.constant 9.99999974E-6 : f32
    %134 = vector.broadcast %cst_46 : f32 to vector<2x12x1xf32>
    %135 = arith.addf %131, %134 : vector<2x12x1xf32>
    %136 = math.rsqrt %135 : vector<2x12x1xf32>
    %137 = vector.broadcast %136 : vector<2x12x1xf32> to vector<2x12x32xf32>
    %138 = arith.mulf %133, %137 : vector<2x12x32xf32>
    %139 = vector.shape_cast %119 : vector<1x32xf32> to vector<1x1x32xf32>
    %140 = vector.broadcast %139 : vector<1x1x32xf32> to vector<2x12x32xf32>
    %141 = arith.mulf %138, %140 : vector<2x12x32xf32>
    %142 = vector.shape_cast %120 : vector<1x32xf32> to vector<1x1x32xf32>
    %143 = vector.broadcast %142 : vector<1x1x32xf32> to vector<2x12x32xf32>
    %144 = arith.addf %141, %143 : vector<2x12x32xf32>
    %145 = vector.shape_cast %144 : vector<2x12x32xf32> to vector<24x32xf32>
    %146 = arith.truncf %145 : vector<24x32xf32> to vector<24x32xbf16>
    %c0_47 = arith.constant 0 : index
    %c0_48 = arith.constant 0 : index
    %147 = vector.load %arg9[%c0_47, %c0_48] : memref<32x64xbf16, #tpu.memory_space<vmem>>, vector<32x64xbf16>
    %cst_49 = arith.constant dense<0.000000e+00> : vector<24x64xf32>
    %148 = tpu.matmul %146, %147, %cst_49 {dimension_numbers = #tpu.dot_dimension_numbers<[1], [0], [0], [1], [0, 0, 1, 1], [], []>} : vector<24x32xbf16>, vector<32x64xbf16>, vector<24x64xf32> -> vector<24x64xf32>
    %c0_50 = arith.constant 0 : index
    %c0_51 = arith.constant 0 : index
    %149 = vector.load %arg10[%c0_50, %c0_51] : memref<1x64xf32, #tpu.memory_space<vmem>>, vector<1x64xf32>
    %150 = vector.broadcast %149 : vector<1x64xf32> to vector<24x64xf32>
    %151 = arith.addf %148, %150 : vector<24x64xf32>
    %cst_52 = arith.constant 5.000000e-01 : f32
    %152 = vector.broadcast %cst_52 : f32 to vector<24x64xf32>
    %153 = arith.mulf %152, %151 : vector<24x64xf32>
    %cst_53 = arith.constant 4.471500e-02 : f32
    %154 = vector.broadcast %cst_53 : f32 to vector<24x64xf32>
    %155 = arith.mulf %154, %151 : vector<24x64xf32>
    %156 = arith.mulf %155, %151 : vector<24x64xf32>
    %157 = arith.mulf %156, %151 : vector<24x64xf32>
    %158 = arith.addf %151, %157 : vector<24x64xf32>
    %cst_54 = arith.constant 0.797884583 : f32
    %159 = vector.broadcast %cst_54 : f32 to vector<24x64xf32>
    %160 = arith.mulf %159, %158 : vector<24x64xf32>
    %161 = math.tanh %160 : vector<24x64xf32>
    %cst_55 = arith.constant 1.000000e+00 : f32
    %162 = vector.broadcast %cst_55 : f32 to vector<24x64xf32>
    %163 = arith.addf %162, %161 : vector<24x64xf32>
    %164 = arith.mulf %153, %163 : vector<24x64xf32>
    %165 = arith.truncf %164 : vector<24x64xf32> to vector<24x64xbf16>
    %c0_56 = arith.constant 0 : index
    %c0_57 = arith.constant 0 : index
    %166 = vector.load %arg11[%c0_56, %c0_57] : memref<64x32xbf16, #tpu.memory_space<vmem>>, vector<64x32xbf16>
    %cst_58 = arith.constant dense<0.000000e+00> : vector<24x32xf32>
    %167 = tpu.matmul %165, %166, %cst_58 {dimension_numbers = #tpu.dot_dimension_numbers<[1], [0], [0], [1], [0, 0, 1, 1], [], []>} : vector<24x64xbf16>, vector<64x32xbf16>, vector<24x32xf32> -> vector<24x32xf32>
    %c0_59 = arith.constant 0 : index
    %c0_60 = arith.constant 0 : index
    %168 = vector.load %arg12[%c0_59, %c0_60] : memref<1x32xf32, #tpu.memory_space<vmem>>, vector<1x32xf32>
    %169 = vector.broadcast %168 : vector<1x32xf32> to vector<24x32xf32>
    %170 = arith.addf %167, %169 : vector<24x32xf32>
    %171 = vector.shape_cast %170 : vector<24x32xf32> to vector<2x12x32xf32>
    %172 = arith.addf %115, %171 : vector<2x12x32xf32>
    %c0_61 = arith.constant 0 : index
    %c0_62 = arith.constant 0 : index
    %c0_63 = arith.constant 0 : index
    %173 = vector.load %arg13[%c0_61, %c0_62, %c0_63] : memref<2x12x32xf32, #tpu.memory_space<vmem>>, vector<2x12x32xf32>
    tpu.vector_store %arg13[%c0_61, %c0_62, %c0_63], %172 {strides = array<i32>} : memref<2x12x32xf32, #tpu.memory_space<vmem>>, vector<2x12x32xf32>,
    return
  }
}

module attributes {stable_mosaic.version = 11 : i64} {
  func.func @_layernorm_kernel(%arg0: memref<2x12x32xf32, #tpu.memory_space<vmem>>, %arg1: memref<1x32xf32, #tpu.memory_space<vmem>>, %arg2: memref<1x32xf32, #tpu.memory_space<vmem>>, %arg3: memref<2x12x32xf32, #tpu.memory_space<vmem>>) attributes {dimension_semantics = [], scalar_prefetch = 0 : i64, scratch_operands = 0 : i64, tpu.core_type = #tpu.core_type<tc>} {
    %c0 = arith.constant 0 : index
    %c0_0 = arith.constant 0 : index
    %c0_1 = arith.constant 0 : index
    %0 = vector.load %arg0[%c0, %c0_0, %c0_1] : memref<2x12x32xf32, #tpu.memory_space<vmem>>, vector<2x12x32xf32>
    %c0_2 = arith.constant 0 : index
    %c0_3 = arith.constant 0 : index
    %1 = vector.load %arg1[%c0_2, %c0_3] : memref<1x32xf32, #tpu.memory_space<vmem>>, vector<1x32xf32>
    %c0_4 = arith.constant 0 : index
    %c0_5 = arith.constant 0 : index
    %2 = vector.load %arg2[%c0_4, %c0_5] : memref<1x32xf32, #tpu.memory_space<vmem>>, vector<1x32xf32>
    %cst = arith.constant dense<0.000000e+00> : vector<2x12xf32>
    %3 = vector.multi_reduction <add>, %0, %cst [2] : vector<2x12x32xf32> to vector<2x12xf32>
    %4 = vector.shape_cast %3 : vector<2x12xf32> to vector<2x12x1xf32>
    %cst_6 = arith.constant 3.200000e+01 : f32
    %5 = vector.broadcast %cst_6 : f32 to vector<2x12x1xf32>
    %6 = arith.divf %4, %5 : vector<2x12x1xf32>
    %7 = vector.broadcast %6 : vector<2x12x1xf32> to vector<2x12x32xf32>
    %8 = arith.subf %0, %7 : vector<2x12x32xf32>
    %9 = arith.mulf %8, %8 : vector<2x12x32xf32>
    %cst_7 = arith.constant dense<0.000000e+00> : vector<2x12xf32>
    %10 = vector.multi_reduction <add>, %9, %cst_7 [2] : vector<2x12x32xf32> to vector<2x12xf32>
    %11 = vector.shape_cast %10 : vector<2x12xf32> to vector<2x12x1xf32>
    %cst_8 = arith.constant 3.200000e+01 : f32
    %12 = vector.broadcast %cst_8 : f32 to vector<2x12x1xf32>
    %13 = arith.divf %11, %12 : vector<2x12x1xf32>
    %14 = vector.broadcast %6 : vector<2x12x1xf32> to vector<2x12x32xf32>
    %15 = arith.subf %0, %14 : vector<2x12x32xf32>
    %cst_9 = arith.constant 9.99999974E-6 : f32
    %16 = vector.broadcast %cst_9 : f32 to vector<2x12x1xf32>
    %17 = arith.addf %13, %16 : vector<2x12x1xf32>
    %18 = math.rsqrt %17 : vector<2x12x1xf32>
    %19 = vector.broadcast %18 : vector<2x12x1xf32> to vector<2x12x32xf32>
    %20 = arith.mulf %15, %19 : vector<2x12x32xf32>
    %21 = vector.shape_cast %1 : vector<1x32xf32> to vector<1x1x32xf32>
    %22 = vector.broadcast %21 : vector<1x1x32xf32> to vector<2x12x32xf32>
    %23 = arith.mulf %20, %22 : vector<2x12x32xf32>
    %24 = vector.shape_cast %2 : vector<1x32xf32> to vector<1x1x32xf32>
    %25 = vector.broadcast %24 : vector<1x1x32xf32> to vector<2x12x32xf32>
    %26 = arith.addf %23, %25 : vector<2x12x32xf32>
    %c0_10 = arith.constant 0 : index
    %c0_11 = arith.constant 0 : index
    %c0_12 = arith.constant 0 : index
    %27 = vector.load %arg3[%c0_10, %c0_11, %c0_12] : memref<2x12x32xf32, #tpu.memory_space<vmem>>, vector<2x12x32xf32>
    tpu.vector_store %arg3[%c0_10, %c0_11, %c0_12], %26 {strides = array<i32>} : memref<2x12x32xf32, #tpu.memory_space<vmem>>, vector<2x12x32xf32>,
    return
  }
}

module attributes {stable_mosaic.version = 11 : i64} {
  func.func @_linear_add_kernel(%arg0: memref<24x32xf32, #tpu.memory_space<vmem>>, %arg1: memref<32x48xbf16, #tpu.memory_space<vmem>>, %arg2: memref<1x48xf32, #tpu.memory_space<vmem>>, %arg3: memref<24x48xf32, #tpu.memory_space<vmem>>, %arg4: memref<24x48xf32, #tpu.memory_space<vmem>>) attributes {dimension_semantics = [], scalar_prefetch = 0 : i64, scratch_operands = 0 : i64, tpu.core_type = #tpu.core_type<tc>} {
    %c0 = arith.constant 0 : index
    %c0_0 = arith.constant 0 : index
    %0 = vector.load %arg0[%c0, %c0_0] : memref<24x32xf32, #tpu.memory_space<vmem>>, vector<24x32xf32>
    %1 = arith.truncf %0 : vector<24x32xf32> to vector<24x32xbf16>
    %c0_1 = arith.constant 0 : index
    %c0_2 = arith.constant 0 : index
    %2 = vector.load %arg1[%c0_1, %c0_2] : memref<32x48xbf16, #tpu.memory_space<vmem>>, vector<32x48xbf16>
    %cst = arith.constant dense<0.000000e+00> : vector<24x48xf32>
    %3 = tpu.matmul %1, %2, %cst {dimension_numbers = #tpu.dot_dimension_numbers<[1], [0], [0], [1], [0, 0, 1, 1], [], []>} : vector<24x32xbf16>, vector<32x48xbf16>, vector<24x48xf32> -> vector<24x48xf32>
    %c0_3 = arith.constant 0 : index
    %c0_4 = arith.constant 0 : index
    %4 = vector.load %arg2[%c0_3, %c0_4] : memref<1x48xf32, #tpu.memory_space<vmem>>, vector<1x48xf32>
    %5 = vector.broadcast %4 : vector<1x48xf32> to vector<24x48xf32>
    %6 = arith.addf %3, %5 : vector<24x48xf32>
    %c0_5 = arith.constant 0 : index
    %c0_6 = arith.constant 0 : index
    %7 = vector.load %arg3[%c0_5, %c0_6] : memref<24x48xf32, #tpu.memory_space<vmem>>, vector<24x48xf32>
    %8 = arith.addf %6, %7 : vector<24x48xf32>
    %c0_7 = arith.constant 0 : index
    %c0_8 = arith.constant 0 : index
    %9 = vector.load %arg4[%c0_7, %c0_8] : memref<24x48xf32, #tpu.memory_space<vmem>>, vector<24x48xf32>
    tpu.vector_store %arg4[%c0_7, %c0_8], %8 {strides = array<i32>} : memref<24x48xf32, #tpu.memory_space<vmem>>, vector<24x48xf32>,
    return
  }
}

module attributes {stable_mosaic.version = 11 : i64} {
  func.func @_layernorm_kernel(%arg0: memref<2x4x32xf32, #tpu.memory_space<vmem>>, %arg1: memref<1x32xf32, #tpu.memory_space<vmem>>, %arg2: memref<1x32xf32, #tpu.memory_space<vmem>>, %arg3: memref<2x4x32xf32, #tpu.memory_space<vmem>>) attributes {dimension_semantics = [], scalar_prefetch = 0 : i64, scratch_operands = 0 : i64, tpu.core_type = #tpu.core_type<tc>} {
    %c0 = arith.constant 0 : index
    %c0_0 = arith.constant 0 : index
    %c0_1 = arith.constant 0 : index
    %0 = vector.load %arg0[%c0, %c0_0, %c0_1] : memref<2x4x32xf32, #tpu.memory_space<vmem>>, vector<2x4x32xf32>
    %c0_2 = arith.constant 0 : index
    %c0_3 = arith.constant 0 : index
    %1 = vector.load %arg1[%c0_2, %c0_3] : memref<1x32xf32, #tpu.memory_space<vmem>>, vector<1x32xf32>
    %c0_4 = arith.constant 0 : index
    %c0_5 = arith.constant 0 : index
    %2 = vector.load %arg2[%c0_4, %c0_5] : memref<1x32xf32, #tpu.memory_space<vmem>>, vector<1x32xf32>
    %cst = arith.constant dense<0.000000e+00> : vector<2x4xf32>
    %3 = vector.multi_reduction <add>, %0, %cst [2] : vector<2x4x32xf32> to vector<2x4xf32>
    %4 = vector.shape_cast %3 : vector<2x4xf32> to vector<2x4x1xf32>
    %cst_6 = arith.constant 3.200000e+01 : f32
    %5 = vector.broadcast %cst_6 : f32 to vector<2x4x1xf32>
    %6 = arith.divf %4, %5 : vector<2x4x1xf32>
    %7 = vector.broadcast %6 : vector<2x4x1xf32> to vector<2x4x32xf32>
    %8 = arith.subf %0, %7 : vector<2x4x32xf32>
    %9 = arith.mulf %8, %8 : vector<2x4x32xf32>
    %cst_7 = arith.constant dense<0.000000e+00> : vector<2x4xf32>
    %10 = vector.multi_reduction <add>, %9, %cst_7 [2] : vector<2x4x32xf32> to vector<2x4xf32>
    %11 = vector.shape_cast %10 : vector<2x4xf32> to vector<2x4x1xf32>
    %cst_8 = arith.constant 3.200000e+01 : f32
    %12 = vector.broadcast %cst_8 : f32 to vector<2x4x1xf32>
    %13 = arith.divf %11, %12 : vector<2x4x1xf32>
    %14 = vector.broadcast %6 : vector<2x4x1xf32> to vector<2x4x32xf32>
    %15 = arith.subf %0, %14 : vector<2x4x32xf32>
    %cst_9 = arith.constant 9.99999974E-6 : f32
    %16 = vector.broadcast %cst_9 : f32 to vector<2x4x1xf32>
    %17 = arith.addf %13, %16 : vector<2x4x1xf32>
    %18 = math.rsqrt %17 : vector<2x4x1xf32>
    %19 = vector.broadcast %18 : vector<2x4x1xf32> to vector<2x4x32xf32>
    %20 = arith.mulf %15, %19 : vector<2x4x32xf32>
    %21 = vector.shape_cast %1 : vector<1x32xf32> to vector<1x1x32xf32>
    %22 = vector.broadcast %21 : vector<1x1x32xf32> to vector<2x4x32xf32>
    %23 = arith.mulf %20, %22 : vector<2x4x32xf32>
    %24 = vector.shape_cast %2 : vector<1x32xf32> to vector<1x1x32xf32>
    %25 = vector.broadcast %24 : vector<1x1x32xf32> to vector<2x4x32xf32>
    %26 = arith.addf %23, %25 : vector<2x4x32xf32>
    %c0_10 = arith.constant 0 : index
    %c0_11 = arith.constant 0 : index
    %c0_12 = arith.constant 0 : index
    %27 = vector.load %arg3[%c0_10, %c0_11, %c0_12] : memref<2x4x32xf32, #tpu.memory_space<vmem>>, vector<2x4x32xf32>
    tpu.vector_store %arg3[%c0_10, %c0_11, %c0_12], %26 {strides = array<i32>} : memref<2x4x32xf32, #tpu.memory_space<vmem>>, vector<2x4x32xf32>,
    return
  }
}

module attributes {stable_mosaic.version = 11 : i64} {
  func.func @_transformer_layer_kernel(%arg0: memref<2x4x32xf32, #tpu.memory_space<vmem>>, %arg1: memref<2x1x32xf32, #tpu.memory_space<vmem>>, %arg2: memref<1x32xf32, #tpu.memory_space<vmem>>, %arg3: memref<1x32xf32, #tpu.memory_space<vmem>>, %arg4: memref<32x96xbf16, #tpu.memory_space<vmem>>, %arg5: memref<32x32xbf16, #tpu.memory_space<vmem>>, %arg6: memref<1x32xf32, #tpu.memory_space<vmem>>, %arg7: memref<1x32xf32, #tpu.memory_space<vmem>>, %arg8: memref<1x32xf32, #tpu.memory_space<vmem>>, %arg9: memref<32x64xbf16, #tpu.memory_space<vmem>>, %arg10: memref<1x64xf32, #tpu.memory_space<vmem>>, %arg11: memref<64x32xbf16, #tpu.memory_space<vmem>>, %arg12: memref<1x32xf32, #tpu.memory_space<vmem>>, %arg13: memref<2x4x32xf32, #tpu.memory_space<vmem>>) attributes {dimension_semantics = [], scalar_prefetch = 0 : i64, scratch_operands = 0 : i64, tpu.core_type = #tpu.core_type<tc>} {
    %c0 = arith.constant 0 : index
    %c0_0 = arith.constant 0 : index
    %c0_1 = arith.constant 0 : index
    %0 = vector.load %arg0[%c0, %c0_0, %c0_1] : memref<2x4x32xf32, #tpu.memory_space<vmem>>, vector<2x4x32xf32>
    %c0_2 = arith.constant 0 : index
    %c0_3 = arith.constant 0 : index
    %1 = vector.load %arg2[%c0_2, %c0_3] : memref<1x32xf32, #tpu.memory_space<vmem>>, vector<1x32xf32>
    %c0_4 = arith.constant 0 : index
    %c0_5 = arith.constant 0 : index
    %2 = vector.load %arg3[%c0_4, %c0_5] : memref<1x32xf32, #tpu.memory_space<vmem>>, vector<1x32xf32>
    %cst = arith.constant dense<0.000000e+00> : vector<2x4xf32>
    %3 = vector.multi_reduction <add>, %0, %cst [2] : vector<2x4x32xf32> to vector<2x4xf32>
    %4 = vector.shape_cast %3 : vector<2x4xf32> to vector<2x4x1xf32>
    %cst_6 = arith.constant 3.200000e+01 : f32
    %5 = vector.broadcast %cst_6 : f32 to vector<2x4x1xf32>
    %6 = arith.divf %4, %5 : vector<2x4x1xf32>
    %7 = vector.broadcast %6 : vector<2x4x1xf32> to vector<2x4x32xf32>
    %8 = arith.subf %0, %7 : vector<2x4x32xf32>
    %9 = arith.mulf %8, %8 : vector<2x4x32xf32>
    %cst_7 = arith.constant dense<0.000000e+00> : vector<2x4xf32>
    %10 = vector.multi_reduction <add>, %9, %cst_7 [2] : vector<2x4x32xf32> to vector<2x4xf32>
    %11 = vector.shape_cast %10 : vector<2x4xf32> to vector<2x4x1xf32>
    %cst_8 = arith.constant 3.200000e+01 : f32
    %12 = vector.broadcast %cst_8 : f32 to vector<2x4x1xf32>
    %13 = arith.divf %11, %12 : vector<2x4x1xf32>
    %14 = vector.broadcast %6 : vector<2x4x1xf32> to vector<2x4x32xf32>
    %15 = arith.subf %0, %14 : vector<2x4x32xf32>
    %cst_9 = arith.constant 9.99999974E-6 : f32
    %16 = vector.broadcast %cst_9 : f32 to vector<2x4x1xf32>
    %17 = arith.addf %13, %16 : vector<2x4x1xf32>
    %18 = math.rsqrt %17 : vector<2x4x1xf32>
    %19 = vector.broadcast %18 : vector<2x4x1xf32> to vector<2x4x32xf32>
    %20 = arith.mulf %15, %19 : vector<2x4x32xf32>
    %21 = vector.shape_cast %1 : vector<1x32xf32> to vector<1x1x32xf32>
    %22 = vector.broadcast %21 : vector<1x1x32xf32> to vector<2x4x32xf32>
    %23 = arith.mulf %20, %22 : vector<2x4x32xf32>
    %24 = vector.shape_cast %2 : vector<1x32xf32> to vector<1x1x32xf32>
    %25 = vector.broadcast %24 : vector<1x1x32xf32> to vector<2x4x32xf32>
    %26 = arith.addf %23, %25 : vector<2x4x32xf32>
    %27 = vector.shape_cast %26 : vector<2x4x32xf32> to vector<8x32xf32>
    %28 = arith.truncf %27 : vector<8x32xf32> to vector<8x32xbf16>
    %c0_10 = arith.constant 0 : index
    %c0_11 = arith.constant 0 : index
    %29 = vector.load %arg4[%c0_10, %c0_11] : memref<32x96xbf16, #tpu.memory_space<vmem>>, vector<32x96xbf16>
    %cst_12 = arith.constant dense<0.000000e+00> : vector<8x96xf32>
    %30 = tpu.matmul %28, %29, %cst_12 {dimension_numbers = #tpu.dot_dimension_numbers<[1], [0], [0], [1], [0, 0, 1, 1], [], []>} : vector<8x32xbf16>, vector<32x96xbf16>, vector<8x96xf32> -> vector<8x96xf32>
    %31 = vector.extract_strided_slice %30 {offsets = [0, 0], sizes = [8, 32], strides = [1, 1]} : vector<8x96xf32> to vector<8x32xf32>
    %cst_13 = arith.constant 0.353553385 : f32
    %32 = vector.broadcast %cst_13 : f32 to vector<8x32xf32>
    %33 = arith.mulf %31, %32 : vector<8x32xf32>
    %34 = vector.shape_cast %33 : vector<8x32xf32> to vector<2x4x32xf32>
    %35 = arith.truncf %34 : vector<2x4x32xf32> to vector<2x4x32xbf16>
    %36 = vector.extract_strided_slice %30 {offsets = [0, 32], sizes = [8, 32], strides = [1, 1]} : vector<8x96xf32> to vector<8x32xf32>
    %37 = vector.shape_cast %36 : vector<8x32xf32> to vector<2x4x32xf32>
    %38 = arith.truncf %37 : vector<2x4x32xf32> to vector<2x4x32xbf16>
    %39 = vector.extract_strided_slice %30 {offsets = [0, 64], sizes = [8, 32], strides = [1, 1]} : vector<8x96xf32> to vector<8x32xf32>
    %40 = vector.shape_cast %39 : vector<8x32xf32> to vector<2x4x32xf32>
    %41 = arith.truncf %40 : vector<2x4x32xf32> to vector<2x4x32xbf16>
    %42 = vector.extract_strided_slice %35 {offsets = [0, 0, 0], sizes = [2, 4, 8], strides = [1, 1, 1]} : vector<2x4x32xbf16> to vector<2x4x8xbf16>
    %43 = vector.extract_strided_slice %38 {offsets = [0, 0, 0], sizes = [2, 4, 8], strides = [1, 1, 1]} : vector<2x4x32xbf16> to vector<2x4x8xbf16>
    "tpu.trace_start"() <{level = 10 : i32, message = "bqd,bkd->bqk"}> : () -> ()
    %cst_14 = arith.constant dense<0.000000e+00> : vector<2x4x4xf32>
    %44 = tpu.matmul %42, %43, %cst_14 {dimension_numbers = #tpu.dot_dimension_numbers<[2], [2], [1], [1], [0, 0, 0, 1, 1, 1], [0], [0]>} : vector<2x4x8xbf16>, vector<2x4x8xbf16>, vector<2x4x4xf32> -> vector<2x4x4xf32>
    "tpu.trace_stop"() : () -> ()
    %cst_15 = arith.constant dense<0xFF800000> : vector<2x4xf32>
    %45 = vector.multi_reduction <maximumf>, %44, %cst_15 [2] : vector<2x4x4xf32> to vector<2x4xf32>
    %46 = vector.shape_cast %45 : vector<2x4xf32> to vector<2x4x1xf32>
    %47 = vector.broadcast %46 : vector<2x4x1xf32> to vector<2x4x4xf32>
    %48 = arith.subf %44, %47 : vector<2x4x4xf32>
    %49 = math.exp %48 : vector<2x4x4xf32>
    %cst_16 = arith.constant dense<0.000000e+00> : vector<2x4xf32>
    %50 = vector.multi_reduction <add>, %49, %cst_16 [2] : vector<2x4x4xf32> to vector<2x4xf32>
    %51 = vector.shape_cast %50 : vector<2x4xf32> to vector<2x4x1xf32>
    %52 = tpu.reciprocal %51 {approx = true} : vector<2x4x1xf32> -> vector<2x4x1xf32>
    %53 = vector.broadcast %52 : vector<2x4x1xf32> to vector<2x4x4xf32>
    %54 = arith.mulf %49, %53 : vector<2x4x4xf32>
    %55 = arith.truncf %54 : vector<2x4x4xf32> to vector<2x4x4xbf16>
    %56 = vector.extract_strided_slice %41 {offsets = [0, 0, 0], sizes = [2, 4, 8], strides = [1, 1, 1]} : vector<2x4x32xbf16> to vector<2x4x8xbf16>
    "tpu.trace_start"() <{level = 10 : i32, message = "bqk,bkd->bqd"}> : () -> ()
    %cst_17 = arith.constant dense<0.000000e+00> : vector<2x4x8xf32>
    %57 = tpu.matmul %55, %56, %cst_17 {dimension_numbers = #tpu.dot_dimension_numbers<[2], [1], [1], [2], [0, 0, 0, 1, 1, 2], [0], [0]>} : vector<2x4x4xbf16>, vector<2x4x8xbf16>, vector<2x4x8xf32> -> vector<2x4x8xf32>
    "tpu.trace_stop"() : () -> ()
    %58 = vector.extract_strided_slice %35 {offsets = [0, 0, 8], sizes = [2, 4, 8], strides = [1, 1, 1]} : vector<2x4x32xbf16> to vector<2x4x8xbf16>
    %59 = vector.extract_strided_slice %38 {offsets = [0, 0, 8], sizes = [2, 4, 8], strides = [1, 1, 1]} : vector<2x4x32xbf16> to vector<2x4x8xbf16>
    "tpu.trace_start"() <{level = 10 : i32, message = "bqd,bkd->bqk"}> : () -> ()
    %cst_18 = arith.constant dense<0.000000e+00> : vector<2x4x4xf32>
    %60 = tpu.matmul %58, %59, %cst_18 {dimension_numbers = #tpu.dot_dimension_numbers<[2], [2], [1], [1], [0, 0, 0, 1, 1, 1], [0], [0]>} : vector<2x4x8xbf16>, vector<2x4x8xbf16>, vector<2x4x4xf32> -> vector<2x4x4xf32>
    "tpu.trace_stop"() : () -> ()
    %cst_19 = arith.constant dense<0xFF800000> : vector<2x4xf32>
    %61 = vector.multi_reduction <maximumf>, %60, %cst_19 [2] : vector<2x4x4xf32> to vector<2x4xf32>
    %62 = vector.shape_cast %61 : vector<2x4xf32> to vector<2x4x1xf32>
    %63 = vector.broadcast %62 : vector<2x4x1xf32> to vector<2x4x4xf32>
    %64 = arith.subf %60, %63 : vector<2x4x4xf32>
    %65 = math.exp %64 : vector<2x4x4xf32>
    %cst_20 = arith.constant dense<0.000000e+00> : vector<2x4xf32>
    %66 = vector.multi_reduction <add>, %65, %cst_20 [2] : vector<2x4x4xf32> to vector<2x4xf32>
    %67 = vector.shape_cast %66 : vector<2x4xf32> to vector<2x4x1xf32>
    %68 = tpu.reciprocal %67 {approx = true} : vector<2x4x1xf32> -> vector<2x4x1xf32>
    %69 = vector.broadcast %68 : vector<2x4x1xf32> to vector<2x4x4xf32>
    %70 = arith.mulf %65, %69 : vector<2x4x4xf32>
    %71 = arith.truncf %70 : vector<2x4x4xf32> to vector<2x4x4xbf16>
    %72 = vector.extract_strided_slice %41 {offsets = [0, 0, 8], sizes = [2, 4, 8], strides = [1, 1, 1]} : vector<2x4x32xbf16> to vector<2x4x8xbf16>
    "tpu.trace_start"() <{level = 10 : i32, message = "bqk,bkd->bqd"}> : () -> ()
    %cst_21 = arith.constant dense<0.000000e+00> : vector<2x4x8xf32>
    %73 = tpu.matmul %71, %72, %cst_21 {dimension_numbers = #tpu.dot_dimension_numbers<[2], [1], [1], [2], [0, 0, 0, 1, 1, 2], [0], [0]>} : vector<2x4x4xbf16>, vector<2x4x8xbf16>, vector<2x4x8xf32> -> vector<2x4x8xf32>
    "tpu.trace_stop"() : () -> ()
    %74 = vector.extract_strided_slice %35 {offsets = [0, 0, 16], sizes = [2, 4, 8], strides = [1, 1, 1]} : vector<2x4x32xbf16> to vector<2x4x8xbf16>
    %75 = vector.extract_strided_slice %38 {offsets = [0, 0, 16], sizes = [2, 4, 8], strides = [1, 1, 1]} : vector<2x4x32xbf16> to vector<2x4x8xbf16>
    "tpu.trace_start"() <{level = 10 : i32, message = "bqd,bkd->bqk"}> : () -> ()
    %cst_22 = arith.constant dense<0.000000e+00> : vector<2x4x4xf32>
    %76 = tpu.matmul %74, %75, %cst_22 {dimension_numbers = #tpu.dot_dimension_numbers<[2], [2], [1], [1], [0, 0, 0, 1, 1, 1], [0], [0]>} : vector<2x4x8xbf16>, vector<2x4x8xbf16>, vector<2x4x4xf32> -> vector<2x4x4xf32>
    "tpu.trace_stop"() : () -> ()
    %cst_23 = arith.constant dense<0xFF800000> : vector<2x4xf32>
    %77 = vector.multi_reduction <maximumf>, %76, %cst_23 [2] : vector<2x4x4xf32> to vector<2x4xf32>
    %78 = vector.shape_cast %77 : vector<2x4xf32> to vector<2x4x1xf32>
    %79 = vector.broadcast %78 : vector<2x4x1xf32> to vector<2x4x4xf32>
    %80 = arith.subf %76, %79 : vector<2x4x4xf32>
    %81 = math.exp %80 : vector<2x4x4xf32>
    %cst_24 = arith.constant dense<0.000000e+00> : vector<2x4xf32>
    %82 = vector.multi_reduction <add>, %81, %cst_24 [2] : vector<2x4x4xf32> to vector<2x4xf32>
    %83 = vector.shape_cast %82 : vector<2x4xf32> to vector<2x4x1xf32>
    %84 = tpu.reciprocal %83 {approx = true} : vector<2x4x1xf32> -> vector<2x4x1xf32>
    %85 = vector.broadcast %84 : vector<2x4x1xf32> to vector<2x4x4xf32>
    %86 = arith.mulf %81, %85 : vector<2x4x4xf32>
    %87 = arith.truncf %86 : vector<2x4x4xf32> to vector<2x4x4xbf16>
    %88 = vector.extract_strided_slice %41 {offsets = [0, 0, 16], sizes = [2, 4, 8], strides = [1, 1, 1]} : vector<2x4x32xbf16> to vector<2x4x8xbf16>
    "tpu.trace_start"() <{level = 10 : i32, message = "bqk,bkd->bqd"}> : () -> ()
    %cst_25 = arith.constant dense<0.000000e+00> : vector<2x4x8xf32>
    %89 = tpu.matmul %87, %88, %cst_25 {dimension_numbers = #tpu.dot_dimension_numbers<[2], [1], [1], [2], [0, 0, 0, 1, 1, 2], [0], [0]>} : vector<2x4x4xbf16>, vector<2x4x8xbf16>, vector<2x4x8xf32> -> vector<2x4x8xf32>
    "tpu.trace_stop"() : () -> ()
    %90 = vector.extract_strided_slice %35 {offsets = [0, 0, 24], sizes = [2, 4, 8], strides = [1, 1, 1]} : vector<2x4x32xbf16> to vector<2x4x8xbf16>
    %91 = vector.extract_strided_slice %38 {offsets = [0, 0, 24], sizes = [2, 4, 8], strides = [1, 1, 1]} : vector<2x4x32xbf16> to vector<2x4x8xbf16>
    "tpu.trace_start"() <{level = 10 : i32, message = "bqd,bkd->bqk"}> : () -> ()
    %cst_26 = arith.constant dense<0.000000e+00> : vector<2x4x4xf32>
    %92 = tpu.matmul %90, %91, %cst_26 {dimension_numbers = #tpu.dot_dimension_numbers<[2], [2], [1], [1], [0, 0, 0, 1, 1, 1], [0], [0]>} : vector<2x4x8xbf16>, vector<2x4x8xbf16>, vector<2x4x4xf32> -> vector<2x4x4xf32>
    "tpu.trace_stop"() : () -> ()
    %cst_27 = arith.constant dense<0xFF800000> : vector<2x4xf32>
    %93 = vector.multi_reduction <maximumf>, %92, %cst_27 [2] : vector<2x4x4xf32> to vector<2x4xf32>
    %94 = vector.shape_cast %93 : vector<2x4xf32> to vector<2x4x1xf32>
    %95 = vector.broadcast %94 : vector<2x4x1xf32> to vector<2x4x4xf32>
    %96 = arith.subf %92, %95 : vector<2x4x4xf32>
    %97 = math.exp %96 : vector<2x4x4xf32>
    %cst_28 = arith.constant dense<0.000000e+00> : vector<2x4xf32>
    %98 = vector.multi_reduction <add>, %97, %cst_28 [2] : vector<2x4x4xf32> to vector<2x4xf32>
    %99 = vector.shape_cast %98 : vector<2x4xf32> to vector<2x4x1xf32>
    %100 = tpu.reciprocal %99 {approx = true} : vector<2x4x1xf32> -> vector<2x4x1xf32>
    %101 = vector.broadcast %100 : vector<2x4x1xf32> to vector<2x4x4xf32>
    %102 = arith.mulf %97, %101 : vector<2x4x4xf32>
    %103 = arith.truncf %102 : vector<2x4x4xf32> to vector<2x4x4xbf16>
    %104 = vector.extract_strided_slice %41 {offsets = [0, 0, 24], sizes = [2, 4, 8], strides = [1, 1, 1]} : vector<2x4x32xbf16> to vector<2x4x8xbf16>
    "tpu.trace_start"() <{level = 10 : i32, message = "bqk,bkd->bqd"}> : () -> ()
    %cst_29 = arith.constant dense<0.000000e+00> : vector<2x4x8xf32>
    %105 = tpu.matmul %103, %104, %cst_29 {dimension_numbers = #tpu.dot_dimension_numbers<[2], [1], [1], [2], [0, 0, 0, 1, 1, 2], [0], [0]>} : vector<2x4x4xbf16>, vector<2x4x8xbf16>, vector<2x4x8xf32> -> vector<2x4x8xf32>
    "tpu.trace_stop"() : () -> ()
    %106 = tpu.concatenate %57, %73, %89, %105 in 2 : vector<2x4x8xf32>, vector<2x4x8xf32>, vector<2x4x8xf32>, vector<2x4x8xf32> -> vector<2x4x32xf32>
    %107 = vector.shape_cast %106 : vector<2x4x32xf32> to vector<8x32xf32>
    %108 = arith.truncf %107 : vector<8x32xf32> to vector<8x32xbf16>
    %c0_30 = arith.constant 0 : index
    %c0_31 = arith.constant 0 : index
    %109 = vector.load %arg5[%c0_30, %c0_31] : memref<32x32xbf16, #tpu.memory_space<vmem>>, vector<32x32xbf16>
    %cst_32 = arith.constant dense<0.000000e+00> : vector<8x32xf32>
    %110 = tpu.matmul %108, %109, %cst_32 {dimension_numbers = #tpu.dot_dimension_numbers<[1], [0], [0], [1], [0, 0, 1, 1], [], []>} : vector<8x32xbf16>, vector<32x32xbf16>, vector<8x32xf32> -> vector<8x32xf32>
    %c0_33 = arith.constant 0 : index
    %c0_34 = arith.constant 0 : index
    %111 = vector.load %arg6[%c0_33, %c0_34] : memref<1x32xf32, #tpu.memory_space<vmem>>, vector<1x32xf32>
    %112 = vector.broadcast %111 : vector<1x32xf32> to vector<8x32xf32>
    %113 = arith.addf %110, %112 : vector<8x32xf32>
    %114 = vector.shape_cast %113 : vector<8x32xf32> to vector<2x4x32xf32>
    %115 = arith.addf %0, %114 : vector<2x4x32xf32>
    %c0_35 = arith.constant 0 : index
    %c0_36 = arith.constant 0 : index
    %c0_37 = arith.constant 0 : index
    %116 = vector.load %arg1[%c0_35, %c0_36, %c0_37] : memref<2x1x32xf32, #tpu.memory_space<vmem>>, vector<2x1x32xf32>
    %117 = vector.broadcast %116 : vector<2x1x32xf32> to vector<2x4x32xf32>
    %118 = arith.addf %115, %117 : vector<2x4x32xf32>
    %c0_38 = arith.constant 0 : index
    %c0_39 = arith.constant 0 : index
    %119 = vector.load %arg7[%c0_38, %c0_39] : memref<1x32xf32, #tpu.memory_space<vmem>>, vector<1x32xf32>
    %c0_40 = arith.constant 0 : index
    %c0_41 = arith.constant 0 : index
    %120 = vector.load %arg8[%c0_40, %c0_41] : memref<1x32xf32, #tpu.memory_space<vmem>>, vector<1x32xf32>
    %cst_42 = arith.constant dense<0.000000e+00> : vector<2x4xf32>
    %121 = vector.multi_reduction <add>, %118, %cst_42 [2] : vector<2x4x32xf32> to vector<2x4xf32>
    %122 = vector.shape_cast %121 : vector<2x4xf32> to vector<2x4x1xf32>
    %cst_43 = arith.constant 3.200000e+01 : f32
    %123 = vector.broadcast %cst_43 : f32 to vector<2x4x1xf32>
    %124 = arith.divf %122, %123 : vector<2x4x1xf32>
    %125 = vector.broadcast %124 : vector<2x4x1xf32> to vector<2x4x32xf32>
    %126 = arith.subf %118, %125 : vector<2x4x32xf32>
    %127 = arith.mulf %126, %126 : vector<2x4x32xf32>
    %cst_44 = arith.constant dense<0.000000e+00> : vector<2x4xf32>
    %128 = vector.multi_reduction <add>, %127, %cst_44 [2] : vector<2x4x32xf32> to vector<2x4xf32>
    %129 = vector.shape_cast %128 : vector<2x4xf32> to vector<2x4x1xf32>
    %cst_45 = arith.constant 3.200000e+01 : f32
    %130 = vector.broadcast %cst_45 : f32 to vector<2x4x1xf32>
    %131 = arith.divf %129, %130 : vector<2x4x1xf32>
    %132 = vector.broadcast %124 : vector<2x4x1xf32> to vector<2x4x32xf32>
    %133 = arith.subf %118, %132 : vector<2x4x32xf32>
    %cst_46 = arith.constant 9.99999974E-6 : f32
    %134 = vector.broadcast %cst_46 : f32 to vector<2x4x1xf32>
    %135 = arith.addf %131, %134 : vector<2x4x1xf32>
    %136 = math.rsqrt %135 : vector<2x4x1xf32>
    %137 = vector.broadcast %136 : vector<2x4x1xf32> to vector<2x4x32xf32>
    %138 = arith.mulf %133, %137 : vector<2x4x32xf32>
    %139 = vector.shape_cast %119 : vector<1x32xf32> to vector<1x1x32xf32>
    %140 = vector.broadcast %139 : vector<1x1x32xf32> to vector<2x4x32xf32>
    %141 = arith.mulf %138, %140 : vector<2x4x32xf32>
    %142 = vector.shape_cast %120 : vector<1x32xf32> to vector<1x1x32xf32>
    %143 = vector.broadcast %142 : vector<1x1x32xf32> to vector<2x4x32xf32>
    %144 = arith.addf %141, %143 : vector<2x4x32xf32>
    %145 = vector.shape_cast %144 : vector<2x4x32xf32> to vector<8x32xf32>
    %146 = arith.truncf %145 : vector<8x32xf32> to vector<8x32xbf16>
    %c0_47 = arith.constant 0 : index
    %c0_48 = arith.constant 0 : index
    %147 = vector.load %arg9[%c0_47, %c0_48] : memref<32x64xbf16, #tpu.memory_space<vmem>>, vector<32x64xbf16>
    %cst_49 = arith.constant dense<0.000000e+00> : vector<8x64xf32>
    %148 = tpu.matmul %146, %147, %cst_49 {dimension_numbers = #tpu.dot_dimension_numbers<[1], [0], [0], [1], [0, 0, 1, 1], [], []>} : vector<8x32xbf16>, vector<32x64xbf16>, vector<8x64xf32> -> vector<8x64xf32>
    %c0_50 = arith.constant 0 : index
    %c0_51 = arith.constant 0 : index
    %149 = vector.load %arg10[%c0_50, %c0_51] : memref<1x64xf32, #tpu.memory_space<vmem>>, vector<1x64xf32>
    %150 = vector.broadcast %149 : vector<1x64xf32> to vector<8x64xf32>
    %151 = arith.addf %148, %150 : vector<8x64xf32>
    %cst_52 = arith.constant 5.000000e-01 : f32
    %152 = vector.broadcast %cst_52 : f32 to vector<8x64xf32>
    %153 = arith.mulf %152, %151 : vector<8x64xf32>
    %cst_53 = arith.constant 4.471500e-02 : f32
    %154 = vector.broadcast %cst_53 : f32 to vector<8x64xf32>
    %155 = arith.mulf %154, %151 : vector<8x64xf32>
    %156 = arith.mulf %155, %151 : vector<8x64xf32>
    %157 = arith.mulf %156, %151 : vector<8x64xf32>
    %158 = arith.addf %151, %157 : vector<8x64xf32>
    %cst_54 = arith.constant 0.797884583 : f32
    %159 = vector.broadcast %cst_54 : f32 to vector<8x64xf32>
    %160 = arith.mulf %159, %158 : vector<8x64xf32>
    %161 = math.tanh %160 : vector<8x64xf32>
    %cst_55 = arith.constant 1.000000e+00 : f32
    %162 = vector.broadcast %cst_55 : f32 to vector<8x64xf32>
    %163 = arith.addf %162, %161 : vector<8x64xf32>
    %164 = arith.mulf %153, %163 : vector<8x64xf32>
    %165 = arith.truncf %164 : vector<8x64xf32> to vector<8x64xbf16>
    %c0_56 = arith.constant 0 : index
    %c0_57 = arith.constant 0 : index
    %166 = vector.load %arg11[%c0_56, %c0_57] : memref<64x32xbf16, #tpu.memory_space<vmem>>, vector<64x32xbf16>
    %cst_58 = arith.constant dense<0.000000e+00> : vector<8x32xf32>
    %167 = tpu.matmul %165, %166, %cst_58 {dimension_numbers = #tpu.dot_dimension_numbers<[1], [0], [0], [1], [0, 0, 1, 1], [], []>} : vector<8x64xbf16>, vector<64x32xbf16>, vector<8x32xf32> -> vector<8x32xf32>
    %c0_59 = arith.constant 0 : index
    %c0_60 = arith.constant 0 : index
    %168 = vector.load %arg12[%c0_59, %c0_60] : memref<1x32xf32, #tpu.memory_space<vmem>>, vector<1x32xf32>
    %169 = vector.broadcast %168 : vector<1x32xf32> to vector<8x32xf32>
    %170 = arith.addf %167, %169 : vector<8x32xf32>
    %171 = vector.shape_cast %170 : vector<8x32xf32> to vector<2x4x32xf32>
    %172 = arith.addf %115, %171 : vector<2x4x32xf32>
    %c0_61 = arith.constant 0 : index
    %c0_62 = arith.constant 0 : index
    %c0_63 = arith.constant 0 : index
    %173 = vector.load %arg13[%c0_61, %c0_62, %c0_63] : memref<2x4x32xf32, #tpu.memory_space<vmem>>, vector<2x4x32xf32>
    tpu.vector_store %arg13[%c0_61, %c0_62, %c0_63], %172 {strides = array<i32>} : memref<2x4x32xf32, #tpu.memory_space<vmem>>, vector<2x4x32xf32>,
    return
  }
}

module attributes {stable_mosaic.version = 11 : i64} {
  func.func @_linear_add_kernel(%arg0: memref<8x32xf32, #tpu.memory_space<vmem>>, %arg1: memref<32x48xbf16, #tpu.memory_space<vmem>>, %arg2: memref<1x48xf32, #tpu.memory_space<vmem>>, %arg3: memref<8x48xf32, #tpu.memory_space<vmem>>, %arg4: memref<8x48xf32, #tpu.memory_space<vmem>>) attributes {dimension_semantics = [], scalar_prefetch = 0 : i64, scratch_operands = 0 : i64, tpu.core_type = #tpu.core_type<tc>} {
    %c0 = arith.constant 0 : index
    %c0_0 = arith.constant 0 : index
    %0 = vector.load %arg0[%c0, %c0_0] : memref<8x32xf32, #tpu.memory_space<vmem>>, vector<8x32xf32>
    %1 = arith.truncf %0 : vector<8x32xf32> to vector<8x32xbf16>
    %c0_1 = arith.constant 0 : index
    %c0_2 = arith.constant 0 : index
    %2 = vector.load %arg1[%c0_1, %c0_2] : memref<32x48xbf16, #tpu.memory_space<vmem>>, vector<32x48xbf16>
    %cst = arith.constant dense<0.000000e+00> : vector<8x48xf32>
    %3 = tpu.matmul %1, %2, %cst {dimension_numbers = #tpu.dot_dimension_numbers<[1], [0], [0], [1], [0, 0, 1, 1], [], []>} : vector<8x32xbf16>, vector<32x48xbf16>, vector<8x48xf32> -> vector<8x48xf32>
    %c0_3 = arith.constant 0 : index
    %c0_4 = arith.constant 0 : index
    %4 = vector.load %arg2[%c0_3, %c0_4] : memref<1x48xf32, #tpu.memory_space<vmem>>, vector<1x48xf32>
    %5 = vector.broadcast %4 : vector<1x48xf32> to vector<8x48xf32>
    %6 = arith.addf %3, %5 : vector<8x48xf32>
    %c0_5 = arith.constant 0 : index
    %c0_6 = arith.constant 0 : index
    %7 = vector.load %arg3[%c0_5, %c0_6] : memref<8x48xf32, #tpu.memory_space<vmem>>, vector<8x48xf32>
    %8 = arith.addf %6, %7 : vector<8x48xf32>
    %c0_7 = arith.constant 0 : index
    %c0_8 = arith.constant 0 : index
    %9 = vector.load %arg4[%c0_7, %c0_8] : memref<8x48xf32, #tpu.memory_space<vmem>>, vector<8x48xf32>
    tpu.vector_store %arg4[%c0_7, %c0_8], %8 {strides = array<i32>} : memref<8x48xf32, #tpu.memory_space<vmem>>, vector<8x48xf32>,
    return
  }
}

module attributes {stable_mosaic.version = 11 : i64} {
  func.func @_time_mlp_kernel(%arg0: memref<2x48xf32, #tpu.memory_space<vmem>>, %arg1: memref<48x192xbf16, #tpu.memory_space<vmem>>, %arg2: memref<1x192xf32, #tpu.memory_space<vmem>>, %arg3: memref<192x48xbf16, #tpu.memory_space<vmem>>, %arg4: memref<1x48xf32, #tpu.memory_space<vmem>>, %arg5: memref<2x48xf32, #tpu.memory_space<vmem>>) attributes {dimension_semantics = [], scalar_prefetch = 0 : i64, scratch_operands = 0 : i64, tpu.core_type = #tpu.core_type<tc>} {
    %c0 = arith.constant 0 : index
    %c0_0 = arith.constant 0 : index
    %0 = vector.load %arg0[%c0, %c0_0] : memref<2x48xf32, #tpu.memory_space<vmem>>, vector<2x48xf32>
    %1 = arith.truncf %0 : vector<2x48xf32> to vector<2x48xbf16>
    %c0_1 = arith.constant 0 : index
    %c0_2 = arith.constant 0 : index
    %2 = vector.load %arg1[%c0_1, %c0_2] : memref<48x192xbf16, #tpu.memory_space<vmem>>, vector<48x192xbf16>
    %cst = arith.constant dense<0.000000e+00> : vector<2x192xf32>
    %3 = tpu.matmul %1, %2, %cst {dimension_numbers = #tpu.dot_dimension_numbers<[1], [0], [0], [1], [0, 0, 1, 1], [], []>} : vector<2x48xbf16>, vector<48x192xbf16>, vector<2x192xf32> -> vector<2x192xf32>
    %c0_3 = arith.constant 0 : index
    %c0_4 = arith.constant 0 : index
    %4 = vector.load %arg2[%c0_3, %c0_4] : memref<1x192xf32, #tpu.memory_space<vmem>>, vector<1x192xf32>
    %5 = vector.broadcast %4 : vector<1x192xf32> to vector<2x192xf32>
    %6 = arith.addf %3, %5 : vector<2x192xf32>
    %cst_5 = arith.constant 5.000000e-01 : f32
    %7 = vector.broadcast %cst_5 : f32 to vector<2x192xf32>
    %8 = arith.mulf %7, %6 : vector<2x192xf32>
    %cst_6 = arith.constant 4.471500e-02 : f32
    %9 = vector.broadcast %cst_6 : f32 to vector<2x192xf32>
    %10 = arith.mulf %9, %6 : vector<2x192xf32>
    %11 = arith.mulf %10, %6 : vector<2x192xf32>
    %12 = arith.mulf %11, %6 : vector<2x192xf32>
    %13 = arith.addf %6, %12 : vector<2x192xf32>
    %cst_7 = arith.constant 0.797884583 : f32
    %14 = vector.broadcast %cst_7 : f32 to vector<2x192xf32>
    %15 = arith.mulf %14, %13 : vector<2x192xf32>
    %16 = math.tanh %15 : vector<2x192xf32>
    %cst_8 = arith.constant 1.000000e+00 : f32
    %17 = vector.broadcast %cst_8 : f32 to vector<2x192xf32>
    %18 = arith.addf %17, %16 : vector<2x192xf32>
    %19 = arith.mulf %8, %18 : vector<2x192xf32>
    %20 = arith.truncf %19 : vector<2x192xf32> to vector<2x192xbf16>
    %c0_9 = arith.constant 0 : index
    %c0_10 = arith.constant 0 : index
    %21 = vector.load %arg3[%c0_9, %c0_10] : memref<192x48xbf16, #tpu.memory_space<vmem>>, vector<192x48xbf16>
    %cst_11 = arith.constant dense<0.000000e+00> : vector<2x48xf32>
    %22 = tpu.matmul %20, %21, %cst_11 {dimension_numbers = #tpu.dot_dimension_numbers<[1], [0], [0], [1], [0, 0, 1, 1], [], []>} : vector<2x192xbf16>, vector<192x48xbf16>, vector<2x48xf32> -> vector<2x48xf32>
    %c0_12 = arith.constant 0 : index
    %c0_13 = arith.constant 0 : index
    %23 = vector.load %arg4[%c0_12, %c0_13] : memref<1x48xf32, #tpu.memory_space<vmem>>, vector<1x48xf32>
    %24 = vector.broadcast %23 : vector<1x48xf32> to vector<2x48xf32>
    %25 = arith.addf %22, %24 : vector<2x48xf32>
    %c0_14 = arith.constant 0 : index
    %c0_15 = arith.constant 0 : index
    %26 = vector.load %arg5[%c0_14, %c0_15] : memref<2x48xf32, #tpu.memory_space<vmem>>, vector<2x48xf32>
    tpu.vector_store %arg5[%c0_14, %c0_15], %25 {strides = array<i32>} : memref<2x48xf32, #tpu.memory_space<vmem>>, vector<2x48xf32>,
    return
  }
}

module attributes {stable_mosaic.version = 11 : i64} {
  func.func @_layernorm_kernel(%arg0: memref<2x16x48xf32, #tpu.memory_space<vmem>>, %arg1: memref<1x48xf32, #tpu.memory_space<vmem>>, %arg2: memref<1x48xf32, #tpu.memory_space<vmem>>, %arg3: memref<2x16x48xf32, #tpu.memory_space<vmem>>) attributes {dimension_semantics = [], scalar_prefetch = 0 : i64, scratch_operands = 0 : i64, tpu.core_type = #tpu.core_type<tc>} {
    %c0 = arith.constant 0 : index
    %c0_0 = arith.constant 0 : index
    %c0_1 = arith.constant 0 : index
    %0 = vector.load %arg0[%c0, %c0_0, %c0_1] : memref<2x16x48xf32, #tpu.memory_space<vmem>>, vector<2x16x48xf32>
    %c0_2 = arith.constant 0 : index
    %c0_3 = arith.constant 0 : index
    %1 = vector.load %arg1[%c0_2, %c0_3] : memref<1x48xf32, #tpu.memory_space<vmem>>, vector<1x48xf32>
    %c0_4 = arith.constant 0 : index
    %c0_5 = arith.constant 0 : index
    %2 = vector.load %arg2[%c0_4, %c0_5] : memref<1x48xf32, #tpu.memory_space<vmem>>, vector<1x48xf32>
    %cst = arith.constant dense<0.000000e+00> : vector<2x16xf32>
    %3 = vector.multi_reduction <add>, %0, %cst [2] : vector<2x16x48xf32> to vector<2x16xf32>
    %4 = vector.shape_cast %3 : vector<2x16xf32> to vector<2x16x1xf32>
    %cst_6 = arith.constant 4.800000e+01 : f32
    %5 = vector.broadcast %cst_6 : f32 to vector<2x16x1xf32>
    %6 = arith.divf %4, %5 : vector<2x16x1xf32>
    %7 = vector.broadcast %6 : vector<2x16x1xf32> to vector<2x16x48xf32>
    %8 = arith.subf %0, %7 : vector<2x16x48xf32>
    %9 = arith.mulf %8, %8 : vector<2x16x48xf32>
    %cst_7 = arith.constant dense<0.000000e+00> : vector<2x16xf32>
    %10 = vector.multi_reduction <add>, %9, %cst_7 [2] : vector<2x16x48xf32> to vector<2x16xf32>
    %11 = vector.shape_cast %10 : vector<2x16xf32> to vector<2x16x1xf32>
    %cst_8 = arith.constant 4.800000e+01 : f32
    %12 = vector.broadcast %cst_8 : f32 to vector<2x16x1xf32>
    %13 = arith.divf %11, %12 : vector<2x16x1xf32>
    %14 = vector.broadcast %6 : vector<2x16x1xf32> to vector<2x16x48xf32>
    %15 = arith.subf %0, %14 : vector<2x16x48xf32>
    %cst_9 = arith.constant 9.99999974E-6 : f32
    %16 = vector.broadcast %cst_9 : f32 to vector<2x16x1xf32>
    %17 = arith.addf %13, %16 : vector<2x16x1xf32>
    %18 = math.rsqrt %17 : vector<2x16x1xf32>
    %19 = vector.broadcast %18 : vector<2x16x1xf32> to vector<2x16x48xf32>
    %20 = arith.mulf %15, %19 : vector<2x16x48xf32>
    %21 = vector.shape_cast %1 : vector<1x48xf32> to vector<1x1x48xf32>
    %22 = vector.broadcast %21 : vector<1x1x48xf32> to vector<2x16x48xf32>
    %23 = arith.mulf %20, %22 : vector<2x16x48xf32>
    %24 = vector.shape_cast %2 : vector<1x48xf32> to vector<1x1x48xf32>
    %25 = vector.broadcast %24 : vector<1x1x48xf32> to vector<2x16x48xf32>
    %26 = arith.addf %23, %25 : vector<2x16x48xf32>
    %c0_10 = arith.constant 0 : index
    %c0_11 = arith.constant 0 : index
    %c0_12 = arith.constant 0 : index
    %27 = vector.load %arg3[%c0_10, %c0_11, %c0_12] : memref<2x16x48xf32, #tpu.memory_space<vmem>>, vector<2x16x48xf32>
    tpu.vector_store %arg3[%c0_10, %c0_11, %c0_12], %26 {strides = array<i32>} : memref<2x16x48xf32, #tpu.memory_space<vmem>>, vector<2x16x48xf32>,
    return
  }
}

module attributes {stable_mosaic.version = 11 : i64} {
  func.func @_transformer_layer_kernel(%arg0: memref<2x16x48xf32, #tpu.memory_space<vmem>>, %arg1: memref<2x1x48xf32, #tpu.memory_space<vmem>>, %arg2: memref<1x48xf32, #tpu.memory_space<vmem>>, %arg3: memref<1x48xf32, #tpu.memory_space<vmem>>, %arg4: memref<48x96xbf16, #tpu.memory_space<vmem>>, %arg5: memref<32x48xbf16, #tpu.memory_space<vmem>>, %arg6: memref<1x48xf32, #tpu.memory_space<vmem>>, %arg7: memref<1x48xf32, #tpu.memory_space<vmem>>, %arg8: memref<1x48xf32, #tpu.memory_space<vmem>>, %arg9: memref<48x192xbf16, #tpu.memory_space<vmem>>, %arg10: memref<1x192xf32, #tpu.memory_space<vmem>>, %arg11: memref<192x48xbf16, #tpu.memory_space<vmem>>, %arg12: memref<1x48xf32, #tpu.memory_space<vmem>>, %arg13: memref<2x16x48xf32, #tpu.memory_space<vmem>>) attributes {dimension_semantics = [], scalar_prefetch = 0 : i64, scratch_operands = 0 : i64, tpu.core_type = #tpu.core_type<tc>} {
    %c0 = arith.constant 0 : index
    %c0_0 = arith.constant 0 : index
    %c0_1 = arith.constant 0 : index
    %0 = vector.load %arg0[%c0, %c0_0, %c0_1] : memref<2x16x48xf32, #tpu.memory_space<vmem>>, vector<2x16x48xf32>
    %c0_2 = arith.constant 0 : index
    %c0_3 = arith.constant 0 : index
    %1 = vector.load %arg2[%c0_2, %c0_3] : memref<1x48xf32, #tpu.memory_space<vmem>>, vector<1x48xf32>
    %c0_4 = arith.constant 0 : index
    %c0_5 = arith.constant 0 : index
    %2 = vector.load %arg3[%c0_4, %c0_5] : memref<1x48xf32, #tpu.memory_space<vmem>>, vector<1x48xf32>
    %cst = arith.constant dense<0.000000e+00> : vector<2x16xf32>
    %3 = vector.multi_reduction <add>, %0, %cst [2] : vector<2x16x48xf32> to vector<2x16xf32>
    %4 = vector.shape_cast %3 : vector<2x16xf32> to vector<2x16x1xf32>
    %cst_6 = arith.constant 4.800000e+01 : f32
    %5 = vector.broadcast %cst_6 : f32 to vector<2x16x1xf32>
    %6 = arith.divf %4, %5 : vector<2x16x1xf32>
    %7 = vector.broadcast %6 : vector<2x16x1xf32> to vector<2x16x48xf32>
    %8 = arith.subf %0, %7 : vector<2x16x48xf32>
    %9 = arith.mulf %8, %8 : vector<2x16x48xf32>
    %cst_7 = arith.constant dense<0.000000e+00> : vector<2x16xf32>
    %10 = vector.multi_reduction <add>, %9, %cst_7 [2] : vector<2x16x48xf32> to vector<2x16xf32>
    %11 = vector.shape_cast %10 : vector<2x16xf32> to vector<2x16x1xf32>
    %cst_8 = arith.constant 4.800000e+01 : f32
    %12 = vector.broadcast %cst_8 : f32 to vector<2x16x1xf32>
    %13 = arith.divf %11, %12 : vector<2x16x1xf32>
    %14 = vector.broadcast %6 : vector<2x16x1xf32> to vector<2x16x48xf32>
    %15 = arith.subf %0, %14 : vector<2x16x48xf32>
    %cst_9 = arith.constant 9.99999974E-6 : f32
    %16 = vector.broadcast %cst_9 : f32 to vector<2x16x1xf32>
    %17 = arith.addf %13, %16 : vector<2x16x1xf32>
    %18 = math.rsqrt %17 : vector<2x16x1xf32>
    %19 = vector.broadcast %18 : vector<2x16x1xf32> to vector<2x16x48xf32>
    %20 = arith.mulf %15, %19 : vector<2x16x48xf32>
    %21 = vector.shape_cast %1 : vector<1x48xf32> to vector<1x1x48xf32>
    %22 = vector.broadcast %21 : vector<1x1x48xf32> to vector<2x16x48xf32>
    %23 = arith.mulf %20, %22 : vector<2x16x48xf32>
    %24 = vector.shape_cast %2 : vector<1x48xf32> to vector<1x1x48xf32>
    %25 = vector.broadcast %24 : vector<1x1x48xf32> to vector<2x16x48xf32>
    %26 = arith.addf %23, %25 : vector<2x16x48xf32>
    %27 = vector.shape_cast %26 : vector<2x16x48xf32> to vector<32x48xf32>
    %28 = arith.truncf %27 : vector<32x48xf32> to vector<32x48xbf16>
    %c0_10 = arith.constant 0 : index
    %c0_11 = arith.constant 0 : index
    %29 = vector.load %arg4[%c0_10, %c0_11] : memref<48x96xbf16, #tpu.memory_space<vmem>>, vector<48x96xbf16>
    %cst_12 = arith.constant dense<0.000000e+00> : vector<32x96xf32>
    %30 = tpu.matmul %28, %29, %cst_12 {dimension_numbers = #tpu.dot_dimension_numbers<[1], [0], [0], [1], [0, 0, 1, 1], [], []>} : vector<32x48xbf16>, vector<48x96xbf16>, vector<32x96xf32> -> vector<32x96xf32>
    %31 = vector.extract_strided_slice %30 {offsets = [0, 0], sizes = [32, 32], strides = [1, 1]} : vector<32x96xf32> to vector<32x32xf32>
    %cst_13 = arith.constant 0.353553385 : f32
    %32 = vector.broadcast %cst_13 : f32 to vector<32x32xf32>
    %33 = arith.mulf %31, %32 : vector<32x32xf32>
    %34 = vector.shape_cast %33 : vector<32x32xf32> to vector<2x16x32xf32>
    %35 = arith.truncf %34 : vector<2x16x32xf32> to vector<2x16x32xbf16>
    %36 = vector.extract_strided_slice %30 {offsets = [0, 32], sizes = [32, 32], strides = [1, 1]} : vector<32x96xf32> to vector<32x32xf32>
    %37 = vector.shape_cast %36 : vector<32x32xf32> to vector<2x16x32xf32>
    %38 = arith.truncf %37 : vector<2x16x32xf32> to vector<2x16x32xbf16>
    %39 = vector.extract_strided_slice %30 {offsets = [0, 64], sizes = [32, 32], strides = [1, 1]} : vector<32x96xf32> to vector<32x32xf32>
    %40 = vector.shape_cast %39 : vector<32x32xf32> to vector<2x16x32xf32>
    %41 = arith.truncf %40 : vector<2x16x32xf32> to vector<2x16x32xbf16>
    %42 = vector.extract_strided_slice %35 {offsets = [0, 0, 0], sizes = [2, 16, 8], strides = [1, 1, 1]} : vector<2x16x32xbf16> to vector<2x16x8xbf16>
    %43 = vector.extract_strided_slice %38 {offsets = [0, 0, 0], sizes = [2, 16, 8], strides = [1, 1, 1]} : vector<2x16x32xbf16> to vector<2x16x8xbf16>
    "tpu.trace_start"() <{level = 10 : i32, message = "bqd,bkd->bqk"}> : () -> ()
    %cst_14 = arith.constant dense<0.000000e+00> : vector<2x16x16xf32>
    %44 = tpu.matmul %42, %43, %cst_14 {dimension_numbers = #tpu.dot_dimension_numbers<[2], [2], [1], [1], [0, 0, 0, 1, 1, 1], [0], [0]>} : vector<2x16x8xbf16>, vector<2x16x8xbf16>, vector<2x16x16xf32> -> vector<2x16x16xf32>
    "tpu.trace_stop"() : () -> ()
    %cst_15 = arith.constant dense<0xFF800000> : vector<2x16xf32>
    %45 = vector.multi_reduction <maximumf>, %44, %cst_15 [2] : vector<2x16x16xf32> to vector<2x16xf32>
    %46 = vector.shape_cast %45 : vector<2x16xf32> to vector<2x16x1xf32>
    %47 = vector.broadcast %46 : vector<2x16x1xf32> to vector<2x16x16xf32>
    %48 = arith.subf %44, %47 : vector<2x16x16xf32>
    %49 = math.exp %48 : vector<2x16x16xf32>
    %cst_16 = arith.constant dense<0.000000e+00> : vector<2x16xf32>
    %50 = vector.multi_reduction <add>, %49, %cst_16 [2] : vector<2x16x16xf32> to vector<2x16xf32>
    %51 = vector.shape_cast %50 : vector<2x16xf32> to vector<2x16x1xf32>
    %52 = tpu.reciprocal %51 {approx = true} : vector<2x16x1xf32> -> vector<2x16x1xf32>
    %53 = vector.broadcast %52 : vector<2x16x1xf32> to vector<2x16x16xf32>
    %54 = arith.mulf %49, %53 : vector<2x16x16xf32>
    %55 = arith.truncf %54 : vector<2x16x16xf32> to vector<2x16x16xbf16>
    %56 = vector.extract_strided_slice %41 {offsets = [0, 0, 0], sizes = [2, 16, 8], strides = [1, 1, 1]} : vector<2x16x32xbf16> to vector<2x16x8xbf16>
    "tpu.trace_start"() <{level = 10 : i32, message = "bqk,bkd->bqd"}> : () -> ()
    %cst_17 = arith.constant dense<0.000000e+00> : vector<2x16x8xf32>
    %57 = tpu.matmul %55, %56, %cst_17 {dimension_numbers = #tpu.dot_dimension_numbers<[2], [1], [1], [2], [0, 0, 0, 1, 1, 2], [0], [0]>} : vector<2x16x16xbf16>, vector<2x16x8xbf16>, vector<2x16x8xf32> -> vector<2x16x8xf32>
    "tpu.trace_stop"() : () -> ()
    %58 = vector.extract_strided_slice %35 {offsets = [0, 0, 8], sizes = [2, 16, 8], strides = [1, 1, 1]} : vector<2x16x32xbf16> to vector<2x16x8xbf16>
    %59 = vector.extract_strided_slice %38 {offsets = [0, 0, 8], sizes = [2, 16, 8], strides = [1, 1, 1]} : vector<2x16x32xbf16> to vector<2x16x8xbf16>
    "tpu.trace_start"() <{level = 10 : i32, message = "bqd,bkd->bqk"}> : () -> ()
    %cst_18 = arith.constant dense<0.000000e+00> : vector<2x16x16xf32>
    %60 = tpu.matmul %58, %59, %cst_18 {dimension_numbers = #tpu.dot_dimension_numbers<[2], [2], [1], [1], [0, 0, 0, 1, 1, 1], [0], [0]>} : vector<2x16x8xbf16>, vector<2x16x8xbf16>, vector<2x16x16xf32> -> vector<2x16x16xf32>
    "tpu.trace_stop"() : () -> ()
    %cst_19 = arith.constant dense<0xFF800000> : vector<2x16xf32>
    %61 = vector.multi_reduction <maximumf>, %60, %cst_19 [2] : vector<2x16x16xf32> to vector<2x16xf32>
    %62 = vector.shape_cast %61 : vector<2x16xf32> to vector<2x16x1xf32>
    %63 = vector.broadcast %62 : vector<2x16x1xf32> to vector<2x16x16xf32>
    %64 = arith.subf %60, %63 : vector<2x16x16xf32>
    %65 = math.exp %64 : vector<2x16x16xf32>
    %cst_20 = arith.constant dense<0.000000e+00> : vector<2x16xf32>
    %66 = vector.multi_reduction <add>, %65, %cst_20 [2] : vector<2x16x16xf32> to vector<2x16xf32>
    %67 = vector.shape_cast %66 : vector<2x16xf32> to vector<2x16x1xf32>
    %68 = tpu.reciprocal %67 {approx = true} : vector<2x16x1xf32> -> vector<2x16x1xf32>
    %69 = vector.broadcast %68 : vector<2x16x1xf32> to vector<2x16x16xf32>
    %70 = arith.mulf %65, %69 : vector<2x16x16xf32>
    %71 = arith.truncf %70 : vector<2x16x16xf32> to vector<2x16x16xbf16>
    %72 = vector.extract_strided_slice %41 {offsets = [0, 0, 8], sizes = [2, 16, 8], strides = [1, 1, 1]} : vector<2x16x32xbf16> to vector<2x16x8xbf16>
    "tpu.trace_start"() <{level = 10 : i32, message = "bqk,bkd->bqd"}> : () -> ()
    %cst_21 = arith.constant dense<0.000000e+00> : vector<2x16x8xf32>
    %73 = tpu.matmul %71, %72, %cst_21 {dimension_numbers = #tpu.dot_dimension_numbers<[2], [1], [1], [2], [0, 0, 0, 1, 1, 2], [0], [0]>} : vector<2x16x16xbf16>, vector<2x16x8xbf16>, vector<2x16x8xf32> -> vector<2x16x8xf32>
    "tpu.trace_stop"() : () -> ()
    %74 = vector.extract_strided_slice %35 {offsets = [0, 0, 16], sizes = [2, 16, 8], strides = [1, 1, 1]} : vector<2x16x32xbf16> to vector<2x16x8xbf16>
    %75 = vector.extract_strided_slice %38 {offsets = [0, 0, 16], sizes = [2, 16, 8], strides = [1, 1, 1]} : vector<2x16x32xbf16> to vector<2x16x8xbf16>
    "tpu.trace_start"() <{level = 10 : i32, message = "bqd,bkd->bqk"}> : () -> ()
    %cst_22 = arith.constant dense<0.000000e+00> : vector<2x16x16xf32>
    %76 = tpu.matmul %74, %75, %cst_22 {dimension_numbers = #tpu.dot_dimension_numbers<[2], [2], [1], [1], [0, 0, 0, 1, 1, 1], [0], [0]>} : vector<2x16x8xbf16>, vector<2x16x8xbf16>, vector<2x16x16xf32> -> vector<2x16x16xf32>
    "tpu.trace_stop"() : () -> ()
    %cst_23 = arith.constant dense<0xFF800000> : vector<2x16xf32>
    %77 = vector.multi_reduction <maximumf>, %76, %cst_23 [2] : vector<2x16x16xf32> to vector<2x16xf32>
    %78 = vector.shape_cast %77 : vector<2x16xf32> to vector<2x16x1xf32>
    %79 = vector.broadcast %78 : vector<2x16x1xf32> to vector<2x16x16xf32>
    %80 = arith.subf %76, %79 : vector<2x16x16xf32>
    %81 = math.exp %80 : vector<2x16x16xf32>
    %cst_24 = arith.constant dense<0.000000e+00> : vector<2x16xf32>
    %82 = vector.multi_reduction <add>, %81, %cst_24 [2] : vector<2x16x16xf32> to vector<2x16xf32>
    %83 = vector.shape_cast %82 : vector<2x16xf32> to vector<2x16x1xf32>
    %84 = tpu.reciprocal %83 {approx = true} : vector<2x16x1xf32> -> vector<2x16x1xf32>
    %85 = vector.broadcast %84 : vector<2x16x1xf32> to vector<2x16x16xf32>
    %86 = arith.mulf %81, %85 : vector<2x16x16xf32>
    %87 = arith.truncf %86 : vector<2x16x16xf32> to vector<2x16x16xbf16>
    %88 = vector.extract_strided_slice %41 {offsets = [0, 0, 16], sizes = [2, 16, 8], strides = [1, 1, 1]} : vector<2x16x32xbf16> to vector<2x16x8xbf16>
    "tpu.trace_start"() <{level = 10 : i32, message = "bqk,bkd->bqd"}> : () -> ()
    %cst_25 = arith.constant dense<0.000000e+00> : vector<2x16x8xf32>
    %89 = tpu.matmul %87, %88, %cst_25 {dimension_numbers = #tpu.dot_dimension_numbers<[2], [1], [1], [2], [0, 0, 0, 1, 1, 2], [0], [0]>} : vector<2x16x16xbf16>, vector<2x16x8xbf16>, vector<2x16x8xf32> -> vector<2x16x8xf32>
    "tpu.trace_stop"() : () -> ()
    %90 = vector.extract_strided_slice %35 {offsets = [0, 0, 24], sizes = [2, 16, 8], strides = [1, 1, 1]} : vector<2x16x32xbf16> to vector<2x16x8xbf16>
    %91 = vector.extract_strided_slice %38 {offsets = [0, 0, 24], sizes = [2, 16, 8], strides = [1, 1, 1]} : vector<2x16x32xbf16> to vector<2x16x8xbf16>
    "tpu.trace_start"() <{level = 10 : i32, message = "bqd,bkd->bqk"}> : () -> ()
    %cst_26 = arith.constant dense<0.000000e+00> : vector<2x16x16xf32>
    %92 = tpu.matmul %90, %91, %cst_26 {dimension_numbers = #tpu.dot_dimension_numbers<[2], [2], [1], [1], [0, 0, 0, 1, 1, 1], [0], [0]>} : vector<2x16x8xbf16>, vector<2x16x8xbf16>, vector<2x16x16xf32> -> vector<2x16x16xf32>
    "tpu.trace_stop"() : () -> ()
    %cst_27 = arith.constant dense<0xFF800000> : vector<2x16xf32>
    %93 = vector.multi_reduction <maximumf>, %92, %cst_27 [2] : vector<2x16x16xf32> to vector<2x16xf32>
    %94 = vector.shape_cast %93 : vector<2x16xf32> to vector<2x16x1xf32>
    %95 = vector.broadcast %94 : vector<2x16x1xf32> to vector<2x16x16xf32>
    %96 = arith.subf %92, %95 : vector<2x16x16xf32>
    %97 = math.exp %96 : vector<2x16x16xf32>
    %cst_28 = arith.constant dense<0.000000e+00> : vector<2x16xf32>
    %98 = vector.multi_reduction <add>, %97, %cst_28 [2] : vector<2x16x16xf32> to vector<2x16xf32>
    %99 = vector.shape_cast %98 : vector<2x16xf32> to vector<2x16x1xf32>
    %100 = tpu.reciprocal %99 {approx = true} : vector<2x16x1xf32> -> vector<2x16x1xf32>
    %101 = vector.broadcast %100 : vector<2x16x1xf32> to vector<2x16x16xf32>
    %102 = arith.mulf %97, %101 : vector<2x16x16xf32>
    %103 = arith.truncf %102 : vector<2x16x16xf32> to vector<2x16x16xbf16>
    %104 = vector.extract_strided_slice %41 {offsets = [0, 0, 24], sizes = [2, 16, 8], strides = [1, 1, 1]} : vector<2x16x32xbf16> to vector<2x16x8xbf16>
    "tpu.trace_start"() <{level = 10 : i32, message = "bqk,bkd->bqd"}> : () -> ()
    %cst_29 = arith.constant dense<0.000000e+00> : vector<2x16x8xf32>
    %105 = tpu.matmul %103, %104, %cst_29 {dimension_numbers = #tpu.dot_dimension_numbers<[2], [1], [1], [2], [0, 0, 0, 1, 1, 2], [0], [0]>} : vector<2x16x16xbf16>, vector<2x16x8xbf16>, vector<2x16x8xf32> -> vector<2x16x8xf32>
    "tpu.trace_stop"() : () -> ()
    %106 = tpu.concatenate %57, %73, %89, %105 in 2 : vector<2x16x8xf32>, vector<2x16x8xf32>, vector<2x16x8xf32>, vector<2x16x8xf32> -> vector<2x16x32xf32>
    %107 = vector.shape_cast %106 : vector<2x16x32xf32> to vector<32x32xf32>
    %108 = arith.truncf %107 : vector<32x32xf32> to vector<32x32xbf16>
    %c0_30 = arith.constant 0 : index
    %c0_31 = arith.constant 0 : index
    %109 = vector.load %arg5[%c0_30, %c0_31] : memref<32x48xbf16, #tpu.memory_space<vmem>>, vector<32x48xbf16>
    %cst_32 = arith.constant dense<0.000000e+00> : vector<32x48xf32>
    %110 = tpu.matmul %108, %109, %cst_32 {dimension_numbers = #tpu.dot_dimension_numbers<[1], [0], [0], [1], [0, 0, 1, 1], [], []>} : vector<32x32xbf16>, vector<32x48xbf16>, vector<32x48xf32> -> vector<32x48xf32>
    %c0_33 = arith.constant 0 : index
    %c0_34 = arith.constant 0 : index
    %111 = vector.load %arg6[%c0_33, %c0_34] : memref<1x48xf32, #tpu.memory_space<vmem>>, vector<1x48xf32>
    %112 = vector.broadcast %111 : vector<1x48xf32> to vector<32x48xf32>
    %113 = arith.addf %110, %112 : vector<32x48xf32>
    %114 = vector.shape_cast %113 : vector<32x48xf32> to vector<2x16x48xf32>
    %115 = arith.addf %0, %114 : vector<2x16x48xf32>
    %c0_35 = arith.constant 0 : index
    %c0_36 = arith.constant 0 : index
    %c0_37 = arith.constant 0 : index
    %116 = vector.load %arg1[%c0_35, %c0_36, %c0_37] : memref<2x1x48xf32, #tpu.memory_space<vmem>>, vector<2x1x48xf32>
    %117 = vector.broadcast %116 : vector<2x1x48xf32> to vector<2x16x48xf32>
    %118 = arith.addf %115, %117 : vector<2x16x48xf32>
    %c0_38 = arith.constant 0 : index
    %c0_39 = arith.constant 0 : index
    %119 = vector.load %arg7[%c0_38, %c0_39] : memref<1x48xf32, #tpu.memory_space<vmem>>, vector<1x48xf32>
    %c0_40 = arith.constant 0 : index
    %c0_41 = arith.constant 0 : index
    %120 = vector.load %arg8[%c0_40, %c0_41] : memref<1x48xf32, #tpu.memory_space<vmem>>, vector<1x48xf32>
    %cst_42 = arith.constant dense<0.000000e+00> : vector<2x16xf32>
    %121 = vector.multi_reduction <add>, %118, %cst_42 [2] : vector<2x16x48xf32> to vector<2x16xf32>
    %122 = vector.shape_cast %121 : vector<2x16xf32> to vector<2x16x1xf32>
    %cst_43 = arith.constant 4.800000e+01 : f32
    %123 = vector.broadcast %cst_43 : f32 to vector<2x16x1xf32>
    %124 = arith.divf %122, %123 : vector<2x16x1xf32>
    %125 = vector.broadcast %124 : vector<2x16x1xf32> to vector<2x16x48xf32>
    %126 = arith.subf %118, %125 : vector<2x16x48xf32>
    %127 = arith.mulf %126, %126 : vector<2x16x48xf32>
    %cst_44 = arith.constant dense<0.000000e+00> : vector<2x16xf32>
    %128 = vector.multi_reduction <add>, %127, %cst_44 [2] : vector<2x16x48xf32> to vector<2x16xf32>
    %129 = vector.shape_cast %128 : vector<2x16xf32> to vector<2x16x1xf32>
    %cst_45 = arith.constant 4.800000e+01 : f32
    %130 = vector.broadcast %cst_45 : f32 to vector<2x16x1xf32>
    %131 = arith.divf %129, %130 : vector<2x16x1xf32>
    %132 = vector.broadcast %124 : vector<2x16x1xf32> to vector<2x16x48xf32>
    %133 = arith.subf %118, %132 : vector<2x16x48xf32>
    %cst_46 = arith.constant 9.99999974E-6 : f32
    %134 = vector.broadcast %cst_46 : f32 to vector<2x16x1xf32>
    %135 = arith.addf %131, %134 : vector<2x16x1xf32>
    %136 = math.rsqrt %135 : vector<2x16x1xf32>
    %137 = vector.broadcast %136 : vector<2x16x1xf32> to vector<2x16x48xf32>
    %138 = arith.mulf %133, %137 : vector<2x16x48xf32>
    %139 = vector.shape_cast %119 : vector<1x48xf32> to vector<1x1x48xf32>
    %140 = vector.broadcast %139 : vector<1x1x48xf32> to vector<2x16x48xf32>
    %141 = arith.mulf %138, %140 : vector<2x16x48xf32>
    %142 = vector.shape_cast %120 : vector<1x48xf32> to vector<1x1x48xf32>
    %143 = vector.broadcast %142 : vector<1x1x48xf32> to vector<2x16x48xf32>
    %144 = arith.addf %141, %143 : vector<2x16x48xf32>
    %145 = vector.shape_cast %144 : vector<2x16x48xf32> to vector<32x48xf32>
    %146 = arith.truncf %145 : vector<32x48xf32> to vector<32x48xbf16>
    %c0_47 = arith.constant 0 : index
    %c0_48 = arith.constant 0 : index
    %147 = vector.load %arg9[%c0_47, %c0_48] : memref<48x192xbf16, #tpu.memory_space<vmem>>, vector<48x192xbf16>
    %cst_49 = arith.constant dense<0.000000e+00> : vector<32x192xf32>
    %148 = tpu.matmul %146, %147, %cst_49 {dimension_numbers = #tpu.dot_dimension_numbers<[1], [0], [0], [1], [0, 0, 1, 1], [], []>} : vector<32x48xbf16>, vector<48x192xbf16>, vector<32x192xf32> -> vector<32x192xf32>
    %c0_50 = arith.constant 0 : index
    %c0_51 = arith.constant 0 : index
    %149 = vector.load %arg10[%c0_50, %c0_51] : memref<1x192xf32, #tpu.memory_space<vmem>>, vector<1x192xf32>
    %150 = vector.broadcast %149 : vector<1x192xf32> to vector<32x192xf32>
    %151 = arith.addf %148, %150 : vector<32x192xf32>
    %cst_52 = arith.constant 5.000000e-01 : f32
    %152 = vector.broadcast %cst_52 : f32 to vector<32x192xf32>
    %153 = arith.mulf %152, %151 : vector<32x192xf32>
    %cst_53 = arith.constant 4.471500e-02 : f32
    %154 = vector.broadcast %cst_53 : f32 to vector<32x192xf32>
    %155 = arith.mulf %154, %151 : vector<32x192xf32>
    %156 = arith.mulf %155, %151 : vector<32x192xf32>
    %157 = arith.mulf %156, %151 : vector<32x192xf32>
    %158 = arith.addf %151, %157 : vector<32x192xf32>
    %cst_54 = arith.constant 0.797884583 : f32
    %159 = vector.broadcast %cst_54 : f32 to vector<32x192xf32>
    %160 = arith.mulf %159, %158 : vector<32x192xf32>
    %161 = math.tanh %160 : vector<32x192xf32>
    %cst_55 = arith.constant 1.000000e+00 : f32
    %162 = vector.broadcast %cst_55 : f32 to vector<32x192xf32>
    %163 = arith.addf %162, %161 : vector<32x192xf32>
    %164 = arith.mulf %153, %163 : vector<32x192xf32>
    %165 = arith.truncf %164 : vector<32x192xf32> to vector<32x192xbf16>
    %c0_56 = arith.constant 0 : index
    %c0_57 = arith.constant 0 : index
    %166 = vector.load %arg11[%c0_56, %c0_57] : memref<192x48xbf16, #tpu.memory_space<vmem>>, vector<192x48xbf16>
    %cst_58 = arith.constant dense<0.000000e+00> : vector<32x48xf32>
    %167 = tpu.matmul %165, %166, %cst_58 {dimension_numbers = #tpu.dot_dimension_numbers<[1], [0], [0], [1], [0, 0, 1, 1], [], []>} : vector<32x192xbf16>, vector<192x48xbf16>, vector<32x48xf32> -> vector<32x48xf32>
    %c0_59 = arith.constant 0 : index
    %c0_60 = arith.constant 0 : index
    %168 = vector.load %arg12[%c0_59, %c0_60] : memref<1x48xf32, #tpu.memory_space<vmem>>, vector<1x48xf32>
    %169 = vector.broadcast %168 : vector<1x48xf32> to vector<32x48xf32>
    %170 = arith.addf %167, %169 : vector<32x48xf32>
    %171 = vector.shape_cast %170 : vector<32x48xf32> to vector<2x16x48xf32>
    %172 = arith.addf %115, %171 : vector<2x16x48xf32>
    %c0_61 = arith.constant 0 : index
    %c0_62 = arith.constant 0 : index
    %c0_63 = arith.constant 0 : index
    %173 = vector.load %arg13[%c0_61, %c0_62, %c0_63] : memref<2x16x48xf32, #tpu.memory_space<vmem>>, vector<2x16x48xf32>
    tpu.vector_store %arg13[%c0_61, %c0_62, %c0_63], %172 {strides = array<i32>} : memref<2x16x48xf32, #tpu.memory_space<vmem>>, vector<2x16x48xf32>,
    return
  }
}

module attributes {stable_mosaic.version = 11 : i64} {
  func.func @_linear_kernel(%arg0: memref<24x48xf32, #tpu.memory_space<vmem>>, %arg1: memref<48x64xbf16, #tpu.memory_space<vmem>>, %arg2: memref<1x64xf32, #tpu.memory_space<vmem>>, %arg3: memref<24x64xf32, #tpu.memory_space<vmem>>) attributes {dimension_semantics = [], scalar_prefetch = 0 : i64, scratch_operands = 0 : i64, tpu.core_type = #tpu.core_type<tc>} {
    %c0 = arith.constant 0 : index
    %c0_0 = arith.constant 0 : index
    %0 = vector.load %arg0[%c0, %c0_0] : memref<24x48xf32, #tpu.memory_space<vmem>>, vector<24x48xf32>
    %1 = arith.truncf %0 : vector<24x48xf32> to vector<24x48xbf16>
    %c0_1 = arith.constant 0 : index
    %c0_2 = arith.constant 0 : index
    %2 = vector.load %arg1[%c0_1, %c0_2] : memref<48x64xbf16, #tpu.memory_space<vmem>>, vector<48x64xbf16>
    %cst = arith.constant dense<0.000000e+00> : vector<24x64xf32>
    %3 = tpu.matmul %1, %2, %cst {dimension_numbers = #tpu.dot_dimension_numbers<[1], [0], [0], [1], [0, 0, 1, 1], [], []>} : vector<24x48xbf16>, vector<48x64xbf16>, vector<24x64xf32> -> vector<24x64xf32>
    %c0_3 = arith.constant 0 : index
    %c0_4 = arith.constant 0 : index
    %4 = vector.load %arg2[%c0_3, %c0_4] : memref<1x64xf32, #tpu.memory_space<vmem>>, vector<1x64xf32>
    %5 = vector.broadcast %4 : vector<1x64xf32> to vector<24x64xf32>
    %6 = arith.addf %3, %5 : vector<24x64xf32>
    %c0_5 = arith.constant 0 : index
    %c0_6 = arith.constant 0 : index
    %7 = vector.load %arg3[%c0_5, %c0_6] : memref<24x64xf32, #tpu.memory_space<vmem>>, vector<24x64xf32>
    tpu.vector_store %arg3[%c0_5, %c0_6], %6 {strides = array<i32>} : memref<24x64xf32, #tpu.memory_space<vmem>>, vector<24x64xf32>,
    return
  }
}

</mosaic_0001>

<bundles_post_ra>
// kernel: run.12
= control target key start
LH: loop header
LB: loop body
LE: loop exit
PB: predicated region body
PF: predicated region fallthrough
CT: control target
= control target key end

     0   :  { %vm40_vm0 = vcmask 523264   ;;  %v636_v16 = vmov 64.0   ;;  %s1041_s0 = inlined_call_operand.vmem [shape: f32[4,16,64], index: 0, kind: input, shape index: {}]   ;;  %s1042_s1 = inlined_call_operand.vmem [shape: f32[1,64], index: 1, kind: input, shape index: {}]   ;;  %s1043_s2 = inlined_call_operand.vmem [shape: f32[1,64], index: 2, kind: input, shape index: {}]   ;;  %s1044_s4 = inlined_call_operand.vmem [shape: f32[1,32], index: 4, kind: input, shape index: {}]   ;;  %s1045_s3 = inlined_call_operand.vmem [shape: bf16[64,32], index: 3, kind: input, shape index: {}]   ;;  %s1046_s5 = inlined_call_operand.vmem [shape: f32[1,32], index: 5, kind: input, shape index: {}]   ;;  %s1047_s6 = inlined_call_operand.vmem [shape: f32[1,32], index: 6, kind: input, shape index: {}]   ;;  %s1048_s7 = inlined_call_operand.vmem [shape: f32[16,32], index: 7, kind: input, shape index: {}]   ;;  %s1049_s8 = inlined_call_operand.vmem [shape: f32[4,16,32], index: 8, kind: output, shape index: {}]  }
   0x1   :  { %v36_v0 = vld [vmem:[%s1041_s0 + $0x30] sm:$0xff]  ;;  %v34_v1 = vld [vmem:[%s1041_s0 + $0x20] sm:$0xff]  ;;  %v37_v6 = vld [vmem:[%s1041_s0 + $0x38] sm:$0xff]  ;;  %600 = vrcp.f32 %v636_v16 }
   0x2   :  { %v30_v2 = vld [vmem:[%s1041_s0] sm:$0xff]  ;;  %v59_v3 = vsel %vm40_vm0, %v36_v0, 0.0  ;;  %v53_v4 = vsel %vm40_vm0, %v34_v1, 0.0  ;;  %v35_v7 = vld [vmem:[%s1041_s0 + $0x28] sm:$0xff]  ;;  %v62_v9 = vsel %vm40_vm0, %v37_v6, 0.0  ;;  %v32_v12 = vld [vmem:[%s1041_s0 + $0x10] sm:$0xff] }
   0x3   :  { %v41_v5 = vsel %vm40_vm0, %v30_v2, 0.0  ;;  %60 = vadd.xlane.f32.xlu1 %v59_v3  ;;  %54 = vadd.xlane.f32.xlu0 %v53_v4  ;;  %v31_v8 = vld [vmem:[%s1041_s0 + $0x8] sm:$0xff]  ;;  %v56_v10 = vsel %vm40_vm0, %v35_v7, 0.0  ;;  %v33_v13 = vld [vmem:[%s1041_s0 + $0x18] sm:$0xff]  ;;  %v47_v14 = vsel %vm40_vm0, %v32_v12, 0.0 }
   0x4   :  { %42 = vadd.xlane.f32.xlu2 %v41_v5  ;;  %v44_v11 = vsel %vm40_vm0, %v31_v8, 0.0  ;;  %v50_v15 = vsel %vm40_vm0, %v33_v13, 0.0  ;;  %v580_v63 = vld [vmem:[%s1045_s3 + $0x18] sm:$0xff]  ;;  %v578_v5 = vld [vmem:[%s1045_s3 + $0x8] sm:$0xff] }
   0x5   :  { %582 = vmatpush.bf16.msra.mxu2 %v580_v63  ;;  %583 = vmatpush.bf16.msra.mxu3 %v580_v63 }
   0x6   :  { %302 = vmatpush.bf16.msra.mxu0 %v580_v63  ;;  %581 = vmatpush.bf16.msra.mxu1 %v580_v63 }
   0x7   :  { %v601_v17 = vpop.eup %600 }
   0x8   :  { %v66_v18 = vmul.f32 64.0, %v601_v17  ;;  %vm70_vm1 = vweird.f32 %v601_v17 }
   0xa   :  { %v67_v19 = vsub.f32 1.0, %v66_v18 }
   0xb   :  { %63 = vadd.xlane.f32.xlu1 %v62_v9  ;;  %57 = vadd.xlane.f32.xlu0 %v56_v10 }
   0xc   :  { %45 = vadd.xlane.f32.xlu2 %v44_v11  ;;  %v68_v20 = vmul.f32 %v601_v17, %v67_v19 }
   0xe   :  { %v69_v21 = vadd.f32 %v601_v17, %v68_v20 }
  0x10   :  { %v715_v22 = vsel %vm70_vm1, %v601_v17, %v69_v21 }
  0x13   :  { %48 = vadd.xlane.f32.xlu0 %v47_v14  ;;  %51 = vadd.xlane.f32.xlu1 %v50_v15 }
  0x76   :  { %v61_v23 = vpop.xlane.xlu1 %60  ;;  %v55_v24 = vpop.xlane.xlu0 %54 }
  0x77   :  { %v78_v25 = vmul.f32 %v715_v22, %v61_v23  ;;  %v76_v26 = vmul.f32 %v715_v22, %v55_v24  ;;  %v43_v27 = vpop.xlane.xlu2 %42 }
  0x78   :  { %v72_v36 = vmul.f32 %v715_v22, %v43_v27 }
  0x79   :  { %v719_v28 = vsub.f32 %v36_v0, %v78_v25  ;;  %v721_v29 = vsub.f32 %v34_v1, %v76_v26  ;;  %v579_v0 = vld [vmem:[%s1045_s3 + $0x10] sm:$0xff] }
  0x7a   :  { %v739_v44 = vsub.f32 %v30_v2, %v72_v36  ;;  %585 = vmatpush.bf16.msra.mxu2 %v579_v0  ;;  %586 = vmatpush.bf16.msra.mxu3 %v579_v0 }
  0x7b   :  { %v94_v30 = vmul.f32 %v719_v28, %v719_v28  ;;  %v92_v31 = vmul.f32 %v721_v29, %v721_v29  ;;  %303 = vmatpush.bf16.msra.mxu0 %v579_v0  ;;  %584 = vmatpush.bf16.msra.mxu1 %v579_v0 }
  0x7c   :  { %v88_v55 = vmul.f32 %v739_v44, %v739_v44 }
  0x7d   :  { %v114_v32 = vsel %vm40_vm0, %v94_v30, 0.0  ;;  %v108_v33 = vsel %vm40_vm0, %v92_v31, 0.0 }
  0x7e   :  { %v64_v34 = vpop.xlane.xlu1 %63  ;;  %v58_v35 = vpop.xlane.xlu0 %57  ;;  %115 = vadd.xlane.f32.xlu1 %v114_v32  ;;  %109 = vadd.xlane.f32.xlu2 %v108_v33  ;;  %v96_v59 = vsel %vm40_vm0, %v88_v55, 0.0 }
  0x7f   :  { %v79_v37 = vmul.f32 %v715_v22, %v64_v34  ;;  %v77_v38 = vmul.f32 %v715_v22, %v58_v35  ;;  %v46_v39 = vpop.xlane.xlu2 %45  ;;  %588 = vmatpush.bf16.msra.mxu2 %v578_v5  ;;  %589 = vmatpush.bf16.msra.mxu3 %v578_v5 }
  0x80   :  { %v73_v40 = vmul.f32 %v715_v22, %v46_v39  ;;  %304 = vmatpush.bf16.msra.mxu0 %v578_v5  ;;  %587 = vmatpush.bf16.msra.mxu1 %v578_v5 }
  0x81   :  { %v733_v41 = vsub.f32 %v37_v6, %v79_v37  ;;  %v735_v42 = vsub.f32 %v35_v7, %v77_v38 }
  0x82   :  { %v737_v43 = vsub.f32 %v31_v8, %v73_v40  ;;  %v577_v8 = vld [vmem:[%s1045_s3] sm:$0xff] }
  0x83   :  { %v93_v45 = vmul.f32 %v735_v42, %v735_v42  ;;  %v95_v46 = vmul.f32 %v733_v41, %v733_v41  ;;  %591 = vmatpush.bf16.msra.mxu2 %v577_v8  ;;  %592 = vmatpush.bf16.msra.mxu3 %v577_v8 }
  0x84   :  { %v89_v47 = vmul.f32 %v737_v43, %v737_v43  ;;  %305 = vmatpush.bf16.msra.mxu0 %v577_v8  ;;  %590 = vmatpush.bf16.msra.mxu1 %v577_v8 }
  0x85   :  { %v111_v48 = vsel %vm40_vm0, %v93_v45, 0.0  ;;  %v117_v49 = vsel %vm40_vm0, %v95_v46, 0.0 }
  0x86   :  { %112 = vadd.xlane.f32.xlu0 %v111_v48  ;;  %v49_v50 = vpop.xlane.xlu0 %48  ;;  %118 = vadd.xlane.f32.xlu2 %v117_v49  ;;  %v99_v51 = vsel %vm40_vm0, %v89_v47, 0.0  ;;  %v52_v52 = vpop.xlane.xlu1 %51 }
  0x87   :  { %v74_v53 = vmul.f32 %v715_v22, %v49_v50  ;;  %100 = vadd.xlane.f32.xlu1 %v99_v51  ;;  %v75_v54 = vmul.f32 %v715_v22, %v52_v52 }
  0x89   :  { %v754_v56 = vsub.f32 %v32_v12, %v74_v53  ;;  %v756_v57 = vsub.f32 %v33_v13, %v75_v54 }
  0x8b   :  { %v90_v58 = vmul.f32 %v754_v56, %v754_v56  ;;  %v91_v61 = vmul.f32 %v756_v57, %v756_v57 }
  0x8d   :  { %v102_v60 = vsel %vm40_vm0, %v90_v58, 0.0  ;;  %v105_v62 = vsel %vm40_vm0, %v91_v61, 0.0 }
  0x8e   :  { %103 = vadd.xlane.f32.xlu2 %v102_v60  ;;  %97 = vadd.xlane.f32.xlu0 %v96_v59 }
  0x96   :  { %106 = vadd.xlane.f32.xlu0 %v105_v62 }
  0xf1   :  { %v116_v1 = vpop.xlane.xlu1 %115  ;;  %v110_v2 = vpop.xlane.xlu2 %109 }
  0xf2   :  { %v126_v3 = vmul.f32 %v116_v1, %v715_v22  ;;  %v124_v4 = vmul.f32 %v110_v2, %v715_v22  ;;  %v818_v1 = vld [vmem:[%s1042_s1] ss:$0 sm:$0xff] }
  0xf4   :  { %v134_v6 = vadd.f32 1e-05, %v126_v3  ;;  %v132_v7 = vadd.f32 1e-05, %v124_v4 }
  0xf6   :  { %602 = vrsqrt.f32 %v134_v6  ;;  %vm202_vm2 = vweird.f32 %v134_v6  ;;  %vm182_vm5 = vweird.f32 %v132_v7 }
  0xf7   :  { %604 = vrsqrt.f32 %v132_v7 }
  0xf9   :  { %v113_v9 = vpop.xlane.xlu0 %112  ;;  %v119_v10 = vpop.xlane.xlu2 %118 }
  0xfa   :  { %v125_v11 = vmul.f32 %v113_v9, %v715_v22  ;;  %v101_v12 = vpop.xlane.xlu1 %100  ;;  %v127_v13 = vmul.f32 %v119_v10, %v715_v22 }
  0xfb   :  { %v121_v14 = vmul.f32 %v101_v12, %v715_v22 }
  0xfc   :  { %v603_v15 = vpop.eup %602  ;;  %v133_v16 = vadd.f32 1e-05, %v125_v11  ;;  %v782_v17 = vadd.f32 1e-05, %v127_v13  ;;  %v596_v13 = vld [vmem:[%s1043_s2] ss:$0 sm:$0xff] }
  0xfd   :  { %v605_v18 = vpop.eup %604  ;;  %v197_v19 = vmul.f32 %v603_v15, %v134_v6  ;;  %v129_v20 = vadd.f32 1e-05, %v121_v14  ;;  %vm203_vm4 = vweird.f32 %v603_v15 }
  0xfe   :  { %v177_v21 = vmul.f32 %v605_v18, %v132_v7  ;;  %606 = vrsqrt.f32 %v133_v16  ;;  %vm183_vm3 = vweird.f32 %v605_v18  ;;  %vm192_vm7 = vweird.f32 %v133_v16  ;;  %vm805_vm8 = vmor %vm202_vm2, %vm203_vm4 }
  0xff   :  { %v198_v23 = vmul.f32 %v603_v15, %v197_v19  ;;  %608 = vrsqrt.f32 %v129_v20  ;;  %vm795_vm6 = vmor %vm182_vm5, %vm183_vm3  ;;  %vm152_vm9 = vweird.f32 %v129_v20  ;;  %vm212_vm12 = vweird.f32 %v782_v17 }
 0x100   :  { %v178_v24 = vmul.f32 %v605_v18, %v177_v21  ;;  %610 = vrsqrt.f32 %v782_v17 }
 0x101   :  { %v199_v25 = vmul.f32 0.5, %v198_v23  ;;  %v98_v26 = vpop.xlane.xlu0 %97  ;;  %v104_v27 = vpop.xlane.xlu2 %103 }
 0x102   :  { %v179_v30 = vmul.f32 0.5, %v178_v24  ;;  %v120_v31 = vmul.f32 %v98_v26, %v715_v22  ;;  %v122_v32 = vmul.f32 %v104_v27, %v715_v22 }
 0x103   :  { %v200_v33 = vsub.f32 1.5, %v199_v25 }
 0x104   :  { %v607_v34 = vpop.eup %606  ;;  %v180_v35 = vsub.f32 1.5, %v179_v30  ;;  %v787_v36 = vadd.f32 1e-05, %v120_v31  ;;  %v791_v39 = vadd.f32 1e-05, %v122_v32 }
 0x105   :  { %v789_v37 = vpop.eup %608  ;;  %v187_v38 = vmul.f32 %v607_v34, %v133_v16  ;;  %v201_v45 = vmul.f32 %v603_v15, %v200_v33  ;;  %vm193_vm10 = vweird.f32 %v607_v34 }
 0x106   :  { %v611_v40 = vpop.eup %610  ;;  %v181_v46 = vmul.f32 %v605_v18, %v180_v35  ;;  %v147_v47 = vmul.f32 %v789_v37, %v129_v20  ;;  %612 = vrsqrt.f32 %v787_v36  ;;  %vm153_vm11 = vweird.f32 %v789_v37  ;;  %vm194_vm14 = vmor %vm192_vm7, %vm193_vm10 }
 0x107   :  { %v188_v49 = vmul.f32 %v607_v34, %v187_v38  ;;  %v207_v50 = vmul.f32 %v611_v40, %v782_v17  ;;  %614 = vrsqrt.f32 %v791_v39  ;;  %v205_v59 = vsel %vm805_vm8, %v603_v15, %v201_v45  ;;  %vm827_vm15 = vmor %vm152_vm9, %vm153_vm11 }
 0x108   :  { %v185_v51 = vsel %vm795_vm6, %v605_v18, %v181_v46  ;;  %v148_v52 = vmul.f32 %v789_v37, %v147_v47  ;;  %vm213_vm13 = vweird.f32 %v611_v40  ;;  %v222_v5 = vmul.f32 %v205_v59, %v719_v28 }
 0x109   :  { %v189_v54 = vmul.f32 0.5, %v188_v49  ;;  %v208_v55 = vmul.f32 %v611_v40, %v207_v50  ;;  %v107_v58 = vpop.xlane.xlu0 %106  ;;  %v220_v62 = vmul.f32 %v185_v51, %v721_v29  ;;  %vm214_vm1 = vmor %vm212_vm12, %vm213_vm13  ;;  %vm142_vm2 = vweird.f32 %v787_v36 }
 0x10a   :  { %v149_v60 = vmul.f32 0.5, %v148_v52  ;;  %v123_v61 = vmul.f32 %v107_v58, %v715_v22  ;;  %v233_v20 = vmul.f32 %v818_v1, %v222_v5  ;;  %vm162_vm4 = vweird.f32 %v791_v39 }
 0x10b   :  { %v190_v63 = vsub.f32 1.5, %v189_v54  ;;  %v209_v0 = vmul.f32 0.5, %v208_v55  ;;  %v231_v28 = vmul.f32 %v818_v1, %v220_v62  ;;  %vm329_vm11 = vcmask 261120  }
 0x10c   :  { %v613_v2 = vpop.eup %612  ;;  %v150_v3 = vsub.f32 1.5, %v149_v60  ;;  %v131_v4 = vadd.f32 1e-05, %v123_v61 }
 0x10d   :  { %v191_v22 = vmul.f32 %v607_v34, %v190_v63  ;;  %v210_v29 = vsub.f32 1.5, %v209_v0  ;;  %v137_v6 = vmul.f32 %v613_v2, %v787_v36  ;;  %v615_v9 = vpop.eup %614  ;;  %vm143_vm3 = vweird.f32 %v613_v2 }
 0x10e   :  { %v151_v7 = vmul.f32 %v789_v37, %v150_v3  ;;  %616 = vrsqrt.f32 %v131_v4  ;;  %v157_v15 = vmul.f32 %v615_v9, %v791_v39  ;;  %v242_v17 = vadd.f32 %v596_v13, %v231_v28  ;;  %vm144_vm5 = vmor %vm142_vm2, %vm143_vm3 }
 0x10f   :  { %v195_v10 = vsel %vm194_vm14, %v607_v34, %v191_v22  ;;  %v211_v11 = vmul.f32 %v611_v40, %v210_v29  ;;  %v138_v12 = vmul.f32 %v613_v2, %v137_v6  ;;  %vm163_vm6 = vweird.f32 %v615_v9 }
 0x110   :  { %v221_v14 = vmul.f32 %v195_v10, %v735_v42  ;;  %v155_v16 = vsel %vm827_vm15, %v789_v37, %v151_v7  ;;  %v158_v23 = vmul.f32 %v615_v9, %v157_v15  ;;  %vm164_vm7 = vmor %vm162_vm4, %vm163_vm6  ;;  %vm172_vm9 = vweird.f32 %v131_v4 }
 0x111   :  { %v215_v18 = vsel %vm214_vm1, %v611_v40, %v211_v11  ;;  %v139_v19 = vmul.f32 0.5, %v138_v12  ;;  %v217_v26 = vmul.f32 %v155_v16, %v737_v43 }
 0x112   :  { %v223_v21 = vmul.f32 %v215_v18, %v733_v41  ;;  %v232_v24 = vmul.f32 %v818_v1, %v221_v14  ;;  %v159_v27 = vmul.f32 0.5, %v158_v23  ;;  %v244_v41 = vadd.f32 %v596_v13, %v233_v20 }
 0x113   :  { %v140_v42 = vsub.f32 1.5, %v139_v19  ;;  %v228_v46 = vmul.f32 %v818_v1, %v217_v26  ;;  %v637_v20 = vmov 32.0  }
 0x114   :  { %v617_v25 = vpop.eup %616  ;;  %v243_v30 = vadd.f32 %v596_v13, %v232_v24  ;;  %v234_v31 = vmul.f32 %v818_v1, %v223_v21  ;;  %v160_v34 = vsub.f32 1.5, %v159_v27  ;;  %618 = vrcp.f32 %v637_v20 }
 0x115   :  { %v141_v32 = vmul.f32 %v613_v2, %v140_v42  ;;  %v167_v33 = vmul.f32 %v617_v25, %v131_v4  ;;  %vm173_vm8 = vweird.f32 %v617_v25  ;;  %v239_v52 = vadd.f32 %v596_v13, %v228_v46 }
 0x116   :  { %v248_v35 = vpack.c.bf16 %v243_v30, %v242_v17  ;;  %v245_v37 = vadd.f32 %v596_v13, %v234_v31  ;;  %v161_v45 = vmul.f32 %v615_v9, %v160_v34  ;;  %vm174_vm10 = vmor %vm172_vm9, %vm173_vm8 }
 0x117   :  { %v145_v36 = vsel %vm144_vm5, %v613_v2, %v141_v32  ;;  %v168_v38 = vmul.f32 %v617_v25, %v167_v33 }
 0x118   :  { %v216_v40 = vmul.f32 %v145_v36, %v739_v44  ;;  %575 = vmatmul.msk.bf16.vlgmr.msra.gmra.mxu2 %vm40_vm0, %v248_v35  ;;  %v249_v43 = vpack.c.bf16 %v245_v37, %v244_v41  ;;  %v165_v48 = vsel %vm164_vm7, %v615_v9, %v161_v45 }
 0x119   :  { %v169_v47 = vmul.f32 0.5, %v168_v38  ;;  %v218_v51 = vmul.f32 %v165_v48, %v754_v56  ;;  %v597_v56 = vld [vmem:[%s1044_s4] ss:$0 sm:$0xff] }
 0x11a   :  { %576 = vmatmul.msk.bf16.vlgmr.msra.gmra.mxu3 %vm40_vm0, %v249_v43  ;;  %v227_v49 = vmul.f32 %v818_v1, %v216_v40  ;;  %v619_v21 = vpop.eup %618 }
 0x11b   :  { %v170_v50 = vsub.f32 1.5, %v169_v47  ;;  %v229_v58 = vmul.f32 %v818_v1, %v218_v51  ;;  %v355_v23 = vmul.f32 32.0, %v619_v21 }
 0x11c   :  { %v238_v44 = vadd.f32 %v596_v13, %v227_v49 }
 0x11d   :  { %v171_v53 = vmul.f32 %v617_v25, %v170_v50  ;;  %v240_v60 = vadd.f32 %v596_v13, %v229_v58  ;;  %v356_v24 = vsub.f32 1.0, %v355_v23 }
 0x11e   :  { %v246_v54 = vpack.c.bf16 %v239_v52, %v238_v44 }
 0x11f   :  { %v175_v55 = vsel %vm174_vm10, %v617_v25, %v171_v53  ;;  %v357_v42 = vmul.f32 %v619_v21, %v356_v24 }
 0x120   :  { %v219_v39 = vmul.f32 %v175_v55, %v756_v57  ;;  %573 = vmatmul.msk.bf16.vlgmr.msra.gmra.mxu0 %vm40_vm0, %v246_v54 }
 0x121   :  { %v358_v17 = vadd.f32 %v619_v21, %v357_v42 }
 0x122   :  { %v230_v59 = vmul.f32 %v818_v1, %v219_v39 }
 0x124   :  { %v241_v61 = vadd.f32 %v596_v13, %v230_v59 }
 0x126   :  { %v247_v62 = vpack.c.bf16 %v241_v61, %v240_v60 }
 0x128   :  { %574 = vmatmul.msk.bf16.vlgmr.msra.gmra.mxu1 %vm40_vm0, %v247_v62  ;;  %vm359_vm0 = vweird.f32 %v619_v21 }
 0x129   :  { %v874_v25 = vsel %vm359_vm0, %v619_v21, %v358_v17 }
 0x19b   :  { %v317_v63 = vpop.f32.mrf.mxu2 }
 0x19c   :  { %v318_v0 = vadd.f32 %v597_v56, %v317_v63 }
 0x19d   :  { %v307_v2 = vpop.f32.mrf.mxu0  ;;  %v322_v4 = vpop.f32.mrf.mxu3 }
 0x19e   :  { %v308_v57 = vadd.f32 %v597_v56, %v307_v2  ;;  %v342_v3 = vsel %vm329_vm11, %v318_v0, 0.0  ;;  %v323_v18 = vadd.f32 %v597_v56, %v322_v4 }
 0x19f   :  { %343 = vadd.xlane.f32.xlu2 %v342_v3 }
 0x1a0   :  { %v330_v1 = vsel %vm329_vm11, %v308_v57, 0.0  ;;  %v348_v19 = vsel %vm329_vm11, %v323_v18, 0.0 }
 0x1a1   :  { %331 = vadd.xlane.f32.xlu1 %v330_v1 }
 0x1a3   :  { %v319_v10 = vpop.f32.mrf.mxu2 }
 0x1a4   :  { %v320_v12 = vadd.f32 %v597_v56, %v319_v10 }
 0x1a5   :  { %v309_v5 = vpop.f32.mrf.mxu0  ;;  %v312_v29 = vpop.f32.mrf.mxu1 }
 0x1a6   :  { %v310_v22 = vadd.f32 %v597_v56, %v309_v5  ;;  %v313_v6 = vadd.f32 %v597_v56, %v312_v29  ;;  %v324_v8 = vpop.f32.mrf.mxu3  ;;  %v345_v16 = vsel %vm329_vm11, %v320_v12, 0.0 }
 0x1a7   :  { %v325_v11 = vadd.f32 %v597_v56, %v324_v8 }
 0x1a8   :  { %v333_v7 = vsel %vm329_vm11, %v310_v22, 0.0  ;;  %v336_v9 = vsel %vm329_vm11, %v313_v6, 0.0 }
 0x1a9   :  { %334 = vadd.xlane.f32.xlu2 %v333_v7  ;;  %337 = vadd.xlane.f32.xlu0 %v336_v9  ;;  %v351_v14 = vsel %vm329_vm11, %v325_v11, 0.0 }
 0x1ad   :  { %v314_v28 = vpop.f32.mrf.mxu1 }
 0x1ae   :  { %v315_v13 = vadd.f32 %v597_v56, %v314_v28 }
 0x1b0   :  { %v339_v15 = vsel %vm329_vm11, %v315_v13, 0.0 }
 0x1b1   :  { %352 = vadd.xlane.f32.xlu2 %v351_v14  ;;  %340 = vadd.xlane.f32.xlu1 %v339_v15 }
 0x1b2   :  { %346 = vadd.xlane.f32.xlu0 %v345_v16 }
 0x1b9   :  { %349 = vadd.xlane.f32.xlu1 %v348_v19 }
 0x212   :  { %v344_v26 = vpop.xlane.xlu2 %343 }
 0x213   :  { %v365_v27 = vmul.f32 %v874_v25, %v344_v26 }
 0x214   :  { %v332_v30 = vpop.xlane.xlu1 %331 }
 0x215   :  { %v877_v31 = vsub.f32 %v318_v0, %v365_v27  ;;  %v361_v32 = vmul.f32 %v874_v25, %v332_v30 }
 0x217   :  { %v880_v33 = vsub.f32 %v308_v57, %v361_v32  ;;  %v381_v41 = vmul.f32 %v877_v31, %v877_v31 }
 0x219   :  { %v397_v34 = vsel %vm329_vm11, %v381_v41, 0.0  ;;  %v377_v35 = vmul.f32 %v880_v33, %v880_v33 }
 0x21a   :  { %398 = vadd.xlane.f32.xlu1 %v397_v34 }
 0x21b   :  { %v385_v37 = vsel %vm329_vm11, %v377_v35, 0.0  ;;  %v939_v35 = vld [vmem:[%s1046_s5] ss:$0 sm:$0xff] }
 0x21c   :  { %386 = vadd.xlane.f32.xlu0 %v385_v37  ;;  %v335_v36 = vpop.xlane.xlu2 %334  ;;  %v338_v38 = vpop.xlane.xlu0 %337 }
 0x21d   :  { %v362_v40 = vmul.f32 %v874_v25, %v335_v36  ;;  %v363_v45 = vmul.f32 %v874_v25, %v338_v38 }
 0x21f   :  { %v890_v43 = vsub.f32 %v310_v22, %v362_v40  ;;  %v892_v46 = vsub.f32 %v313_v6, %v363_v45 }
 0x221   :  { %v378_v47 = vmul.f32 %v890_v43, %v890_v43  ;;  %v379_v48 = vmul.f32 %v892_v46, %v892_v46 }
 0x223   :  { %v388_v49 = vsel %vm329_vm11, %v378_v47, 0.0  ;;  %v391_v50 = vsel %vm329_vm11, %v379_v48, 0.0  ;;  %v948_v48 = vld [vmem:[%s1047_s6] ss:$0 sm:$0xff] }
 0x224   :  { %389 = vadd.xlane.f32.xlu1 %v388_v49  ;;  %v353_v51 = vpop.xlane.xlu2 %352  ;;  %v341_v44 = vpop.xlane.xlu1 %340  ;;  %392 = vadd.xlane.f32.xlu2 %v391_v50 }
 0x225   :  { %v347_v52 = vpop.xlane.xlu0 %346  ;;  %v368_v53 = vmul.f32 %v874_v25, %v353_v51  ;;  %v364_v54 = vmul.f32 %v874_v25, %v341_v44 }
 0x226   :  { %v366_v55 = vmul.f32 %v874_v25, %v347_v52 }
 0x227   :  { %v903_v39 = vsub.f32 %v325_v11, %v368_v53  ;;  %v905_v58 = vsub.f32 %v315_v13, %v364_v54 }
 0x228   :  { %v907_v59 = vsub.f32 %v320_v12, %v366_v55 }
 0x229   :  { %v384_v60 = vmul.f32 %v903_v39, %v903_v39  ;;  %v380_v61 = vmul.f32 %v905_v58, %v905_v58 }
 0x22a   :  { %v382_v62 = vmul.f32 %v907_v59, %v907_v59 }
 0x22b   :  { %v406_v56 = vsel %vm329_vm11, %v384_v60, 0.0  ;;  %v394_v63 = vsel %vm329_vm11, %v380_v61, 0.0 }
 0x22c   :  { %v400_v0 = vsel %vm329_vm11, %v382_v62, 0.0  ;;  %407 = vadd.xlane.f32.xlu1 %v406_v56  ;;  %v350_v2 = vpop.xlane.xlu1 %349  ;;  %395 = vadd.xlane.f32.xlu0 %v394_v63 }
 0x22d   :  { %401 = vadd.xlane.f32.xlu2 %v400_v0  ;;  %v367_v57 = vmul.f32 %v874_v25, %v350_v2 }
 0x22f   :  { %v919_v3 = vsub.f32 %v323_v18, %v367_v57 }
 0x231   :  { %v383_v4 = vmul.f32 %v919_v3, %v919_v3 }
 0x233   :  { %v403_v1 = vsel %vm329_vm11, %v383_v4, 0.0 }
 0x234   :  { %404 = vadd.xlane.f32.xlu0 %v403_v1 }
 0x28d   :  { %v399_v5 = vpop.xlane.xlu1 %398 }
 0x28e   :  { %v413_v22 = vmul.f32 %v399_v5, %v874_v25 }
 0x28f   :  { %v387_v29 = vpop.xlane.xlu0 %386 }
 0x290   :  { %v421_v6 = vadd.f32 1e-05, %v413_v22  ;;  %v409_v7 = vmul.f32 %v387_v29, %v874_v25 }
 0x292   :  { %620 = vrsqrt.f32 %v421_v6  ;;  %v417_v8 = vadd.f32 1e-05, %v409_v7  ;;  %vm471_vm13 = vweird.f32 %v421_v6 }
 0x294   :  { %622 = vrsqrt.f32 %v417_v8  ;;  %vm431_vm1 = vweird.f32 %v417_v8 }
 0x297   :  { %v390_v9 = vpop.xlane.xlu1 %389  ;;  %v393_v12 = vpop.xlane.xlu2 %392 }
 0x298   :  { %v621_v10 = vpop.eup %620  ;;  %v410_v11 = vmul.f32 %v390_v9, %v874_v25  ;;  %v411_v13 = vmul.f32 %v393_v12, %v874_v25 }
 0x299   :  { %v466_v28 = vmul.f32 %v621_v10, %v421_v6  ;;  %vm472_vm12 = vweird.f32 %v621_v10 }
 0x29a   :  { %v623_v14 = vpop.eup %622  ;;  %v928_v15 = vadd.f32 1e-05, %v410_v11  ;;  %v930_v19 = vadd.f32 1e-05, %v411_v13  ;;  %vm473_vm15 = vmor %vm471_vm13, %vm472_vm12 }
 0x29b   :  { %v467_v16 = vmul.f32 %v621_v10, %v466_v28  ;;  %v426_v18 = vmul.f32 %v623_v14, %v417_v8  ;;  %vm432_vm14 = vweird.f32 %v623_v14 }
 0x29c   :  { %624 = vrsqrt.f32 %v928_v15  ;;  %vm433_vm2 = vmor %vm431_vm1, %vm432_vm14  ;;  %vm441_vm5 = vweird.f32 %v928_v15  ;;  %vm451_vm7 = vweird.f32 %v930_v19 }
 0x29d   :  { %v468_v20 = vmul.f32 0.5, %v467_v16  ;;  %v427_v21 = vmul.f32 %v623_v14, %v426_v18  ;;  %626 = vrsqrt.f32 %v930_v19 }
 0x29f   :  { %v469_v23 = vsub.f32 1.5, %v468_v20  ;;  %v428_v24 = vmul.f32 0.5, %v427_v21  ;;  %v408_v42 = vpop.xlane.xlu1 %407  ;;  %v396_v17 = vpop.xlane.xlu0 %395  ;;  %v536_v20 = vld [vmem:[%s1048_s7 + $0x8] sm:$0xff] }
 0x2a0   :  { %v416_v26 = vmul.f32 %v408_v42, %v874_v25  ;;  %v402_v27 = vpop.xlane.xlu2 %401  ;;  %v412_v41 = vmul.f32 %v396_v17, %v874_v25 }
 0x2a1   :  { %v470_v30 = vmul.f32 %v621_v10, %v469_v23  ;;  %v429_v32 = vsub.f32 1.5, %v428_v24  ;;  %v414_v47 = vmul.f32 %v402_v27, %v874_v25 }
 0x2a2   :  { %v625_v34 = vpop.eup %624  ;;  %v941_v37 = vadd.f32 1e-05, %v416_v26  ;;  %v953_v51 = vadd.f32 1e-05, %v412_v41 }
 0x2a3   :  { %v627_v36 = vpop.eup %626  ;;  %v474_v38 = vsel %vm473_vm15, %v621_v10, %v470_v30  ;;  %v430_v40 = vmul.f32 %v623_v14, %v429_v32  ;;  %v436_v45 = vmul.f32 %v625_v34, %v928_v15  ;;  %v964_v61 = vadd.f32 1e-05, %v414_v47 }
 0x2a4   :  { %v509_v49 = vmul.f32 %v474_v38, %v877_v31  ;;  %v446_v50 = vmul.f32 %v627_v36, %v930_v19  ;;  %628 = vrsqrt.f32 %v941_v37  ;;  %v962_v31 = vld [vmem:[%s1048_s7] sm:$0xff]  ;;  %vm442_vm3 = vweird.f32 %v625_v34 }
 0x2a5   :  { %v434_v44 = vsel %vm433_vm2, %v623_v14, %v430_v40  ;;  %v437_v52 = vmul.f32 %v625_v34, %v436_v45  ;;  %630 = vrsqrt.f32 %v953_v51  ;;  %vm452_vm4 = vweird.f32 %v627_v36  ;;  %vm443_vm6 = vmor %vm441_vm5, %vm442_vm3 }
 0x2a6   :  { %v520_v53 = vmul.f32 %v939_v35, %v509_v49  ;;  %v505_v54 = vmul.f32 %v434_v44, %v880_v33  ;;  %v447_v55 = vmul.f32 %v627_v36, %v446_v50  ;;  %632 = vrsqrt.f32 %v964_v61  ;;  %vm453_vm8 = vmor %vm451_vm7, %vm452_vm4 }
 0x2a7   :  { %v438_v60 = vmul.f32 0.5, %v437_v52  ;;  %v405_v0 = vpop.xlane.xlu0 %404  ;;  %vm501_vm0 = vweird.f32 %v941_v37  ;;  %vm461_vm12 = vweird.f32 %v953_v51  ;;  %vm481_vm1 = vweird.f32 %v964_v61 }
 0x2a8   :  { %v531_v62 = vadd.f32 %v948_v48, %v520_v53  ;;  %v516_v56 = vmul.f32 %v939_v35, %v505_v54  ;;  %v448_v63 = vmul.f32 0.5, %v447_v55  ;;  %v415_v33 = vmul.f32 %v405_v0, %v874_v25 }
 0x2a9   :  { %v439_v2 = vsub.f32 1.5, %v438_v60 }
 0x2aa   :  { %v541_v57 = vadd.f32 %v962_v31, %v531_v62  ;;  %v527_v4 = vadd.f32 %v948_v48, %v516_v56  ;;  %v449_v1 = vsub.f32 1.5, %v448_v63  ;;  %v629_v5 = vpop.eup %628  ;;  %v973_v29 = vadd.f32 1e-05, %v415_v33 }
 0x2ab   :  { %v440_v22 = vmul.f32 %v625_v34, %v439_v2  ;;  %v631_v6 = vpop.eup %630  ;;  %v496_v8 = vmul.f32 %v629_v5, %v941_v37  ;;  %vm502_vm9 = vweird.f32 %v629_v5 }
 0x2ac   :  { %549 = vst.msk [vmem:[%s1049_s8 + $0x20] sm:$0xff] %vm329_vm11, %v541_v57  ;;  %v537_v25 = vadd.f32 %v962_v31, %v527_v4  ;;  %v450_v7 = vmul.f32 %v627_v36, %v449_v1  ;;  %v456_v10 = vmul.f32 %v631_v6, %v953_v51  ;;  %634 = vrsqrt.f32 %v973_v29  ;;  %v633_v13 = vpop.eup %632  ;;  %vm503_vm13 = vmor %vm501_vm0, %vm502_vm9 }
 0x2ad   :  { %v444_v9 = vsel %vm443_vm6, %v625_v34, %v440_v22  ;;  %v497_v28 = vmul.f32 %v629_v5, %v496_v8  ;;  %v476_v19 = vmul.f32 %v633_v13, %v964_v61  ;;  %vm462_vm10 = vweird.f32 %v631_v6 }
 0x2ae   :  { %545 = vst.msk [vmem:[%s1049_s8] sm:$0xff] %vm329_vm11, %v537_v25  ;;  %v506_v11 = vmul.f32 %v444_v9, %v890_v43  ;;  %v454_v12 = vsel %vm453_vm8, %v627_v36, %v450_v7  ;;  %v457_v15 = vmul.f32 %v631_v6, %v456_v10  ;;  %vm463_vm14 = vmor %vm461_vm12, %vm462_vm10  ;;  %vm482_vm15 = vweird.f32 %v633_v13 }
 0x2af   :  { %v507_v14 = vmul.f32 %v454_v12, %v892_v46  ;;  %v498_v18 = vmul.f32 0.5, %v497_v28  ;;  %v477_v42 = vmul.f32 %v633_v13, %v476_v19  ;;  %vm483_vm2 = vmor %vm481_vm1, %vm482_vm15  ;;  %vm491_vm4 = vweird.f32 %v973_v29 }
 0x2b0   :  { %v517_v16 = vmul.f32 %v939_v35, %v506_v11  ;;  %v458_v23 = vmul.f32 0.5, %v457_v15 }
 0x2b1   :  { %v518_v21 = vmul.f32 %v939_v35, %v507_v14  ;;  %v499_v24 = vsub.f32 1.5, %v498_v18  ;;  %v478_v32 = vmul.f32 0.5, %v477_v42 }
 0x2b2   :  { %v528_v43 = vadd.f32 %v948_v48, %v517_v16  ;;  %v635_v17 = vpop.eup %634  ;;  %v459_v26 = vsub.f32 1.5, %v458_v23 }
 0x2b3   :  { %v529_v46 = vadd.f32 %v948_v48, %v518_v21  ;;  %v500_v30 = vmul.f32 %v629_v5, %v499_v24  ;;  %v486_v41 = vmul.f32 %v635_v17, %v973_v29  ;;  %v479_v40 = vsub.f32 1.5, %v478_v32 }
 0x2b4   :  { %v538_v27 = vadd.f32 %v536_v20, %v528_v43  ;;  %v460_v36 = vmul.f32 %v631_v6, %v459_v26  ;;  %vm492_vm3 = vweird.f32 %v635_v17 }
 0x2b5   :  { %v539_v34 = vadd.f32 %v962_v31, %v529_v46  ;;  %v504_v38 = vsel %vm503_vm13, %v629_v5, %v500_v30  ;;  %v487_v37 = vmul.f32 %v635_v17, %v486_v41  ;;  %v480_v50 = vmul.f32 %v633_v13, %v479_v40  ;;  %vm493_vm5 = vmor %vm491_vm4, %vm492_vm3 }
 0x2b6   :  { %546 = vst.msk [vmem:[%s1049_s8 + $0x8] sm:$0xff] %vm329_vm11, %v538_v27  ;;  %v464_v45 = vsel %vm463_vm14, %v631_v6, %v460_v36  ;;  %v512_v47 = vmul.f32 %v504_v38, %v903_v39 }
 0x2b7   :  { %547 = vst.msk [vmem:[%s1049_s8 + $0x10] sm:$0xff] %vm329_vm11, %v539_v34  ;;  %v508_v49 = vmul.f32 %v464_v45, %v905_v58  ;;  %v488_v51 = vmul.f32 0.5, %v487_v37  ;;  %v484_v53 = vsel %vm483_vm2, %v633_v13, %v480_v50 }
 0x2b8   :  { %v523_v44 = vmul.f32 %v939_v35, %v512_v47  ;;  %v510_v60 = vmul.f32 %v484_v53, %v907_v59 }
 0x2b9   :  { %v519_v52 = vmul.f32 %v939_v35, %v508_v49  ;;  %v489_v54 = vsub.f32 1.5, %v488_v51 }
 0x2ba   :  { %v534_v55 = vadd.f32 %v948_v48, %v523_v44  ;;  %v521_v61 = vmul.f32 %v939_v35, %v510_v60 }
 0x2bb   :  { %v530_v39 = vadd.f32 %v948_v48, %v519_v52  ;;  %v490_v62 = vmul.f32 %v635_v17, %v489_v54 }
 0x2bc   :  { %v544_v58 = vadd.f32 %v536_v20, %v534_v55  ;;  %v532_v0 = vadd.f32 %v948_v48, %v521_v61 }
 0x2bd   :  { %v540_v56 = vadd.f32 %v536_v20, %v530_v39  ;;  %v494_v63 = vsel %vm493_vm5, %v635_v17, %v490_v62 }
 0x2be   :  { %552 = vst.msk [vmem:[%s1049_s8 + $0x38] sm:$0xff] %vm329_vm11, %v544_v58  ;;  %v511_v59 = vmul.f32 %v494_v63, %v919_v3  ;;  %v542_v2 = vadd.f32 %v536_v20, %v532_v0 }
 0x2bf   :  { %548 = vst.msk [vmem:[%s1049_s8 + $0x18] sm:$0xff] %vm329_vm11, %v540_v56 }
 0x2c0   :  { %v522_v33 = vmul.f32 %v939_v35, %v511_v59  ;;  %550 = vst.msk [vmem:[%s1049_s8 + $0x28] sm:$0xff] %vm329_vm11, %v542_v2 }
 0x2c2   :  { %v533_v57 = vadd.f32 %v948_v48, %v522_v33 }
 0x2c4   :  { %v543_v4 = vadd.f32 %v962_v31, %v533_v57 }
 0x2c6   :  { %551 = vst.msk [vmem:[%s1049_s8 + $0x30] sm:$0xff] %vm329_vm11, %v543_v4 }

// kernel: run.16
= control target key start
LH: loop header
LB: loop body
LE: loop exit
PB: predicated region body
PF: predicated region fallthrough
CT: control target
= control target key end

     0   :  { %vm43_vm0 = vcmask 261120   ;;  %vm151_vm1 = vcmask 254976   ;;  %s284_s1 = inlined_call_operand.vmem [shape: bf16[32,128], index: 1, kind: input, shape index: {}]   ;;  %s285_s0 = inlined_call_operand.vmem [shape: f32[2,32], index: 0, kind: input, shape index: {}]   ;;  %s286_s3 = inlined_call_operand.vmem [shape: bf16[128,32], index: 3, kind: input, shape index: {}]   ;;  %s287_s2 = inlined_call_operand.vmem [shape: f32[1,128], index: 2, kind: input, shape index: {}]   ;;  %s288_s4 = inlined_call_operand.vmem [shape: f32[1,32], index: 4, kind: input, shape index: {}]   ;;  %s289_s5 = inlined_call_operand.vmem [shape: f32[2,32], index: 5, kind: output, shape index: {}]  }
   0x1   :  { %v199_v0 = vld [vmem:[%s284_s1 + $0x8] sm:$0xff]  ;;  %v207_v1 = vld [vmem:[%s286_s3 + $0x38] sm:$0xff]  ;;  %v198_v2 = vld [vmem:[%s284_s1] sm:$0xff] }
   0x2   :  { %53 = vmatpush.bf16.msra.mxu0 %v199_v0  ;;  %v21_v3 = vld [vmem:[%s285_s0] sm:$0x3]  ;;  %138 = vmatpush.bf16.msra.mxu1 %v207_v1  ;;  %v206_v4 = vld [vmem:[%s286_s3 + $0x30] sm:$0xff]  ;;  %v205_v6 = vld [vmem:[%s286_s3 + $0x28] sm:$0xff] }
   0x3   :  { %v22_v5 = vpack.c.bf16 %v21_v3, %v21_v3  ;;  %v204_v7 = vld [vmem:[%s286_s3 + $0x20] sm:$0xff]  ;;  %v203_v8 = vld [vmem:[%s286_s3 + $0x18] sm:$0xff]  ;;  %v202_v9 = vld [vmem:[%s286_s3 + $0x10] sm:$0xff] }
   0x4   :  { %v201_v10 = vld [vmem:[%s286_s3 + $0x8] sm:$0xff]  ;;  %v200_v11 = vld [vmem:[%s286_s3] sm:$0xff] }
   0x5   :  { %v208_v12 = vld [vmem:[%s287_s2] ss:$0 sm:$0xff] }
   0x6   :  { %54 = vmatpush.bf16.msra.mxu0 %v198_v2  ;;  %139 = vmatpush.bf16.msra.mxu1 %v206_v4  ;;  %v209_v26 = vld [vmem:[%s288_s4] ss:$0 sm:$0xff] }
   0x9   :  { %165 = vmatmul.msk.bf16.vlgmr.msra.gmra.mxu0 %vm43_vm0, %v22_v5 }
   0xa   :  { %140 = vmatpush.bf16.msra.mxu1 %v205_v6 }
   0xe   :  { %141 = vmatpush.bf16.msra.mxu1 %v204_v7 }
  0x12   :  { %142 = vmatpush.bf16.msra.mxu1 %v203_v8 }
  0x16   :  { %143 = vmatpush.bf16.msra.mxu1 %v202_v9 }
  0x1a   :  { %144 = vmatpush.bf16.msra.mxu1 %v201_v10 }
  0x1e   :  { %145 = vmatpush.bf16.msra.mxu1 %v200_v11 }
  0x86   :  { %v56_v13 = vpop.f32.mrf.mxu0 }
  0x87   :  { %v57_v14 = vadd.f32 %v208_v12, %v56_v13 }
  0x89   :  { %v61_v15 = vmul.f32 0.044715, %v57_v14  ;;  %v60_v22 = vmul.f32 0.5, %v57_v14 }
  0x8b   :  { %v62_v16 = vmul.f32 %v61_v15, %v57_v14 }
  0x8d   :  { %v63_v17 = vmul.f32 %v62_v16, %v57_v14 }
  0x8e   :  { %v58_v18 = vpop.f32.mrf.mxu0 }
  0x8f   :  { %v64_v19 = vadd.f32 %v63_v17, %v57_v14 }
  0x91   :  { %v65_v20 = vmul.f32 0.7978846, %v64_v19 }
  0x93   :  { %210 = vtanh.f32 %v65_v20 }
  0x99   :  { %v211_v21 = vpop.eup %210 }
  0x9a   :  { %v67_v23 = vadd.f32 1.0, %v211_v21 }
  0x9c   :  { %v68_v24 = vmul.f32 %v67_v23, %v60_v22 }
  0x9e   :  { %v69_v25 = vpack.c.bf16 %v68_v24, %v68_v24 }
  0xa0   :  { %146 = vmatmul.bf16.vlgmr.msra.gmra.mxu1 %v69_v25 }
 0x11d   :  { %v147_v27 = vpop.f32.mrf.mxu1 }
 0x11e   :  { %v148_v28 = vadd.f32 %v209_v26, %v147_v27 }
 0x120   :  { %152 = vst.msk [vmem:[%s289_s5] sm:$0x3] %vm151_vm1, %v148_v28 }
 0x125   :  { %v149_v29 = vpop.f32.mrf.mxu1 }

// kernel: run.18
= control target key start
LH: loop header
LB: loop body
LE: loop exit
PB: predicated region body
PF: predicated region fallthrough
CT: control target
= control target key end

     0   :  { %vm20_vm0 = vcmask 261120   ;;  %vm24_vm1 = vcmask 257024   ;;  %v152_v8 = vmov 32.0   ;;  %s230_s0 = inlined_call_operand.vmem [shape: f32[2,12,32], index: 0, kind: input, shape index: {}]   ;;  %s231_s1 = inlined_call_operand.vmem [shape: f32[1,32], index: 1, kind: input, shape index: {}]   ;;  %s232_s2 = inlined_call_operand.vmem [shape: f32[1,32], index: 2, kind: input, shape index: {}]   ;;  %s233_s3 = inlined_call_operand.vmem [shape: f32[2,12,32], index: 3, kind: output, shape index: {}]  }
   0x1   :  { %v16_v0 = vld [vmem:[%s230_s0 + $0x10] sm:$0xff]  ;;  %v14_v1 = vld [vmem:[%s230_s0] sm:$0xff]  ;;  %v17_v4 = vld [vmem:[%s230_s0 + $0x18] sm:$0xf]  ;;  %142 = vrcp.f32 %v152_v8 }
   0x2   :  { %v28_v2 = vsel %vm20_vm0, %v16_v0, 0.0  ;;  %v21_v3 = vsel %vm20_vm0, %v14_v1, 0.0  ;;  %v15_v5 = vld [vmem:[%s230_s0 + $0x8] sm:$0xf]  ;;  %v31_v6 = vsel %vm24_vm1, %v17_v4, 0.0 }
   0x3   :  { %29 = vadd.xlane.f32.xlu1 %v28_v2  ;;  %22 = vadd.xlane.f32.xlu0 %v21_v3  ;;  %v25_v7 = vsel %vm24_vm1, %v15_v5, 0.0  ;;  %v140_v61 = vld [vmem:[%s231_s1] ss:$0 sm:$0xff] }
   0x4   :  { %v141_v2 = vld [vmem:[%s232_s2] ss:$0 sm:$0xff] }
   0x7   :  { %v143_v9 = vpop.eup %142 }
   0x8   :  { %v35_v10 = vmul.f32 32.0, %v143_v9  ;;  %vm39_vm2 = vweird.f32 %v143_v9 }
   0xa   :  { %v36_v11 = vsub.f32 1.0, %v35_v10 }
   0xb   :  { %32 = vadd.xlane.f32.xlu1 %v31_v6  ;;  %26 = vadd.xlane.f32.xlu0 %v25_v7 }
   0xc   :  { %v37_v12 = vmul.f32 %v143_v9, %v36_v11 }
   0xe   :  { %v38_v13 = vadd.f32 %v143_v9, %v37_v12 }
  0x10   :  { %v40_v14 = vsel %vm39_vm2, %v143_v9, %v38_v13 }
  0x76   :  { %v30_v15 = vpop.xlane.xlu1 %29  ;;  %v23_v16 = vpop.xlane.xlu0 %22 }
  0x77   :  { %v43_v17 = vmul.f32 %v40_v14, %v30_v15  ;;  %v41_v18 = vmul.f32 %v40_v14, %v23_v16 }
  0x79   :  { %v189_v19 = vsub.f32 %v16_v0, %v43_v17  ;;  %v45_v20 = vsub.f32 %v14_v1, %v41_v18 }
  0x7b   :  { %v51_v21 = vmul.f32 %v189_v19, %v189_v19  ;;  %v49_v22 = vmul.f32 %v45_v20, %v45_v20 }
  0x7d   :  { %v59_v23 = vsel %vm20_vm0, %v51_v21, 0.0  ;;  %v53_v24 = vsel %vm20_vm0, %v49_v22, 0.0 }
  0x7e   :  { %v33_v25 = vpop.xlane.xlu1 %32  ;;  %60 = vadd.xlane.f32.xlu0 %v59_v23  ;;  %54 = vadd.xlane.f32.xlu2 %v53_v24  ;;  %v27_v26 = vpop.xlane.xlu0 %26 }
  0x7f   :  { %v44_v27 = vmul.f32 %v40_v14, %v33_v25  ;;  %v42_v28 = vmul.f32 %v40_v14, %v27_v26 }
  0x81   :  { %v195_v29 = vsub.f32 %v17_v4, %v44_v27  ;;  %v197_v30 = vsub.f32 %v15_v5, %v42_v28 }
  0x83   :  { %v52_v31 = vmul.f32 %v195_v29, %v195_v29  ;;  %v50_v32 = vmul.f32 %v197_v30, %v197_v30 }
  0x85   :  { %v62_v33 = vsel %vm24_vm1, %v52_v31, 0.0  ;;  %v56_v34 = vsel %vm24_vm1, %v50_v32, 0.0 }
  0x86   :  { %63 = vadd.xlane.f32.xlu1 %v62_v33  ;;  %57 = vadd.xlane.f32.xlu2 %v56_v34 }
  0xf1   :  { %v55_v35 = vpop.xlane.xlu2 %54  ;;  %v61_v36 = vpop.xlane.xlu0 %60 }
  0xf2   :  { %v65_v37 = vmul.f32 %v55_v35, %v40_v14  ;;  %v67_v38 = vmul.f32 %v61_v36, %v40_v14 }
  0xf4   :  { %v69_v39 = vadd.f32 1e-05, %v65_v37  ;;  %v71_v40 = vadd.f32 1e-05, %v67_v38 }
  0xf6   :  { %144 = vrsqrt.f32 %v69_v39  ;;  %vm79_vm5 = vweird.f32 %v69_v39  ;;  %vm99_vm7 = vweird.f32 %v71_v40 }
  0xf7   :  { %146 = vrsqrt.f32 %v71_v40 }
  0xf9   :  { %v64_v41 = vpop.xlane.xlu1 %63  ;;  %v58_v42 = vpop.xlane.xlu2 %57 }
  0xfa   :  { %v68_v43 = vmul.f32 %v64_v41, %v40_v14  ;;  %v66_v44 = vmul.f32 %v58_v42, %v40_v14 }
  0xfc   :  { %v145_v45 = vpop.eup %144  ;;  %v72_v46 = vadd.f32 1e-05, %v68_v43  ;;  %v70_v47 = vadd.f32 1e-05, %v66_v44 }
  0xfd   :  { %v147_v48 = vpop.eup %146  ;;  %v74_v49 = vmul.f32 %v145_v45, %v69_v39  ;;  %vm80_vm3 = vweird.f32 %v145_v45 }
  0xfe   :  { %v94_v50 = vmul.f32 %v147_v48, %v71_v40  ;;  %148 = vrsqrt.f32 %v72_v46  ;;  %vm100_vm4 = vweird.f32 %v147_v48  ;;  %vm81_vm6 = vmor %vm79_vm5, %vm80_vm3  ;;  %vm109_vm11 = vweird.f32 %v72_v46 }
  0xff   :  { %v75_v51 = vmul.f32 %v145_v45, %v74_v49  ;;  %150 = vrsqrt.f32 %v70_v47  ;;  %vm101_vm8 = vmor %vm99_vm7, %vm100_vm4  ;;  %vm89_vm13 = vweird.f32 %v70_v47 }
 0x100   :  { %v95_v52 = vmul.f32 %v147_v48, %v94_v50 }
 0x101   :  { %v76_v53 = vmul.f32 0.5, %v75_v51 }
 0x102   :  { %v96_v54 = vmul.f32 0.5, %v95_v52 }
 0x103   :  { %v77_v55 = vsub.f32 1.5, %v76_v53 }
 0x104   :  { %v149_v56 = vpop.eup %148  ;;  %v97_v57 = vsub.f32 1.5, %v96_v54 }
 0x105   :  { %v151_v58 = vpop.eup %150  ;;  %v78_v59 = vmul.f32 %v145_v45, %v77_v55  ;;  %v104_v60 = vmul.f32 %v149_v56, %v72_v46  ;;  %vm110_vm9 = vweird.f32 %v149_v56 }
 0x106   :  { %v98_v62 = vmul.f32 %v147_v48, %v97_v57  ;;  %v84_v63 = vmul.f32 %v151_v58, %v70_v47  ;;  %vm90_vm10 = vweird.f32 %v151_v58  ;;  %vm111_vm12 = vmor %vm109_vm11, %vm110_vm9 }
 0x107   :  { %v82_v0 = vsel %vm81_vm6, %v145_v45, %v78_v59  ;;  %v105_v1 = vmul.f32 %v149_v56, %v104_v60  ;;  %vm91_vm14 = vmor %vm89_vm13, %vm90_vm10 }
 0x108   :  { %v113_v3 = vmul.f32 %v82_v0, %v45_v20  ;;  %v102_v4 = vsel %vm101_vm8, %v147_v48, %v98_v62  ;;  %v85_v5 = vmul.f32 %v151_v58, %v84_v63 }
 0x109   :  { %v115_v6 = vmul.f32 %v102_v4, %v189_v19  ;;  %v106_v7 = vmul.f32 0.5, %v105_v1 }
 0x10a   :  { %v120_v8 = vmul.f32 %v140_v61, %v113_v3  ;;  %v86_v9 = vmul.f32 0.5, %v85_v5 }
 0x10b   :  { %v122_v10 = vmul.f32 %v140_v61, %v115_v6  ;;  %v107_v11 = vsub.f32 1.5, %v106_v7 }
 0x10c   :  { %v127_v12 = vadd.f32 %v141_v2, %v120_v8  ;;  %v87_v13 = vsub.f32 1.5, %v86_v9 }
 0x10d   :  { %v129_v14 = vadd.f32 %v141_v2, %v122_v10  ;;  %v108_v15 = vmul.f32 %v149_v56, %v107_v11 }
 0x10e   :  { %131 = vst.msk [vmem:[%s233_s3] sm:$0xff] %vm20_vm0, %v127_v12  ;;  %v88_v16 = vmul.f32 %v151_v58, %v87_v13 }
 0x10f   :  { %133 = vst.msk [vmem:[%s233_s3 + $0x10] sm:$0xff] %vm20_vm0, %v129_v14  ;;  %v112_v17 = vsel %vm111_vm12, %v149_v56, %v108_v15 }
 0x110   :  { %v116_v18 = vmul.f32 %v112_v17, %v195_v29  ;;  %v92_v19 = vsel %vm91_vm14, %v151_v58, %v88_v16 }
 0x111   :  { %v114_v20 = vmul.f32 %v92_v19, %v197_v30 }
 0x112   :  { %v123_v21 = vmul.f32 %v140_v61, %v116_v18 }
 0x113   :  { %v121_v22 = vmul.f32 %v140_v61, %v114_v20 }
 0x114   :  { %v130_v23 = vadd.f32 %v141_v2, %v123_v21 }
 0x115   :  { %v128_v24 = vadd.f32 %v141_v2, %v121_v22 }
 0x116   :  { %134 = vst.msk [vmem:[%s233_s3 + $0x18] sm:$0xf] %vm24_vm1, %v130_v23 }
 0x117   :  { %132 = vst.msk [vmem:[%s233_s3 + $0x8] sm:$0xf] %vm24_vm1, %v128_v24 }

// kernel: run.19
= control target key start
LH: loop header
LB: loop body
LE: loop exit
PB: predicated region body
PF: predicated region fallthrough
CT: control target
= control target key end

     0   :  { %vm43_vm0 = vcmask 261120   ;;  %vm74_vm1 = vcmask 392192   ;;  %s158_s1 = inlined_call_operand.vmem [shape: bf16[32,48], index: 1, kind: input, shape index: {}]   ;;  %s159_s0 = inlined_call_operand.vmem [shape: f32[24,32], index: 0, kind: input, shape index: {}]   ;;  %s160_s2 = inlined_call_operand.vmem [shape: f32[1,48], index: 2, kind: input, shape index: {}]   ;;  %s161_s3 = inlined_call_operand.vmem [shape: f32[24,48], index: 3, kind: input, shape index: {}]   ;;  %s162_s4 = inlined_call_operand.vmem [shape: f32[24,48], index: 4, kind: output, shape index: {}]  }
   0x1   :  { %v93_v0 = vld [vmem:[%s158_s1 + $0x8] sm:$0xff]  ;;  %v92_v1 = vld [vmem:[%s158_s1] sm:$0xff]  ;;  %v20_v4 = vld [vmem:[%s159_s0 + $0x10] sm:$0xff] }
   0x2   :  { %56 = vmatpush.bf16.msra.mxu0 %v93_v0  ;;  %94 = vmatpush.bf16.msra.mxu1 %v93_v0  ;;  %v18_v2 = vld [vmem:[%s159_s0] sm:$0xff]  ;;  %v19_v3 = vld [vmem:[%s159_s0 + $0x8] sm:$0xff]  ;;  %v22_v6 = vpack.c.bf16 %v20_v4, %v20_v4  ;;  %v70_v11 = vld [vmem:[%s161_s3 + $0x10] sm:$0xff] }
   0x3   :  { %v21_v5 = vpack.c.bf16 %v19_v3, %v18_v2  ;;  %v96_v7 = vld [vmem:[%s160_s2] ss:$0 sm:$0xff]  ;;  %v69_v17 = vld [vmem:[%s161_s3 + $0x8] sm:$0xff] }
   0x4   :  { %v68_v9 = vld [vmem:[%s161_s3] sm:$0xff] }
   0x6   :  { %57 = vmatpush.bf16.msra.mxu0 %v92_v1  ;;  %95 = vmatpush.bf16.msra.mxu1 %v92_v1 }
   0x9   :  { %90 = vmatmul.msk.bf16.vlgmr.msra.gmra.mxu0 %vm43_vm0, %v21_v5  ;;  %91 = vmatmul.msk.bf16.vlgmr.msra.gmra.mxu1 %vm43_vm0, %v22_v6 }
  0x86   :  { %v59_v8 = vpop.f32.mrf.mxu0  ;;  %v64_v10 = vpop.f32.mrf.mxu1 }
  0x87   :  { %v60_v12 = vadd.f32 %v96_v7, %v59_v8  ;;  %v65_v13 = vadd.f32 %v96_v7, %v64_v10 }
  0x89   :  { %v71_v14 = vadd.f32 %v68_v9, %v60_v12  ;;  %v73_v15 = vadd.f32 %v70_v11, %v65_v13 }
  0x8b   :  { %75 = vst.msk [vmem:[%s162_s4] sm:$0xff] %vm74_vm1, %v71_v14 }
  0x8c   :  { %77 = vst.msk [vmem:[%s162_s4 + $0x10] sm:$0xff] %vm74_vm1, %v73_v15 }
  0x8e   :  { %v61_v16 = vpop.f32.mrf.mxu0  ;;  %v66_v18 = vpop.f32.mrf.mxu1 }
  0x8f   :  { %v62_v19 = vadd.f32 %v96_v7, %v61_v16 }
  0x91   :  { %v72_v20 = vadd.f32 %v69_v17, %v62_v19 }
  0x93   :  { %76 = vst.msk [vmem:[%s162_s4 + $0x8] sm:$0xff] %vm74_vm1, %v72_v20 }

// kernel: run.14
= control target key start
LH: loop header
LB: loop body
LE: loop exit
PB: predicated region body
PF: predicated region fallthrough
CT: control target
= control target key end

     0   :  { %vm18_vm0 = vcmask 257024   ;;  %v95_v4 = vmov 32.0   ;;  %s140_s0 = inlined_call_operand.vmem [shape: f32[2,4,32], index: 0, kind: input, shape index: {}]   ;;  %s141_s1 = inlined_call_operand.vmem [shape: f32[1,32], index: 1, kind: input, shape index: {}]   ;;  %s142_s2 = inlined_call_operand.vmem [shape: f32[1,32], index: 2, kind: input, shape index: {}]   ;;  %s143_s3 = inlined_call_operand.vmem [shape: f32[2,4,32], index: 3, kind: output, shape index: {}]  }
   0x1   :  { %v14_v0 = vld [vmem:[%s140_s0] sm:$0xf]  ;;  %v15_v2 = vld [vmem:[%s140_s0 + $0x4] sm:$0xf]  ;;  %89 = vrcp.f32 %v95_v4 }
   0x2   :  { %v19_v1 = vsel %vm18_vm0, %v14_v0, 0.0  ;;  %v22_v3 = vsel %vm18_vm0, %v15_v2, 0.0  ;;  %v87_v35 = vld [vmem:[%s141_s1] ss:$0 sm:$0xff] }
   0x3   :  { %20 = vadd.xlane.f32.xlu0 %v19_v1  ;;  %v88_v38 = vld [vmem:[%s142_s2] ss:$0 sm:$0xff] }
   0x7   :  { %v90_v5 = vpop.eup %89 }
   0x8   :  { %v26_v6 = vmul.f32 32.0, %v90_v5  ;;  %vm30_vm1 = vweird.f32 %v90_v5 }
   0xa   :  { %v27_v7 = vsub.f32 1.0, %v26_v6 }
   0xb   :  { %23 = vadd.xlane.f32.xlu0 %v22_v3 }
   0xc   :  { %v28_v8 = vmul.f32 %v90_v5, %v27_v7 }
   0xe   :  { %v29_v9 = vadd.f32 %v90_v5, %v28_v8 }
  0x10   :  { %v31_v10 = vsel %vm30_vm1, %v90_v5, %v29_v9 }
  0x76   :  { %v21_v11 = vpop.xlane.xlu0 %20 }
  0x77   :  { %v32_v12 = vmul.f32 %v31_v10, %v21_v11 }
  0x79   :  { %v34_v13 = vsub.f32 %v14_v0, %v32_v12 }
  0x7b   :  { %v36_v14 = vmul.f32 %v34_v13, %v34_v13 }
  0x7d   :  { %v38_v15 = vsel %vm18_vm0, %v36_v14, 0.0 }
  0x7e   :  { %39 = vadd.xlane.f32.xlu1 %v38_v15  ;;  %v24_v16 = vpop.xlane.xlu0 %23 }
  0x7f   :  { %v33_v17 = vmul.f32 %v31_v10, %v24_v16 }
  0x81   :  { %v35_v18 = vsub.f32 %v15_v2, %v33_v17 }
  0x83   :  { %v37_v19 = vmul.f32 %v35_v18, %v35_v18 }
  0x85   :  { %v41_v20 = vsel %vm18_vm0, %v37_v19, 0.0 }
  0x86   :  { %42 = vadd.xlane.f32.xlu1 %v41_v20 }
  0xf1   :  { %v40_v21 = vpop.xlane.xlu1 %39 }
  0xf2   :  { %v44_v22 = vmul.f32 %v40_v21, %v31_v10 }
  0xf4   :  { %v46_v23 = vadd.f32 1e-05, %v44_v22 }
  0xf6   :  { %91 = vrsqrt.f32 %v46_v23  ;;  %vm54_vm3 = vweird.f32 %v46_v23 }
  0xf9   :  { %v43_v24 = vpop.xlane.xlu1 %42 }
  0xfa   :  { %v45_v25 = vmul.f32 %v43_v24, %v31_v10 }
  0xfc   :  { %v92_v26 = vpop.eup %91  ;;  %v47_v27 = vadd.f32 1e-05, %v45_v25 }
  0xfd   :  { %v49_v28 = vmul.f32 %v92_v26, %v46_v23  ;;  %vm55_vm2 = vweird.f32 %v92_v26 }
  0xfe   :  { %93 = vrsqrt.f32 %v47_v27  ;;  %vm56_vm4 = vmor %vm54_vm3, %vm55_vm2  ;;  %vm64_vm6 = vweird.f32 %v47_v27 }
  0xff   :  { %v50_v29 = vmul.f32 %v92_v26, %v49_v28 }
 0x101   :  { %v51_v30 = vmul.f32 0.5, %v50_v29 }
 0x103   :  { %v52_v31 = vsub.f32 1.5, %v51_v30 }
 0x104   :  { %v94_v32 = vpop.eup %93 }
 0x105   :  { %v53_v33 = vmul.f32 %v92_v26, %v52_v31  ;;  %v59_v34 = vmul.f32 %v94_v32, %v47_v27  ;;  %vm65_vm5 = vweird.f32 %v94_v32 }
 0x106   :  { %vm66_vm7 = vmor %vm64_vm6, %vm65_vm5 }
 0x107   :  { %v57_v36 = vsel %vm56_vm4, %v92_v26, %v53_v33  ;;  %v60_v37 = vmul.f32 %v94_v32, %v59_v34 }
 0x108   :  { %v68_v39 = vmul.f32 %v57_v36, %v34_v13 }
 0x109   :  { %v61_v40 = vmul.f32 0.5, %v60_v37 }
 0x10a   :  { %v73_v41 = vmul.f32 %v87_v35, %v68_v39 }
 0x10b   :  { %v62_v42 = vsub.f32 1.5, %v61_v40 }
 0x10c   :  { %v78_v43 = vadd.f32 %v88_v38, %v73_v41 }
 0x10d   :  { %v63_v44 = vmul.f32 %v94_v32, %v62_v42 }
 0x10e   :  { %80 = vst.msk [vmem:[%s143_s3] sm:$0xf] %vm18_vm0, %v78_v43 }
 0x10f   :  { %v67_v45 = vsel %vm66_vm7, %v94_v32, %v63_v44 }
 0x110   :  { %v69_v46 = vmul.f32 %v67_v45, %v35_v18 }
 0x112   :  { %v74_v47 = vmul.f32 %v87_v35, %v69_v46 }
 0x114   :  { %v79_v48 = vadd.f32 %v88_v38, %v74_v47 }
 0x116   :  { %81 = vst.msk [vmem:[%s143_s3 + $0x4] sm:$0xf] %vm18_vm0, %v79_v48 }

// kernel: run.17
= control target key start
LH: loop header
LB: loop body
LE: loop exit
PB: predicated region body
PF: predicated region fallthrough
CT: control target
= control target key end

     0   :  { %vm51_vm0 = vcmask 261120   ;;  %vm55_vm1 = vcmask 257024   ;;  %v1603_v8 = vmov 32.0   ;;  %s1606_s23 = smov 80   ;;  %s1607_s24 = smov 112   ;;  %vm323_vm15 = vcmask 64512   ;;  %s2087_s0 = inlined_call_operand.vmem [shape: f32[2,12,32], index: 0, kind: input, shape index: {}, may-alias: {0,13}]   ;;  %s2088_s2 = inlined_call_operand.vmem [shape: f32[1,32], index: 2, kind: input, shape index: {}]   ;;  %s2089_s3 = inlined_call_operand.vmem [shape: f32[1,32], index: 3, kind: input, shape index: {}]   ;;  %s2090_s4 = inlined_call_operand.vmem [shape: bf16[32,96], index: 4, kind: input, shape index: {}]   ;;  %s2091_s6 = inlined_call_operand.vmem [shape: f32[1,32], index: 6, kind: input, shape index: {}]   ;;  %s2092_s5 = inlined_call_operand.vmem [shape: bf16[32,32], index: 5, kind: input, shape index: {}]   ;;  %s2093_s1 = inlined_call_operand.vmem [shape: f32[2,1,32], index: 1, kind: input, shape index: {}]   ;;  %s2094_s7 = inlined_call_operand.vmem [shape: f32[1,32], index: 7, kind: input, shape index: {}]   ;;  %s2095_s8 = inlined_call_operand.vmem [shape: f32[1,32], index: 8, kind: input, shape index: {}]   ;;  %s2096_s10 = inlined_call_operand.vmem [shape: f32[1,64], index: 10, kind: input, shape index: {}]   ;;  %s2097_s9 = inlined_call_operand.vmem [shape: bf16[32,64], index: 9, kind: input, shape index: {}]   ;;  %s2098_s12 = inlined_call_operand.vmem [shape: f32[1,32], index: 12, kind: input, shape index: {}]   ;;  %s2099_s11 = inlined_call_operand.vmem [shape: bf16[64,32], index: 11, kind: input, shape index: {}]   ;;  %s2100_s13 = inlined_call_operand.vmem [shape: f32[2,12,32], index: 13, kind: output, shape index: {}, may-alias: {0,13}]  }
   0x1   :  { %v47_v0 = vld [vmem:[%s2087_s0 + $0x10] sm:$0xff]  ;;  %v45_v1 = vld [vmem:[%s2087_s0] sm:$0xff]  ;;  %v48_v4 = vld [vmem:[%s2087_s0 + $0x18] sm:$0xf]  ;;  %1511 = vrcp.f32 %v1603_v8  ;;  %s1608_s25 = smov 120   ;;  %s1609_s26 = smov 72  }
   0x2   :  { %v59_v2 = vsel %vm51_vm0, %v47_v0, 0.0  ;;  %v52_v3 = vsel %vm51_vm0, %v45_v1, 0.0  ;;  %v46_v5 = vld [vmem:[%s2087_s0 + $0x8] sm:$0xf]  ;;  %v62_v6 = vsel %vm55_vm1, %v48_v4, 0.0  ;;  %v1477_v49 = vld [vmem:[%s2090_s4] sm:$0xff] }
   0x3   :  { %60 = vadd.xlane.f32.xlu1 %v59_v2  ;;  %53 = vadd.xlane.f32.xlu0 %v52_v3  ;;  %v56_v7 = vsel %vm55_vm1, %v46_v5, 0.0  ;;  %v1478_v41 = vld [vmem:[%s2090_s4 + $0x8] sm:$0xff]  ;;  %v1502_v63 = vld [vmem:[%s2088_s2] ss:$0 sm:$0xff]  ;;  %s1604_s2 = smov 88   ;;  %s1610_s27 = smov 64  }
   0x4   :  { %215 = vmatpush.bf16.msra.mxu0 %v1478_v41  ;;  %s1611_s28 = smov 104   ;;  %s1612_s29 = smov 56  }
   0x5   :  { %s1613_s30 = smov 48   ;;  %s1614_s14 = smov 40  }
   0x6   :  { %s1615_s15 = smov 8   ;;  %s1616_s16 = smov 16  }
   0x7   :  { %v1512_v9 = vpop.eup %1511  ;;  %s1617_s17 = smov 24  }
   0x8   :  { %v66_v10 = vmul.f32 32.0, %v1512_v9  ;;  %vm70_vm2 = vweird.f32 %v1512_v9  ;;  %216 = vmatpush.bf16.msra.mxu0 %v1477_v49 }
   0xa   :  { %v67_v11 = vsub.f32 1.0, %v66_v10 }
   0xb   :  { %63 = vadd.xlane.f32.xlu1 %v62_v6  ;;  %57 = vadd.xlane.f32.xlu0 %v56_v7 }
   0xc   :  { %v68_v12 = vmul.f32 %v1512_v9, %v67_v11 }
   0xe   :  { %v69_v13 = vadd.f32 %v1512_v9, %v68_v12 }
  0x10   :  { %v1704_v14 = vsel %vm70_vm2, %v1512_v9, %v69_v13  ;;  %vm441_vm2 = vcmask 1045504  }
  0x76   :  { %v61_v15 = vpop.xlane.xlu1 %60  ;;  %v54_v16 = vpop.xlane.xlu0 %53 }
  0x77   :  { %v74_v17 = vmul.f32 %v1704_v14, %v61_v15  ;;  %v72_v18 = vmul.f32 %v1704_v14, %v54_v16 }
  0x79   :  { %v1708_v19 = vsub.f32 %v47_v0, %v74_v17  ;;  %v1710_v20 = vsub.f32 %v45_v1, %v72_v18 }
  0x7b   :  { %v82_v21 = vmul.f32 %v1708_v19, %v1708_v19  ;;  %v80_v22 = vmul.f32 %v1710_v20, %v1710_v20 }
  0x7d   :  { %v90_v23 = vsel %vm51_vm0, %v82_v21, 0.0  ;;  %v84_v24 = vsel %vm51_vm0, %v80_v22, 0.0 }
  0x7e   :  { %v64_v25 = vpop.xlane.xlu1 %63  ;;  %91 = vadd.xlane.f32.xlu0 %v90_v23  ;;  %85 = vadd.xlane.f32.xlu2 %v84_v24  ;;  %v58_v26 = vpop.xlane.xlu0 %57 }
  0x7f   :  { %v75_v27 = vmul.f32 %v1704_v14, %v64_v25  ;;  %v73_v28 = vmul.f32 %v1704_v14, %v58_v26 }
  0x81   :  { %v1720_v29 = vsub.f32 %v48_v4, %v75_v27  ;;  %v1722_v30 = vsub.f32 %v46_v5, %v73_v28  ;;  %v1503_v4 = vld [vmem:[%s2089_s3] ss:$0 sm:$0xff]  ;;  %s1605_s3 = smov 96  }
  0x83   :  { %v83_v31 = vmul.f32 %v1720_v29, %v1720_v29  ;;  %v81_v32 = vmul.f32 %v1722_v30, %v1722_v30 }
  0x85   :  { %v93_v33 = vsel %vm55_vm1, %v83_v31, 0.0  ;;  %v87_v34 = vsel %vm55_vm1, %v81_v32, 0.0 }
  0x86   :  { %94 = vadd.xlane.f32.xlu1 %v93_v33  ;;  %88 = vadd.xlane.f32.xlu2 %v87_v34 }
  0xf1   :  { %v86_v35 = vpop.xlane.xlu2 %85  ;;  %v92_v36 = vpop.xlane.xlu0 %91 }
  0xf2   :  { %v96_v37 = vmul.f32 %v86_v35, %v1704_v14  ;;  %v98_v38 = vmul.f32 %v92_v36, %v1704_v14 }
  0xf4   :  { %v100_v39 = vadd.f32 1e-05, %v96_v37  ;;  %v102_v40 = vadd.f32 1e-05, %v98_v38 }
  0xf6   :  { %1513 = vrsqrt.f32 %v100_v39  ;;  %vm130_vm4 = vweird.f32 %v102_v40  ;;  %vm110_vm6 = vweird.f32 %v100_v39 }
  0xf7   :  { %1515 = vrsqrt.f32 %v102_v40 }
  0xf9   :  { %v95_v42 = vpop.xlane.xlu1 %94  ;;  %v89_v43 = vpop.xlane.xlu2 %88 }
  0xfa   :  { %v99_v44 = vmul.f32 %v95_v42, %v1704_v14  ;;  %v97_v45 = vmul.f32 %v89_v43, %v1704_v14 }
  0xfc   :  { %v1514_v46 = vpop.eup %1513  ;;  %v103_v47 = vadd.f32 1e-05, %v99_v44  ;;  %v101_v48 = vadd.f32 1e-05, %v97_v45 }
  0xfd   :  { %v1516_v50 = vpop.eup %1515  ;;  %v105_v51 = vmul.f32 %v1514_v46, %v100_v39  ;;  %vm111_vm3 = vweird.f32 %v1514_v46 }
  0xfe   :  { %v125_v52 = vmul.f32 %v1516_v50, %v102_v40  ;;  %1517 = vrsqrt.f32 %v103_v47  ;;  %vm131_vm5 = vweird.f32 %v1516_v50  ;;  %vm112_vm7 = vmor %vm110_vm6, %vm111_vm3  ;;  %vm140_vm9 = vweird.f32 %v103_v47 }
  0xff   :  { %v106_v53 = vmul.f32 %v1514_v46, %v105_v51  ;;  %1519 = vrsqrt.f32 %v101_v48  ;;  %vm132_vm8 = vmor %vm130_vm4, %vm131_vm5  ;;  %vm120_vm13 = vweird.f32 %v101_v48  ;;  %vm376_vm3 = vcmask 97280  }
 0x100   :  { %v126_v54 = vmul.f32 %v1516_v50, %v125_v52  ;;  %vm380_vm4 = vcmask 93184   ;;  %vm993_vm5 = vcmask 130048   ;;  %vm998_vm6 = vcmask 195584  }
 0x101   :  { %v107_v55 = vmul.f32 0.5, %v106_v53 }
 0x102   :  { %v127_v56 = vmul.f32 0.5, %v126_v54 }
 0x103   :  { %v108_v57 = vsub.f32 1.5, %v107_v55 }
 0x104   :  { %v1518_v58 = vpop.eup %1517  ;;  %v128_v59 = vsub.f32 1.5, %v127_v56 }
 0x105   :  { %v1520_v60 = vpop.eup %1519  ;;  %v109_v61 = vmul.f32 %v1514_v46, %v108_v57  ;;  %v135_v62 = vmul.f32 %v1518_v58, %v103_v47  ;;  %vm141_vm10 = vweird.f32 %v1518_v58 }
 0x106   :  { %v129_v0 = vmul.f32 %v1516_v50, %v128_v59  ;;  %v115_v1 = vmul.f32 %v1520_v60, %v101_v48  ;;  %vm142_vm11 = vmor %vm140_vm9, %vm141_vm10  ;;  %vm121_vm12 = vweird.f32 %v1520_v60 }
 0x107   :  { %v113_v2 = vsel %vm112_vm7, %v1514_v46, %v109_v61  ;;  %v136_v3 = vmul.f32 %v1518_v58, %v135_v62  ;;  %vm122_vm14 = vmor %vm120_vm13, %vm121_vm12 }
 0x108   :  { %v144_v5 = vmul.f32 %v113_v2, %v1710_v20  ;;  %v133_v6 = vsel %vm132_vm8, %v1516_v50, %v129_v0  ;;  %v116_v7 = vmul.f32 %v1520_v60, %v115_v1 }
 0x109   :  { %v146_v8 = vmul.f32 %v133_v6, %v1708_v19  ;;  %v137_v9 = vmul.f32 0.5, %v136_v3 }
 0x10a   :  { %v151_v10 = vmul.f32 %v1502_v63, %v144_v5  ;;  %v117_v11 = vmul.f32 0.5, %v116_v7 }
 0x10b   :  { %v153_v12 = vmul.f32 %v1502_v63, %v146_v8  ;;  %v138_v13 = vsub.f32 1.5, %v137_v9 }
 0x10c   :  { %v158_v15 = vadd.f32 %v1503_v4, %v151_v10  ;;  %v118_v16 = vsub.f32 1.5, %v117_v11 }
 0x10d   :  { %v160_v17 = vadd.f32 %v1503_v4, %v153_v12  ;;  %v139_v18 = vmul.f32 %v1518_v58, %v138_v13 }
 0x10e   :  { %v166_v21 = vrot.slane %v158_v15, 4  ;;  %168 = vst [vmem:[#allocation1] ss:$2 sm:$0xff] %v158_v15  ;;  %v119_v20 = vmul.f32 %v1520_v60, %v118_v16 }
 0x10f   :  { %v167_v22 = vrot.slane %v160_v17, 4  ;;  %174 = vst [vmem:[#allocation1 + $0x11] ss:$2 sm:$0xff] %v160_v17  ;;  %v143_v19 = vsel %vm142_vm11, %v1518_v58, %v139_v18 }
 0x110   :  { %170 = vst [vmem:[#allocation1 + $0x1] ss:$2 sm:$0xff] %v166_v21  ;;  %v147_v23 = vmul.f32 %v143_v19, %v1720_v29  ;;  %v123_v24 = vsel %vm122_vm14, %v1520_v60, %v119_v20 }
 0x111   :  { %176 = vst [vmem:[#allocation1 + $0x20] ss:$2 sm:$0xff] %v167_v22  ;;  %v145_v25 = vmul.f32 %v123_v24, %v1722_v30 }
 0x112   :  { %v154_v26 = vmul.f32 %v1502_v63, %v147_v23 }
 0x113   :  { %v152_v27 = vmul.f32 %v1502_v63, %v145_v25 }
 0x114   :  { %v161_v28 = vadd.f32 %v1503_v4, %v154_v26 }
 0x115   :  { %v159_v31 = vadd.f32 %v1503_v4, %v152_v27 }
 0x116   :  { %178 = vst [vmem:[#allocation1 + $0x21] ss:$2 sm:$0xff] %v161_v28 }
 0x117   :  { %172 = vst [vmem:[#allocation1 + $0x10] ss:$2 sm:$0xff] %v159_v31  ;;  %v179_v32 = vld.sshfl [vmem:[#allocation1] sm:$0xff pattern:$0x75316420] }
 0x11d   :  { %v181_v35 = vld.sshfl [vmem:[#allocation1 + $0x20] sm:$0xff pattern:$0x75316420] }
 0x11e   :  { %v180_v33 = vld.sshfl [vmem:[#allocation1 + $0x10] sm:$0xff pattern:$0x75316420]  ;;  %v186_v36 = vpack.c.bf16 %v181_v35, %v181_v35 }
 0x11f   :  { %v185_v34 = vpack.c.bf16 %v180_v33, %v179_v32 }
 0x121   :  { %1421 = vmatmul.msk.bf16.vlgmr.msra.gmra.mxu0 %vm51_vm0, %v185_v34 }
 0x131   :  { %1422 = vmatmul.msk.bf16.gmra.mxu0 %vm51_vm0, %v186_v36 }
 0x19e   :  { %v218_v29 = vpop.f32.mrf.mxu0 }
 0x19f   :  { %v227_v37 = vmul.f32 0.35355338, %v218_v29  ;;  %v262_v42 = vrot.slane %v218_v29, 4 }
 0x1a1   :  { %v233_v38 = vrot.slane %v227_v37, 4  ;;  %236 = vst [vmem:[#allocation1] ss:$2 sm:$0xff] %v227_v37 }
 0x1a3   :  { %238 = vst [vmem:[#allocation1 + $0x1] ss:$2 sm:$0xff] %v233_v38 }
 0x1a6   :  { %v220_v30 = vpop.f32.mrf.mxu0 }
 0x1a7   :  { %v228_v39 = vmul.f32 0.35355338, %v220_v30  ;;  %v263_v50 = vrot.slane %v220_v30, 4 }
 0x1a9   :  { %v234_v40 = vrot.slane %v228_v39, 4  ;;  %240 = vst [vmem:[#allocation1 + $0x10] ss:$2 sm:$0xff] %v228_v39 }
 0x1aa   :  { %v241_v41 = vld.sshfl [vmem:[#allocation1] sm:$0xff pattern:$0x75316420] }
 0x1ab   :  { %265 = vst [vmem:[#allocation1] ss:$2 sm:$0xff] %v218_v29  ;;  %v255_v6 = vpack.c.bf16 %v241_v41, %v241_v41 }
 0x1ac   :  { %267 = vst [vmem:[#allocation1 + $0x1] ss:$2 sm:$0xff] %v262_v42 }
 0x1ad   :  { %244 = vst [vmem:[#allocation1 + $0x20] ss:$2 sm:$0xff] %v234_v40  ;;  %v313_v10 = vunpack.c.l.b16 %v255_v6 }
 0x1ae   :  { %v223_v43 = vpop.f32.mrf.mxu0 }
 0x1af   :  { %v229_v44 = vmul.f32 0.35355338, %v223_v43  ;;  %v264_v55 = vrot.slane %v223_v43, 4 }
 0x1b0   :  { %v242_v45 = vld.sshfl [vmem:[#allocation1 + $0x10] sm:$0xff pattern:$0x75316420] }
 0x1b1   :  { %269 = vst [vmem:[#allocation1 + $0x10] ss:$2 sm:$0xff] %v220_v30  ;;  %v235_v46 = vrot.slane %v229_v44, 4  ;;  %v256_v4 = vpack.c.bf16 %v242_v45, %v242_v45 }
 0x1b2   :  { %246 = vst [vmem:[#allocation1 + $0x21] ss:$2 sm:$0xff] %v229_v44 }
 0x1b3   :  { %v270_v47 = vld.sshfl [vmem:[#allocation1] sm:$0xff pattern:$0x75316420]  ;;  %248 = vst [vmem:[#allocation1 + $0x30] ss:$2 sm:$0xff] %v235_v46  ;;  %v314_v8 = vunpack.c.l.b16 %v256_v4 }
 0x1b4   :  { %288 = vst [vmem:[#allocation1] ss:$2 sm:$0xff] %v218_v29  ;;  %v284_v49 = vpack.c.bf16 %v270_v47, %v270_v47 }
 0x1b5   :  { %290 = vst [vmem:[#allocation1 + $0x1] ss:$2 sm:$0xff] %v262_v42  ;;  %v315_v11 = vpack.c.b16 %v314_v8, %v313_v10 }
 0x1b6   :  { %v225_v48 = vpop.f32.mrf.mxu0  ;;  %v318_v56 = vunpack.c.l.b16 %v284_v49 }
 0x1b8   :  { %v271_v51 = vld.sshfl [vmem:[#allocation1 + $0x10] sm:$0xff pattern:$0x75316420] }
 0x1b9   :  { %292 = vst [vmem:[#allocation1 + $0x10] ss:$2 sm:$0xff] %v220_v30  ;;  %v249_v52 = vld.sshfl [vmem:[#allocation1 + $0x20] sm:$0xff pattern:$0x75316420]  ;;  %v285_v53 = vpack.c.bf16 %v271_v51, %v271_v51 }
 0x1ba   :  { %v250_v54 = vld.sshfl [vmem:[#allocation1 + $0x30] sm:$0xff pattern:$0x75316420]  ;;  %273 = vst [vmem:[#allocation1 + $0x20] ss:$2 sm:$0xff] %v263_v50  ;;  %v257_v2 = vpack.c.bf16 %v249_v52, %v249_v52 }
 0x1bb   :  { %275 = vst [vmem:[#allocation1 + $0x21] ss:$2 sm:$0xff] %v223_v43  ;;  %v319_v57 = vunpack.c.l.b16 %v285_v53  ;;  %v258_v63 = vpack.c.bf16 %v250_v54, %v250_v54 }
 0x1bc   :  { %277 = vst [vmem:[#allocation1 + $0x30] ss:$2 sm:$0xff] %v264_v55  ;;  %v346_v7 = vunpack.c.l.b16 %v257_v2  ;;  %v293_v13 = vld.sshfl [vmem:[#allocation1] sm:$0xff pattern:$0x75316420] }
 0x1bd   :  { %v320_v58 = vpack.c.b16 %v319_v57, %v318_v56  ;;  %v347_v5 = vunpack.c.l.b16 %v258_v63  ;;  %v307_v16 = vpack.c.bf16 %v293_v13, %v293_v13 }
 0x1bf   :  { %493 = vrot.lane.b32.xlu1 %v320_v58, %s1604_s2  ;;  %321 = vrot.lane.b32.xlu0 %v320_v58, %s1605_s3  ;;  %v348_v9 = vpack.c.b16 %v347_v5, %v346_v7  ;;  %v433_v18 = vunpack.c.l.b16 %v307_v16 }
 0x1c0   :  { %v294_v12 = vld.sshfl [vmem:[#allocation1 + $0x10] sm:$0xff pattern:$0x75316420] }
 0x1c1   :  { %v308_v15 = vpack.c.bf16 %v294_v12, %v294_v12 }
 0x1c2   :  { %v278_v59 = vld.sshfl [vmem:[#allocation1 + $0x20] sm:$0xff pattern:$0x75316420] }
 0x1c3   :  { %v279_v60 = vld.sshfl [vmem:[#allocation1 + $0x30] sm:$0xff pattern:$0x75316420]  ;;  %298 = vst [vmem:[#allocation1 + $0x21] ss:$2 sm:$0xff] %v223_v43  ;;  %v286_v61 = vpack.c.bf16 %v278_v59, %v278_v59  ;;  %v434_v17 = vunpack.c.l.b16 %v308_v15 }
 0x1c4   :  { %300 = vst [vmem:[#allocation1 + $0x30] ss:$2 sm:$0xff] %v264_v55  ;;  %v287_v62 = vpack.c.bf16 %v279_v60, %v279_v60 }
 0x1c5   :  { %296 = vst [vmem:[#allocation1 + $0x20] ss:$2 sm:$0xff] %v263_v50  ;;  %v351_v0 = vunpack.c.l.b16 %v286_v61  ;;  %v1753_v21 = vpack.c.b16 %v434_v17, %v433_v18 }
 0x1c6   :  { %v352_v1 = vunpack.c.l.b16 %v287_v62 }
 0x1c7   :  { %643 = vrot.lane.b32.xlu1 %v320_v58, %s1606_s23 }
 0x1c8   :  { %v353_v3 = vpack.c.b16 %v352_v1, %v351_v0 }
 0x1ca   :  { %517 = vrot.lane.b32.xlu0 %v353_v3, %s1604_s2  ;;  %354 = vrot.lane.b32.xlu2 %v353_v3, %s1605_s3 }
 0x1cb   :  { %v302_v20 = vld.sshfl [vmem:[#allocation1 + $0x30] sm:$0xff pattern:$0x75316420] }
 0x1cc   :  { %v301_v22 = vld.sshfl [vmem:[#allocation1 + $0x20] sm:$0xff pattern:$0x75316420]  ;;  %v310_v19 = vpack.c.bf16 %v302_v20, %v302_v20 }
 0x1cd   :  { %v309_v23 = vpack.c.bf16 %v301_v22, %v301_v22 }
 0x1ce   :  { %v467_v24 = vunpack.c.l.b16 %v310_v19 }
 0x1cf   :  { %665 = vrot.lane.b32.xlu1 %v348_v9, %s1607_s24  ;;  %v466_v25 = vunpack.c.l.b16 %v309_v23 }
 0x1d1   :  { %v1759_v26 = vpack.c.b16 %v467_v24, %v466_v25 }
 0x1d2   :  { %641 = vrot.lane.b32.xlu0 %v315_v11, %s1607_s24  ;;  %491 = vrot.lane.b32.xlu2 %v315_v11, %s1608_s25 }
 0x1d7   :  { %817 = vrot.lane.b32.xlu1 %v353_v3, %s1609_s26 }
 0x1da   :  { %793 = vrot.lane.b32.xlu0 %v320_v58, %s1609_s26  ;;  %515 = vrot.lane.b32.xlu2 %v348_v9, %s1608_s25 }
 0x1df   :  { %436 = vrot.lane.b32.xlu1 %v1753_v21, %s1610_s27 }
 0x1e2   :  { %815 = vrot.lane.b32.xlu0 %v348_v9, %s1611_s28  ;;  %667 = vrot.lane.b32.xlu2 %v353_v3, %s1606_s23 }
 0x1ea   :  { %592 = vrot.lane.b32.xlu0 %v1753_v21, %s1612_s29  ;;  %791 = vrot.lane.b32.xlu2 %v315_v11, %s1611_s28 }
 0x1f2   :  { %469 = vrot.lane.b32.xlu2 %v1759_v26, %s1610_s27 }
 0x224   :  { %v355_v27 = vpop.permute.xlu2 %354 }
 0x225   :  { %v360_v28 = vsel %vm323_vm15, %v355_v27, 0 }
 0x226   :  { %369 = vmatpush.bf16.xpose.msra.mxu2 %v360_v28 }
 0x22c   :  { %v492_v31 = vpop.permute.xlu2 %491 }
 0x22d   :  { %1424 = vmatmul.msk.bf16.vlgmr.msra.gmra.mxu2 %vm323_vm15, %v348_v9 }
 0x231   :  { %v494_v32 = vpop.permute.xlu1 %493  ;;  %v322_v33 = vpop.permute.xlu0 %321 }
 0x232   :  { %v328_v34 = vsel %vm323_vm15, %v322_v33, 0  ;;  %v499_v35 = vsel %vm323_vm15, %v494_v32, 0 }
 0x233   :  { %337 = vmatpush.bf16.xpose.msra.mxu1 %v328_v34 }
 0x234   :  { %v516_v36 = vpop.permute.xlu2 %515 }
 0x239   :  { %v644_v29 = vpop.permute.xlu1 %643 }
 0x23a   :  { %v649_v37 = vsel %vm323_vm15, %v644_v29, 0  ;;  %1423 = vmatmul.msk.bf16.vlgmr.msra.gmra.mxu1 %vm323_vm15, %v315_v11 }
 0x23b   :  { %508 = vmatpush.bf16.xpose.msrb.mxu1 %v499_v35 }
 0x23c   :  { %v518_v38 = vpop.permute.xlu0 %517  ;;  %v668_v30 = vpop.permute.xlu2 %667 }
 0x23d   :  { %v673_v39 = vsel %vm323_vm15, %v668_v30, 0  ;;  %v523_v40 = vsel %vm323_vm15, %v518_v38, 0 }
 0x23e   :  { %532 = vmatpush.bf16.xpose.msrb.mxu2 %v523_v40 }
 0x241   :  { %v666_v41 = vpop.permute.xlu1 %665 }
 0x243   :  { %658 = vmatpush.bf16.xpose.msra.mxu1 %v649_v37 }
 0x244   :  { %v642_v42 = vpop.permute.xlu0 %641  ;;  %v792_v43 = vpop.permute.xlu2 %791 }
 0x245   :  { %1428 = vmatmul.msk.bf16.vlgmr.msrb.gmra.mxu2 %vm323_vm15, %v516_v36 }
 0x246   :  { %682 = vmatpush.bf16.xpose.msra.mxu2 %v673_v39 }
 0x249   :  { %v818_v44 = vpop.permute.xlu1 %817 }
 0x24a   :  { %v823_v45 = vsel %vm323_vm15, %v818_v44, 0  ;;  %1427 = vmatmul.msk.bf16.vlgmr.msrb.gmra.mxu1 %vm323_vm15, %v492_v31 }
 0x24c   :  { %v794_v46 = vpop.permute.xlu0 %793  ;;  %v470_v47 = vpop.permute.xlu2 %469 }
 0x24d   :  { %v799_v48 = vsel %vm323_vm15, %v794_v46, 0  ;;  %v475_v49 = vsel %vm441_vm2, %v470_v47, 0 }
 0x24e   :  { %832 = vmatpush.bf16.xpose.msrb.mxu2 %v823_v45  ;;  %484 = vmatpush.bf16.msra.mxu3 %v475_v49 }
 0x24f   :  { %808 = vmatpush.bf16.xpose.msrb.mxu1 %v799_v48 }
 0x251   :  { %v437_v50 = vpop.permute.xlu1 %436 }
 0x252   :  { %v443_v51 = vsel %vm441_vm2, %v437_v50, 0 }
 0x253   :  { %452 = vmatpush.bf16.msrb.mxu0 %v443_v51 }
 0x254   :  { %v816_v52 = vpop.permute.xlu0 %815 }
 0x255   :  { %1432 = vmatmul.msk.bf16.vlgmr.msra.gmra.mxu2 %vm323_vm15, %v666_v41 }
 0x25a   :  { %1431 = vmatmul.msk.bf16.vlgmr.msra.gmra.mxu1 %vm323_vm15, %v642_v42 }
 0x25c   :  { %v593_v53 = vpop.permute.xlu0 %592 }
 0x25d   :  { %v598_v54 = vsel %vm441_vm2, %v593_v53, 0 }
 0x25e   :  { %607 = vmatpush.bf16.msrb.mxu3 %v598_v54 }
 0x265   :  { %1436 = vmatmul.msk.bf16.vlgmr.msrb.gmra.mxu2 %vm323_vm15, %v816_v52 }
 0x26a   :  { %1435 = vmatmul.msk.bf16.vlgmr.msrb.gmra.mxu1 %vm323_vm15, %v792_v43 }
 0x2b0   :  { %v1781_v55 = vpop.f32.mrf.mxu2 }
 0x2b1   :  { %v384_v0 = vsel %vm376_vm3, %v1781_v55, -inf }
 0x2b7   :  { %v339_v56 = vpop.f32.mrf.mxu1 }
 0x2b8   :  { %v377_v57 = vsel %vm376_vm3, %v339_v56, -inf  ;;  %v1784_v59 = vpop.f32.mrf.mxu2 }
 0x2b9   :  { %378 = vmax.xlane.f32.xlu0 %v377_v57  ;;  %v387_v5 = vsel %vm380_vm4, %v1784_v59, -inf }
 0x2bf   :  { %v341_v58 = vpop.f32.mrf.mxu1 }
 0x2c0   :  { %v381_v60 = vsel %vm380_vm4, %v341_v58, -inf }
 0x2c1   :  { %382 = vmax.xlane.f32.xlu2 %v381_v60 }
 0x2c7   :  { %v510_v61 = vpop.f32.mrf.mxu1 }
 0x2c8   :  { %v1787_v62 = vpop.f32.mrf.mxu2  ;;  %v539_v63 = vsel %vm376_vm3, %v510_v61, -inf }
 0x2c9   :  { %540 = vmax.xlane.f32.xlu1 %v539_v63  ;;  %385 = vmax.xlane.f32.xlu2 %v384_v0  ;;  %v545_v4 = vsel %vm376_vm3, %v1787_v62, -inf }
 0x2cf   :  { %v1792_v1 = vpop.f32.mrf.mxu1 }
 0x2d0   :  { %v1794_v2 = vpop.f32.mrf.mxu2  ;;  %v542_v3 = vsel %vm380_vm4, %v1792_v1, -inf }
 0x2d1   :  { %543 = vmax.xlane.f32.xlu0 %v542_v3  ;;  %546 = vmax.xlane.f32.xlu2 %v545_v4  ;;  %v548_v9 = vsel %vm380_vm4, %v1794_v2, -inf }
 0x2d2   :  { %388 = vmax.xlane.f32.xlu1 %v387_v5 }
 0x2d7   :  { %v660_v6 = vpop.f32.mrf.mxu1 }
 0x2d8   :  { %v1802_v7 = vpop.f32.mrf.mxu2  ;;  %v689_v8 = vsel %vm376_vm3, %v660_v6, -inf }
 0x2d9   :  { %690 = vmax.xlane.f32.xlu0 %v689_v8  ;;  %v695_v15 = vsel %vm376_vm3, %v1802_v7, -inf }
 0x2da   :  { %549 = vmax.xlane.f32.xlu1 %v548_v9 }
 0x2df   :  { %v1807_v10 = vpop.f32.mrf.mxu1 }
 0x2e0   :  { %v1809_v11 = vpop.f32.mrf.mxu2  ;;  %v692_v12 = vsel %vm380_vm4, %v1807_v10, -inf }
 0x2e1   :  { %693 = vmax.xlane.f32.xlu2 %v692_v12  ;;  %v698_v13 = vsel %vm380_vm4, %v1809_v11, -inf }
 0x2e2   :  { %699 = vmax.xlane.f32.xlu0 %v698_v13  ;;  %696 = vmax.xlane.f32.xlu1 %v695_v15 }
 0x2e7   :  { %v1817_v16 = vpop.f32.mrf.mxu1 }
 0x2e8   :  { %v1819_v17 = vpop.f32.mrf.mxu2  ;;  %v839_v18 = vsel %vm376_vm3, %v1817_v16, -inf }
 0x2e9   :  { %840 = vmax.xlane.f32.xlu2 %v839_v18  ;;  %v845_v24 = vsel %vm376_vm3, %v1819_v17, -inf }
 0x2ef   :  { %v1823_v20 = vpop.f32.mrf.mxu1 }
 0x2f0   :  { %v1825_v22 = vpop.f32.mrf.mxu2  ;;  %v842_v19 = vsel %vm380_vm4, %v1823_v20, -inf }
 0x2f1   :  { %v848_v23 = vsel %vm380_vm4, %v1825_v22, -inf  ;;  %843 = vmax.xlane.f32.xlu1 %v842_v19 }
 0x2f2   :  { %849 = vmax.xlane.f32.xlu0 %v848_v23 }
 0x2f9   :  { %846 = vmax.xlane.f32.xlu1 %v845_v24 }
 0x32c   :  { %v379_v25 = vpop.xlane.xlu0 %378 }
 0x32d   :  { %v390_v27 = vsub.f32 %v339_v56, %v379_v25 }
 0x32f   :  { %v394_v28 = vmul.f32 1.442695, %v390_v27 }
 0x331   :  { %1521 = vpow2.f32 %v394_v28 }
 0x334   :  { %v383_v31 = vpop.xlane.xlu2 %382 }
 0x335   :  { %v391_v32 = vsub.f32 %v341_v58, %v383_v31 }
 0x337   :  { %v1833_v33 = vpop.eup %1521  ;;  %v396_v34 = vmul.f32 1.442695, %v391_v32 }
 0x338   :  { %v402_v35 = vsel %vm376_vm3, %v1833_v33, 0.0 }
 0x339   :  { %1523 = vpow2.f32 %v396_v34  ;;  %403 = vadd.xlane.f32.xlu1 %v402_v35 }
 0x33c   :  { %v541_v36 = vpop.xlane.xlu1 %540  ;;  %v386_v29 = vpop.xlane.xlu2 %385 }
 0x33d   :  { %v551_v37 = vsub.f32 %v510_v61, %v541_v36  ;;  %v392_v38 = vsub.f32 %v1781_v55, %v386_v29 }
 0x33f   :  { %v1838_v30 = vpop.eup %1523  ;;  %v555_v39 = vmul.f32 1.442695, %v551_v37  ;;  %v398_v40 = vmul.f32 1.442695, %v392_v38 }
 0x340   :  { %v405_v41 = vsel %vm380_vm4, %v1838_v30, 0.0 }
 0x341   :  { %1525 = vpow2.f32 %v555_v39  ;;  %406 = vadd.xlane.f32.xlu0 %v405_v41 }
 0x342   :  { %1527 = vpow2.f32 %v398_v40 }
 0x344   :  { %v544_v42 = vpop.xlane.xlu0 %543  ;;  %v547_v18 = vpop.xlane.xlu2 %546 }
 0x345   :  { %v389_v43 = vpop.xlane.xlu1 %388  ;;  %v552_v13 = vsub.f32 %v1792_v1, %v544_v42  ;;  %v553_v19 = vsub.f32 %v1787_v62, %v547_v18 }
 0x346   :  { %v393_v44 = vsub.f32 %v1784_v59, %v389_v43 }
 0x347   :  { %v1843_v45 = vpop.eup %1525  ;;  %v557_v15 = vmul.f32 1.442695, %v552_v13  ;;  %v559_v27 = vmul.f32 1.442695, %v553_v19 }
 0x348   :  { %v1845_v46 = vpop.eup %1527  ;;  %v400_v47 = vmul.f32 1.442695, %v393_v44  ;;  %v563_v48 = vsel %vm376_vm3, %v1843_v45, 0.0 }
 0x349   :  { %v408_v49 = vsel %vm376_vm3, %v1845_v46, 0.0  ;;  %564 = vadd.xlane.f32.xlu1 %v563_v48 }
 0x34a   :  { %409 = vadd.xlane.f32.xlu0 %v408_v49  ;;  %1529 = vpow2.f32 %v400_v47 }
 0x34c   :  { %v691_v50 = vpop.xlane.xlu0 %690 }
 0x34d   :  { %v701_v51 = vsub.f32 %v660_v6, %v691_v50  ;;  %v550_v52 = vpop.xlane.xlu1 %549 }
 0x34f   :  { %v705_v53 = vmul.f32 1.442695, %v701_v51 }
 0x350   :  { %v1851_v54 = vpop.eup %1529 }
 0x351   :  { %1531 = vpow2.f32 %v705_v53  ;;  %v411_v55 = vsel %vm380_vm4, %v1851_v54, 0.0 }
 0x352   :  { %412 = vadd.xlane.f32.xlu2 %v411_v55 }
 0x354   :  { %v694_v25 = vpop.xlane.xlu2 %693 }
 0x355   :  { %v697_v56 = vpop.xlane.xlu1 %696  ;;  %v700_v57 = vpop.xlane.xlu0 %699  ;;  %v702_v1 = vsub.f32 %v1807_v10, %v694_v25 }
 0x356   :  { %v703_v58 = vsub.f32 %v1802_v7, %v697_v56  ;;  %v704_v63 = vsub.f32 %v1809_v11, %v700_v57 }
 0x357   :  { %v1856_v59 = vpop.eup %1531  ;;  %v707_v62 = vmul.f32 1.442695, %v702_v1 }
 0x358   :  { %v709_v60 = vmul.f32 1.442695, %v703_v58  ;;  %v713_v61 = vsel %vm376_vm3, %v1856_v59, 0.0  ;;  %v711_v0 = vmul.f32 1.442695, %v704_v63 }
 0x359   :  { %714 = vadd.xlane.f32.xlu1 %v713_v61 }
 0x35a   :  { %1533 = vpow2.f32 %v709_v60 }
 0x35b   :  { %1535 = vpow2.f32 %v711_v0 }
 0x35e   :  { %742 = vrot.lane.b32.xlu0 %v1753_v21, %s1613_s30 }
 0x360   :  { %v1863_v3 = vpop.eup %1533 }
 0x361   :  { %v719_v4 = vsel %vm376_vm3, %v1863_v3, 0.0  ;;  %v1868_v7 = vpop.eup %1535 }
 0x362   :  { %720 = vadd.xlane.f32.xlu1 %v719_v4  ;;  %v722_v9 = vsel %vm380_vm4, %v1868_v7, 0.0 }
 0x364   :  { %v844_v5 = vpop.xlane.xlu1 %843 }
 0x365   :  { %v852_v6 = vsub.f32 %v1823_v20, %v844_v5  ;;  %v554_v20 = vsub.f32 %v1794_v2, %v550_v52  ;;  %v841_v2 = vpop.xlane.xlu2 %840  ;;  %v850_v38 = vpop.xlane.xlu0 %849 }
 0x366   :  { %v851_v35 = vsub.f32 %v1817_v16, %v841_v2  ;;  %v854_v16 = vsub.f32 %v1825_v22, %v850_v38 }
 0x367   :  { %v857_v8 = vmul.f32 1.442695, %v852_v6  ;;  %v561_v23 = vmul.f32 1.442695, %v554_v20 }
 0x368   :  { %v855_v36 = vmul.f32 1.442695, %v851_v35  ;;  %v861_v41 = vmul.f32 1.442695, %v854_v16 }
 0x369   :  { %1537 = vpow2.f32 %v857_v8 }
 0x36a   :  { %619 = vrot.lane.b32.xlu2 %v1759_v26, %s1612_s29  ;;  %723 = vadd.xlane.f32.xlu1 %v722_v9  ;;  %1539 = vpow2.f32 %v557_v15 }
 0x36b   :  { %1541 = vpow2.f32 %v561_v23 }
 0x36c   :  { %1543 = vpow2.f32 %v559_v27  ;;  %v847_v40 = vpop.xlane.xlu1 %846 }
 0x36d   :  { %1545 = vpow2.f32 %v707_v62  ;;  %v853_v50 = vsub.f32 %v1819_v17, %v847_v40 }
 0x36e   :  { %1547 = vpow2.f32 %v855_v36 }
 0x36f   :  { %v1874_v11 = vpop.eup %1537  ;;  %1549 = vpow2.f32 %v861_v41  ;;  %v859_v56 = vmul.f32 1.442695, %v853_v50 }
 0x370   :  { %v866_v12 = vsel %vm380_vm4, %v1874_v11, 0.0  ;;  %v1881_v24 = vpop.eup %1539 }
 0x371   :  { %v566_v28 = vsel %vm380_vm4, %v1881_v24, 0.0  ;;  %v1886_v31 = vpop.eup %1541 }
 0x372   :  { %867 = vadd.xlane.f32.xlu1 %v866_v12  ;;  %v572_v32 = vsel %vm380_vm4, %v1886_v31, 0.0  ;;  %v1892_v34 = vpop.eup %1543 }
 0x373   :  { %v569_v10 = vsel %vm376_vm3, %v1892_v34, 0.0  ;;  %v1897_v29 = vpop.eup %1545 }
 0x374   :  { %v1901_v37 = vpop.eup %1547 }
 0x375   :  { %v863_v39 = vsel %vm376_vm3, %v1901_v37, 0.0  ;;  %v1908_v43 = vpop.eup %1549 }
 0x376   :  { %v872_v48 = vsel %vm380_vm4, %v1908_v43, 0.0 }
 0x388   :  { %567 = vadd.xlane.f32.xlu0 %v566_v28 }
 0x38b   :  { %892 = vrot.lane.b32.xlu1 %v1753_v21, %s1614_s14  ;;  %v716_v21 = vsel %vm380_vm4, %v1897_v29, 0.0 }
 0x390   :  { %573 = vadd.xlane.f32.xlu0 %v572_v32 }
 0x393   :  { %570 = vadd.xlane.f32.xlu2 %v569_v10 }
 0x39b   :  { %717 = vadd.xlane.f32.xlu2 %v716_v21 }
 0x3a3   :  { %864 = vadd.xlane.f32.xlu2 %v863_v39 }
 0x3a4   :  { %769 = vrot.lane.b32.xlu0 %v1759_v26, %s1613_s30 }
 0x3ac   :  { %v404_v42 = vpop.xlane.xlu1 %403 }
 0x3ad   :  { %1551 = vrcp.f32 %v404_v42 }
 0x3b3   :  { %v1552_v47 = vpop.eup %1551 }
 0x3b4   :  { %v407_v44 = vpop.xlane.xlu0 %406  ;;  %v418_v22 = vmul.f32 %v1552_v47, %v1833_v33 }
 0x3b5   :  { %1553 = vrcp.f32 %v407_v44  ;;  %873 = vadd.xlane.f32.xlu1 %v872_v48 }
 0x3b6   :  { %v422_v51 = vpack.c.bf16 %v418_v22, %v418_v22 }
 0x3b8   :  { %v428_v57 = vunpack.c.l.b16 %v422_v51 }
 0x3bb   :  { %v1554_v49 = vpop.eup %1553  ;;  %919 = vrot.lane.b32.xlu2 %v1759_v26, %s1614_s14 }
 0x3bc   :  { %v419_v52 = vmul.f32 %v1554_v49, %v1838_v30 }
 0x3bd   :  { %v410_v55 = vpop.xlane.xlu0 %409 }
 0x3be   :  { %v423_v53 = vpack.c.bf16 %v419_v52, %v419_v52  ;;  %1555 = vrcp.f32 %v410_v55 }
 0x3bf   :  { %1557 = vpow2.f32 %v859_v56 }
 0x3c0   :  { %v429_v58 = vunpack.c.l.b16 %v423_v53 }
 0x3c2   :  { %v430_v60 = vpack.c.b16 %v429_v58, %v428_v57 }
 0x3c4   :  { %1425 = vmatmul.msk.bf16.vlgmr.msrb.gmra.mxu0 %vm376_vm3, %v430_v60  ;;  %v1556_v61 = vpop.eup %1555 }
 0x3c5   :  { %v413_v33 = vpop.xlane.xlu2 %412  ;;  %v1918_v17 = vpop.eup %1557  ;;  %v420_v30 = vmul.f32 %v1556_v61, %v1845_v46 }
 0x3c6   :  { %1559 = vrcp.f32 %v413_v33  ;;  %v869_v26 = vsel %vm376_vm3, %v1918_v17, 0.0  ;;  %v565_v46 = vpop.xlane.xlu1 %564 }
 0x3c7   :  { %v424_v5 = vpack.c.bf16 %v420_v30, %v420_v30  ;;  %1561 = vrcp.f32 %v565_v46 }
 0x3c9   :  { %v461_v9 = vunpack.c.l.b16 %v424_v5 }
 0x3cc   :  { %v1560_v63 = vpop.eup %1559 }
 0x3cd   :  { %v620_v0 = vpop.permute.xlu2 %619  ;;  %v421_v4 = vmul.f32 %v1560_v63, %v1851_v54  ;;  %v1562_v25 = vpop.eup %1561 }
 0x3ce   :  { %870 = vadd.xlane.f32.xlu0 %v869_v26  ;;  %v625_v6 = vsel %vm441_vm2, %v620_v0, 0  ;;  %v715_v20 = vpop.xlane.xlu1 %714  ;;  %v579_v27 = vmul.f32 %v1562_v25, %v1843_v45 }
 0x3cf   :  { %634 = vmatpush.bf16.msra.mxu0 %v625_v6  ;;  %v425_v8 = vpack.c.bf16 %v421_v4, %v421_v4 }
 0x3d0   :  { %v743_v13 = vpop.permute.xlu0 %742  ;;  %v583_v62 = vpack.c.bf16 %v579_v27, %v579_v27 }
 0x3d1   :  { %v462_v12 = vunpack.c.l.b16 %v425_v8  ;;  %v748_v18 = vsel %vm441_vm2, %v743_v13, 0 }
 0x3d2   :  { %v589_v10 = vunpack.c.l.b16 %v583_v62 }
 0x3d3   :  { %v463_v15 = vpack.c.b16 %v462_v12, %v461_v9 }
 0x3d5   :  { %1426 = vmatmul.msk.bf16.vlgmr.msra.gmra.mxu3 %vm376_vm3, %v463_v15 }
 0x3d6   :  { %757 = vmatpush.bf16.msra.mxu3 %v748_v18  ;;  %v721_v19 = vpop.xlane.xlu1 %720 }
 0x3de   :  { %v724_v23 = vpop.xlane.xlu1 %723 }
 0x3e6   :  { %v868_v28 = vpop.xlane.xlu1 %867 }
 0x3fb   :  { %v568_v54 = vpop.xlane.xlu0 %567 }
 0x3fc   :  { %1563 = vrcp.f32 %v568_v54 }
 0x3fd   :  { %v893_v38 = vpop.permute.xlu1 %892 }
 0x3fe   :  { %v898_v40 = vsel %vm441_vm2, %v893_v38, 0 }
 0x402   :  { %v1564_v1 = vpop.eup %1563 }
 0x403   :  { %v580_v2 = vmul.f32 %v1564_v1, %v1881_v24  ;;  %v574_v32 = vpop.xlane.xlu0 %573 }
 0x404   :  { %1565 = vrcp.f32 %v574_v32 }
 0x405   :  { %v584_v35 = vpack.c.bf16 %v580_v2, %v580_v2 }
 0x406   :  { %v571_v21 = vpop.xlane.xlu2 %570 }
 0x407   :  { %v590_v36 = vunpack.c.l.b16 %v584_v35  ;;  %1567 = vrcp.f32 %v571_v21 }
 0x408   :  { %1569 = vrcp.f32 %v715_v20 }
 0x409   :  { %v591_v39 = vpack.c.b16 %v590_v36, %v589_v10  ;;  %1571 = vrcp.f32 %v724_v23 }
 0x40a   :  { %v1566_v16 = vpop.eup %1565 }
 0x40b   :  { %v582_v45 = vmul.f32 %v1566_v16, %v1886_v31  ;;  %1429 = vmatmul.msk.bf16.vlgmr.msrb.gmra.mxu3 %vm376_vm3, %v591_v39 }
 0x40c   :  { %907 = vmatpush.bf16.msrb.mxu3 %v898_v40 }
 0x40d   :  { %v1568_v41 = vpop.eup %1567  ;;  %v586_v24 = vpack.c.bf16 %v582_v45, %v582_v45 }
 0x40e   :  { %v581_v42 = vmul.f32 %v1568_v41, %v1892_v34  ;;  %v718_v44 = vpop.xlane.xlu2 %717  ;;  %v1570_v47 = vpop.eup %1569 }
 0x40f   :  { %1573 = vrcp.f32 %v718_v44  ;;  %v729_v22 = vmul.f32 %v1570_v47, %v1856_v59  ;;  %v617_v49 = vunpack.c.l.b16 %v586_v24  ;;  %v1572_v51 = vpop.eup %1571 }
 0x410   :  { %v585_v48 = vpack.c.bf16 %v581_v42, %v581_v42  ;;  %1575 = vrcp.f32 %v721_v19  ;;  %v732_v60 = vmul.f32 %v1572_v51, %v1868_v7 }
 0x411   :  { %v733_v55 = vpack.c.bf16 %v729_v22, %v729_v22  ;;  %v1480_v22 = vld [vmem:[%s2092_s5 + $0x8] sm:$0xff] }
 0x412   :  { %v616_v50 = vunpack.c.l.b16 %v585_v48  ;;  %v736_v63 = vpack.c.bf16 %v732_v60, %v732_v60  ;;  %1060 = vmatpush.bf16.msra.mxu1 %v1480_v22 }
 0x413   :  { %v739_v33 = vunpack.c.l.b16 %v733_v55 }
 0x414   :  { %v618_v52 = vpack.c.b16 %v617_v49, %v616_v50  ;;  %v767_v8 = vunpack.c.l.b16 %v736_v63 }
 0x415   :  { %v1574_v31 = vpop.eup %1573 }
 0x416   :  { %v770_v53 = vpop.permute.xlu0 %769  ;;  %v730_v56 = vmul.f32 %v1574_v31, %v1897_v29  ;;  %v865_v57 = vpop.xlane.xlu2 %864  ;;  %1430 = vmatmul.msk.bf16.vlgmr.msra.gmra.mxu0 %vm376_vm3, %v618_v52 }
 0x417   :  { %v775_v58 = vsel %vm441_vm2, %v770_v53, 0  ;;  %v1576_v34 = vpop.eup %1575  ;;  %1577 = vrcp.f32 %v865_v57 }
 0x418   :  { %784 = vmatpush.bf16.msrb.mxu0 %v775_v58  ;;  %v734_v59 = vpack.c.bf16 %v730_v56, %v730_v56  ;;  %1579 = vrcp.f32 %v868_v28  ;;  %v731_v61 = vmul.f32 %v1576_v34, %v1863_v3  ;;  %v1479_v34 = vld [vmem:[%s2092_s5] sm:$0xff] }
 0x419   :  { %1061 = vmatpush.bf16.msra.mxu1 %v1479_v34 }
 0x41a   :  { %v740_v30 = vunpack.c.l.b16 %v734_v59  ;;  %v735_v29 = vpack.c.bf16 %v731_v61, %v731_v61 }
 0x41c   :  { %v741_v26 = vpack.c.b16 %v740_v30, %v739_v33  ;;  %v766_v7 = vunpack.c.l.b16 %v735_v29 }
 0x41d   :  { %v1578_v0 = vpop.eup %1577 }
 0x41e   :  { %v920_v4 = vpop.permute.xlu2 %919  ;;  %1433 = vmatmul.msk.bf16.vlgmr.msra.gmra.mxu3 %vm376_vm3, %v741_v26  ;;  %v1580_v5 = vpop.eup %1579  ;;  %v879_v9 = vmul.f32 %v1578_v0, %v1901_v37  ;;  %v768_v13 = vpack.c.b16 %v767_v8, %v766_v7 }
 0x41f   :  { %v925_v6 = vsel %vm441_vm2, %v920_v4, 0  ;;  %v880_v12 = vmul.f32 %v1580_v5, %v1874_v11 }
 0x420   :  { %934 = vmatpush.bf16.msra.mxu0 %v925_v6  ;;  %v883_v3 = vpack.c.bf16 %v879_v9, %v879_v9 }
 0x421   :  { %v884_v15 = vpack.c.bf16 %v880_v12, %v880_v12 }
 0x422   :  { %v889_v18 = vunpack.c.l.b16 %v883_v3 }
 0x423   :  { %v890_v46 = vunpack.c.l.b16 %v884_v15 }
 0x425   :  { %v891_v20 = vpack.c.b16 %v890_v46, %v889_v18  ;;  %v1504_v18 = vld [vmem:[%s2091_s6] ss:$0 sm:$0xff] }
 0x426   :  { %1434 = vmatmul.msk.bf16.vlgmr.msrb.gmra.mxu0 %vm376_vm3, %v768_v13 }
 0x428   :  { %v874_v19 = vpop.xlane.xlu1 %873 }
 0x429   :  { %1581 = vrcp.f32 %v874_v19 }
 0x42e   :  { %1437 = vmatmul.msk.bf16.vlgmr.msrb.gmra.mxu3 %vm376_vm3, %v891_v20 }
 0x42f   :  { %v1582_v54 = vpop.eup %1581 }
 0x430   :  { %v882_v37 = vmul.f32 %v1582_v54, %v1908_v43 }
 0x432   :  { %v886_v27 = vpack.c.bf16 %v882_v37, %v882_v37 }
 0x434   :  { %v917_v1 = vunpack.c.l.b16 %v886_v27 }
 0x441   :  { %v871_v23 = vpop.xlane.xlu0 %870  ;;  %v454_v35 = vpop.f32.mrf.mxu0 }
 0x442   :  { %1583 = vrcp.f32 %v871_v23 }
 0x448   :  { %v1584_v25 = vpop.eup %1583 }
 0x449   :  { %v881_v11 = vmul.f32 %v1584_v25, %v1918_v17  ;;  %v456_v36 = vpop.f32.mrf.mxu0  ;;  %v1505_v25 = vld [vmem:[%s2093_s1] ss:$0 sm:$0xff] }
 0x44b   :  { %v885_v28 = vpack.c.bf16 %v881_v11, %v881_v11  ;;  %v1599_v11 = vld [vmem:[%s2087_s0] sm:$0xff] }
 0x44d   :  { %v916_v62 = vunpack.c.l.b16 %v885_v28 }
 0x44f   :  { %v918_v2 = vpack.c.b16 %v917_v1, %v916_v62 }
 0x451   :  { %1438 = vmatmul.msk.bf16.vlgmr.msra.gmra.mxu0 %vm376_vm3, %v918_v2 }
 0x458   :  { %v486_v32 = vpop.f32.mrf.mxu3 }
 0x460   :  { %v1948_v10 = vpop.f32.mrf.mxu3 }
 0x48e   :  { %v609_v21 = vpop.f32.mrf.mxu3 }
 0x493   :  { %v636_v38 = vpop.f32.mrf.mxu0 }
 0x494   :  { %949 = vrot.lane.b32.xlu0 %v636_v38, %s1615_s15 }
 0x496   :  { %v611_v43 = vpop.f32.mrf.mxu3 }
 0x497   :  { %947 = vrot.lane.b32.xlu2 %v611_v43, %s1615_s15 }
 0x49b   :  { %v638_v39 = vpop.f32.mrf.mxu0 }
 0x49c   :  { %945 = vrot.lane.b32.xlu0 %v609_v21, %s1615_s15 }
 0x4a1   :  { %v759_v17 = vpop.f32.mrf.mxu3 }
 0x4a2   :  { %961 = vrot.lane.b32.xlu2 %v759_v17, %s1616_s16  ;;  %v1506_v17 = vld [vmem:[%s2093_s1 + $0x1] ss:$0 sm:$0xff] }
 0x4a3   :  { %v786_v16 = vpop.f32.mrf.mxu0 }
 0x4a4   :  { %965 = vrot.lane.b32.xlu0 %v786_v16, %s1616_s16 }
 0x4a9   :  { %v761_v40 = vpop.f32.mrf.mxu3 }
 0x4aa   :  { %963 = vrot.lane.b32.xlu2 %v761_v40, %s1616_s16  ;;  %v1601_v40 = vld [vmem:[%s2087_s0 + $0x10] sm:$0xff] }
 0x4ab   :  { %v788_v24 = vpop.f32.mrf.mxu0 }
 0x4b1   :  { %v909_v45 = vpop.f32.mrf.mxu3 }
 0x4b2   :  { %977 = vrot.lane.b32.xlu1 %v909_v45, %s1617_s17 }
 0x4b9   :  { %v911_v41 = vpop.f32.mrf.mxu3 }
 0x4ba   :  { %979 = vrot.lane.b32.xlu2 %v911_v41, %s1617_s17 }
 0x4c2   :  { %951 = vrot.lane.b32.xlu2 %v638_v39, %s1615_s15 }
 0x4ce   :  { %v936_v42 = vpop.f32.mrf.mxu0 }
 0x4cf   :  { %981 = vrot.lane.b32.xlu0 %v936_v42, %s1617_s17  ;;  %v1602_v42 = vld [vmem:[%s2087_s0 + $0x18] sm:$0xf] }
 0x4d6   :  { %v938_v44 = vpop.f32.mrf.mxu0 }
 0x4d7   :  { %967 = vrot.lane.b32.xlu0 %v788_v24, %s1616_s16  ;;  %983 = vrot.lane.b32.xlu1 %v938_v44, %s1617_s17 }
 0x4f1   :  { %v948_v47 = vpop.permute.xlu2 %947 }
 0x4f2   :  { %v990_v50 = vsel %vm323_vm15, %v456_v36, %v948_v47  ;;  %v1600_v36 = vld [vmem:[%s2087_s0 + $0x8] sm:$0xf] }
 0x4fc   :  { %v962_v48 = vpop.permute.xlu2 %961 }
 0x504   :  { %v964_v49 = vpop.permute.xlu2 %963 }
 0x505   :  { %v995_v51 = vsel %vm993_vm5, %v990_v50, %v964_v49 }
 0x506   :  { %v950_v52 = vpop.permute.xlu0 %949 }
 0x507   :  { %v991_v61 = vsel %vm323_vm15, %v486_v32, %v950_v52 }
 0x50e   :  { %v946_v55 = vpop.permute.xlu0 %945 }
 0x50f   :  { %v989_v56 = vsel %vm323_vm15, %v454_v35, %v946_v55 }
 0x510   :  { %v994_v58 = vsel %vm993_vm5, %v989_v56, %v962_v48 }
 0x514   :  { %v980_v31 = vpop.permute.xlu2 %979 }
 0x515   :  { %v1000_v53 = vsel %vm998_vm6, %v995_v51, %v980_v31 }
 0x516   :  { %1013 = vst [vmem:[#allocation1 + $0x10] ss:$2 sm:$0xff] %v1000_v53  ;;  %v966_v33 = vpop.permute.xlu0 %965 }
 0x517   :  { %v996_v30 = vsel %vm993_vm5, %v991_v61, %v966_v33 }
 0x51c   :  { %v952_v29 = vpop.permute.xlu2 %951 }
 0x51d   :  { %v992_v4 = vsel %vm323_vm15, %v1948_v10, %v952_v29 }
 0x524   :  { %v978_v57 = vpop.permute.xlu1 %977 }
 0x525   :  { %v999_v60 = vsel %vm998_vm6, %v994_v58, %v978_v57 }
 0x526   :  { %v1007_v59 = vrot.slane %v999_v60, 4  ;;  %1009 = vst [vmem:[#allocation1] ss:$2 sm:$0xff] %v999_v60 }
 0x528   :  { %1011 = vst [vmem:[#allocation1 + $0x1] ss:$2 sm:$0xff] %v1007_v59 }
 0x52f   :  { %v1020_v9 = vld.sshfl [vmem:[#allocation1] sm:$0xff pattern:$0x75316420] }
 0x541   :  { %v982_v63 = vpop.permute.xlu0 %981 }
 0x542   :  { %v1001_v26 = vsel %vm998_vm6, %v996_v30, %v982_v63 }
 0x543   :  { %v1008_v0 = vrot.slane %v1001_v26, 4  ;;  %1015 = vst [vmem:[#allocation1 + $0x11] ss:$2 sm:$0xff] %v1001_v26 }
 0x545   :  { %1017 = vst [vmem:[#allocation1 + $0x20] ss:$2 sm:$0xff] %v1008_v0 }
 0x549   :  { %v968_v5 = vpop.permute.xlu0 %967  ;;  %v984_v6 = vpop.permute.xlu1 %983 }
 0x54a   :  { %v997_v8 = vsel %vm993_vm5, %v992_v4, %v968_v5  ;;  %v1021_v7 = vld.sshfl [vmem:[#allocation1 + $0x10] sm:$0xff pattern:$0x75316420]  ;;  %vm1351_vm5 = vcmask 523264  }
 0x54b   :  { %v1002_v12 = vsel %vm998_vm6, %v997_v8, %v984_v6  ;;  %v1026_v13 = vpack.c.bf16 %v1021_v7, %v1020_v9 }
 0x54c   :  { %1019 = vst [vmem:[#allocation1 + $0x21] ss:$2 sm:$0xff] %v1002_v12 }
 0x54d   :  { %1447 = vmatmul.msk.bf16.vlgmr.msra.gmra.mxu1 %vm51_vm0, %v1026_v13 }
 0x553   :  { %v1022_v3 = vld.sshfl [vmem:[#allocation1 + $0x20] sm:$0xff pattern:$0x75316420] }
 0x554   :  { %v1027_v15 = vpack.c.bf16 %v1022_v3, %v1022_v3 }
 0x55d   :  { %1448 = vmatmul.msk.bf16.gmra.mxu1 %vm51_vm0, %v1027_v15 }
 0x5ca   :  { %v1063_v46 = vpop.f32.mrf.mxu1 }
 0x5cb   :  { %v1064_v20 = vadd.f32 %v1504_v18, %v1063_v46 }
 0x5cd   :  { %v1075_v19 = vrot.slane %v1064_v20, 4  ;;  %1078 = vst [vmem:[#allocation1] ss:$2 sm:$0xff] %v1064_v20 }
 0x5cf   :  { %1080 = vst [vmem:[#allocation1 + $0x1] ss:$2 sm:$0xff] %v1075_v19 }
 0x5d2   :  { %v1065_v23 = vpop.f32.mrf.mxu1 }
 0x5d3   :  { %v1066_v54 = vadd.f32 %v1504_v18, %v1065_v23  ;;  %v1481_v23 = vld [vmem:[%s2097_s9] sm:$0xff] }
 0x5d5   :  { %v1076_v37 = vrot.slane %v1066_v54, 4  ;;  %1082 = vst [vmem:[#allocation1 + $0x10] ss:$2 sm:$0xff] %v1066_v54 }
 0x5d6   :  { %v1083_v27 = vld.sshfl [vmem:[#allocation1] sm:$0xff pattern:$0x75316420] }
 0x5d7   :  { %1086 = vst [vmem:[#allocation1 + $0x20] ss:$2 sm:$0xff] %v1076_v37  ;;  %v1980_v28 = vadd.f32 %v1599_v11, %v1083_v27 }
 0x5d9   :  { %v1109_v1 = vadd.f32 %v1505_v25, %v1980_v28 }
 0x5da   :  { %v1068_v62 = vpop.f32.mrf.mxu1 }
 0x5db   :  { %v1069_v2 = vadd.f32 %v1504_v18, %v1068_v62  ;;  %v1115_v32 = vsel %vm51_vm0, %v1109_v1, 0.0  ;;  %v1482_v18 = vld [vmem:[%s2097_s9 + $0x8] sm:$0xff] }
 0x5dc   :  { %1116 = vadd.xlane.f32.xlu2 %v1115_v32  ;;  %v1084_v35 = vld.sshfl [vmem:[#allocation1 + $0x10] sm:$0xff pattern:$0x75316420]  ;;  %1274 = vmatpush.bf16.msra.mxu2 %v1482_v18  ;;  %v1507_v32 = vld [vmem:[%s2094_s7] ss:$0 sm:$0xff] }
 0x5dd   :  { %v1077_v10 = vrot.slane %v1069_v2, 4  ;;  %1088 = vst [vmem:[#allocation1 + $0x21] ss:$2 sm:$0xff] %v1069_v2  ;;  %v1987_v21 = vadd.f32 %v1600_v36, %v1084_v35 }
 0x5df   :  { %1090 = vst [vmem:[#allocation1 + $0x30] ss:$2 sm:$0xff] %v1077_v10  ;;  %v1110_v38 = vadd.f32 %v1505_v25, %v1987_v21 }
 0x5e0   :  { %1275 = vmatpush.bf16.msra.mxu2 %v1481_v23 }
 0x5e1   :  { %v1118_v43 = vsel %vm55_vm1, %v1110_v38, 0.0 }
 0x5e2   :  { %1119 = vadd.xlane.f32.xlu0 %v1118_v43  ;;  %v1070_v39 = vpop.f32.mrf.mxu1 }
 0x5e4   :  { %v1091_v16 = vld.sshfl [vmem:[#allocation1 + $0x20] sm:$0xff pattern:$0x75316420] }
 0x5e5   :  { %v1997_v45 = vadd.f32 %v1601_v40, %v1091_v16 }
 0x5e6   :  { %v1092_v41 = vld.sshfl [vmem:[#allocation1 + $0x30] sm:$0xff pattern:$0x75316420] }
 0x5e7   :  { %v1111_v24 = vadd.f32 %v1506_v17, %v1997_v45  ;;  %v2003_v44 = vadd.f32 %v1602_v42, %v1092_v41 }
 0x5e9   :  { %v1121_v47 = vsel %vm51_vm0, %v1111_v24, 0.0  ;;  %v1112_v48 = vadd.f32 %v1506_v17, %v2003_v44 }
 0x5ea   :  { %1122 = vadd.xlane.f32.xlu1 %v1121_v47 }
 0x5eb   :  { %v1124_v22 = vsel %vm55_vm1, %v1112_v48, 0.0 }
 0x5ec   :  { %1125 = vadd.xlane.f32.xlu2 %v1124_v22 }
 0x64f   :  { %v1117_v49 = vpop.xlane.xlu2 %1116 }
 0x650   :  { %v1127_v50 = vmul.f32 %v1117_v49, %v1704_v14 }
 0x652   :  { %v1131_v51 = vsub.f32 %v1109_v1, %v1127_v50 }
 0x654   :  { %v1135_v52 = vmul.f32 %v1131_v51, %v1131_v51 }
 0x655   :  { %v1120_v31 = vpop.xlane.xlu0 %1119 }
 0x656   :  { %v1128_v53 = vmul.f32 %v1120_v31, %v1704_v14  ;;  %v1139_v55 = vsel %vm51_vm0, %v1135_v52, 0.0 }
 0x657   :  { %1140 = vadd.xlane.f32.xlu0 %v1139_v55 }
 0x658   :  { %v2011_v56 = vsub.f32 %v1110_v38, %v1128_v53 }
 0x65a   :  { %v1136_v57 = vmul.f32 %v2011_v56, %v2011_v56 }
 0x65c   :  { %v1142_v58 = vsel %vm55_vm1, %v1136_v57, 0.0 }
 0x65d   :  { %1143 = vadd.xlane.f32.xlu1 %v1142_v58  ;;  %v1123_v34 = vpop.xlane.xlu1 %1122 }
 0x65e   :  { %v1129_v60 = vmul.f32 %v1123_v34, %v1704_v14 }
 0x65f   :  { %v1126_v59 = vpop.xlane.xlu2 %1125 }
 0x660   :  { %v2017_v33 = vsub.f32 %v1111_v24, %v1129_v60  ;;  %v1130_v61 = vmul.f32 %v1126_v59, %v1704_v14 }
 0x662   :  { %v2020_v30 = vsub.f32 %v1112_v48, %v1130_v61  ;;  %v1137_v63 = vmul.f32 %v2017_v33, %v2017_v33 }
 0x664   :  { %v1145_v26 = vsel %vm51_vm0, %v1137_v63, 0.0  ;;  %v1138_v0 = vmul.f32 %v2020_v30, %v2020_v30 }
 0x665   :  { %1146 = vadd.xlane.f32.xlu2 %v1145_v26 }
 0x666   :  { %v1148_v29 = vsel %vm55_vm1, %v1138_v0, 0.0 }
 0x667   :  { %1149 = vadd.xlane.f32.xlu0 %v1148_v29 }
 0x6ca   :  { %v1141_v4 = vpop.xlane.xlu0 %1140 }
 0x6cb   :  { %v1151_v5 = vmul.f32 %v1141_v4, %v1704_v14 }
 0x6cd   :  { %v1155_v6 = vadd.f32 1e-05, %v1151_v5 }
 0x6cf   :  { %1585 = vrsqrt.f32 %v1155_v6  ;;  %vm1165_vm8 = vweird.f32 %v1155_v6 }
 0x6d0   :  { %v1144_v8 = vpop.xlane.xlu1 %1143 }
 0x6d1   :  { %v1152_v9 = vmul.f32 %v1144_v8, %v1704_v14 }
 0x6d3   :  { %v1156_v7 = vadd.f32 1e-05, %v1152_v9 }
 0x6d5   :  { %v1586_v12 = vpop.eup %1585  ;;  %1587 = vrsqrt.f32 %v1156_v7  ;;  %vm1175_vm11 = vweird.f32 %v1156_v7 }
 0x6d6   :  { %v1160_v13 = vmul.f32 %v1586_v12, %v1155_v6  ;;  %vm1166_vm7 = vweird.f32 %v1586_v12 }
 0x6d7   :  { %vm1167_vm9 = vmor %vm1165_vm8, %vm1166_vm7 }
 0x6d8   :  { %v1161_v3 = vmul.f32 %v1586_v12, %v1160_v13  ;;  %v1147_v15 = vpop.xlane.xlu2 %1146  ;;  %v1483_v13 = vld [vmem:[%s2099_s11] sm:$0xff] }
 0x6d9   :  { %v1153_v46 = vmul.f32 %v1147_v15, %v1704_v14 }
 0x6da   :  { %v1162_v20 = vmul.f32 0.5, %v1161_v3  ;;  %v1150_v19 = vpop.xlane.xlu0 %1149 }
 0x6db   :  { %v1588_v54 = vpop.eup %1587  ;;  %v1157_v37 = vadd.f32 1e-05, %v1153_v46  ;;  %v1154_v25 = vmul.f32 %v1150_v19, %v1704_v14  ;;  %v1508_v14 = vld [vmem:[%s2095_s8] ss:$0 sm:$0xff] }
 0x6dc   :  { %v1163_v27 = vsub.f32 1.5, %v1162_v20  ;;  %v1170_v11 = vmul.f32 %v1588_v54, %v1156_v7  ;;  %vm1176_vm10 = vweird.f32 %v1588_v54  ;;  %v1484_v7 = vld [vmem:[%s2099_s11 + $0x8] sm:$0xff] }
 0x6dd   :  { %1589 = vrsqrt.f32 %v1157_v37  ;;  %v1158_v1 = vadd.f32 1e-05, %v1154_v25  ;;  %vm1177_vm12 = vmor %vm1175_vm11, %vm1176_vm10  ;;  %vm1185_vm14 = vweird.f32 %v1157_v37 }
 0x6de   :  { %v1164_v62 = vmul.f32 %v1586_v12, %v1163_v27  ;;  %v1171_v2 = vmul.f32 %v1588_v54, %v1170_v11 }
 0x6df   :  { %1591 = vrsqrt.f32 %v1158_v1  ;;  %vm1195_vm3 = vweird.f32 %v1158_v1 }
 0x6e0   :  { %v1168_v35 = vsel %vm1167_vm9, %v1586_v12, %v1164_v62  ;;  %v1172_v10 = vmul.f32 0.5, %v1171_v2  ;;  %v1509_v12 = vld [vmem:[%s2096_s10] ss:$0 sm:$0xff] }
 0x6e1   :  { %v1199_v36 = vmul.f32 %v1168_v35, %v1131_v51 }
 0x6e2   :  { %v1173_v38 = vsub.f32 1.5, %v1172_v10 }
 0x6e3   :  { %v1590_v43 = vpop.eup %1589  ;;  %v1206_v39 = vmul.f32 %v1507_v32, %v1199_v36 }
 0x6e4   :  { %v1174_v17 = vmul.f32 %v1588_v54, %v1173_v38  ;;  %v1180_v16 = vmul.f32 %v1590_v43, %v1157_v37  ;;  %vm1186_vm13 = vweird.f32 %v1590_v43 }
 0x6e5   :  { %v1592_v40 = vpop.eup %1591  ;;  %v1213_v41 = vadd.f32 %v1508_v14, %v1206_v39  ;;  %vm1187_vm2 = vmor %vm1185_vm14, %vm1186_vm13 }
 0x6e6   :  { %v1178_v24 = vsel %vm1177_vm12, %v1588_v54, %v1174_v17  ;;  %v1181_v42 = vmul.f32 %v1590_v43, %v1180_v16  ;;  %v1190_v47 = vmul.f32 %v1592_v40, %v1158_v1  ;;  %vm1196_vm15 = vweird.f32 %v1592_v40 }
 0x6e7   :  { %v1221_v48 = vrot.slane %v1213_v41, 4  ;;  %1223 = vst [vmem:[#allocation1] ss:$2 sm:$0xff] %v1213_v41  ;;  %v1200_v22 = vmul.f32 %v1178_v24, %v2011_v56  ;;  %vm1197_vm4 = vmor %vm1195_vm3, %vm1196_vm15 }
 0x6e8   :  { %v1182_v49 = vmul.f32 0.5, %v1181_v42  ;;  %v1191_v50 = vmul.f32 %v1592_v40, %v1190_v47 }
 0x6e9   :  { %1225 = vst [vmem:[#allocation1 + $0x1] ss:$2 sm:$0xff] %v1221_v48  ;;  %v1207_v51 = vmul.f32 %v1507_v32, %v1200_v22 }
 0x6ea   :  { %v1183_v52 = vsub.f32 1.5, %v1182_v49  ;;  %v1192_v31 = vmul.f32 0.5, %v1191_v50 }
 0x6eb   :  { %v1214_v53 = vadd.f32 %v1508_v14, %v1207_v51 }
 0x6ec   :  { %v1184_v55 = vmul.f32 %v1590_v43, %v1183_v52  ;;  %v1193_v57 = vsub.f32 1.5, %v1192_v31  ;;  %v1510_v31 = vld [vmem:[%s2098_s12] ss:$0 sm:$0xff] }
 0x6ed   :  { %1227 = vst [vmem:[#allocation1 + $0x10] ss:$2 sm:$0xff] %v1214_v53 }
 0x6ee   :  { %v1188_v58 = vsel %vm1187_vm2, %v1590_v43, %v1184_v55  ;;  %v1194_v34 = vmul.f32 %v1592_v40, %v1193_v57 }
 0x6ef   :  { %v1201_v60 = vmul.f32 %v1188_v58, %v2017_v33  ;;  %v1486_v33 = vld [vmem:[%s2099_s11 + $0x18] sm:$0xff] }
 0x6f0   :  { %v1198_v56 = vsel %vm1197_vm4, %v1592_v40, %v1194_v34  ;;  %v1234_v4 = vld.sshfl [vmem:[#allocation1] sm:$0xff pattern:$0x75316420]  ;;  %1362 = vmatpush.bf16.msra.mxu3 %v1486_v33 }
 0x6f1   :  { %v1208_v59 = vmul.f32 %v1507_v32, %v1201_v60  ;;  %v1202_v61 = vmul.f32 %v1198_v56, %v2020_v30  ;;  %v1485_v30 = vld [vmem:[%s2099_s11 + $0x10] sm:$0xff] }
 0x6f3   :  { %v1215_v63 = vadd.f32 %v1508_v14, %v1208_v59  ;;  %v1209_v26 = vmul.f32 %v1507_v32, %v1202_v61 }
 0x6f4   :  { %1363 = vmatpush.bf16.msra.mxu3 %v1485_v30 }
 0x6f5   :  { %v1222_v0 = vrot.slane %v1215_v63, 4  ;;  %1229 = vst [vmem:[#allocation1 + $0x11] ss:$2 sm:$0xff] %v1215_v63  ;;  %v1216_v29 = vadd.f32 %v1508_v14, %v1209_v26 }
 0x6f7   :  { %1231 = vst [vmem:[#allocation1 + $0x20] ss:$2 sm:$0xff] %v1222_v0 }
 0x6f8   :  { %1233 = vst [vmem:[#allocation1 + $0x21] ss:$2 sm:$0xff] %v1216_v29  ;;  %1364 = vmatpush.bf16.msra.mxu3 %v1484_v7 }
 0x6fc   :  { %v1235_v5 = vld.sshfl [vmem:[#allocation1 + $0x10] sm:$0xff pattern:$0x75316420]  ;;  %1365 = vmatpush.bf16.msra.mxu3 %v1483_v13 }
 0x6fd   :  { %v1240_v6 = vpack.c.bf16 %v1235_v5, %v1234_v4 }
 0x6ff   :  { %1457 = vmatmul.msk.bf16.vlgmr.msra.gmra.mxu2 %vm51_vm0, %v1240_v6  ;;  %v1236_v8 = vld.sshfl [vmem:[#allocation1 + $0x20] sm:$0xff pattern:$0x75316420] }
 0x700   :  { %v1241_v9 = vpack.c.bf16 %v1236_v8, %v1236_v8 }
 0x70f   :  { %1458 = vmatmul.msk.bf16.gmra.mxu2 %vm51_vm0, %v1241_v9 }
 0x782   :  { %v1277_v3 = vpop.f32.mrf.mxu2 }
 0x783   :  { %v1278_v15 = vadd.f32 %v1509_v12, %v1277_v3 }
 0x785   :  { %v1289_v18 = vmul.f32 0.044715, %v1278_v15  ;;  %v1286_v40 = vmul.f32 0.5, %v1278_v15 }
 0x787   :  { %v1292_v46 = vmul.f32 %v1289_v18, %v1278_v15 }
 0x789   :  { %v1295_v20 = vmul.f32 %v1292_v46, %v1278_v15 }
 0x78a   :  { %v1279_v19 = vpop.f32.mrf.mxu2 }
 0x78b   :  { %v1298_v23 = vadd.f32 %v1295_v20, %v1278_v15  ;;  %v1280_v54 = vadd.f32 %v1509_v12, %v1279_v19 }
 0x78d   :  { %v1290_v37 = vmul.f32 0.044715, %v1280_v54  ;;  %v1301_v25 = vmul.f32 0.7978846, %v1298_v23  ;;  %v1287_v41 = vmul.f32 0.5, %v1280_v54 }
 0x78f   :  { %v1293_v27 = vmul.f32 %v1290_v37, %v1280_v54  ;;  %1593 = vtanh.f32 %v1301_v25 }
 0x791   :  { %v1296_v11 = vmul.f32 %v1293_v27, %v1280_v54 }
 0x792   :  { %v1282_v1 = vpop.f32.mrf.mxu2 }
 0x793   :  { %v1299_v62 = vadd.f32 %v1296_v11, %v1280_v54  ;;  %v1283_v2 = vadd.f32 %v1509_v12, %v1282_v1 }
 0x795   :  { %v1302_v32 = vmul.f32 0.7978846, %v1299_v62  ;;  %v1291_v35 = vmul.f32 0.044715, %v1283_v2  ;;  %v1594_v14 = vpop.eup %1593  ;;  %v1288_v50 = vmul.f32 0.5, %v1283_v2 }
 0x796   :  { %v1307_v39 = vadd.f32 1.0, %v1594_v14 }
 0x797   :  { %1595 = vtanh.f32 %v1302_v32  ;;  %v1294_v10 = vmul.f32 %v1291_v35, %v1283_v2 }
 0x798   :  { %v1310_v42 = vmul.f32 %v1307_v39, %v1286_v40 }
 0x799   :  { %v1297_v36 = vmul.f32 %v1294_v10, %v1283_v2 }
 0x79a   :  { %v1284_v38 = vpop.f32.mrf.mxu2 }
 0x79b   :  { %v1300_v43 = vadd.f32 %v1297_v36, %v1283_v2 }
 0x79d   :  { %v1596_v17 = vpop.eup %1595  ;;  %v1303_v16 = vmul.f32 0.7978846, %v1300_v43 }
 0x79e   :  { %v1308_v24 = vadd.f32 1.0, %v1596_v17 }
 0x79f   :  { %1597 = vtanh.f32 %v1303_v16 }
 0x7a0   :  { %v1311_v47 = vmul.f32 %v1308_v24, %v1287_v41 }
 0x7a2   :  { %v1313_v48 = vpack.c.bf16 %v1311_v47, %v1310_v42 }
 0x7a4   :  { %1475 = vmatmul.msk.bf16.vlgmr.msra.gmra.mxu3 %vm1351_vm5, %v1313_v48 }
 0x7a5   :  { %v1598_v22 = vpop.eup %1597 }
 0x7a6   :  { %v1309_v49 = vadd.f32 1.0, %v1598_v22 }
 0x7a8   :  { %v1312_v51 = vmul.f32 %v1309_v49, %v1288_v50 }
 0x7aa   :  { %v1314_v52 = vpack.c.bf16 %v1312_v51, %v1312_v51 }
 0x7b4   :  { %1476 = vmatmul.msk.bf16.gmra.mxu3 %vm1351_vm5, %v1314_v52 }
 0x827   :  { %v1367_v53 = vpop.f32.mrf.mxu3 }
 0x828   :  { %v1368_v55 = vadd.f32 %v1510_v31, %v1367_v53 }
 0x82a   :  { %v1379_v57 = vrot.slane %v1368_v55, 4  ;;  %1382 = vst [vmem:[#allocation1] ss:$2 sm:$0xff] %v1368_v55 }
 0x82c   :  { %1384 = vst [vmem:[#allocation1 + $0x1] ss:$2 sm:$0xff] %v1379_v57 }
 0x82f   :  { %v1369_v58 = vpop.f32.mrf.mxu3 }
 0x830   :  { %v1370_v34 = vadd.f32 %v1510_v31, %v1369_v58 }
 0x832   :  { %v1380_v60 = vrot.slane %v1370_v34, 4  ;;  %1386 = vst [vmem:[#allocation1 + $0x10] ss:$2 sm:$0xff] %v1370_v34 }
 0x833   :  { %v1387_v56 = vld.sshfl [vmem:[#allocation1] sm:$0xff pattern:$0x75316420] }
 0x834   :  { %v1401_v59 = vadd.f32 %v1387_v56, %v1980_v28  ;;  %1390 = vst [vmem:[#allocation1 + $0x20] ss:$2 sm:$0xff] %v1380_v60 }
 0x836   :  { %1405 = vst.msk [vmem:[%s2100_s13] sm:$0xff] %vm51_vm0, %v1401_v59 }
 0x837   :  { %v1372_v61 = vpop.f32.mrf.mxu3 }
 0x838   :  { %v1373_v63 = vadd.f32 %v1510_v31, %v1372_v61 }
 0x839   :  { %v1388_v26 = vld.sshfl [vmem:[#allocation1 + $0x10] sm:$0xff pattern:$0x75316420] }
 0x83a   :  { %v1402_v0 = vadd.f32 %v1388_v26, %v1987_v21  ;;  %v1381_v29 = vrot.slane %v1373_v63, 4  ;;  %1392 = vst [vmem:[#allocation1 + $0x21] ss:$2 sm:$0xff] %v1373_v63 }
 0x83c   :  { %1394 = vst [vmem:[#allocation1 + $0x30] ss:$2 sm:$0xff] %v1381_v29 }
 0x83d   :  { %1406 = vst.msk [vmem:[%s2100_s13 + $0x8] sm:$0xf] %vm55_vm1, %v1402_v0 }
 0x83f   :  { %v1374_v28 = vpop.f32.mrf.mxu3 }
 0x841   :  { %v1395_v4 = vld.sshfl [vmem:[#allocation1 + $0x20] sm:$0xff pattern:$0x75316420] }
 0x842   :  { %v1403_v5 = vadd.f32 %v1395_v4, %v1997_v45 }
 0x843   :  { %v1396_v6 = vld.sshfl [vmem:[#allocation1 + $0x30] sm:$0xff pattern:$0x75316420] }
 0x844   :  { %v1404_v8 = vadd.f32 %v1396_v6, %v2003_v44  ;;  %1407 = vst.msk [vmem:[%s2100_s13 + $0x10] sm:$0xff] %vm51_vm0, %v1403_v5 }
 0x846   :  { %1408 = vst.msk [vmem:[%s2100_s13 + $0x18] sm:$0xf] %vm55_vm1, %v1404_v8 }

// kernel: run.15
= control target key start
LH: loop header
LB: loop body
LE: loop exit
PB: predicated region body
PF: predicated region fallthrough
CT: control target
= control target key end

     0   :  { %vm40_vm0 = vcmask 261120   ;;  %vm59_vm1 = vcmask 392192   ;;  %s120_s1 = inlined_call_operand.vmem [shape: bf16[32,48], index: 1, kind: input, shape index: {}]   ;;  %s121_s0 = inlined_call_operand.vmem [shape: f32[8,32], index: 0, kind: input, shape index: {}]   ;;  %s122_s2 = inlined_call_operand.vmem [shape: f32[1,48], index: 2, kind: input, shape index: {}]   ;;  %s123_s3 = inlined_call_operand.vmem [shape: f32[8,48], index: 3, kind: input, shape index: {}]   ;;  %s124_s4 = inlined_call_operand.vmem [shape: f32[8,48], index: 4, kind: output, shape index: {}]  }
   0x1   :  { %v75_v0 = vld [vmem:[%s120_s1 + $0x8] sm:$0xff]  ;;  %v74_v1 = vld [vmem:[%s120_s1] sm:$0xff] }
   0x2   :  { %50 = vmatpush.bf16.msra.mxu0 %v75_v0  ;;  %v18_v2 = vld [vmem:[%s121_s0] sm:$0xff] }
   0x3   :  { %v19_v3 = vpack.c.bf16 %v18_v2, %v18_v2  ;;  %v76_v4 = vld [vmem:[%s122_s2] ss:$0 sm:$0xff] }
   0x4   :  { %v57_v6 = vld [vmem:[%s123_s3] sm:$0xff] }
   0x6   :  { %51 = vmatpush.bf16.msra.mxu0 %v74_v1 }
   0x9   :  { %73 = vmatmul.msk.bf16.vlgmr.msra.gmra.mxu0 %vm40_vm0, %v19_v3 }
  0x86   :  { %v53_v5 = vpop.f32.mrf.mxu0 }
  0x87   :  { %v54_v7 = vadd.f32 %v76_v4, %v53_v5 }
  0x89   :  { %v58_v8 = vadd.f32 %v57_v6, %v54_v7 }
  0x8b   :  { %60 = vst.msk [vmem:[%s124_s4] sm:$0xff] %vm59_vm1, %v58_v8 }
  0x8e   :  { %v55_v9 = vpop.f32.mrf.mxu0 }

// kernel: run.13
= control target key start
LH: loop header
LB: loop body
LE: loop exit
PB: predicated region body
PF: predicated region fallthrough
CT: control target
= control target key end

     0   :  { %vm49_vm0 = vcmask 257024   ;;  %v1026_v4 = vmov 32.0   ;;  %vm135_vm8 = vcmask 261120   ;;  %s1029_s18 = smov 80   ;;  %s1030_s19 = smov 112   ;;  %vm168_vm9 = vcmask 64512   ;;  %s1325_s0 = inlined_call_operand.vmem [shape: f32[2,4,32], index: 0, kind: input, shape index: {}, may-alias: {0,13}]   ;;  %s1326_s2 = inlined_call_operand.vmem [shape: f32[1,32], index: 2, kind: input, shape index: {}]   ;;  %s1327_s3 = inlined_call_operand.vmem [shape: f32[1,32], index: 3, kind: input, shape index: {}]   ;;  %s1328_s4 = inlined_call_operand.vmem [shape: bf16[32,96], index: 4, kind: input, shape index: {}]   ;;  %s1329_s6 = inlined_call_operand.vmem [shape: f32[1,32], index: 6, kind: input, shape index: {}]   ;;  %s1330_s5 = inlined_call_operand.vmem [shape: bf16[32,32], index: 5, kind: input, shape index: {}]   ;;  %s1331_s1 = inlined_call_operand.vmem [shape: f32[2,1,32], index: 1, kind: input, shape index: {}]   ;;  %s1332_s7 = inlined_call_operand.vmem [shape: f32[1,32], index: 7, kind: input, shape index: {}]   ;;  %s1333_s8 = inlined_call_operand.vmem [shape: f32[1,32], index: 8, kind: input, shape index: {}]   ;;  %s1334_s10 = inlined_call_operand.vmem [shape: f32[1,64], index: 10, kind: input, shape index: {}]   ;;  %s1335_s9 = inlined_call_operand.vmem [shape: bf16[32,64], index: 9, kind: input, shape index: {}]   ;;  %s1336_s12 = inlined_call_operand.vmem [shape: f32[1,32], index: 12, kind: input, shape index: {}]   ;;  %s1337_s11 = inlined_call_operand.vmem [shape: bf16[64,32], index: 11, kind: input, shape index: {}]   ;;  %s1338_s13 = inlined_call_operand.vmem [shape: f32[2,4,32], index: 13, kind: output, shape index: {}, may-alias: {0,13}]  }
   0x1   :  { %v1114_v0 = vld [vmem:[%s1325_s0] sm:$0xf]  ;;  %v1121_v2 = vld [vmem:[%s1325_s0 + $0x4] sm:$0xf]  ;;  %982 = vrcp.f32 %v1026_v4  ;;  %v949_v24 = vld [vmem:[%s1328_s4 + $0x8] sm:$0xff]  ;;  %s1031_s20 = smov 72  }
   0x2   :  { %v50_v1 = vsel %vm49_vm0, %v1114_v0, 0.0  ;;  %v53_v3 = vsel %vm49_vm0, %v1121_v2, 0.0  ;;  %145 = vmatpush.bf16.msra.mxu0 %v949_v24  ;;  %v948_v25 = vld [vmem:[%s1328_s4] sm:$0xff]  ;;  %s1032_s21 = smov 120   ;;  %s1033_s22 = smov 104   ;;  %vm212_vm10 = vcmask 27648  }
   0x3   :  { %51 = vadd.xlane.f32.xlu0 %v50_v1  ;;  %v973_v37 = vld [vmem:[%s1326_s2] ss:$0 sm:$0xff]  ;;  %s1027_s2 = smov 88   ;;  %s1034_s23 = smov 64   ;;  %vm243_vm11 = vcmask 1041408   ;;  %vm239_vm12 = vcmask 31744  }
   0x4   :  { %v974_v40 = vld [vmem:[%s1327_s3] ss:$0 sm:$0xff]  ;;  %s1028_s3 = smov 96   ;;  %s1035_s24 = smov 56   ;;  %vm652_vm13 = vcmask 195584   ;;  %vm649_vm14 = vcmask 130048  }
   0x5   :  { %s1036_s25 = smov 48   ;;  %s1037_s26 = smov 40  }
   0x6   :  { %146 = vmatpush.bf16.msra.mxu0 %v948_v25  ;;  %s1038_s27 = smov 8   ;;  %s1039_s28 = smov 16  }
   0x7   :  { %v983_v5 = vpop.eup %982  ;;  %s1040_s0 = smov 24  }
   0x8   :  { %v57_v6 = vmul.f32 32.0, %v983_v5  ;;  %vm61_vm1 = vweird.f32 %v983_v5 }
   0xa   :  { %v58_v7 = vsub.f32 1.0, %v57_v6 }
   0xb   :  { %54 = vadd.xlane.f32.xlu0 %v53_v3 }
   0xc   :  { %v59_v8 = vmul.f32 %v983_v5, %v58_v7 }
   0xe   :  { %v60_v9 = vadd.f32 %v983_v5, %v59_v8 }
  0x10   :  { %v1125_v10 = vsel %vm61_vm1, %v983_v5, %v60_v9 }
  0x76   :  { %v52_v11 = vpop.xlane.xlu0 %51 }
  0x77   :  { %v63_v12 = vmul.f32 %v1125_v10, %v52_v11 }
  0x79   :  { %v65_v13 = vsub.f32 %v1114_v0, %v63_v12 }
  0x7b   :  { %v67_v14 = vmul.f32 %v65_v13, %v65_v13 }
  0x7d   :  { %v69_v15 = vsel %vm49_vm0, %v67_v14, 0.0 }
  0x7e   :  { %70 = vadd.xlane.f32.xlu1 %v69_v15  ;;  %v55_v16 = vpop.xlane.xlu0 %54 }
  0x7f   :  { %v64_v17 = vmul.f32 %v1125_v10, %v55_v16 }
  0x81   :  { %v66_v18 = vsub.f32 %v1121_v2, %v64_v17 }
  0x83   :  { %v68_v19 = vmul.f32 %v66_v18, %v66_v18 }
  0x85   :  { %v72_v20 = vsel %vm49_vm0, %v68_v19, 0.0 }
  0x86   :  { %73 = vadd.xlane.f32.xlu1 %v72_v20 }
  0xf1   :  { %v71_v21 = vpop.xlane.xlu1 %70 }
  0xf2   :  { %v75_v22 = vmul.f32 %v71_v21, %v1125_v10 }
  0xf4   :  { %v77_v23 = vadd.f32 1e-05, %v75_v22 }
  0xf6   :  { %984 = vrsqrt.f32 %v77_v23  ;;  %vm85_vm3 = vweird.f32 %v77_v23 }
  0xf9   :  { %v74_v26 = vpop.xlane.xlu1 %73 }
  0xfa   :  { %v76_v27 = vmul.f32 %v74_v26, %v1125_v10 }
  0xfc   :  { %v985_v28 = vpop.eup %984  ;;  %v78_v29 = vadd.f32 1e-05, %v76_v27 }
  0xfd   :  { %v80_v30 = vmul.f32 %v985_v28, %v77_v23  ;;  %vm86_vm2 = vweird.f32 %v985_v28 }
  0xfe   :  { %986 = vrsqrt.f32 %v78_v29  ;;  %vm87_vm4 = vmor %vm85_vm3, %vm86_vm2  ;;  %vm95_vm6 = vweird.f32 %v78_v29 }
  0xff   :  { %v81_v31 = vmul.f32 %v985_v28, %v80_v30 }
 0x101   :  { %v82_v32 = vmul.f32 0.5, %v81_v31 }
 0x103   :  { %v83_v33 = vsub.f32 1.5, %v82_v32 }
 0x104   :  { %v987_v34 = vpop.eup %986 }
 0x105   :  { %v84_v35 = vmul.f32 %v985_v28, %v83_v33  ;;  %v90_v36 = vmul.f32 %v987_v34, %v78_v29  ;;  %vm96_vm5 = vweird.f32 %v987_v34 }
 0x106   :  { %vm97_vm7 = vmor %vm95_vm6, %vm96_vm5  ;;  %vm860_vm6 = vcmask 523264  }
 0x107   :  { %v88_v38 = vsel %vm87_vm4, %v985_v28, %v84_v35  ;;  %v91_v39 = vmul.f32 %v987_v34, %v90_v36 }
 0x108   :  { %v99_v41 = vmul.f32 %v88_v38, %v65_v13 }
 0x109   :  { %v92_v42 = vmul.f32 0.5, %v91_v39 }
 0x10a   :  { %v104_v43 = vmul.f32 %v973_v37, %v99_v41 }
 0x10b   :  { %v93_v44 = vsub.f32 1.5, %v92_v42 }
 0x10c   :  { %v109_v45 = vadd.f32 %v974_v40, %v104_v43 }
 0x10d   :  { %v94_v46 = vmul.f32 %v987_v34, %v93_v44 }
 0x10e   :  { %113 = vst [vmem:[#allocation1] ss:$2 sm:$0xff] %v109_v45 }
 0x10f   :  { %v98_v47 = vsel %vm97_vm7, %v987_v34, %v94_v46 }
 0x110   :  { %v100_v48 = vmul.f32 %v98_v47, %v66_v18 }
 0x112   :  { %v105_v49 = vmul.f32 %v973_v37, %v100_v48 }
 0x114   :  { %v110_v50 = vadd.f32 %v974_v40, %v105_v49 }
 0x116   :  { %115 = vst [vmem:[#allocation1 + $0x1] ss:$2 sm:$0xff] %v110_v50 }
 0x11d   :  { %v116_v51 = vld.sshfl [vmem:[#allocation1] sm:$0xff pattern:$0x75316420] }
 0x11e   :  { %v118_v52 = vpack.c.bf16 %v116_v51, %v116_v51 }
 0x120   :  { %896 = vmatmul.msk.bf16.vlgmr.msra.gmra.mxu0 %vm135_vm8, %v118_v52 }
 0x19d   :  { %v148_v53 = vpop.f32.mrf.mxu0 }
 0x19e   :  { %v152_v54 = vmul.f32 0.35355338, %v148_v53  ;;  %v159_v55 = vrot.slane %v148_v53, 4  ;;  %v161_v56 = vpack.c.bf16 %v148_v53, %v148_v53 }
 0x1a0   :  { %v154_v57 = vrot.slane %v152_v54, 4  ;;  %v162_v58 = vpack.c.bf16 %v159_v55, %v159_v55  ;;  %v164_v59 = vunpack.c.l.b16 %v161_v56  ;;  %v156_v4 = vpack.c.bf16 %v152_v54, %v152_v54 }
 0x1a2   :  { %v1148_v60 = vpack.c.b16 %v164_v59, %v164_v59  ;;  %v189_v61 = vunpack.c.l.b16 %v162_v58  ;;  %v157_v62 = vpack.c.bf16 %v154_v57, %v154_v57  ;;  %v282_v6 = vunpack.c.l.b16 %v156_v4 }
 0x1a4   :  { %v1150_v63 = vpack.c.b16 %v189_v61, %v189_v61  ;;  %286 = vrot.lane.b32.xlu0 %v1148_v60, %s1027_s2  ;;  %166 = vrot.lane.b32.xlu2 %v1148_v60, %s1028_s3  ;;  %v308_v3 = vunpack.c.l.b16 %v157_v62  ;;  %v283_v7 = vpack.c.b16 %v282_v6, %v282_v6 }
 0x1a5   :  { %v150_v1 = vpop.f32.mrf.mxu0 }
 0x1a6   :  { %312 = vrot.lane.b32.xlu1 %v1150_v63, %s1027_s2  ;;  %v309_v5 = vpack.c.b16 %v308_v3, %v308_v3 }
 0x1ac   :  { %424 = vrot.lane.b32.xlu0 %v1150_v63, %s1029_s18  ;;  %191 = vrot.lane.b32.xlu2 %v1150_v63, %s1028_s3 }
 0x1ae   :  { %422 = vrot.lane.b32.xlu1 %v309_v5, %s1030_s19 }
 0x1b4   :  { %513 = vrot.lane.b32.xlu0 %v1148_v60, %s1031_s20  ;;  %284 = vrot.lane.b32.xlu2 %v283_v7, %s1032_s21 }
 0x1b6   :  { %511 = vrot.lane.b32.xlu1 %v283_v7, %s1033_s22 }
 0x1bc   :  { %534 = vrot.lane.b32.xlu0 %v309_v5, %s1033_s22  ;;  %310 = vrot.lane.b32.xlu2 %v309_v5, %s1032_s21 }
 0x1c4   :  { %401 = vrot.lane.b32.xlu2 %v1148_v60, %s1029_s18 }
 0x1cc   :  { %399 = vrot.lane.b32.xlu2 %v283_v7, %s1030_s19 }
 0x1d4   :  { %536 = vrot.lane.b32.xlu2 %v1150_v63, %s1031_s20 }
 0x1fe   :  { %v167_v8 = vpop.permute.xlu2 %166 }
 0x1ff   :  { %v173_v9 = vsel %vm168_vm9, %v167_v8, 0 }
 0x200   :  { %182 = vmatpush.bf16.xpose.msra.mxu1 %v173_v9 }
 0x206   :  { %v192_v11 = vpop.permute.xlu2 %191 }
 0x207   :  { %897 = vmatmul.msk.bf16.vlgmr.msra.gmra.mxu1 %vm168_vm9, %v156_v4  ;;  %v197_v12 = vsel %vm168_vm9, %v192_v11, 0 }
 0x208   :  { %206 = vmatpush.bf16.xpose.msra.mxu2 %v197_v12 }
 0x20e   :  { %v285_v13 = vpop.permute.xlu2 %284 }
 0x20f   :  { %898 = vmatmul.msk.bf16.vlgmr.msra.gmra.mxu2 %vm168_vm9, %v157_v62 }
 0x216   :  { %v287_v14 = vpop.permute.xlu0 %286  ;;  %v311_v15 = vpop.permute.xlu2 %310 }
 0x217   :  { %v292_v16 = vsel %vm168_vm9, %v287_v14, 0 }
 0x218   :  { %301 = vmatpush.bf16.xpose.msrb.mxu0 %v292_v16  ;;  %v313_v17 = vpop.permute.xlu1 %312 }
 0x219   :  { %v318_v18 = vsel %vm168_vm9, %v313_v17, 0 }
 0x21a   :  { %327 = vmatpush.bf16.xpose.msrb.mxu1 %v318_v18 }
 0x21e   :  { %v425_v19 = vpop.permute.xlu0 %424  ;;  %v402_v20 = vpop.permute.xlu2 %401 }
 0x21f   :  { %v430_v21 = vsel %vm168_vm9, %v425_v19, 0  ;;  %v407_v22 = vsel %vm168_vm9, %v402_v20, 0  ;;  %901 = vmatmul.msk.bf16.vlgmr.msrb.gmra.mxu0 %vm168_vm9, %v285_v13 }
 0x220   :  { %416 = vmatpush.bf16.xpose.msra.mxu0 %v407_v22  ;;  %v423_v28 = vpop.permute.xlu1 %422 }
 0x221   :  { %902 = vmatmul.msk.bf16.vlgmr.msrb.gmra.mxu1 %vm168_vm9, %v311_v15 }
 0x222   :  { %439 = vmatpush.bf16.xpose.msra.mxu1 %v430_v21 }
 0x226   :  { %v514_v23 = vpop.permute.xlu0 %513  ;;  %v400_v24 = vpop.permute.xlu2 %399 }
 0x227   :  { %v519_v25 = vsel %vm168_vm9, %v514_v23, 0 }
 0x228   :  { %528 = vmatpush.bf16.xpose.msrb.mxu0 %v519_v25  ;;  %v512_v29 = vpop.permute.xlu1 %511 }
 0x22e   :  { %v537_v26 = vpop.permute.xlu2 %536  ;;  %v535_v30 = vpop.permute.xlu0 %534 }
 0x22f   :  { %v542_v27 = vsel %vm168_vm9, %v537_v26, 0  ;;  %905 = vmatmul.msk.bf16.vlgmr.msra.gmra.mxu0 %vm168_vm9, %v400_v24 }
 0x230   :  { %551 = vmatpush.bf16.xpose.msrb.mxu1 %v542_v27 }
 0x231   :  { %906 = vmatmul.msk.bf16.vlgmr.msra.gmra.mxu1 %vm168_vm9, %v423_v28 }
 0x23f   :  { %909 = vmatmul.msk.bf16.vlgmr.msrb.gmra.mxu0 %vm168_vm9, %v512_v29 }
 0x241   :  { %910 = vmatmul.msk.bf16.vlgmr.msrb.gmra.mxu1 %vm168_vm9, %v535_v30 }
 0x284   :  { %v184_v31 = vpop.f32.mrf.mxu1 }
 0x285   :  { %v213_v32 = vsel %vm212_vm10, %v184_v31, -inf }
 0x286   :  { %214 = vmax.xlane.f32.xlu2 %v213_v32 }
 0x28c   :  { %v186_v33 = vpop.f32.mrf.mxu1 }
 0x292   :  { %v208_v34 = vpop.f32.mrf.mxu2 }
 0x293   :  { %v216_v35 = vsel %vm212_vm10, %v208_v34, -inf }
 0x294   :  { %217 = vmax.xlane.f32.xlu1 %v216_v35 }
 0x29a   :  { %v210_v36 = vpop.f32.mrf.mxu2 }
 0x29c   :  { %v303_v37 = vpop.f32.mrf.mxu0 }
 0x29d   :  { %v333_v38 = vsel %vm212_vm10, %v303_v37, -inf }
 0x29e   :  { %260 = vrot.lane.b32.xlu2 %v1150_v63, %s1034_s23  ;;  %v329_v39 = vpop.f32.mrf.mxu1  ;;  %334 = vmax.xlane.f32.xlu0 %v333_v38 }
 0x29f   :  { %v336_v50 = vsel %vm212_vm10, %v329_v39, -inf }
 0x2a4   :  { %v305_v40 = vpop.f32.mrf.mxu0 }
 0x2a6   :  { %378 = vrot.lane.b32.xlu2 %v1150_v63, %s1035_s24  ;;  %v331_v41 = vpop.f32.mrf.mxu1 }
 0x2ac   :  { %v418_v42 = vpop.f32.mrf.mxu0 }
 0x2ad   :  { %237 = vrot.lane.b32.xlu1 %v1148_v60, %s1034_s23  ;;  %v445_v52 = vsel %vm212_vm10, %v418_v42, -inf }
 0x2ae   :  { %v1182_v43 = vpop.f32.mrf.mxu1 }
 0x2af   :  { %v448_v53 = vsel %vm212_vm10, %v1182_v43, -inf }
 0x2b2   :  { %357 = vrot.lane.b32.xlu0 %v1148_v60, %s1035_s24 }
 0x2b4   :  { %v420_v44 = vpop.f32.mrf.mxu0 }
 0x2b6   :  { %v443_v45 = vpop.f32.mrf.mxu1 }
 0x2bc   :  { %v1185_v46 = vpop.f32.mrf.mxu0 }
 0x2bd   :  { %v557_v54 = vsel %vm212_vm10, %v1185_v46, -inf }
 0x2be   :  { %v1187_v47 = vpop.f32.mrf.mxu1 }
 0x2bf   :  { %v560_v51 = vsel %vm212_vm10, %v1187_v47, -inf }
 0x2c4   :  { %v532_v48 = vpop.f32.mrf.mxu0 }
 0x2c6   :  { %v555_v49 = vpop.f32.mrf.mxu1 }
 0x2cf   :  { %337 = vmax.xlane.f32.xlu2 %v336_v50 }
 0x2d7   :  { %561 = vmax.xlane.f32.xlu2 %v560_v51  ;;  %446 = vmax.xlane.f32.xlu1 %v445_v52 }
 0x2dc   :  { %449 = vmax.xlane.f32.xlu0 %v448_v53 }
 0x2e4   :  { %558 = vmax.xlane.f32.xlu0 %v557_v54 }
 0x2f9   :  { %v215_v55 = vpop.xlane.xlu2 %214 }
 0x2fa   :  { %v219_v56 = vsub.f32 %v184_v31, %v215_v55 }
 0x2fc   :  { %v221_v57 = vmul.f32 1.442695, %v219_v56 }
 0x2fe   :  { %988 = vpow2.f32 %v221_v57 }
 0x301   :  { %v261_v8 = vpop.permute.xlu2 %260 }
 0x302   :  { %v266_v12 = vsel %vm243_vm11, %v261_v8, 0 }
 0x304   :  { %v1197_v58 = vpop.eup %988 }
 0x305   :  { %v225_v59 = vsel %vm212_vm10, %v1197_v58, 0.0 }
 0x306   :  { %226 = vadd.xlane.f32.xlu2 %v225_v59 }
 0x307   :  { %v218_v61 = vpop.xlane.xlu1 %217 }
 0x308   :  { %v220_v3 = vsub.f32 %v208_v34, %v218_v61 }
 0x309   :  { %v379_v17 = vpop.permute.xlu2 %378 }
 0x30a   :  { %v223_v5 = vmul.f32 1.442695, %v220_v3  ;;  %v384_v45 = vsel %vm243_vm11, %v379_v17, 0 }
 0x311   :  { %v335_v62 = vpop.xlane.xlu0 %334 }
 0x312   :  { %v339_v1 = vsub.f32 %v303_v37, %v335_v62 }
 0x314   :  { %v341_v4 = vmul.f32 1.442695, %v339_v1 }
 0x316   :  { %990 = vpow2.f32 %v341_v4 }
 0x317   :  { %992 = vpow2.f32 %v223_v5 }
 0x31c   :  { %v1201_v6 = vpop.eup %990 }
 0x31d   :  { %v345_v7 = vsel %vm212_vm10, %v1201_v6, 0.0  ;;  %v1209_v13 = vpop.eup %992 }
 0x31e   :  { %490 = vrot.lane.b32.xlu2 %v1150_v63, %s1036_s25  ;;  %346 = vadd.xlane.f32.xlu0 %v345_v7  ;;  %v228_v16 = vsel %vm212_vm10, %v1209_v13, 0.0 }
 0x31f   :  { %v238_v9 = vpop.permute.xlu1 %237 }
 0x320   :  { %v245_v11 = vsel %vm243_vm11, %v238_v9, 0 }
 0x321   :  { %254 = vmatpush.bf16.msra.mxu3 %v245_v11 }
 0x324   :  { %v358_v14 = vpop.permute.xlu0 %357 }
 0x325   :  { %275 = vmatpush.bf16.msrb.mxu3 %v266_v12  ;;  %v363_v15 = vsel %vm243_vm11, %v358_v14, 0 }
 0x326   :  { %372 = vmatpush.bf16.msrb.mxu2 %v363_v15  ;;  %229 = vadd.xlane.f32.xlu0 %v228_v16 }
 0x342   :  { %v338_v18 = vpop.xlane.xlu2 %337 }
 0x343   :  { %v340_v19 = vsub.f32 %v329_v39, %v338_v18 }
 0x345   :  { %v343_v20 = vmul.f32 1.442695, %v340_v19 }
 0x347   :  { %994 = vpow2.f32 %v343_v20 }
 0x34a   :  { %v447_v21 = vpop.xlane.xlu1 %446  ;;  %v562_v38 = vpop.xlane.xlu2 %561 }
 0x34b   :  { %v451_v22 = vsub.f32 %v418_v42, %v447_v21  ;;  %v564_v41 = vsub.f32 %v1187_v47, %v562_v38 }
 0x34d   :  { %v995_v23 = vpop.eup %994  ;;  %v453_v24 = vmul.f32 1.442695, %v451_v22  ;;  %v567_v44 = vmul.f32 1.442695, %v564_v41 }
 0x34e   :  { %v348_v25 = vsel %vm212_vm10, %v995_v23, 0.0 }
 0x34f   :  { %v450_v26 = vpop.xlane.xlu0 %449  ;;  %349 = vadd.xlane.f32.xlu1 %v348_v25  ;;  %996 = vpow2.f32 %v453_v24 }
 0x350   :  { %v452_v27 = vsub.f32 %v1182_v43, %v450_v26 }
 0x352   :  { %v455_v28 = vmul.f32 1.442695, %v452_v27 }
 0x354   :  { %998 = vpow2.f32 %v455_v28 }
 0x355   :  { %v1216_v29 = vpop.eup %996 }
 0x356   :  { %v457_v30 = vsel %vm212_vm10, %v1216_v29, 0.0 }
 0x357   :  { %v559_v31 = vpop.xlane.xlu0 %558  ;;  %458 = vadd.xlane.f32.xlu2 %v457_v30 }
 0x358   :  { %v563_v32 = vsub.f32 %v1185_v46, %v559_v31 }
 0x35a   :  { %v999_v33 = vpop.eup %998  ;;  %v565_v34 = vmul.f32 1.442695, %v563_v32 }
 0x35b   :  { %v460_v35 = vsel %vm212_vm10, %v999_v33, 0.0 }
 0x35c   :  { %1000 = vpow2.f32 %v565_v34  ;;  %461 = vadd.xlane.f32.xlu0 %v460_v35 }
 0x362   :  { %v1222_v36 = vpop.eup %1000 }
 0x363   :  { %v569_v37 = vsel %vm212_vm10, %v1222_v36, 0.0 }
 0x364   :  { %570 = vadd.xlane.f32.xlu0 %v569_v37 }
 0x368   :  { %469 = vrot.lane.b32.xlu1 %v1148_v60, %s1036_s25 }
 0x36f   :  { %602 = vrot.lane.b32.xlu2 %v1150_v63, %s1037_s26 }
 0x378   :  { %581 = vrot.lane.b32.xlu0 %v1148_v60, %s1037_s26 }
 0x379   :  { %v227_v39 = vpop.xlane.xlu2 %226 }
 0x37a   :  { %1002 = vrcp.f32 %v227_v39  ;;  %v951_v39 = vld [vmem:[%s1330_s5 + $0x8] sm:$0xff] }
 0x37b   :  { %1004 = vpow2.f32 %v567_v44  ;;  %692 = vmatpush.bf16.msra.mxu0 %v951_v39 }
 0x380   :  { %v1003_v40 = vpop.eup %1002 }
 0x381   :  { %v233_v42 = vmul.f32 %v1003_v40, %v1197_v58  ;;  %v1005_v63 = vpop.eup %1004  ;;  %v491_v53 = vpop.permute.xlu2 %490 }
 0x382   :  { %v572_v60 = vsel %vm212_vm10, %v1005_v63, 0.0  ;;  %v496_v55 = vsel %vm243_vm11, %v491_v53, 0  ;;  %v975_v53 = vld [vmem:[%s1329_s6] ss:$0 sm:$0xff] }
 0x383   :  { %v235_v43 = vpack.c.bf16 %v233_v42, %v233_v42 }
 0x385   :  { %899 = vmatmul.msk.bf16.vlgmr.msra.gmra.mxu3 %vm239_vm12, %v235_v43 }
 0x386   :  { %393 = vmatpush.bf16.msra.mxu3 %v384_v45 }
 0x391   :  { %v347_v46 = vpop.xlane.xlu0 %346 }
 0x392   :  { %1006 = vrcp.f32 %v347_v46  ;;  %573 = vadd.xlane.f32.xlu1 %v572_v60 }
 0x398   :  { %v1007_v48 = vpop.eup %1006 }
 0x399   :  { %v353_v47 = vmul.f32 %v1007_v48, %v1201_v6  ;;  %v230_v49 = vpop.xlane.xlu0 %229 }
 0x39a   :  { %1008 = vrcp.f32 %v230_v49 }
 0x39b   :  { %v355_v50 = vpack.c.bf16 %v353_v47, %v353_v47 }
 0x39d   :  { %903 = vmatmul.msk.bf16.vlgmr.msrb.gmra.mxu2 %vm239_vm12, %v355_v50 }
 0x3a0   :  { %v1009_v51 = vpop.eup %1008 }
 0x3a1   :  { %v234_v52 = vmul.f32 %v1009_v51, %v1209_v13 }
 0x3a3   :  { %v236_v54 = vpack.c.bf16 %v234_v52, %v234_v52 }
 0x3a5   :  { %900 = vmatmul.msk.bf16.vlgmr.msrb.gmra.mxu3 %vm239_vm12, %v236_v54 }
 0x3a6   :  { %505 = vmatpush.bf16.msrb.mxu3 %v496_v55 }
 0x3c2   :  { %v350_v56 = vpop.xlane.xlu1 %349 }
 0x3c3   :  { %1010 = vrcp.f32 %v350_v56  ;;  %v976_v56 = vld [vmem:[%s1331_s1] ss:$0 sm:$0xff] }
 0x3c9   :  { %v1011_v57 = vpop.eup %1010 }
 0x3ca   :  { %v354_v58 = vmul.f32 %v1011_v57, %v995_v23  ;;  %v459_v59 = vpop.xlane.xlu2 %458 }
 0x3cb   :  { %1012 = vrcp.f32 %v459_v59  ;;  %v977_v59 = vld [vmem:[%s1331_s1 + $0x1] ss:$0 sm:$0xff] }
 0x3cc   :  { %v356_v61 = vpack.c.bf16 %v354_v58, %v354_v58 }
 0x3ce   :  { %904 = vmatmul.msk.bf16.vlgmr.msra.gmra.mxu3 %vm239_vm12, %v356_v61 }
 0x3cf   :  { %v462_v62 = vpop.xlane.xlu0 %461 }
 0x3d0   :  { %1014 = vrcp.f32 %v462_v62 }
 0x3d1   :  { %v1013_v4 = vpop.eup %1012 }
 0x3d2   :  { %v603_v1 = vpop.permute.xlu2 %602  ;;  %v465_v7 = vmul.f32 %v1013_v4, %v1216_v29 }
 0x3d3   :  { %v608_v3 = vsel %vm243_vm11, %v603_v1, 0 }
 0x3d4   :  { %617 = vmatpush.bf16.msra.mxu3 %v608_v3  ;;  %v467_v12 = vpack.c.bf16 %v465_v7, %v465_v7 }
 0x3d6   :  { %v1015_v5 = vpop.eup %1014 }
 0x3d7   :  { %v466_v6 = vmul.f32 %v1015_v5, %v999_v33  ;;  %v571_v13 = vpop.xlane.xlu0 %570 }
 0x3d8   :  { %1016 = vrcp.f32 %v571_v13 }
 0x3d9   :  { %v468_v11 = vpack.c.bf16 %v466_v6, %v466_v6 }
 0x3da   :  { %v470_v8 = vpop.permute.xlu1 %469 }
 0x3db   :  { %v475_v9 = vsel %vm243_vm11, %v470_v8, 0 }
 0x3dc   :  { %484 = vmatpush.bf16.msra.mxu2 %v475_v9 }
 0x3de   :  { %908 = vmatmul.msk.bf16.vlgmr.msrb.gmra.mxu3 %vm239_vm12, %v468_v11  ;;  %v1017_v14 = vpop.eup %1016 }
 0x3df   :  { %907 = vmatmul.msk.bf16.vlgmr.msra.gmra.mxu2 %vm239_vm12, %v467_v12  ;;  %v577_v15 = vmul.f32 %v1017_v14, %v1222_v36 }
 0x3e1   :  { %v579_v18 = vpack.c.bf16 %v577_v15, %v577_v15  ;;  %v953_v15 = vld [vmem:[%s1335_s9 + $0x8] sm:$0xff] }
 0x3e2   :  { %807 = vmatpush.bf16.msra.mxu1 %v953_v15 }
 0x3ea   :  { %v582_v16 = vpop.permute.xlu0 %581 }
 0x3eb   :  { %v587_v17 = vsel %vm243_vm11, %v582_v16, 0 }
 0x3ec   :  { %596 = vmatpush.bf16.msrb.mxu2 %v587_v17 }
 0x3ef   :  { %911 = vmatmul.msk.bf16.vlgmr.msrb.gmra.mxu2 %vm239_vm12, %v579_v18  ;;  %v952_v18 = vld [vmem:[%s1335_s9] sm:$0xff] }
 0x3f0   :  { %808 = vmatpush.bf16.msra.mxu1 %v952_v18 }
 0x405   :  { %v574_v19 = vpop.xlane.xlu1 %573 }
 0x406   :  { %1018 = vrcp.f32 %v574_v19 }
 0x408   :  { %v256_v20 = vpop.f32.mrf.mxu3 }
 0x40c   :  { %v1019_v21 = vpop.eup %1018 }
 0x40d   :  { %v578_v22 = vmul.f32 %v1019_v21, %v1005_v63  ;;  %v950_v63 = vld [vmem:[%s1330_s5] sm:$0xff] }
 0x40e   :  { %693 = vmatpush.bf16.msra.mxu0 %v950_v63  ;;  %v957_v63 = vld [vmem:[%s1337_s11 + $0x18] sm:$0xff] }
 0x40f   :  { %v580_v23 = vpack.c.bf16 %v578_v22, %v578_v22  ;;  %868 = vmatpush.bf16.msra.mxu2 %v957_v63 }
 0x410   :  { %v258_v24 = vpop.f32.mrf.mxu3 }
 0x411   :  { %912 = vmatmul.msk.bf16.vlgmr.msra.gmra.mxu3 %vm239_vm12, %v580_v23 }
 0x420   :  { %v374_v25 = vpop.f32.mrf.mxu2 }
 0x421   :  { %625 = vrot.lane.b32.xlu0 %v374_v25, %s1038_s27 }
 0x428   :  { %v277_v26 = vpop.f32.mrf.mxu3  ;;  %v376_v27 = vpop.f32.mrf.mxu2 }
 0x430   :  { %v279_v28 = vpop.f32.mrf.mxu3 }
 0x451   :  { %v395_v29 = vpop.f32.mrf.mxu3 }
 0x452   :  { %627 = vrot.lane.b32.xlu2 %v395_v29, %s1038_s27 }
 0x459   :  { %v397_v30 = vpop.f32.mrf.mxu3 }
 0x461   :  { %v507_v31 = vpop.f32.mrf.mxu3 }
 0x462   :  { %v486_v32 = vpop.f32.mrf.mxu2  ;;  %635 = vrot.lane.b32.xlu2 %v507_v31, %s1039_s28 }
 0x463   :  { %633 = vrot.lane.b32.xlu0 %v486_v32, %s1039_s28 }
 0x469   :  { %v509_v33 = vpop.f32.mrf.mxu3 }
 0x46a   :  { %v488_v34 = vpop.f32.mrf.mxu2 }
 0x472   :  { %v598_v35 = vpop.f32.mrf.mxu2 }
 0x473   :  { %641 = vrot.lane.b32.xlu0 %v598_v35, %s1040_s0 }
 0x47a   :  { %v600_v36 = vpop.f32.mrf.mxu2 }
 0x47b   :  { %v979_v36 = vld [vmem:[%s1333_s8] ss:$0 sm:$0xff] }
 0x493   :  { %v626_v40 = vpop.permute.xlu0 %625 }
 0x494   :  { %v619_v37 = vpop.f32.mrf.mxu3  ;;  %v647_v42 = vsel %vm168_vm9, %v256_v20, %v626_v40 }
 0x495   :  { %643 = vrot.lane.b32.xlu1 %v619_v37, %s1040_s0 }
 0x49c   :  { %v621_v38 = vpop.f32.mrf.mxu3 }
 0x4ac   :  { %v628_v46 = vpop.permute.xlu2 %627 }
 0x4ad   :  { %v648_v48 = vsel %vm168_vm9, %v277_v26, %v628_v46  ;;  %v956_v46 = vld [vmem:[%s1337_s11 + $0x10] sm:$0xff] }
 0x4ae   :  { %869 = vmatpush.bf16.msra.mxu2 %v956_v46 }
 0x4bc   :  { %v636_v60 = vpop.permute.xlu2 %635 }
 0x4bd   :  { %v651_v47 = vsel %vm649_vm14, %v648_v48, %v636_v60  ;;  %v955_v60 = vld [vmem:[%s1337_s11 + $0x8] sm:$0xff]  ;;  %v954_v48 = vld [vmem:[%s1337_s11] sm:$0xff] }
 0x4be   :  { %870 = vmatpush.bf16.msra.mxu2 %v955_v60 }
 0x4c2   :  { %871 = vmatpush.bf16.msra.mxu2 %v954_v48 }
 0x4d5   :  { %v634_v41 = vpop.permute.xlu0 %633 }
 0x4d6   :  { %v650_v43 = vsel %vm649_vm14, %v647_v42, %v634_v41 }
 0x4e5   :  { %v642_v44 = vpop.permute.xlu0 %641 }
 0x4e6   :  { %v653_v45 = vsel %vm652_vm13, %v650_v43, %v642_v44 }
 0x4e7   :  { %657 = vst [vmem:[#allocation1] ss:$2 sm:$0xff] %v653_v45 }
 0x507   :  { %v644_v49 = vpop.permute.xlu1 %643 }
 0x508   :  { %v654_v50 = vsel %vm652_vm13, %v651_v47, %v644_v49  ;;  %v980_v47 = vld [vmem:[%s1334_s10] ss:$0 sm:$0xff] }
 0x509   :  { %659 = vst [vmem:[#allocation1 + $0x1] ss:$2 sm:$0xff] %v654_v50 }
 0x510   :  { %v660_v51 = vld.sshfl [vmem:[#allocation1] sm:$0xff pattern:$0x75316420] }
 0x511   :  { %v662_v52 = vpack.c.bf16 %v660_v51, %v660_v51 }
 0x513   :  { %921 = vmatmul.msk.bf16.vlgmr.msra.gmra.mxu0 %vm135_vm8, %v662_v52 }
 0x590   :  { %v695_v54 = vpop.f32.mrf.mxu0 }
 0x591   :  { %v696_v55 = vadd.f32 %v975_v53, %v695_v54 }
 0x593   :  { %v700_v57 = vrot.slane %v696_v55, 4  ;;  %v1266_v58 = vadd.f32 %v696_v55, %v1114_v0 }
 0x595   :  { %v712_v61 = vadd.f32 %v976_v56, %v1266_v58  ;;  %v1273_v62 = vadd.f32 %v700_v57, %v1121_v2 }
 0x597   :  { %v716_v1 = vsel %vm49_vm0, %v712_v61, 0.0  ;;  %v713_v3 = vadd.f32 %v977_v59, %v1273_v62 }
 0x598   :  { %v697_v4 = vpop.f32.mrf.mxu0  ;;  %717 = vadd.xlane.f32.xlu2 %v716_v1 }
 0x599   :  { %v719_v5 = vsel %vm49_vm0, %v713_v3, 0.0  ;;  %v981_v4 = vld [vmem:[%s1336_s12] ss:$0 sm:$0xff] }
 0x59a   :  { %720 = vadd.xlane.f32.xlu0 %v719_v5 }
 0x60b   :  { %v718_v0 = vpop.xlane.xlu2 %717 }
 0x60c   :  { %v722_v6 = vmul.f32 %v718_v0, %v1125_v10 }
 0x60d   :  { %v721_v7 = vpop.xlane.xlu0 %720 }
 0x60e   :  { %v724_v8 = vsub.f32 %v712_v61, %v722_v6  ;;  %v723_v9 = vmul.f32 %v721_v7, %v1125_v10 }
 0x610   :  { %v725_v11 = vsub.f32 %v713_v3, %v723_v9  ;;  %v726_v12 = vmul.f32 %v724_v8, %v724_v8 }
 0x612   :  { %v728_v2 = vsel %vm49_vm0, %v726_v12, 0.0  ;;  %v727_v13 = vmul.f32 %v725_v11, %v725_v11 }
 0x613   :  { %729 = vadd.xlane.f32.xlu1 %v728_v2 }
 0x614   :  { %v731_v14 = vsel %vm49_vm0, %v727_v13, 0.0 }
 0x615   :  { %732 = vadd.xlane.f32.xlu2 %v731_v14 }
 0x686   :  { %v730_v16 = vpop.xlane.xlu1 %729 }
 0x687   :  { %v734_v17 = vmul.f32 %v730_v16, %v1125_v10 }
 0x688   :  { %v733_v19 = vpop.xlane.xlu2 %732 }
 0x689   :  { %v736_v20 = vadd.f32 1e-05, %v734_v17  ;;  %v735_v21 = vmul.f32 %v733_v19, %v1125_v10  ;;  %v978_v10 = vld [vmem:[%s1332_s7] ss:$0 sm:$0xff] }
 0x68b   :  { %1020 = vrsqrt.f32 %v736_v20  ;;  %v737_v22 = vadd.f32 1e-05, %v735_v21  ;;  %vm744_vm1 = vweird.f32 %v736_v20 }
 0x68d   :  { %1022 = vrsqrt.f32 %v737_v22  ;;  %vm754_vm4 = vweird.f32 %v737_v22 }
 0x691   :  { %v1021_v23 = vpop.eup %1020 }
 0x692   :  { %v739_v24 = vmul.f32 %v1021_v23, %v736_v20  ;;  %vm745_vm15 = vweird.f32 %v1021_v23 }
 0x693   :  { %v1023_v25 = vpop.eup %1022  ;;  %vm746_vm3 = vmor %vm744_vm1, %vm745_vm15 }
 0x694   :  { %v740_v26 = vmul.f32 %v1021_v23, %v739_v24  ;;  %v749_v27 = vmul.f32 %v1023_v25, %v737_v22  ;;  %vm755_vm2 = vweird.f32 %v1023_v25 }
 0x695   :  { %vm756_vm5 = vmor %vm754_vm4, %vm755_vm2 }
 0x696   :  { %v741_v28 = vmul.f32 0.5, %v740_v26  ;;  %v750_v29 = vmul.f32 %v1023_v25, %v749_v27 }
 0x698   :  { %v742_v30 = vsub.f32 1.5, %v741_v28  ;;  %v751_v31 = vmul.f32 0.5, %v750_v29 }
 0x69a   :  { %v743_v32 = vmul.f32 %v1021_v23, %v742_v30  ;;  %v752_v33 = vsub.f32 1.5, %v751_v31 }
 0x69c   :  { %v747_v34 = vsel %vm746_vm3, %v1021_v23, %v743_v32  ;;  %v753_v35 = vmul.f32 %v1023_v25, %v752_v33 }
 0x69d   :  { %v758_v37 = vmul.f32 %v747_v34, %v724_v8 }
 0x69e   :  { %v757_v38 = vsel %vm756_vm5, %v1023_v25, %v753_v35 }
 0x69f   :  { %v763_v39 = vmul.f32 %v978_v10, %v758_v37  ;;  %v759_v40 = vmul.f32 %v757_v38, %v725_v11 }
 0x6a1   :  { %v768_v41 = vadd.f32 %v979_v36, %v763_v39  ;;  %v764_v42 = vmul.f32 %v978_v10, %v759_v40 }
 0x6a3   :  { %772 = vst [vmem:[#allocation1] ss:$2 sm:$0xff] %v768_v41  ;;  %v769_v43 = vadd.f32 %v979_v36, %v764_v42 }
 0x6a5   :  { %774 = vst [vmem:[#allocation1 + $0x1] ss:$2 sm:$0xff] %v769_v43 }
 0x6ac   :  { %v775_v44 = vld.sshfl [vmem:[#allocation1] sm:$0xff pattern:$0x75316420] }
 0x6ad   :  { %v777_v45 = vpack.c.bf16 %v775_v44, %v775_v44 }
 0x6af   :  { %930 = vmatmul.msk.bf16.vlgmr.msra.gmra.mxu1 %vm135_vm8, %v777_v45 }
 0x72c   :  { %v810_v49 = vpop.f32.mrf.mxu1 }
 0x72d   :  { %v811_v50 = vadd.f32 %v980_v47, %v810_v49 }
 0x72f   :  { %v815_v51 = vmul.f32 0.044715, %v811_v50  ;;  %v814_v59 = vmul.f32 0.5, %v811_v50 }
 0x731   :  { %v816_v52 = vmul.f32 %v815_v51, %v811_v50 }
 0x733   :  { %v817_v53 = vmul.f32 %v816_v52, %v811_v50 }
 0x734   :  { %v812_v54 = vpop.f32.mrf.mxu1 }
 0x735   :  { %v818_v55 = vadd.f32 %v817_v53, %v811_v50 }
 0x737   :  { %v819_v56 = vmul.f32 0.7978846, %v818_v55 }
 0x739   :  { %1024 = vtanh.f32 %v819_v56 }
 0x73f   :  { %v1025_v57 = vpop.eup %1024 }
 0x740   :  { %v821_v61 = vadd.f32 1.0, %v1025_v57 }
 0x742   :  { %v822_v1 = vmul.f32 %v821_v61, %v814_v59 }
 0x744   :  { %v823_v3 = vpack.c.bf16 %v822_v1, %v822_v1 }
 0x746   :  { %947 = vmatmul.msk.bf16.vlgmr.msra.gmra.mxu2 %vm860_vm6, %v823_v3 }
 0x7c9   :  { %v873_v5 = vpop.f32.mrf.mxu2 }
 0x7ca   :  { %v874_v0 = vadd.f32 %v981_v4, %v873_v5 }
 0x7cc   :  { %v878_v6 = vrot.slane %v874_v0, 4  ;;  %v880_v7 = vadd.f32 %v874_v0, %v1266_v58 }
 0x7ce   :  { %v881_v8 = vadd.f32 %v878_v6, %v1273_v62  ;;  %882 = vst.msk [vmem:[%s1338_s13] sm:$0xf] %vm49_vm0, %v880_v7 }
 0x7d0   :  { %883 = vst.msk [vmem:[%s1338_s13 + $0x4] sm:$0xf] %vm49_vm0, %v881_v8 }
 0x7d1   :  { %v875_v9 = vpop.f32.mrf.mxu2 }

// kernel: run.20
= control target key start
LH: loop header
LB: loop body
LE: loop exit
PB: predicated region body
PF: predicated region fallthrough
CT: control target
= control target key end

     0   :  { %vm65_vm0 = vcmask 392192   ;;  %vm215_vm1 = vcmask 523264   ;;  %vm245_vm2 = vcmask 386048   ;;  %s463_s1 = inlined_call_operand.vmem [shape: bf16[48,192], index: 1, kind: input, shape index: {}]   ;;  %s464_s3 = inlined_call_operand.vmem [shape: bf16[192,48], index: 3, kind: input, shape index: {}]   ;;  %s465_s0 = inlined_call_operand.vmem [shape: f32[2,48], index: 0, kind: input, shape index: {}]   ;;  %s466_s4 = inlined_call_operand.vmem [shape: f32[1,48], index: 4, kind: input, shape index: {}]   ;;  %s467_s2 = inlined_call_operand.vmem [shape: f32[1,192], index: 2, kind: input, shape index: {}]   ;;  %s468_s5 = inlined_call_operand.vmem [shape: f32[2,48], index: 5, kind: output, shape index: {}]  }
   0x1   :  { %v269_v0 = vld [vmem:[%s463_s1 + $0x20] sm:$0xf]  ;;  %v331_v1 = vld [vmem:[%s463_s1 + $0x24] sm:$0xf0]  ;;  %v330_v2 = vld [vmem:[%s463_s1 + $0x24] sm:$0xf] }
   0x2   :  { %v270_v3 = vor.u32 %v331_v1, %v269_v0  ;;  %v271_v4 = vld [vmem:[%s463_s1 + $0x28] sm:$0xf0]  ;;  %v261_v5 = vld [vmem:[%s463_s1 + $0x10] sm:$0xf]  ;;  %v329_v6 = vld [vmem:[%s463_s1 + $0x14] sm:$0xf0] }
   0x3   :  { %v274_v7 = vor.u32 %v330_v2, %v271_v4  ;;  %v328_v8 = vld [vmem:[%s463_s1 + $0x14] sm:$0xf]  ;;  %v263_v9 = vld [vmem:[%s463_s1 + $0x18] sm:$0xf0]  ;;  %v262_v10 = vor.u32 %v329_v6, %v261_v5  ;;  %v253_v12 = vld [vmem:[%s463_s1] sm:$0xf] }
   0x4   :  { %74 = vmatpush.bf16.msra.mxu0 %v270_v3  ;;  %v266_v11 = vor.u32 %v328_v8, %v263_v9  ;;  %v327_v13 = vld [vmem:[%s463_s1 + $0x4] sm:$0xf0]  ;;  %v339_v14 = vld [vmem:[%s464_s3 + $0x38] sm:$0xff]  ;;  %v326_v15 = vld [vmem:[%s463_s1 + $0x4] sm:$0xf] }
   0x5   :  { %87 = vmatpush.bf16.msra.mxu1 %v274_v7  ;;  %v255_v16 = vld [vmem:[%s463_s1 + $0x8] sm:$0xf0]  ;;  %219 = vmatpush.bf16.msra.mxu2 %v339_v14  ;;  %v338_v17 = vld [vmem:[%s464_s3 + $0x30] sm:$0xff]  ;;  %v254_v18 = vor.u32 %v327_v13, %v253_v12  ;;  %v21_v19 = vld [vmem:[%s465_s0] sm:$0x3] }
   0x6   :  { %v258_v20 = vor.u32 %v326_v15, %v255_v16  ;;  %v22_v21 = vpack.c.bf16 %v21_v19, %v21_v19  ;;  %v337_v22 = vld [vmem:[%s464_s3 + $0x28] sm:$0xff]  ;;  %v336_v23 = vld [vmem:[%s464_s3 + $0x20] sm:$0xff]  ;;  %v335_v24 = vld [vmem:[%s464_s3 + $0x18] sm:$0xff] }
   0x7   :  { %v343_v25 = vld [vmem:[%s464_s3 + $0x58] sm:$0xff]  ;;  %v342_v26 = vld [vmem:[%s464_s3 + $0x50] sm:$0xff]  ;;  %v341_v28 = vld [vmem:[%s464_s3 + $0x48] sm:$0xff] }
   0x8   :  { %75 = vmatpush.bf16.msra.mxu0 %v262_v10  ;;  %236 = vmatpush.bf16.msra.mxu3 %v343_v25  ;;  %v334_v27 = vld [vmem:[%s464_s3 + $0x10] sm:$0xff]  ;;  %v333_v29 = vld [vmem:[%s464_s3 + $0x8] sm:$0xff]  ;;  %v340_v30 = vld [vmem:[%s464_s3 + $0x40] sm:$0xff] }
   0x9   :  { %88 = vmatpush.bf16.msra.mxu1 %v266_v11  ;;  %220 = vmatpush.bf16.msra.mxu2 %v338_v17  ;;  %v332_v31 = vld [vmem:[%s464_s3] sm:$0xff] }
   0xa   :  { %v29_v32 = vld [vmem:[%s467_s2] sm:$0x3] }
   0xb   :  { %v31_v33 = vperm.slane %v29_v32, 0  ;;  %v32_v34 = vperm.slane %v29_v32, 1  ;;  %v344_v61 = vld [vmem:[%s466_s4] ss:$0 sm:$0xff] }
   0xc   :  { %76 = vmatpush.bf16.msra.mxu0 %v254_v18  ;;  %237 = vmatpush.bf16.msra.mxu3 %v342_v26 }
   0xd   :  { %89 = vmatpush.bf16.msra.mxu1 %v258_v20  ;;  %221 = vmatpush.bf16.msra.mxu2 %v337_v22 }
   0xf   :  { %275 = vmatmul.msk.bf16.vlgmr.msra.gmra.mxu0 %vm65_vm0, %v22_v21 }
  0x10   :  { %276 = vmatmul.msk.bf16.vlgmr.msra.gmra.mxu1 %vm65_vm0, %v22_v21  ;;  %238 = vmatpush.bf16.msra.mxu3 %v341_v28 }
  0x11   :  { %222 = vmatpush.bf16.msra.mxu2 %v336_v23 }
  0x14   :  { %239 = vmatpush.bf16.msra.mxu3 %v340_v30 }
  0x15   :  { %223 = vmatpush.bf16.msra.mxu2 %v335_v24 }
  0x19   :  { %224 = vmatpush.bf16.msra.mxu2 %v334_v27 }
  0x1d   :  { %225 = vmatpush.bf16.msra.mxu2 %v333_v29 }
  0x21   :  { %226 = vmatpush.bf16.msra.mxu2 %v332_v31 }
  0x8c   :  { %v78_v35 = vpop.f32.mrf.mxu0 }
  0x8d   :  { %v79_v36 = vadd.f32 %v78_v35, %v31_v33  ;;  %v91_v37 = vpop.f32.mrf.mxu1 }
  0x8e   :  { %v92_v38 = vadd.f32 %v91_v37, %v32_v34 }
  0x8f   :  { %v97_v39 = vmul.f32 0.044715, %v79_v36  ;;  %v95_v53 = vmul.f32 0.5, %v79_v36 }
  0x90   :  { %v98_v40 = vmul.f32 0.044715, %v92_v38  ;;  %v96_v55 = vmul.f32 0.5, %v92_v38 }
  0x91   :  { %v99_v41 = vmul.f32 %v97_v39, %v79_v36 }
  0x92   :  { %v100_v42 = vmul.f32 %v98_v40, %v92_v38 }
  0x93   :  { %v101_v43 = vmul.f32 %v99_v41, %v79_v36 }
  0x94   :  { %v80_v44 = vpop.f32.mrf.mxu0  ;;  %v102_v45 = vmul.f32 %v100_v42, %v92_v38 }
  0x95   :  { %v93_v46 = vpop.f32.mrf.mxu1  ;;  %v103_v47 = vadd.f32 %v101_v43, %v79_v36 }
  0x96   :  { %v104_v48 = vadd.f32 %v102_v45, %v92_v38 }
  0x97   :  { %v105_v49 = vmul.f32 0.7978846, %v103_v47 }
  0x98   :  { %v106_v50 = vmul.f32 0.7978846, %v104_v48 }
  0x99   :  { %345 = vtanh.f32 %v105_v49 }
  0x9a   :  { %347 = vtanh.f32 %v106_v50 }
  0x9f   :  { %v346_v51 = vpop.eup %345 }
  0xa0   :  { %v348_v52 = vpop.eup %347  ;;  %v109_v54 = vadd.f32 1.0, %v346_v51 }
  0xa1   :  { %v110_v56 = vadd.f32 1.0, %v348_v52 }
  0xa2   :  { %v111_v57 = vmul.f32 %v109_v54, %v95_v53 }
  0xa3   :  { %v112_v58 = vmul.f32 %v110_v56, %v96_v55 }
  0xa4   :  { %v113_v59 = vpack.c.bf16 %v111_v57, %v111_v57 }
  0xa5   :  { %v114_v60 = vpack.c.bf16 %v112_v58, %v112_v58 }
  0xa6   :  { %227 = vmatmul.bf16.vlgmr.msra.gmra.mxu2 %v113_v59 }
  0xa7   :  { %325 = vmatmul.msk.bf16.vlgmr.msra.gmra.mxu3 %vm215_vm1, %v114_v60 }
 0x129   :  { %v228_v62 = vpop.f32.mrf.mxu2 }
 0x12a   :  { %v229_v63 = vadd.f32 %v344_v61, %v228_v62  ;;  %v241_v0 = vpop.f32.mrf.mxu3 }
 0x12c   :  { %v242_v1 = vadd.f32 %v241_v0, %v229_v63 }
 0x12e   :  { %246 = vst.msk [vmem:[%s468_s5] sm:$0x3] %vm245_vm2, %v242_v1 }
 0x131   :  { %v230_v2 = vpop.f32.mrf.mxu2 }
 0x132   :  { %v243_v3 = vpop.f32.mrf.mxu3 }

// kernel: run.22
= control target key start
LH: loop header
LB: loop body
LE: loop exit
PB: predicated region body
PF: predicated region fallthrough
CT: control target
= control target key end

     0   :  { %vm20_vm0 = vcmask 392192   ;;  %v151_v8 = vmov 48.0   ;;  %s229_s0 = inlined_call_operand.vmem [shape: f32[2,16,48], index: 0, kind: input, shape index: {}]   ;;  %s230_s1 = inlined_call_operand.vmem [shape: f32[1,48], index: 1, kind: input, shape index: {}]   ;;  %s231_s2 = inlined_call_operand.vmem [shape: f32[1,48], index: 2, kind: input, shape index: {}]   ;;  %s232_s3 = inlined_call_operand.vmem [shape: f32[2,16,48], index: 3, kind: output, shape index: {}]  }
   0x1   :  { %v16_v0 = vld [vmem:[%s229_s0 + $0x10] sm:$0xff]  ;;  %v14_v1 = vld [vmem:[%s229_s0] sm:$0xff]  ;;  %v17_v4 = vld [vmem:[%s229_s0 + $0x18] sm:$0xff]  ;;  %141 = vrcp.f32 %v151_v8 }
   0x2   :  { %v27_v2 = vsel %vm20_vm0, %v16_v0, 0.0  ;;  %v21_v3 = vsel %vm20_vm0, %v14_v1, 0.0  ;;  %v15_v5 = vld [vmem:[%s229_s0 + $0x8] sm:$0xff]  ;;  %v30_v6 = vsel %vm20_vm0, %v17_v4, 0.0  ;;  %v139_v61 = vld [vmem:[%s230_s1] ss:$0 sm:$0xff] }
   0x3   :  { %28 = vadd.xlane.f32.xlu1 %v27_v2  ;;  %22 = vadd.xlane.f32.xlu0 %v21_v3  ;;  %v24_v7 = vsel %vm20_vm0, %v15_v5, 0.0  ;;  %v140_v2 = vld [vmem:[%s231_s2] ss:$0 sm:$0xff] }
   0x7   :  { %v142_v9 = vpop.eup %141 }
   0x8   :  { %v34_v10 = vmul.f32 48.0, %v142_v9  ;;  %vm38_vm1 = vweird.f32 %v142_v9 }
   0xa   :  { %v35_v11 = vsub.f32 1.0, %v34_v10 }
   0xb   :  { %31 = vadd.xlane.f32.xlu1 %v30_v6  ;;  %25 = vadd.xlane.f32.xlu0 %v24_v7 }
   0xc   :  { %v36_v12 = vmul.f32 %v142_v9, %v35_v11 }
   0xe   :  { %v37_v13 = vadd.f32 %v142_v9, %v36_v12 }
  0x10   :  { %v39_v14 = vsel %vm38_vm1, %v142_v9, %v37_v13 }
  0x76   :  { %v29_v15 = vpop.xlane.xlu1 %28  ;;  %v23_v16 = vpop.xlane.xlu0 %22 }
  0x77   :  { %v42_v17 = vmul.f32 %v39_v14, %v29_v15  ;;  %v40_v18 = vmul.f32 %v39_v14, %v23_v16 }
  0x79   :  { %v188_v19 = vsub.f32 %v16_v0, %v42_v17  ;;  %v44_v20 = vsub.f32 %v14_v1, %v40_v18 }
  0x7b   :  { %v50_v21 = vmul.f32 %v188_v19, %v188_v19  ;;  %v48_v22 = vmul.f32 %v44_v20, %v44_v20 }
  0x7d   :  { %v58_v23 = vsel %vm20_vm0, %v50_v21, 0.0  ;;  %v52_v24 = vsel %vm20_vm0, %v48_v22, 0.0 }
  0x7e   :  { %v32_v25 = vpop.xlane.xlu1 %31  ;;  %59 = vadd.xlane.f32.xlu0 %v58_v23  ;;  %53 = vadd.xlane.f32.xlu2 %v52_v24  ;;  %v26_v26 = vpop.xlane.xlu0 %25 }
  0x7f   :  { %v43_v27 = vmul.f32 %v39_v14, %v32_v25  ;;  %v41_v28 = vmul.f32 %v39_v14, %v26_v26 }
  0x81   :  { %v194_v29 = vsub.f32 %v17_v4, %v43_v27  ;;  %v196_v30 = vsub.f32 %v15_v5, %v41_v28 }
  0x83   :  { %v51_v31 = vmul.f32 %v194_v29, %v194_v29  ;;  %v49_v32 = vmul.f32 %v196_v30, %v196_v30 }
  0x85   :  { %v61_v33 = vsel %vm20_vm0, %v51_v31, 0.0  ;;  %v55_v34 = vsel %vm20_vm0, %v49_v32, 0.0 }
  0x86   :  { %62 = vadd.xlane.f32.xlu1 %v61_v33  ;;  %56 = vadd.xlane.f32.xlu2 %v55_v34 }
  0xf1   :  { %v54_v35 = vpop.xlane.xlu2 %53  ;;  %v60_v36 = vpop.xlane.xlu0 %59 }
  0xf2   :  { %v64_v37 = vmul.f32 %v54_v35, %v39_v14  ;;  %v66_v38 = vmul.f32 %v60_v36, %v39_v14 }
  0xf4   :  { %v68_v39 = vadd.f32 1e-05, %v64_v37  ;;  %v70_v40 = vadd.f32 1e-05, %v66_v38 }
  0xf6   :  { %143 = vrsqrt.f32 %v68_v39  ;;  %vm78_vm4 = vweird.f32 %v68_v39  ;;  %vm98_vm6 = vweird.f32 %v70_v40 }
  0xf7   :  { %145 = vrsqrt.f32 %v70_v40 }
  0xf9   :  { %v63_v41 = vpop.xlane.xlu1 %62  ;;  %v57_v42 = vpop.xlane.xlu2 %56 }
  0xfa   :  { %v67_v43 = vmul.f32 %v63_v41, %v39_v14  ;;  %v65_v44 = vmul.f32 %v57_v42, %v39_v14 }
  0xfc   :  { %v144_v45 = vpop.eup %143  ;;  %v71_v46 = vadd.f32 1e-05, %v67_v43  ;;  %v69_v47 = vadd.f32 1e-05, %v65_v44 }
  0xfd   :  { %v146_v48 = vpop.eup %145  ;;  %v73_v49 = vmul.f32 %v144_v45, %v68_v39  ;;  %vm79_vm2 = vweird.f32 %v144_v45 }
  0xfe   :  { %v93_v50 = vmul.f32 %v146_v48, %v70_v40  ;;  %147 = vrsqrt.f32 %v71_v46  ;;  %vm99_vm3 = vweird.f32 %v146_v48  ;;  %vm80_vm5 = vmor %vm78_vm4, %vm79_vm2  ;;  %vm108_vm10 = vweird.f32 %v71_v46 }
  0xff   :  { %v74_v51 = vmul.f32 %v144_v45, %v73_v49  ;;  %149 = vrsqrt.f32 %v69_v47  ;;  %vm100_vm7 = vmor %vm98_vm6, %vm99_vm3  ;;  %vm88_vm12 = vweird.f32 %v69_v47 }
 0x100   :  { %v94_v52 = vmul.f32 %v146_v48, %v93_v50 }
 0x101   :  { %v75_v53 = vmul.f32 0.5, %v74_v51 }
 0x102   :  { %v95_v54 = vmul.f32 0.5, %v94_v52 }
 0x103   :  { %v76_v55 = vsub.f32 1.5, %v75_v53 }
 0x104   :  { %v148_v56 = vpop.eup %147  ;;  %v96_v57 = vsub.f32 1.5, %v95_v54 }
 0x105   :  { %v150_v58 = vpop.eup %149  ;;  %v77_v59 = vmul.f32 %v144_v45, %v76_v55  ;;  %v103_v60 = vmul.f32 %v148_v56, %v71_v46  ;;  %vm109_vm8 = vweird.f32 %v148_v56 }
 0x106   :  { %v97_v62 = vmul.f32 %v146_v48, %v96_v57  ;;  %v83_v63 = vmul.f32 %v150_v58, %v69_v47  ;;  %vm89_vm9 = vweird.f32 %v150_v58  ;;  %vm110_vm11 = vmor %vm108_vm10, %vm109_vm8 }
 0x107   :  { %v81_v0 = vsel %vm80_vm5, %v144_v45, %v77_v59  ;;  %v104_v1 = vmul.f32 %v148_v56, %v103_v60  ;;  %vm90_vm13 = vmor %vm88_vm12, %vm89_vm9 }
 0x108   :  { %v112_v3 = vmul.f32 %v81_v0, %v44_v20  ;;  %v101_v4 = vsel %vm100_vm7, %v146_v48, %v97_v62  ;;  %v84_v5 = vmul.f32 %v150_v58, %v83_v63 }
 0x109   :  { %v114_v6 = vmul.f32 %v101_v4, %v188_v19  ;;  %v105_v7 = vmul.f32 0.5, %v104_v1 }
 0x10a   :  { %v119_v8 = vmul.f32 %v139_v61, %v112_v3  ;;  %v85_v9 = vmul.f32 0.5, %v84_v5 }
 0x10b   :  { %v121_v10 = vmul.f32 %v139_v61, %v114_v6  ;;  %v106_v11 = vsub.f32 1.5, %v105_v7 }
 0x10c   :  { %v126_v12 = vadd.f32 %v140_v2, %v119_v8  ;;  %v86_v13 = vsub.f32 1.5, %v85_v9 }
 0x10d   :  { %v128_v14 = vadd.f32 %v140_v2, %v121_v10  ;;  %v107_v15 = vmul.f32 %v148_v56, %v106_v11 }
 0x10e   :  { %130 = vst.msk [vmem:[%s232_s3] sm:$0xff] %vm20_vm0, %v126_v12  ;;  %v87_v16 = vmul.f32 %v150_v58, %v86_v13 }
 0x10f   :  { %132 = vst.msk [vmem:[%s232_s3 + $0x10] sm:$0xff] %vm20_vm0, %v128_v14  ;;  %v111_v17 = vsel %vm110_vm11, %v148_v56, %v107_v15 }
 0x110   :  { %v115_v18 = vmul.f32 %v111_v17, %v194_v29  ;;  %v91_v19 = vsel %vm90_vm13, %v150_v58, %v87_v16 }
 0x111   :  { %v113_v20 = vmul.f32 %v91_v19, %v196_v30 }
 0x112   :  { %v122_v21 = vmul.f32 %v139_v61, %v115_v18 }
 0x113   :  { %v120_v22 = vmul.f32 %v139_v61, %v113_v20 }
 0x114   :  { %v129_v23 = vadd.f32 %v140_v2, %v122_v21 }
 0x115   :  { %v127_v24 = vadd.f32 %v140_v2, %v120_v22 }
 0x116   :  { %133 = vst.msk [vmem:[%s232_s3 + $0x18] sm:$0xff] %vm20_vm0, %v129_v23 }
 0x117   :  { %131 = vst.msk [vmem:[%s232_s3 + $0x8] sm:$0xff] %vm20_vm0, %v127_v24 }

// kernel: run.23
= control target key start
LH: loop header
LB: loop body
LE: loop exit
PB: predicated region body
PF: predicated region fallthrough
CT: control target
= control target key end

     0   :  { %vm48_vm0 = vcmask 392192   ;;  %vm73_vm1 = vcmask 523264   ;;  %s152_s1 = inlined_call_operand.vmem [shape: bf16[48,64], index: 1, kind: input, shape index: {}]   ;;  %s153_s2 = inlined_call_operand.vmem [shape: f32[1,64], index: 2, kind: input, shape index: {}]   ;;  %s154_s0 = inlined_call_operand.vmem [shape: f32[24,48], index: 0, kind: input, shape index: {}]   ;;  %s155_s3 = inlined_call_operand.vmem [shape: f32[24,64], index: 3, kind: output, shape index: {}]  }
   0x1   :  { %v97_v0 = vld [vmem:[%s152_s1 + $0x10] sm:$0xff]  ;;  %v96_v1 = vld [vmem:[%s152_s1 + $0x8] sm:$0xff]  ;;  %v95_v2 = vld [vmem:[%s152_s1] sm:$0xff] }
   0x2   :  { %60 = vmatpush.bf16.msra.mxu0 %v97_v0  ;;  %98 = vmatpush.bf16.msra.mxu1 %v97_v0  ;;  %v15_v3 = vld [vmem:[%s154_s0] sm:$0xff]  ;;  %v16_v4 = vld [vmem:[%s154_s0 + $0x8] sm:$0xff]  ;;  %v17_v5 = vld [vmem:[%s154_s0 + $0x10] sm:$0xff] }
   0x3   :  { %v18_v6 = vpack.c.bf16 %v16_v4, %v15_v3  ;;  %v19_v7 = vpack.c.bf16 %v17_v5, %v17_v5  ;;  %v101_v8 = vld [vmem:[%s153_s2] ss:$0 sm:$0xff] }
   0x6   :  { %61 = vmatpush.bf16.msra.mxu0 %v96_v1  ;;  %99 = vmatpush.bf16.msra.mxu1 %v96_v1 }
   0xa   :  { %62 = vmatpush.bf16.msra.mxu0 %v95_v2  ;;  %100 = vmatpush.bf16.msra.mxu1 %v95_v2 }
   0xd   :  { %93 = vmatmul.msk.bf16.vlgmr.msra.gmra.mxu0 %vm48_vm0, %v18_v6  ;;  %94 = vmatmul.msk.bf16.vlgmr.msra.gmra.mxu1 %vm48_vm0, %v19_v7 }
  0x8a   :  { %v64_v9 = vpop.f32.mrf.mxu0  ;;  %v69_v10 = vpop.f32.mrf.mxu1 }
  0x8b   :  { %v65_v11 = vadd.f32 %v101_v8, %v64_v9  ;;  %v70_v12 = vadd.f32 %v101_v8, %v69_v10 }
  0x8d   :  { %74 = vst.msk [vmem:[%s155_s3] sm:$0xff] %vm73_vm1, %v65_v11 }
  0x8e   :  { %76 = vst.msk [vmem:[%s155_s3 + $0x10] sm:$0xff] %vm73_vm1, %v70_v12 }
  0x92   :  { %v66_v13 = vpop.f32.mrf.mxu0  ;;  %v71_v14 = vpop.f32.mrf.mxu1 }
  0x93   :  { %v67_v15 = vadd.f32 %v101_v8, %v66_v13 }
  0x95   :  { %75 = vst.msk [vmem:[%s155_s3 + $0x8] sm:$0xff] %vm73_vm1, %v67_v15 }

// kernel: run.21
= control target key start
LH: loop header
LB: loop body
LE: loop exit
PB: predicated region body
PF: predicated region fallthrough
CT: control target
= control target key end

     0   :  { %vm51_vm0 = vcmask 392192   ;;  %v1672_v8 = vmov 48.0   ;;  %s1675_s25 = smov 88   ;;  %s1676_s26 = smov 120   ;;  %vm236_vm14 = vcmask 64512   ;;  %vm289_vm15 = vcmask 130048   ;;  %s2215_s0 = inlined_call_operand.vmem [shape: f32[2,16,48], index: 0, kind: input, shape index: {}, may-alias: {0,13}]   ;;  %s2216_s2 = inlined_call_operand.vmem [shape: f32[1,48], index: 2, kind: input, shape index: {}]   ;;  %s2217_s3 = inlined_call_operand.vmem [shape: f32[1,48], index: 3, kind: input, shape index: {}]   ;;  %s2218_s4 = inlined_call_operand.vmem [shape: bf16[48,96], index: 4, kind: input, shape index: {}]   ;;  %s2219_s6 = inlined_call_operand.vmem [shape: f32[1,48], index: 6, kind: input, shape index: {}]   ;;  %s2220_s5 = inlined_call_operand.vmem [shape: bf16[32,48], index: 5, kind: input, shape index: {}]   ;;  %s2221_s1 = inlined_call_operand.vmem [shape: f32[2,1,48], index: 1, kind: input, shape index: {}]   ;;  %s2222_s7 = inlined_call_operand.vmem [shape: f32[1,48], index: 7, kind: input, shape index: {}]   ;;  %s2223_s8 = inlined_call_operand.vmem [shape: f32[1,48], index: 8, kind: input, shape index: {}]   ;;  %s2224_s9 = inlined_call_operand.vmem [shape: bf16[48,192], index: 9, kind: input, shape index: {}]   ;;  %s2225_s11 = inlined_call_operand.vmem [shape: bf16[192,48], index: 11, kind: input, shape index: {}]   ;;  %s2226_s12 = inlined_call_operand.vmem [shape: f32[1,48], index: 12, kind: input, shape index: {}]   ;;  %s2227_s10 = inlined_call_operand.vmem [shape: f32[1,192], index: 10, kind: input, shape index: {}]   ;;  %s2228_s13 = inlined_call_operand.vmem [shape: f32[2,16,48], index: 13, kind: output, shape index: {}, may-alias: {0,13}]  }
   0x1   :  { %v47_v0 = vld [vmem:[%s2215_s0 + $0x10] sm:$0xff]  ;;  %v45_v1 = vld [vmem:[%s2215_s0] sm:$0xff]  ;;  %v48_v4 = vld [vmem:[%s2215_s0 + $0x18] sm:$0xff]  ;;  %1570 = vrcp.f32 %v1672_v8  ;;  %s1677_s27 = smov 80   ;;  %s1678_s28 = smov 72  }
   0x2   :  { %v58_v2 = vsel %vm51_vm0, %v47_v0, 0.0  ;;  %v52_v3 = vsel %vm51_vm0, %v45_v1, 0.0  ;;  %v46_v5 = vld [vmem:[%s2215_s0 + $0x8] sm:$0xff]  ;;  %v61_v6 = vsel %vm51_vm0, %v48_v4, 0.0  ;;  %v1496_v35 = vld [vmem:[%s2218_s4 + $0x10] sm:$0xff]  ;;  %v1494_v40 = vld [vmem:[%s2218_s4] sm:$0xff] }
   0x3   :  { %59 = vadd.xlane.f32.xlu1 %v58_v2  ;;  %53 = vadd.xlane.f32.xlu0 %v52_v3  ;;  %v55_v7 = vsel %vm51_vm0, %v46_v5, 0.0  ;;  %v1495_v36 = vld [vmem:[%s2218_s4 + $0x8] sm:$0xff]  ;;  %s1679_s29 = smov 112   ;;  %s1680_s30 = smov 104  }
   0x4   :  { %198 = vmatpush.bf16.msra.mxu0 %v1496_v35  ;;  %s1681_s14 = smov 56   ;;  %s1682_s15 = smov 48  }
   0x5   :  { %s1683_s16 = smov 40   ;;  %s1684_s17 = smov 8  }
   0x6   :  { %s1685_s18 = smov 16   ;;  %s1686_s19 = smov 24  }
   0x7   :  { %v1571_v9 = vpop.eup %1570 }
   0x8   :  { %v65_v10 = vmul.f32 48.0, %v1571_v9  ;;  %vm69_vm1 = vweird.f32 %v1571_v9  ;;  %199 = vmatpush.bf16.msra.mxu0 %v1495_v36 }
   0xa   :  { %v66_v11 = vsub.f32 1.0, %v65_v10 }
   0xb   :  { %62 = vadd.xlane.f32.xlu1 %v61_v6  ;;  %56 = vadd.xlane.f32.xlu0 %v55_v7  ;;  %v1562_v6 = vld [vmem:[%s2216_s2] ss:$0 sm:$0xff]  ;;  %s1673_s2 = smov 96  }
   0xc   :  { %v67_v12 = vmul.f32 %v1571_v9, %v66_v11  ;;  %200 = vmatpush.bf16.msra.mxu0 %v1494_v40 }
   0xe   :  { %v68_v13 = vadd.f32 %v1571_v9, %v67_v12 }
  0x10   :  { %v1773_v14 = vsel %vm69_vm1, %v1571_v9, %v68_v13  ;;  %v1563_v13 = vld [vmem:[%s2217_s3] ss:$0 sm:$0xff]  ;;  %s1674_s3 = smov 64   ;;  %vm882_vm1 = vcmask 195584  }
  0x76   :  { %v60_v15 = vpop.xlane.xlu1 %59  ;;  %v54_v16 = vpop.xlane.xlu0 %53 }
  0x77   :  { %v73_v17 = vmul.f32 %v1773_v14, %v60_v15  ;;  %v71_v18 = vmul.f32 %v1773_v14, %v54_v16 }
  0x79   :  { %v1777_v19 = vsub.f32 %v47_v0, %v73_v17  ;;  %v1779_v20 = vsub.f32 %v45_v1, %v71_v18 }
  0x7b   :  { %v81_v21 = vmul.f32 %v1777_v19, %v1777_v19  ;;  %v79_v22 = vmul.f32 %v1779_v20, %v1779_v20 }
  0x7d   :  { %v89_v23 = vsel %vm51_vm0, %v81_v21, 0.0  ;;  %v83_v24 = vsel %vm51_vm0, %v79_v22, 0.0 }
  0x7e   :  { %v63_v25 = vpop.xlane.xlu1 %62  ;;  %90 = vadd.xlane.f32.xlu0 %v89_v23  ;;  %84 = vadd.xlane.f32.xlu2 %v83_v24  ;;  %v57_v26 = vpop.xlane.xlu0 %56 }
  0x7f   :  { %v74_v27 = vmul.f32 %v1773_v14, %v63_v25  ;;  %v72_v28 = vmul.f32 %v1773_v14, %v57_v26 }
  0x81   :  { %v1789_v29 = vsub.f32 %v48_v4, %v74_v27  ;;  %v1791_v30 = vsub.f32 %v46_v5, %v72_v28 }
  0x83   :  { %v82_v31 = vmul.f32 %v1789_v29, %v1789_v29  ;;  %v80_v32 = vmul.f32 %v1791_v30, %v1791_v30 }
  0x85   :  { %v92_v33 = vsel %vm51_vm0, %v82_v31, 0.0  ;;  %v86_v34 = vsel %vm51_vm0, %v80_v32, 0.0 }
  0x86   :  { %93 = vadd.xlane.f32.xlu1 %v92_v33  ;;  %87 = vadd.xlane.f32.xlu2 %v86_v34 }
  0xf1   :  { %v85_v37 = vpop.xlane.xlu2 %84  ;;  %v91_v39 = vpop.xlane.xlu0 %90 }
  0xf2   :  { %v95_v38 = vmul.f32 %v85_v37, %v1773_v14  ;;  %v97_v42 = vmul.f32 %v91_v39, %v1773_v14 }
  0xf4   :  { %v99_v41 = vadd.f32 1e-05, %v95_v38  ;;  %v101_v43 = vadd.f32 1e-05, %v97_v42 }
  0xf6   :  { %1572 = vrsqrt.f32 %v99_v41  ;;  %vm109_vm3 = vweird.f32 %v99_v41  ;;  %vm129_vm10 = vweird.f32 %v101_v43 }
  0xf7   :  { %1574 = vrsqrt.f32 %v101_v43 }
  0xf9   :  { %v94_v44 = vpop.xlane.xlu1 %93  ;;  %v88_v45 = vpop.xlane.xlu2 %87 }
  0xfa   :  { %v98_v46 = vmul.f32 %v94_v44, %v1773_v14  ;;  %v96_v47 = vmul.f32 %v88_v45, %v1773_v14 }
  0xfc   :  { %v1573_v48 = vpop.eup %1572  ;;  %v102_v49 = vadd.f32 1e-05, %v98_v46  ;;  %v100_v50 = vadd.f32 1e-05, %v96_v47 }
  0xfd   :  { %v104_v51 = vmul.f32 %v1573_v48, %v99_v41  ;;  %v1575_v54 = vpop.eup %1574  ;;  %vm110_vm2 = vweird.f32 %v1573_v48 }
  0xfe   :  { %1576 = vrsqrt.f32 %v102_v49  ;;  %v124_v60 = vmul.f32 %v1575_v54, %v101_v43  ;;  %vm111_vm4 = vmor %vm109_vm3, %vm110_vm2  ;;  %vm119_vm6 = vweird.f32 %v100_v50  ;;  %vm139_vm8 = vweird.f32 %v102_v49 }
  0xff   :  { %v105_v52 = vmul.f32 %v1573_v48, %v104_v51  ;;  %1578 = vrsqrt.f32 %v100_v50  ;;  %vm130_vm11 = vweird.f32 %v1575_v54  ;;  %vm909_vm2 = vcmask 261120  }
 0x100   :  { %v125_v1 = vmul.f32 %v1575_v54, %v124_v60  ;;  %vm131_vm13 = vmor %vm129_vm10, %vm130_vm11 }
 0x101   :  { %v106_v53 = vmul.f32 0.5, %v105_v52 }
 0x102   :  { %v126_v7 = vmul.f32 0.5, %v125_v1 }
 0x103   :  { %v107_v55 = vsub.f32 1.5, %v106_v53 }
 0x104   :  { %v1577_v56 = vpop.eup %1576  ;;  %v127_v15 = vsub.f32 1.5, %v126_v7 }
 0x105   :  { %v1579_v57 = vpop.eup %1578  ;;  %v134_v58 = vmul.f32 %v1577_v56, %v102_v49  ;;  %v108_v59 = vmul.f32 %v1573_v48, %v107_v55  ;;  %vm140_vm9 = vweird.f32 %v1577_v56 }
 0x106   :  { %v114_v61 = vmul.f32 %v1579_v57, %v100_v50  ;;  %vm120_vm5 = vweird.f32 %v1579_v57  ;;  %vm141_vm12 = vmor %vm139_vm8, %vm140_vm9  ;;  %v128_v21 = vmul.f32 %v1575_v54, %v127_v15 }
 0x107   :  { %v135_v62 = vmul.f32 %v1577_v56, %v134_v58  ;;  %v112_v0 = vsel %vm111_vm4, %v1573_v48, %v108_v59  ;;  %vm121_vm7 = vmor %vm119_vm6, %vm120_vm5 }
 0x108   :  { %v115_v63 = vmul.f32 %v1579_v57, %v114_v61  ;;  %v143_v5 = vmul.f32 %v112_v0, %v1779_v20  ;;  %v132_v24 = vsel %vm131_vm13, %v1575_v54, %v128_v21 }
 0x109   :  { %v136_v3 = vmul.f32 0.5, %v135_v62  ;;  %v145_v26 = vmul.f32 %v132_v24, %v1777_v19 }
 0x10a   :  { %v116_v2 = vmul.f32 0.5, %v115_v63  ;;  %v150_v12 = vmul.f32 %v1562_v6, %v143_v5 }
 0x10b   :  { %v137_v9 = vsub.f32 1.5, %v136_v3  ;;  %v152_v28 = vmul.f32 %v1562_v6, %v145_v26 }
 0x10c   :  { %v117_v4 = vsub.f32 1.5, %v116_v2  ;;  %v157_v18 = vadd.f32 %v1563_v13, %v150_v12 }
 0x10d   :  { %v138_v17 = vmul.f32 %v1577_v56, %v137_v9  ;;  %v159_v31 = vadd.f32 %v1563_v13, %v152_v28 }
 0x10e   :  { %v118_v8 = vmul.f32 %v1579_v57, %v117_v4 }
 0x10f   :  { %v142_v23 = vsel %vm141_vm12, %v1577_v56, %v138_v17 }
 0x110   :  { %v122_v10 = vsel %vm121_vm7, %v1579_v57, %v118_v8  ;;  %v146_v25 = vmul.f32 %v142_v23, %v1789_v29 }
 0x111   :  { %v144_v11 = vmul.f32 %v122_v10, %v1791_v30 }
 0x112   :  { %v153_v27 = vmul.f32 %v1562_v6, %v146_v25 }
 0x113   :  { %v151_v16 = vmul.f32 %v1562_v6, %v144_v11 }
 0x114   :  { %v160_v30 = vadd.f32 %v1563_v13, %v153_v27 }
 0x115   :  { %v158_v20 = vadd.f32 %v1563_v13, %v151_v16 }
 0x116   :  { %v162_v32 = vpack.c.bf16 %v160_v30, %v159_v31 }
 0x117   :  { %v161_v22 = vpack.c.bf16 %v158_v20, %v157_v18 }
 0x119   :  { %1388 = vmatmul.msk.bf16.vlgmr.msra.gmra.mxu0 %vm51_vm0, %v161_v22 }
 0x129   :  { %1389 = vmatmul.msk.bf16.gmra.mxu0 %vm51_vm0, %v162_v32 }
 0x196   :  { %v202_v33 = vpop.f32.mrf.mxu0 }
 0x197   :  { %v220_v34 = vpack.c.bf16 %v202_v33, %v202_v33  ;;  %v212_v46 = vmul.f32 0.35355338, %v202_v33 }
 0x199   :  { %v231_v37 = vunpack.c.l.b16 %v220_v34  ;;  %v216_v48 = vpack.c.bf16 %v212_v46, %v212_v46 }
 0x19b   :  { %v226_v50 = vunpack.c.l.b16 %v216_v48 }
 0x19e   :  { %v204_v35 = vpop.f32.mrf.mxu0 }
 0x19f   :  { %v221_v36 = vpack.c.bf16 %v204_v35, %v204_v35  ;;  %v213_v45 = vmul.f32 0.35355338, %v204_v35 }
 0x1a1   :  { %v232_v38 = vunpack.c.l.b16 %v221_v36  ;;  %v217_v47 = vpack.c.bf16 %v213_v45, %v213_v45 }
 0x1a3   :  { %v1824_v39 = vpack.c.b16 %v232_v38, %v231_v37  ;;  %v227_v49 = vunpack.c.l.b16 %v217_v47 }
 0x1a5   :  { %234 = vrot.lane.b32.xlu2 %v1824_v39, %s1673_s2  ;;  %v1834_v51 = vpack.c.b16 %v227_v49, %v226_v50 }
 0x1a6   :  { %v207_v29 = vpop.f32.mrf.mxu0 }
 0x1a7   :  { %v222_v19 = vpack.c.bf16 %v207_v29, %v207_v29  ;;  %v214_v55 = vmul.f32 0.35355338, %v207_v29 }
 0x1a9   :  { %v264_v42 = vunpack.c.l.b16 %v222_v19  ;;  %v218_v58 = vpack.c.bf16 %v214_v55, %v214_v55 }
 0x1ab   :  { %v259_v61 = vunpack.c.l.b16 %v218_v58 }
 0x1ae   :  { %v209_v40 = vpop.f32.mrf.mxu0 }
 0x1af   :  { %v223_v41 = vpack.c.bf16 %v209_v40, %v209_v40  ;;  %v215_v54 = vmul.f32 0.35355338, %v209_v40 }
 0x1b1   :  { %v265_v43 = vunpack.c.l.b16 %v223_v41  ;;  %v219_v56 = vpack.c.bf16 %v215_v54, %v215_v54 }
 0x1b3   :  { %v1827_v44 = vpack.c.b16 %v265_v43, %v264_v42  ;;  %v260_v60 = vunpack.c.l.b16 %v219_v56 }
 0x1b5   :  { %368 = vrot.lane.b32.xlu2 %v1827_v44, %s1674_s3  ;;  %267 = vrot.lane.b32.xlu0 %v1827_v44, %s1673_s2  ;;  %v1842_v62 = vpack.c.b16 %v260_v60, %v259_v61 }
 0x1bd   :  { %390 = vrot.lane.b32.xlu0 %v1824_v39, %s1675_s25 }
 0x1c5   :  { %388 = vrot.lane.b32.xlu0 %v1834_v51, %s1676_s26 }
 0x1ff   :  { %v235_v52 = vpop.permute.xlu2 %234 }
 0x200   :  { %v241_v53 = vsel %vm236_vm14, %v235_v52, 0 }
 0x201   :  { %250 = vmatpush.bf16.xpose.msrb.mxu0 %v241_v53 }
 0x208   :  { %1390 = vmatmul.msk.bf16.vlgmr.msrb.gmra.mxu0 %vm236_vm14, %v1834_v51 }
 0x20f   :  { %v369_v22 = vpop.permute.xlu2 %368 }
 0x227   :  { %v268_v57 = vpop.permute.xlu0 %267 }
 0x228   :  { %v273_v59 = vsel %vm236_vm14, %v268_v57, 0 }
 0x229   :  { %282 = vmatpush.bf16.xpose.msra.mxu2 %v273_v59 }
 0x22f   :  { %v391_v63 = vpop.permute.xlu0 %390 }
 0x230   :  { %1391 = vmatmul.msk.bf16.vlgmr.msra.gmra.mxu2 %vm236_vm14, %v1842_v62  ;;  %v396_v0 = vsel %vm236_vm14, %v391_v63, 0 }
 0x231   :  { %405 = vmatpush.bf16.xpose.msra.mxu1 %v396_v0 }
 0x237   :  { %v389_v1 = vpop.permute.xlu0 %388 }
 0x238   :  { %1394 = vmatmul.msk.bf16.vlgmr.msra.gmra.mxu1 %vm236_vm14, %v389_v1 }
 0x285   :  { %v252_v2 = vpop.f32.mrf.mxu0 }
 0x286   :  { %v290_v3 = vsel %vm289_vm15, %v252_v2, -inf }
 0x287   :  { %291 = vmax.xlane.f32.xlu1 %v290_v3 }
 0x28d   :  { %v254_v4 = vpop.f32.mrf.mxu0 }
 0x28e   :  { %v293_v5 = vsel %vm289_vm15, %v254_v4, -inf }
 0x28f   :  { %294 = vmax.xlane.f32.xlu1 %v293_v5 }
 0x2b3   :  { %v284_v6 = vpop.f32.mrf.mxu2 }
 0x2b4   :  { %v296_v7 = vsel %vm289_vm15, %v284_v6, -inf }
 0x2b5   :  { %297 = vmax.xlane.f32.xlu1 %v296_v7  ;;  %v1868_v37 = vpop.f32.mrf.mxu1 }
 0x2b6   :  { %v436_v38 = vsel %vm289_vm15, %v1868_v37, -inf }
 0x2bb   :  { %v286_v8 = vpop.f32.mrf.mxu2 }
 0x2bc   :  { %v299_v9 = vsel %vm289_vm15, %v286_v8, -inf }
 0x2bd   :  { %300 = vmax.xlane.f32.xlu2 %v299_v9  ;;  %v409_v29 = vpop.f32.mrf.mxu1 }
 0x2be   :  { %v439_v19 = vsel %vm289_vm15, %v409_v29, -inf }
 0x2ce   :  { %343 = vrot.lane.b32.xlu1 %v1824_v39, %s1674_s3 }
 0x2d5   :  { %536 = vrot.lane.b32.xlu2 %v1824_v39, %s1677_s27 }
 0x2fa   :  { %v292_v10 = vpop.xlane.xlu1 %291 }
 0x2fb   :  { %v302_v11 = vsub.f32 %v252_v2, %v292_v10 }
 0x2fd   :  { %v306_v12 = vmul.f32 1.442695, %v302_v11 }
 0x2ff   :  { %1580 = vpow2.f32 %v306_v12 }
 0x302   :  { %v295_v13 = vpop.xlane.xlu1 %294 }
 0x303   :  { %v303_v15 = vsub.f32 %v254_v4, %v295_v13 }
 0x305   :  { %v1581_v16 = vpop.eup %1580  ;;  %v308_v17 = vmul.f32 1.442695, %v303_v15 }
 0x306   :  { %v314_v18 = vsel %vm289_vm15, %v1581_v16, 0.0 }
 0x307   :  { %1582 = vpow2.f32 %v308_v17  ;;  %315 = vadd.xlane.f32.xlu0 %v314_v18 }
 0x30d   :  { %v1583_v20 = vpop.eup %1582 }
 0x30e   :  { %v317_v21 = vsel %vm289_vm15, %v1583_v20, 0.0 }
 0x30f   :  { %318 = vadd.xlane.f32.xlu1 %v317_v21 }
 0x31b   :  { %414 = vrot.lane.b32.xlu0 %v1827_v44, %s1675_s25 }
 0x323   :  { %412 = vrot.lane.b32.xlu0 %v1842_v62, %s1676_s26 }
 0x328   :  { %v298_v23 = vpop.xlane.xlu1 %297 }
 0x329   :  { %v304_v24 = vsub.f32 %v284_v6, %v298_v23 }
 0x32b   :  { %v310_v25 = vmul.f32 1.442695, %v304_v24  ;;  %560 = vrot.lane.b32.xlu0 %v1827_v44, %s1677_s27 }
 0x32d   :  { %1584 = vpow2.f32 %v310_v25 }
 0x330   :  { %v301_v26 = vpop.xlane.xlu2 %300 }
 0x331   :  { %v305_v27 = vsub.f32 %v286_v8, %v301_v26 }
 0x333   :  { %v1585_v28 = vpop.eup %1584  ;;  %v312_v30 = vmul.f32 1.442695, %v305_v27  ;;  %706 = vrot.lane.b32.xlu0 %v1827_v44, %s1678_s28 }
 0x334   :  { %v320_v31 = vsel %vm289_vm15, %v1585_v28, 0.0 }
 0x335   :  { %1586 = vpow2.f32 %v312_v30  ;;  %321 = vadd.xlane.f32.xlu1 %v320_v31 }
 0x338   :  { %v537_v32 = vpop.permute.xlu2 %536 }
 0x339   :  { %v542_v33 = vsel %vm236_vm14, %v537_v32, 0 }
 0x33a   :  { %551 = vmatpush.bf16.xpose.msrb.mxu2 %v542_v33 }
 0x33b   :  { %v1587_v34 = vpop.eup %1586 }
 0x33c   :  { %v323_v35 = vsel %vm289_vm15, %v1587_v34, 0.0 }
 0x33d   :  { %324 = vadd.xlane.f32.xlu2 %v323_v35 }
 0x340   :  { %v344_v36 = vpop.permute.xlu1 %343 }
 0x341   :  { %356 = vmatpush.bf16.msra.mxu3 %v344_v36 }
 0x345   :  { %381 = vmatpush.bf16.msrb.mxu3 %v369_v22 }
 0x34e   :  { %682 = vrot.lane.b32.xlu1 %v1824_v39, %s1678_s28 }
 0x355   :  { %534 = vrot.lane.b32.xlu2 %v1834_v51, %s1679_s29 }
 0x35d   :  { %437 = vmax.xlane.f32.xlu0 %v436_v38  ;;  %680 = vrot.lane.b32.xlu2 %v1834_v51, %s1680_s30 }
 0x365   :  { %558 = vrot.lane.b32.xlu2 %v1842_v62, %s1679_s29 }
 0x36d   :  { %704 = vrot.lane.b32.xlu2 %v1842_v62, %s1680_s30 }
 0x378   :  { %440 = vmax.xlane.f32.xlu1 %v439_v19 }
 0x37a   :  { %v316_v40 = vpop.xlane.xlu0 %315 }
 0x37b   :  { %1588 = vrcp.f32 %v316_v40 }
 0x381   :  { %v1589_v42 = vpop.eup %1588 }
 0x382   :  { %v319_v41 = vpop.xlane.xlu1 %318  ;;  %v330_v43 = vmul.f32 %v1589_v42, %v1581_v16 }
 0x383   :  { %1590 = vrcp.f32 %v319_v41 }
 0x384   :  { %v334_v47 = vpack.c.bf16 %v330_v43, %v330_v43 }
 0x386   :  { %v340_v50 = vunpack.c.l.b16 %v334_v47 }
 0x389   :  { %v1591_v45 = vpop.eup %1590 }
 0x38a   :  { %v331_v46 = vmul.f32 %v1591_v45, %v1583_v20 }
 0x38c   :  { %v335_v48 = vpack.c.bf16 %v331_v46, %v331_v46 }
 0x38d   :  { %v415_v49 = vpop.permute.xlu0 %414 }
 0x38e   :  { %v341_v51 = vunpack.c.l.b16 %v335_v48  ;;  %v420_v53 = vsel %vm236_vm14, %v415_v49, 0 }
 0x390   :  { %v342_v52 = vpack.c.b16 %v341_v51, %v340_v50 }
 0x392   :  { %1392 = vmatmul.msk.bf16.vlgmr.msra.gmra.mxu3 %vm289_vm15, %v342_v52 }
 0x393   :  { %429 = vmatpush.bf16.xpose.msra.mxu3 %v420_v53 }
 0x395   :  { %v413_v54 = vpop.permute.xlu0 %412 }
 0x39d   :  { %v561_v55 = vpop.permute.xlu0 %560 }
 0x39e   :  { %v566_v56 = vsel %vm236_vm14, %v561_v55, 0 }
 0x39f   :  { %575 = vmatpush.bf16.xpose.msra.mxu0 %v566_v56 }
 0x3a5   :  { %v707_v57 = vpop.permute.xlu0 %706 }
 0x3a6   :  { %v712_v58 = vsel %vm236_vm14, %v707_v57, 0 }
 0x3a7   :  { %721 = vmatpush.bf16.xpose.msrb.mxu0 %v712_v58 }
 0x3a8   :  { %v322_v59 = vpop.xlane.xlu1 %321 }
 0x3a9   :  { %1592 = vrcp.f32 %v322_v59 }
 0x3af   :  { %v1593_v61 = vpop.eup %1592 }
 0x3b0   :  { %v325_v60 = vpop.xlane.xlu2 %324  ;;  %v332_v62 = vmul.f32 %v1593_v61, %v1585_v28 }
 0x3b1   :  { %1594 = vrcp.f32 %v325_v60 }
 0x3b2   :  { %v336_v0 = vpack.c.bf16 %v332_v62, %v332_v62 }
 0x3b4   :  { %v365_v4 = vunpack.c.l.b16 %v336_v0 }
 0x3b7   :  { %v1595_v63 = vpop.eup %1594 }
 0x3b8   :  { %v333_v1 = vmul.f32 %v1595_v63, %v1587_v34  ;;  %v535_v2 = vpop.permute.xlu2 %534 }
 0x3b9   :  { %1398 = vmatmul.msk.bf16.vlgmr.msrb.gmra.mxu2 %vm236_vm14, %v535_v2 }
 0x3ba   :  { %v337_v3 = vpack.c.bf16 %v333_v1, %v333_v1 }
 0x3bc   :  { %v366_v5 = vunpack.c.l.b16 %v337_v3 }
 0x3be   :  { %v367_v6 = vpack.c.b16 %v366_v5, %v365_v4 }
 0x3c0   :  { %v683_v7 = vpop.permute.xlu1 %682  ;;  %1393 = vmatmul.msk.bf16.vlgmr.msrb.gmra.mxu3 %vm289_vm15, %v367_v6  ;;  %v681_v8 = vpop.permute.xlu2 %680 }
 0x3c1   :  { %v688_v9 = vsel %vm236_vm14, %v683_v7, 0 }
 0x3c2   :  { %697 = vmatpush.bf16.xpose.msra.mxu2 %v688_v9 }
 0x3c8   :  { %v559_v10 = vpop.permute.xlu2 %558 }
 0x3c9   :  { %1399 = vmatmul.msk.bf16.vlgmr.msra.gmra.mxu0 %vm236_vm14, %v559_v10  ;;  %1402 = vmatmul.msk.bf16.vlgmr.msra.gmra.mxu2 %vm236_vm14, %v681_v8 }
 0x3d0   :  { %1395 = vmatmul.msk.bf16.vlgmr.msra.gmra.mxu3 %vm236_vm14, %v413_v54  ;;  %v705_v11 = vpop.permute.xlu2 %704  ;;  %v438_v26 = vpop.xlane.xlu0 %437 }
 0x3d1   :  { %v448_v30 = vsub.f32 %v1868_v37, %v438_v26 }
 0x3d3   :  { %v452_v35 = vmul.f32 1.442695, %v448_v30 }
 0x3d9   :  { %1403 = vmatmul.msk.bf16.vlgmr.msrb.gmra.mxu0 %vm236_vm14, %v705_v11 }
 0x3eb   :  { %v441_v13 = vpop.xlane.xlu1 %440 }
 0x3ec   :  { %v449_v18 = vsub.f32 %v409_v29, %v441_v13 }
 0x3ee   :  { %v454_v20 = vmul.f32 1.442695, %v449_v18 }
 0x3f0   :  { %1596 = vpow2.f32 %v454_v20 }
 0x3f1   :  { %1598 = vpow2.f32 %v452_v35 }
 0x3f6   :  { %v1901_v28 = vpop.eup %1596 }
 0x3f7   :  { %v463_v34 = vsel %vm289_vm15, %v1901_v28, 0.0  ;;  %v1599_v40 = vpop.eup %1598 }
 0x3f8   :  { %v460_v43 = vsel %vm289_vm15, %v1599_v40, 0.0 }
 0x415   :  { %v1887_v12 = vpop.f32.mrf.mxu3 }
 0x41d   :  { %v1889_v15 = vpop.f32.mrf.mxu3 }
 0x43c   :  { %v553_v16 = vpop.f32.mrf.mxu2 }
 0x43d   :  { %v582_v17 = vsel %vm289_vm15, %v553_v16, -inf }
 0x43e   :  { %583 = vmax.xlane.f32.xlu2 %v582_v17 }
 0x443   :  { %v1892_v21 = vpop.f32.mrf.mxu3 }
 0x444   :  { %v555_v22 = vpop.f32.mrf.mxu2 }
 0x445   :  { %v585_v23 = vsel %vm289_vm15, %v555_v22, -inf }
 0x446   :  { %586 = vmax.xlane.f32.xlu0 %v585_v23  ;;  %v1895_v24 = vpop.f32.mrf.mxu0 }
 0x447   :  { %v588_v25 = vsel %vm289_vm15, %v1895_v24, -inf }
 0x448   :  { %589 = vmax.xlane.f32.xlu2 %v588_v25 }
 0x44b   :  { %v1899_v27 = vpop.f32.mrf.mxu3 }
 0x44c   :  { %v699_v31 = vpop.f32.mrf.mxu2 }
 0x44d   :  { %v728_v32 = vsel %vm289_vm15, %v699_v31, -inf }
 0x44e   :  { %729 = vmax.xlane.f32.xlu0 %v728_v32  ;;  %v1905_v33 = vpop.f32.mrf.mxu0 }
 0x44f   :  { %v591_v37 = vsel %vm289_vm15, %v1905_v33, -inf }
 0x450   :  { %464 = vadd.xlane.f32.xlu2 %v463_v34 }
 0x453   :  { %v1909_v36 = vpop.f32.mrf.mxu3 }
 0x454   :  { %v701_v38 = vpop.f32.mrf.mxu2  ;;  %v442_v48 = vsel %vm289_vm15, %v1909_v36, -inf }
 0x455   :  { %v731_v29 = vsel %vm289_vm15, %v701_v38, -inf }
 0x456   :  { %732 = vmax.xlane.f32.xlu1 %v731_v29  ;;  %592 = vmax.xlane.f32.xlu0 %v591_v37  ;;  %v1914_v19 = vpop.f32.mrf.mxu0 }
 0x457   :  { %v734_v45 = vsel %vm289_vm15, %v1914_v19, -inf }
 0x45b   :  { %v433_v41 = vpop.f32.mrf.mxu3 }
 0x45c   :  { %v445_v42 = vsel %vm289_vm15, %v433_v41, -inf }
 0x45d   :  { %446 = vmax.xlane.f32.xlu2 %v445_v42 }
 0x45e   :  { %461 = vadd.xlane.f32.xlu1 %v460_v43  ;;  %735 = vmax.xlane.f32.xlu0 %v734_v45  ;;  %v1920_v46 = vpop.f32.mrf.mxu0 }
 0x45f   :  { %v737_v47 = vsel %vm289_vm15, %v1920_v46, -inf }
 0x466   :  { %738 = vmax.xlane.f32.xlu1 %v737_v47 }
 0x46e   :  { %443 = vmax.xlane.f32.xlu1 %v442_v48 }
 0x475   :  { %489 = vrot.lane.b32.xlu2 %v1824_v39, %s1681_s14 }
 0x4b1   :  { %v584_v49 = vpop.xlane.xlu2 %583 }
 0x4b2   :  { %v594_v50 = vsub.f32 %v553_v16, %v584_v49 }
 0x4b4   :  { %v598_v51 = vmul.f32 1.442695, %v594_v50 }
 0x4b6   :  { %1600 = vpow2.f32 %v598_v51 }
 0x4b9   :  { %v587_v52 = vpop.xlane.xlu0 %586 }
 0x4ba   :  { %v595_v53 = vsub.f32 %v555_v22, %v587_v52 }
 0x4bb   :  { %v590_v57 = vpop.xlane.xlu2 %589 }
 0x4bc   :  { %v1928_v54 = vpop.eup %1600  ;;  %v600_v55 = vmul.f32 1.442695, %v595_v53 }
 0x4bd   :  { %v606_v56 = vsel %vm289_vm15, %v1928_v54, 0.0 }
 0x4be   :  { %1602 = vpow2.f32 %v600_v55  ;;  %607 = vadd.xlane.f32.xlu0 %v606_v56 }
 0x4c1   :  { %v730_v58 = vpop.xlane.xlu0 %729 }
 0x4c2   :  { %v740_v59 = vsub.f32 %v699_v31, %v730_v58 }
 0x4c3   :  { %v465_v63 = vpop.xlane.xlu2 %464 }
 0x4c4   :  { %v1932_v60 = vpop.eup %1602  ;;  %v744_v61 = vmul.f32 1.442695, %v740_v59 }
 0x4c5   :  { %v609_v62 = vsel %vm289_vm15, %v1932_v60, 0.0 }
 0x4c6   :  { %1604 = vpow2.f32 %v744_v61  ;;  %610 = vadd.xlane.f32.xlu1 %v609_v62 }
 0x4c7   :  { %1606 = vrcp.f32 %v465_v63 }
 0x4c9   :  { %v733_v0 = vpop.xlane.xlu1 %732 }
 0x4ca   :  { %v741_v1 = vsub.f32 %v701_v38, %v733_v0  ;;  %v596_v38 = vsub.f32 %v1895_v24, %v590_v57 }
 0x4cc   :  { %v1936_v2 = vpop.eup %1604  ;;  %v746_v3 = vmul.f32 1.442695, %v741_v1  ;;  %v602_v29 = vmul.f32 1.442695, %v596_v38 }
 0x4cd   :  { %v752_v4 = vsel %vm289_vm15, %v1936_v2, 0.0  ;;  %v1607_v8 = vpop.eup %1606 }
 0x4ce   :  { %1608 = vpow2.f32 %v746_v3  ;;  %753 = vadd.xlane.f32.xlu1 %v752_v4  ;;  %v477_v11 = vmul.f32 %v1607_v8, %v1901_v28 }
 0x4d0   :  { %v447_v5 = vpop.xlane.xlu2 %446  ;;  %v481_v18 = vpack.c.bf16 %v477_v11, %v477_v11 }
 0x4d1   :  { %v451_v6 = vsub.f32 %v433_v41, %v447_v5  ;;  %v462_v7 = vpop.xlane.xlu1 %461 }
 0x4d2   :  { %1610 = vrcp.f32 %v462_v7  ;;  %635 = vrot.lane.b32.xlu0 %v1824_v39, %s1682_s15  ;;  %v487_v26 = vunpack.c.l.b16 %v481_v18 }
 0x4d3   :  { %v458_v9 = vmul.f32 1.442695, %v451_v6 }
 0x4d4   :  { %v1942_v10 = vpop.eup %1608 }
 0x4d5   :  { %1612 = vpow2.f32 %v458_v9  ;;  %v755_v13 = vsel %vm289_vm15, %v1942_v10, 0.0 }
 0x4d6   :  { %756 = vadd.xlane.f32.xlu2 %v755_v13 }
 0x4d8   :  { %v1611_v16 = vpop.eup %1610  ;;  %v490_v17 = vpop.permute.xlu2 %489 }
 0x4d9   :  { %v476_v20 = vmul.f32 %v1611_v16, %v1599_v40  ;;  %502 = vmatpush.bf16.msrb.mxu3 %v490_v17  ;;  %v739_v31 = vpop.xlane.xlu1 %738  ;;  %v593_v40 = vpop.xlane.xlu0 %592 }
 0x4da   :  { %v597_v45 = vsub.f32 %v1905_v33, %v593_v40  ;;  %v743_v49 = vsub.f32 %v1920_v46, %v739_v31 }
 0x4db   :  { %v1947_v22 = vpop.eup %1612  ;;  %v480_v23 = vpack.c.bf16 %v476_v20, %v476_v20 }
 0x4dc   :  { %v469_v25 = vsel %vm289_vm15, %v1947_v22, 0.0  ;;  %v604_v47 = vmul.f32 1.442695, %v597_v45  ;;  %v750_v51 = vmul.f32 1.442695, %v743_v49 }
 0x4dd   :  { %v486_v30 = vunpack.c.l.b16 %v480_v23  ;;  %470 = vadd.xlane.f32.xlu1 %v469_v25 }
 0x4df   :  { %v488_v28 = vpack.c.b16 %v487_v26, %v486_v30 }
 0x4e1   :  { %1396 = vmatmul.msk.bf16.vlgmr.msrb.gmra.mxu3 %vm289_vm15, %v488_v28  ;;  %v444_v32 = vpop.xlane.xlu1 %443  ;;  %v736_v42 = vpop.xlane.xlu0 %735 }
 0x4e2   :  { %v450_v34 = vsub.f32 %v1909_v36, %v444_v32  ;;  %v742_v24 = vsub.f32 %v1914_v19, %v736_v42 }
 0x4e4   :  { %v456_v35 = vmul.f32 1.442695, %v450_v34  ;;  %v748_v43 = vmul.f32 1.442695, %v742_v24 }
 0x4e6   :  { %1614 = vpow2.f32 %v456_v35 }
 0x4e7   :  { %1616 = vpow2.f32 %v602_v29 }
 0x4e8   :  { %1618 = vpow2.f32 %v748_v43 }
 0x4e9   :  { %1620 = vpow2.f32 %v604_v47 }
 0x4ea   :  { %1622 = vpow2.f32 %v750_v51 }
 0x4ec   :  { %v1957_v37 = vpop.eup %1614 }
 0x4ed   :  { %v466_v41 = vsel %vm289_vm15, %v1957_v37, 0.0  ;;  %v1961_v36 = vpop.eup %1616 }
 0x4ee   :  { %781 = vrot.lane.b32.xlu2 %v1824_v39, %s1683_s16  ;;  %v612_v39 = vsel %vm289_vm15, %v1961_v36, 0.0  ;;  %v1967_v48 = vpop.eup %1618 }
 0x4ef   :  { %v758_v50 = vsel %vm289_vm15, %v1967_v48, 0.0  ;;  %v1974_v52 = vpop.eup %1620 }
 0x4f0   :  { %v615_v33 = vsel %vm289_vm15, %v1974_v52, 0.0  ;;  %v1979_v19 = vpop.eup %1622 }
 0x4f1   :  { %v761_v46 = vsel %vm289_vm15, %v1979_v19, 0.0 }
 0x4f6   :  { %514 = vrot.lane.b32.xlu1 %v1827_v44, %s1681_s14 }
 0x4fc   :  { %467 = vadd.xlane.f32.xlu0 %v466_v41 }
 0x504   :  { %613 = vadd.xlane.f32.xlu0 %v612_v39 }
 0x517   :  { %759 = vadd.xlane.f32.xlu2 %v758_v50 }
 0x518   :  { %660 = vrot.lane.b32.xlu0 %v1827_v44, %s1682_s15 }
 0x520   :  { %806 = vrot.lane.b32.xlu0 %v1827_v44, %s1683_s16  ;;  %616 = vadd.xlane.f32.xlu1 %v615_v33 }
 0x528   :  { %762 = vadd.xlane.f32.xlu1 %v761_v46 }
 0x531   :  { %v608_v53 = vpop.xlane.xlu0 %607 }
 0x532   :  { %1624 = vrcp.f32 %v608_v53 }
 0x538   :  { %v1625_v56 = vpop.eup %1624 }
 0x539   :  { %v611_v55 = vpop.xlane.xlu1 %610  ;;  %v622_v57 = vmul.f32 %v1625_v56, %v1928_v54 }
 0x53a   :  { %1626 = vrcp.f32 %v611_v55 }
 0x53b   :  { %v626_v59 = vpack.c.bf16 %v622_v57, %v622_v57 }
 0x53d   :  { %v632_v0 = vunpack.c.l.b16 %v626_v59 }
 0x540   :  { %v1627_v58 = vpop.eup %1626 }
 0x541   :  { %v623_v61 = vmul.f32 %v1627_v58, %v1932_v60  ;;  %v754_v62 = vpop.xlane.xlu1 %753 }
 0x542   :  { %1628 = vrcp.f32 %v754_v62 }
 0x543   :  { %v627_v44 = vpack.c.bf16 %v623_v61, %v623_v61 }
 0x544   :  { %v636_v63 = vpop.permute.xlu0 %635 }
 0x545   :  { %v633_v1 = vunpack.c.l.b16 %v627_v44  ;;  %648 = vmatpush.bf16.msra.mxu3 %v636_v63 }
 0x547   :  { %v634_v3 = vpack.c.b16 %v633_v1, %v632_v0 }
 0x548   :  { %v1629_v5 = vpop.eup %1628 }
 0x549   :  { %1400 = vmatmul.msk.bf16.vlgmr.msra.gmra.mxu3 %vm289_vm15, %v634_v3  ;;  %v757_v4 = vpop.xlane.xlu2 %756  ;;  %v768_v6 = vmul.f32 %v1629_v5, %v1936_v2 }
 0x54a   :  { %1630 = vrcp.f32 %v757_v4 }
 0x54b   :  { %v772_v7 = vpack.c.bf16 %v768_v6, %v768_v6 }
 0x54d   :  { %v778_v11 = vunpack.c.l.b16 %v772_v7 }
 0x550   :  { %v1631_v54 = vpop.eup %1630  ;;  %v471_v17 = vpop.xlane.xlu1 %470 }
 0x551   :  { %v769_v8 = vmul.f32 %v1631_v54, %v1942_v10  ;;  %v782_v60 = vpop.permute.xlu2 %781  ;;  %1632 = vrcp.f32 %v471_v17  ;;  %v1498_v54 = vld [vmem:[%s2220_s5 + $0x8] sm:$0xff] }
 0x552   :  { %794 = vmatpush.bf16.msrb.mxu3 %v782_v60  ;;  %922 = vmatpush.bf16.msrb.mxu2 %v1498_v54 }
 0x553   :  { %v773_v9 = vpack.c.bf16 %v769_v8, %v769_v8 }
 0x555   :  { %v779_v13 = vunpack.c.l.b16 %v773_v9  ;;  %v1497_v9 = vld [vmem:[%s2220_s5] sm:$0xff] }
 0x556   :  { %923 = vmatpush.bf16.msrb.mxu2 %v1497_v9 }
 0x557   :  { %v780_v16 = vpack.c.b16 %v779_v13, %v778_v11  ;;  %v1633_v10 = vpop.eup %1632 }
 0x558   :  { %v479_v26 = vmul.f32 %v1633_v10, %v1947_v22 }
 0x559   :  { %1404 = vmatmul.msk.bf16.vlgmr.msrb.gmra.mxu3 %vm289_vm15, %v780_v16 }
 0x55a   :  { %v483_v31 = vpack.c.bf16 %v479_v26, %v479_v26 }
 0x55c   :  { %v512_v34 = vunpack.c.l.b16 %v483_v31 }
 0x564   :  { %v504_v18 = vpop.f32.mrf.mxu3 }
 0x568   :  { %v515_v20 = vpop.permute.xlu1 %514 }
 0x569   :  { %527 = vmatpush.bf16.msrb.mxu1 %v515_v20 }
 0x56c   :  { %v506_v23 = vpop.f32.mrf.mxu3 }
 0x56d   :  { %v1532_v25 = vpack.i.bf16 %v506_v23, %v504_v18 }
 0x56f   :  { %v468_v2 = vpop.xlane.xlu0 %467  ;;  %1533 = vrot.lane.b32.xlu1 %v1532_v25, %s1684_s17 }
 0x570   :  { %1634 = vrcp.f32 %v468_v2 }
 0x576   :  { %v1635_v30 = vpop.eup %1634 }
 0x577   :  { %v478_v28 = vmul.f32 %v1635_v30, %v1957_v37  ;;  %v614_v29 = vpop.xlane.xlu0 %613 }
 0x578   :  { %1636 = vrcp.f32 %v614_v29 }
 0x579   :  { %v482_v32 = vpack.c.bf16 %v478_v28, %v478_v28 }
 0x57b   :  { %v511_v35 = vunpack.c.l.b16 %v482_v32 }
 0x57d   :  { %v513_v38 = vpack.c.b16 %v512_v34, %v511_v35 }
 0x57e   :  { %v1637_v39 = vpop.eup %1636 }
 0x57f   :  { %1397 = vmatmul.msk.bf16.vlgmr.msrb.gmra.mxu1 %vm289_vm15, %v513_v38  ;;  %v624_v22 = vmul.f32 %v1637_v39, %v1961_v36 }
 0x581   :  { %v628_v43 = vpack.c.bf16 %v624_v22, %v624_v22 }
 0x583   :  { %v657_v50 = vunpack.c.l.b16 %v628_v43 }
 0x58a   :  { %v661_v40 = vpop.permute.xlu0 %660  ;;  %v760_v37 = vpop.xlane.xlu2 %759 }
 0x58b   :  { %673 = vmatpush.bf16.msra.mxu1 %v661_v40 }
 0x592   :  { %v807_v41 = vpop.permute.xlu0 %806 }
 0x593   :  { %819 = vmatpush.bf16.msrb.mxu1 %v807_v41  ;;  %v617_v42 = vpop.xlane.xlu1 %616 }
 0x594   :  { %1638 = vrcp.f32 %v617_v42 }
 0x59a   :  { %v1639_v24 = vpop.eup %1638 }
 0x59b   :  { %v625_v45 = vmul.f32 %v1639_v24, %v1974_v52  ;;  %v763_v47 = vpop.xlane.xlu1 %762 }
 0x59c   :  { %1640 = vrcp.f32 %v763_v47 }
 0x59d   :  { %v629_v49 = vpack.c.bf16 %v625_v45, %v625_v45  ;;  %1642 = vrcp.f32 %v760_v37 }
 0x59f   :  { %v658_v51 = vunpack.c.l.b16 %v629_v49 }
 0x5a1   :  { %v659_v33 = vpack.c.b16 %v658_v51, %v657_v50 }
 0x5a2   :  { %v1641_v46 = vpop.eup %1640 }
 0x5a3   :  { %1401 = vmatmul.msk.bf16.vlgmr.msra.gmra.mxu1 %vm289_vm15, %v659_v33  ;;  %v1643_v53 = vpop.eup %1642  ;;  %v771_v55 = vmul.f32 %v1641_v46, %v1979_v19  ;;  %v1668_v33 = vld [vmem:[%s2215_s0] sm:$0xff] }
 0x5a4   :  { %v770_v36 = vmul.f32 %v1643_v53, %v1967_v48 }
 0x5a5   :  { %v775_v56 = vpack.c.bf16 %v771_v55, %v771_v55 }
 0x5a6   :  { %v774_v57 = vpack.c.bf16 %v770_v36, %v770_v36 }
 0x5a7   :  { %v804_v58 = vunpack.c.l.b16 %v775_v56 }
 0x5a8   :  { %v803_v59 = vunpack.c.l.b16 %v774_v57  ;;  %v1669_v57 = vld [vmem:[%s2215_s0 + $0x8] sm:$0xff] }
 0x5aa   :  { %v805_v52 = vpack.c.b16 %v804_v58, %v803_v59 }
 0x5b3   :  { %1405 = vmatmul.msk.bf16.vlgmr.msrb.gmra.mxu1 %vm289_vm15, %v805_v52 }
 0x5cc   :  { %v650_v61 = vpop.f32.mrf.mxu3 }
 0x5d4   :  { %v652_v62 = vpop.f32.mrf.mxu3 }
 0x5d5   :  { %v1537_v44 = vpack.i.bf16 %v652_v62, %v650_v61 }
 0x5d7   :  { %1538 = vrot.lane.b32.xlu0 %v1537_v44, %s1685_s18  ;;  %v1566_v44 = vld [vmem:[%s2221_s1 + $0x1] ss:$0 sm:$0xff] }
 0x5dc   :  { %v796_v63 = vpop.f32.mrf.mxu3 }
 0x5e1   :  { %v1534_v13 = vpop.permute.xlu1 %1533 }
 0x5e2   :  { %v1536_v16 = vunpack.i.h.bf16 %v1534_v13  ;;  %v1535_v17 = vunpack.i.l.bf16 %v1534_v13 }
 0x5e4   :  { %v798_v0 = vpop.f32.mrf.mxu3  ;;  %v875_v25 = vsel %vm236_vm14, %v1889_v15, %v1536_v16  ;;  %v874_v2 = vsel %vm236_vm14, %v1887_v12, %v1535_v17 }
 0x5e5   :  { %v1542_v1 = vpack.i.bf16 %v798_v0, %v796_v63  ;;  %v1670_v63 = vld [vmem:[%s2215_s0 + $0x10] sm:$0xff] }
 0x5e7   :  { %1543 = vrot.lane.b32.xlu0 %v1542_v1, %s1686_s19 }
 0x5fc   :  { %v529_v19 = vpop.f32.mrf.mxu1 }
 0x604   :  { %v531_v3 = vpop.f32.mrf.mxu1 }
 0x605   :  { %v1547_v48 = vpack.i.bf16 %v531_v3, %v529_v19 }
 0x607   :  { %1548 = vrot.lane.b32.xlu0 %v1547_v48, %s1684_s17 }
 0x620   :  { %v675_v4 = vpop.f32.mrf.mxu1 }
 0x628   :  { %v677_v5 = vpop.f32.mrf.mxu1 }
 0x629   :  { %v1552_v6 = vpack.i.bf16 %v677_v5, %v675_v4  ;;  %v1671_v4 = vld [vmem:[%s2215_s0 + $0x18] sm:$0xff] }
 0x62b   :  { %1553 = vrot.lane.b32.xlu1 %v1552_v6, %s1685_s18 }
 0x630   :  { %v821_v7 = vpop.f32.mrf.mxu1 }
 0x638   :  { %v823_v8 = vpop.f32.mrf.mxu1 }
 0x639   :  { %v1557_v60 = vpack.i.bf16 %v823_v8, %v821_v7 }
 0x63b   :  { %1558 = vrot.lane.b32.xlu2 %v1557_v60, %s1686_s19 }
 0x649   :  { %v1539_v11 = vpop.permute.xlu0 %1538 }
 0x64a   :  { %v1541_v18 = vunpack.i.h.bf16 %v1539_v11  ;;  %v1540_v20 = vunpack.i.l.bf16 %v1539_v11 }
 0x64c   :  { %v879_v30 = vsel %vm289_vm15, %v875_v25, %v1541_v18  ;;  %v878_v31 = vsel %vm289_vm15, %v874_v2, %v1540_v20 }
 0x659   :  { %v1544_v23 = vpop.permute.xlu0 %1543 }
 0x65a   :  { %v1546_v10 = vunpack.i.h.bf16 %v1544_v23  ;;  %v1545_v26 = vunpack.i.l.bf16 %v1544_v23 }
 0x65c   :  { %v884_v28 = vsel %vm882_vm1, %v879_v30, %v1546_v10  ;;  %v883_v32 = vsel %vm882_vm1, %v878_v31, %v1545_v26 }
 0x65d   :  { %v887_v34 = vpack.c.bf16 %v884_v28, %v883_v32 }
 0x65f   :  { %1414 = vmatmul.msk.bf16.vlgmr.msrb.gmra.mxu2 %vm909_vm2, %v887_v34 }
 0x679   :  { %v1549_v35 = vpop.permute.xlu0 %1548 }
 0x67a   :  { %v1551_v38 = vunpack.i.h.bf16 %v1549_v35  ;;  %v1550_v15 = vunpack.i.l.bf16 %v1549_v35  ;;  %v1434_v35 = vld [vmem:[%s2224_s9 + $0x20] sm:$0xf] }
 0x67c   :  { %v877_v42 = vsel %vm236_vm14, %v1899_v27, %v1551_v38  ;;  %v876_v39 = vsel %vm236_vm14, %v1892_v21, %v1550_v15  ;;  %v1564_v27 = vld [vmem:[%s2219_s6] ss:$0 sm:$0xff]  ;;  %v1504_v38 = vld [vmem:[%s2224_s9 + $0x24] sm:$0xf0]  ;;  %v1503_v15 = vld [vmem:[%s2224_s9 + $0x24] sm:$0xf] }
 0x67d   :  { %v1565_v21 = vld [vmem:[%s2221_s1] ss:$0 sm:$0xff] }
 0x695   :  { %v1559_v29 = vpop.permute.xlu2 %1558 }
 0x696   :  { %v1561_v22 = vunpack.i.h.bf16 %v1559_v29  ;;  %v1560_v24 = vunpack.i.l.bf16 %v1559_v29  ;;  %v1435_v29 = vor.u32 %v1504_v38, %v1434_v35 }
 0x698   :  { %1110 = vmatpush.bf16.msra.mxu0 %v1435_v29 }
 0x69d   :  { %v1554_v40 = vpop.permute.xlu1 %1553 }
 0x69e   :  { %v1556_v12 = vunpack.i.h.bf16 %v1554_v40  ;;  %v1555_v41 = vunpack.i.l.bf16 %v1554_v40  ;;  %v1436_v40 = vld [vmem:[%s2224_s9 + $0x28] sm:$0xf0] }
 0x6a0   :  { %v880_v43 = vsel %vm289_vm15, %v876_v39, %v1555_v41  ;;  %v881_v37 = vsel %vm289_vm15, %v877_v42, %v1556_v12  ;;  %v1439_v12 = vor.u32 %v1503_v15, %v1436_v40  ;;  %v1426_v41 = vld [vmem:[%s2224_s9 + $0x10] sm:$0xf]  ;;  %v1502_v42 = vld [vmem:[%s2224_s9 + $0x14] sm:$0xf0]  ;;  %v1501_v39 = vld [vmem:[%s2224_s9 + $0x14] sm:$0xf] }
 0x6a1   :  { %v885_v45 = vsel %vm882_vm1, %v880_v43, %v1560_v24  ;;  %v886_v47 = vsel %vm882_vm1, %v881_v37, %v1561_v22  ;;  %v1427_v22 = vor.u32 %v1502_v42, %v1426_v41  ;;  %v1428_v24 = vld [vmem:[%s2224_s9 + $0x18] sm:$0xf0]  ;;  %vm1319_vm15 = vcmask 523264  }
 0x6a2   :  { %v888_v49 = vpack.c.bf16 %v886_v47, %v885_v45  ;;  %1129 = vmatpush.bf16.msra.mxu3 %v1439_v12  ;;  %v1431_v37 = vor.u32 %v1501_v39, %v1428_v24  ;;  %v1418_v47 = vld [vmem:[%s2224_s9] sm:$0xf] }
 0x6a3   :  { %1111 = vmatpush.bf16.msra.mxu0 %v1427_v22 }
 0x6a4   :  { %1415 = vmatmul.msk.bf16.gmra.mxu2 %vm909_vm2, %v888_v49  ;;  %v1500_v49 = vld [vmem:[%s2224_s9 + $0x4] sm:$0xf0] }
 0x6a6   :  { %1130 = vmatpush.bf16.msra.mxu3 %v1431_v37 }
 0x6e2   :  { %v925_v50 = vpop.f32.mrf.mxu2 }
 0x6e3   :  { %v926_v51 = vadd.f32 %v1564_v27, %v925_v50 }
 0x6e5   :  { %v2033_v46 = vadd.f32 %v1668_v33, %v926_v51  ;;  %v1419_v51 = vor.u32 %v1500_v49, %v1418_v47 }
 0x6e7   :  { %v947_v53 = vadd.f32 %v1565_v21, %v2033_v46  ;;  %1112 = vmatpush.bf16.msra.mxu0 %v1419_v51  ;;  %v1508_v51 = vld [vmem:[%s2225_s11 + $0x18] sm:$0xff] }
 0x6e9   :  { %v953_v55 = vsel %vm51_vm0, %v947_v53, 0.0 }
 0x6ea   :  { %v927_v36 = vpop.f32.mrf.mxu2  ;;  %954 = vadd.xlane.f32.xlu0 %v953_v55 }
 0x6eb   :  { %v928_v56 = vadd.f32 %v1564_v27, %v927_v36 }
 0x6ed   :  { %v2040_v58 = vadd.f32 %v1669_v57, %v928_v56 }
 0x6ef   :  { %v948_v59 = vadd.f32 %v1565_v21, %v2040_v58  ;;  %v1420_v21 = vld [vmem:[%s2224_s9 + $0x8] sm:$0xf0] }
 0x6f1   :  { %v956_v52 = vsel %vm51_vm0, %v948_v59, 0.0 }
 0x6f2   :  { %957 = vadd.xlane.f32.xlu1 %v956_v52 }
 0x727   :  { %v930_v61 = vpop.f32.mrf.mxu2 }
 0x728   :  { %v931_v62 = vadd.f32 %v1564_v27, %v930_v61 }
 0x72a   :  { %v2050_v0 = vadd.f32 %v1670_v63, %v931_v62 }
 0x72c   :  { %v949_v1 = vadd.f32 %v1566_v44, %v2050_v0 }
 0x72e   :  { %v959_v19 = vsel %vm51_vm0, %v949_v1, 0.0 }
 0x72f   :  { %v932_v3 = vpop.f32.mrf.mxu2  ;;  %960 = vadd.xlane.f32.xlu2 %v959_v19 }
 0x730   :  { %v933_v48 = vadd.f32 %v1564_v27, %v932_v3  ;;  %v1499_v27 = vld [vmem:[%s2224_s9 + $0x4] sm:$0xf] }
 0x731   :  { %v1423_v33 = vor.u32 %v1499_v27, %v1420_v21  ;;  %v1512_v27 = vld [vmem:[%s2225_s11 + $0x38] sm:$0xff]  ;;  %v1507_v21 = vld [vmem:[%s2225_s11 + $0x10] sm:$0xff] }
 0x732   :  { %v2057_v5 = vadd.f32 %v1671_v4, %v933_v48  ;;  %v1567_v4 = vld [vmem:[%s2222_s7] ss:$0 sm:$0xff]  ;;  %1326 = vmatpush.bf16.msra.mxu1 %v1512_v27 }
 0x733   :  { %1131 = vmatpush.bf16.msra.mxu3 %v1423_v33  ;;  %v1516_v33 = vld [vmem:[%s2225_s11 + $0x58] sm:$0xff] }
 0x734   :  { %v950_v6 = vadd.f32 %v1566_v44, %v2057_v5  ;;  %1349 = vmatpush.bf16.msra.mxu2 %v1516_v33 }
 0x736   :  { %v962_v54 = vsel %vm51_vm0, %v950_v6, 0.0 }
 0x737   :  { %963 = vadd.xlane.f32.xlu0 %v962_v54 }
 0x75d   :  { %v955_v7 = vpop.xlane.xlu0 %954 }
 0x75e   :  { %v965_v8 = vmul.f32 %v955_v7, %v1773_v14 }
 0x760   :  { %v2062_v60 = vsub.f32 %v947_v53, %v965_v8  ;;  %v1568_v8 = vld [vmem:[%s2223_s8] ss:$0 sm:$0xff] }
 0x762   :  { %v973_v9 = vmul.f32 %v2062_v60, %v2062_v60 }
 0x764   :  { %v977_v11 = vsel %vm51_vm0, %v973_v9, 0.0 }
 0x765   :  { %v958_v13 = vpop.xlane.xlu1 %957  ;;  %978 = vadd.xlane.f32.xlu1 %v977_v11 }
 0x766   :  { %v966_v16 = vmul.f32 %v958_v13, %v1773_v14 }
 0x768   :  { %v2068_v17 = vsub.f32 %v948_v59, %v966_v16 }
 0x76a   :  { %v974_v18 = vmul.f32 %v2068_v17, %v2068_v17 }
 0x76c   :  { %v980_v20 = vsel %vm51_vm0, %v974_v18, 0.0 }
 0x76d   :  { %981 = vadd.xlane.f32.xlu0 %v980_v20 }
 0x7a2   :  { %v961_v23 = vpop.xlane.xlu2 %960 }
 0x7a3   :  { %v967_v25 = vmul.f32 %v961_v23, %v1773_v14 }
 0x7a5   :  { %v2074_v2 = vsub.f32 %v949_v1, %v967_v25 }
 0x7a7   :  { %v975_v10 = vmul.f32 %v2074_v2, %v2074_v2 }
 0x7a9   :  { %v983_v26 = vsel %vm51_vm0, %v975_v10, 0.0 }
 0x7aa   :  { %v964_v30 = vpop.xlane.xlu0 %963  ;;  %984 = vadd.xlane.f32.xlu1 %v983_v26 }
 0x7ab   :  { %v968_v31 = vmul.f32 %v964_v30, %v1773_v14 }
 0x7ad   :  { %v2080_v28 = vsub.f32 %v950_v6, %v968_v31 }
 0x7af   :  { %v976_v32 = vmul.f32 %v2080_v28, %v2080_v28 }
 0x7b1   :  { %v986_v34 = vsel %vm51_vm0, %v976_v32, 0.0 }
 0x7b2   :  { %987 = vadd.xlane.f32.xlu0 %v986_v34 }
 0x7d8   :  { %v979_v43 = vpop.xlane.xlu1 %978 }
 0x7d9   :  { %v989_v45 = vmul.f32 %v979_v43, %v1773_v14 }
 0x7db   :  { %v993_v50 = vadd.f32 1e-05, %v989_v45 }
 0x7dd   :  { %1644 = vrsqrt.f32 %v993_v50  ;;  %vm1003_vm4 = vweird.f32 %v993_v50 }
 0x7e0   :  { %v982_v53 = vpop.xlane.xlu0 %981 }
 0x7e1   :  { %v990_v55 = vmul.f32 %v982_v53, %v1773_v14  ;;  %v1063_v53 = vld [vmem:[%s2227_s10] sm:$0x3] }
 0x7e3   :  { %v1645_v36 = vpop.eup %1644  ;;  %v994_v56 = vadd.f32 1e-05, %v990_v55  ;;  %v1506_v55 = vld [vmem:[%s2225_s11 + $0x8] sm:$0xff] }
 0x7e4   :  { %v998_v57 = vmul.f32 %v1645_v36, %v993_v50  ;;  %vm1004_vm3 = vweird.f32 %v1645_v36  ;;  %v1509_v50 = vld [vmem:[%s2225_s11 + $0x20] sm:$0xff] }
 0x7e5   :  { %1646 = vrsqrt.f32 %v994_v56  ;;  %vm1005_vm5 = vmor %vm1003_vm4, %vm1004_vm3  ;;  %vm1013_vm7 = vweird.f32 %v994_v56 }
 0x7e6   :  { %v999_v59 = vmul.f32 %v1645_v36, %v998_v57  ;;  %v1505_v57 = vld [vmem:[%s2225_s11] sm:$0xff] }
 0x7e8   :  { %v1000_v52 = vmul.f32 0.5, %v999_v59 }
 0x7ea   :  { %v1001_v61 = vsub.f32 1.5, %v1000_v52  ;;  %v1514_v52 = vld [vmem:[%s2225_s11 + $0x48] sm:$0xff] }
 0x7eb   :  { %v1647_v62 = vpop.eup %1646 }
 0x7ec   :  { %v1002_v44 = vmul.f32 %v1645_v36, %v1001_v61  ;;  %v1008_v63 = vmul.f32 %v1647_v62, %v994_v56  ;;  %vm1014_vm6 = vweird.f32 %v1647_v62  ;;  %v2169_v56 = vperm.slane %v1063_v53, 0 }
 0x7ed   :  { %vm1015_vm8 = vmor %vm1013_vm7, %vm1014_vm6 }
 0x7ee   :  { %v1009_v1 = vmul.f32 %v1647_v62, %v1008_v63  ;;  %v1006_v19 = vsel %vm1005_vm5, %v1645_v36, %v1002_v44  ;;  %v1515_v36 = vld [vmem:[%s2225_s11 + $0x50] sm:$0xff]  ;;  %v2181_v63 = vperm.slane %v1063_v53, 1 }
 0x7ef   :  { %v1037_v6 = vmul.f32 %v1006_v19, %v2062_v60  ;;  %1350 = vmatpush.bf16.msra.mxu2 %v1515_v36 }
 0x7f0   :  { %v1010_v3 = vmul.f32 0.5, %v1009_v1 }
 0x7f1   :  { %v1044_v9 = vmul.f32 %v1567_v4, %v1037_v6 }
 0x7f2   :  { %v1011_v48 = vsub.f32 1.5, %v1010_v3 }
 0x7f3   :  { %v1051_v16 = vadd.f32 %v1568_v8, %v1044_v9  ;;  %1351 = vmatpush.bf16.msra.mxu2 %v1514_v52 }
 0x7f4   :  { %v1012_v54 = vmul.f32 %v1647_v62, %v1011_v48 }
 0x7f6   :  { %v1016_v7 = vsel %vm1015_vm8, %v1647_v62, %v1012_v54  ;;  %v1513_v62 = vld [vmem:[%s2225_s11 + $0x40] sm:$0xff] }
 0x7f7   :  { %v1038_v11 = vmul.f32 %v1016_v7, %v2068_v17  ;;  %1352 = vmatpush.bf16.msra.mxu2 %v1513_v62 }
 0x7f9   :  { %v1045_v13 = vmul.f32 %v1567_v4, %v1038_v11 }
 0x7fb   :  { %v1052_v18 = vadd.f32 %v1568_v8, %v1045_v13 }
 0x7fd   :  { %v1055_v20 = vpack.c.bf16 %v1052_v18, %v1051_v16 }
 0x7ff   :  { %1440 = vmatmul.msk.bf16.vlgmr.msra.gmra.mxu0 %vm51_vm0, %v1055_v20  ;;  %1442 = vmatmul.msk.bf16.vlgmr.msra.gmra.mxu3 %vm51_vm0, %v1055_v20 }
 0x81d   :  { %v985_v60 = vpop.xlane.xlu1 %984 }
 0x81e   :  { %v991_v23 = vmul.f32 %v985_v60, %v1773_v14 }
 0x820   :  { %v995_v25 = vadd.f32 1e-05, %v991_v23 }
 0x822   :  { %1648 = vrsqrt.f32 %v995_v25  ;;  %vm1023_vm10 = vweird.f32 %v995_v25 }
 0x825   :  { %v988_v10 = vpop.xlane.xlu0 %987 }
 0x826   :  { %v992_v26 = vmul.f32 %v988_v10, %v1773_v14 }
 0x828   :  { %v1649_v30 = vpop.eup %1648  ;;  %v996_v31 = vadd.f32 1e-05, %v992_v26 }
 0x829   :  { %v1018_v32 = vmul.f32 %v1649_v30, %v995_v25  ;;  %vm1024_vm9 = vweird.f32 %v1649_v30 }
 0x82a   :  { %1650 = vrsqrt.f32 %v996_v31  ;;  %vm1025_vm11 = vmor %vm1023_vm10, %vm1024_vm9  ;;  %vm1033_vm13 = vweird.f32 %v996_v31 }
 0x82b   :  { %v1019_v17 = vmul.f32 %v1649_v30, %v1018_v32 }
 0x82d   :  { %v1020_v34 = vmul.f32 0.5, %v1019_v17 }
 0x82f   :  { %v1021_v35 = vsub.f32 1.5, %v1020_v34 }
 0x830   :  { %v1651_v38 = vpop.eup %1650 }
 0x831   :  { %v1022_v15 = vmul.f32 %v1649_v30, %v1021_v35  ;;  %v1028_v29 = vmul.f32 %v1651_v38, %v996_v31  ;;  %vm1034_vm12 = vweird.f32 %v1651_v38 }
 0x832   :  { %vm1035_vm14 = vmor %vm1033_vm13, %vm1034_vm12 }
 0x833   :  { %v1029_v40 = vmul.f32 %v1651_v38, %v1028_v29  ;;  %v1026_v12 = vsel %vm1025_vm11, %v1649_v30, %v1022_v15 }
 0x834   :  { %v1039_v14 = vmul.f32 %v1026_v12, %v2074_v2  ;;  %v1511_v2 = vld [vmem:[%s2225_s11 + $0x30] sm:$0xff] }
 0x835   :  { %v1030_v41 = vmul.f32 0.5, %v1029_v40  ;;  %1327 = vmatpush.bf16.msra.mxu1 %v1511_v2 }
 0x836   :  { %v1046_v43 = vmul.f32 %v1567_v4, %v1039_v14 }
 0x837   :  { %v1031_v42 = vsub.f32 1.5, %v1030_v41 }
 0x838   :  { %v1053_v45 = vadd.f32 %v1568_v8, %v1046_v43 }
 0x839   :  { %v1032_v39 = vmul.f32 %v1651_v38, %v1031_v42 }
 0x83b   :  { %v1036_v22 = vsel %vm1035_vm14, %v1651_v38, %v1032_v39 }
 0x83c   :  { %v1040_v24 = vmul.f32 %v1036_v22, %v2080_v28  ;;  %v1510_v28 = vld [vmem:[%s2225_s11 + $0x28] sm:$0xff] }
 0x83d   :  { %1328 = vmatpush.bf16.msra.mxu1 %v1510_v28 }
 0x83e   :  { %v1047_v37 = vmul.f32 %v1567_v4, %v1040_v24 }
 0x840   :  { %v1054_v47 = vadd.f32 %v1568_v8, %v1047_v37 }
 0x841   :  { %1329 = vmatpush.bf16.msra.mxu1 %v1509_v50 }
 0x842   :  { %v1056_v49 = vpack.c.bf16 %v1054_v47, %v1053_v45 }
 0x844   :  { %1441 = vmatmul.msk.bf16.gmra.mxu0 %vm51_vm0, %v1056_v49  ;;  %1443 = vmatmul.msk.bf16.gmra.mxu3 %vm51_vm0, %v1056_v49 }
 0x845   :  { %1330 = vmatpush.bf16.msra.mxu1 %v1508_v51 }
 0x849   :  { %1331 = vmatpush.bf16.msra.mxu1 %v1507_v21 }
 0x84d   :  { %1332 = vmatpush.bf16.msra.mxu1 %v1506_v55 }
 0x851   :  { %1333 = vmatpush.bf16.msra.mxu1 %v1505_v57 }
 0x87c   :  { %v1114_v59 = vpop.f32.mrf.mxu0 }
 0x87d   :  { %v1115_v61 = vadd.f32 %v1114_v59, %v2169_v56 }
 0x87f   :  { %v1151_v44 = vmul.f32 0.044715, %v1115_v61  ;;  %v1143_v29 = vmul.f32 0.5, %v1115_v61 }
 0x881   :  { %v1159_v1 = vmul.f32 %v1151_v44, %v1115_v61 }
 0x882   :  { %v1133_v19 = vpop.f32.mrf.mxu3 }
 0x883   :  { %v1167_v3 = vmul.f32 %v1159_v1, %v1115_v61  ;;  %v1134_v48 = vadd.f32 %v1133_v19, %v2181_v63 }
 0x884   :  { %v1116_v4 = vpop.f32.mrf.mxu0 }
 0x885   :  { %v1175_v6 = vadd.f32 %v1167_v3, %v1115_v61  ;;  %v1152_v54 = vmul.f32 0.044715, %v1134_v48  ;;  %v1117_v7 = vadd.f32 %v1116_v4, %v2169_v56  ;;  %v1144_v43 = vmul.f32 0.5, %v1134_v48 }
 0x887   :  { %v1160_v8 = vmul.f32 %v1152_v54, %v1134_v48  ;;  %v1153_v9 = vmul.f32 0.044715, %v1117_v7  ;;  %v1183_v11 = vmul.f32 0.7978846, %v1175_v6  ;;  %v1145_v40 = vmul.f32 0.5, %v1117_v7 }
 0x889   :  { %v1168_v13 = vmul.f32 %v1160_v8, %v1134_v48  ;;  %v1161_v16 = vmul.f32 %v1153_v9, %v1117_v7  ;;  %1652 = vtanh.f32 %v1183_v11 }
 0x88a   :  { %v1135_v18 = vpop.f32.mrf.mxu3 }
 0x88b   :  { %v1176_v20 = vadd.f32 %v1168_v13, %v1134_v48  ;;  %v1169_v60 = vmul.f32 %v1161_v16, %v1117_v7  ;;  %v1136_v23 = vadd.f32 %v1135_v18, %v2181_v63 }
 0x88d   :  { %v1177_v25 = vadd.f32 %v1169_v60, %v1117_v7  ;;  %v1154_v10 = vmul.f32 0.044715, %v1136_v23  ;;  %v1184_v26 = vmul.f32 0.7978846, %v1176_v20  ;;  %v1146_v37 = vmul.f32 0.5, %v1136_v23 }
 0x88f   :  { %v1185_v30 = vmul.f32 0.7978846, %v1177_v25  ;;  %v1162_v31 = vmul.f32 %v1154_v10, %v1136_v23  ;;  %v1653_v17 = vpop.eup %1652 }
 0x890   :  { %v1199_v38 = vadd.f32 1.0, %v1653_v17 }
 0x891   :  { %v1170_v32 = vmul.f32 %v1162_v31, %v1136_v23  ;;  %1654 = vtanh.f32 %v1185_v30 }
 0x892   :  { %1656 = vtanh.f32 %v1184_v26  ;;  %v1207_v42 = vmul.f32 %v1199_v38, %v1143_v29 }
 0x893   :  { %v1178_v34 = vadd.f32 %v1170_v32, %v1136_v23 }
 0x895   :  { %v1186_v35 = vmul.f32 0.7978846, %v1178_v34 }
 0x897   :  { %v1655_v15 = vpop.eup %1654  ;;  %1658 = vtanh.f32 %v1186_v35 }
 0x898   :  { %v1201_v12 = vadd.f32 1.0, %v1655_v15  ;;  %v1657_v41 = vpop.eup %1656 }
 0x899   :  { %v1200_v39 = vadd.f32 1.0, %v1657_v41 }
 0x89a   :  { %v1209_v14 = vmul.f32 %v1201_v12, %v1145_v40  ;;  %v1569_v12 = vld [vmem:[%s2226_s12] ss:$0 sm:$0xff] }
 0x89b   :  { %v1208_v47 = vmul.f32 %v1200_v39, %v1144_v43 }
 0x89c   :  { %v1215_v22 = vpack.c.bf16 %v1209_v14, %v1207_v42 }
 0x89d   :  { %v1659_v24 = vpop.eup %1658 }
 0x89e   :  { %v1202_v45 = vadd.f32 1.0, %v1659_v24  ;;  %1334 = vmatmul.bf16.vlgmr.msra.gmra.mxu1 %v1215_v22 }
 0x8a0   :  { %v1210_v49 = vmul.f32 %v1202_v45, %v1146_v37 }
 0x8a2   :  { %v1216_v27 = vpack.c.bf16 %v1210_v49, %v1208_v47 }
 0x8a4   :  { %1492 = vmatmul.msk.bf16.vlgmr.msra.gmra.mxu2 %vm1319_vm15, %v1216_v27 }
 0x8c1   :  { %v1119_v2 = vpop.f32.mrf.mxu0 }
 0x8c2   :  { %v1120_v28 = vadd.f32 %v1119_v2, %v2169_v56 }
 0x8c4   :  { %v1155_v50 = vmul.f32 0.044715, %v1120_v28  ;;  %v1147_v60 = vmul.f32 0.5, %v1120_v28 }
 0x8c6   :  { %v1163_v51 = vmul.f32 %v1155_v50, %v1120_v28 }
 0x8c7   :  { %v1138_v21 = vpop.f32.mrf.mxu3 }
 0x8c8   :  { %v1139_v33 = vadd.f32 %v1138_v21, %v2181_v63  ;;  %v1171_v53 = vmul.f32 %v1163_v51, %v1120_v28 }
 0x8c9   :  { %v1121_v55 = vpop.f32.mrf.mxu0 }
 0x8ca   :  { %v1156_v36 = vmul.f32 0.044715, %v1139_v33  ;;  %v1122_v57 = vadd.f32 %v1121_v55, %v2169_v56  ;;  %v1179_v59 = vadd.f32 %v1171_v53, %v1120_v28  ;;  %v1148_v17 = vmul.f32 0.5, %v1139_v33 }
 0x8cc   :  { %v1164_v52 = vmul.f32 %v1156_v36, %v1139_v33  ;;  %v1157_v61 = vmul.f32 0.044715, %v1122_v57  ;;  %v1187_v44 = vmul.f32 0.7978846, %v1179_v59  ;;  %v1149_v23 = vmul.f32 0.5, %v1122_v57 }
 0x8ce   :  { %v1165_v62 = vmul.f32 %v1157_v61, %v1122_v57  ;;  %v1172_v1 = vmul.f32 %v1164_v52, %v1139_v33  ;;  %1660 = vtanh.f32 %v1187_v44 }
 0x8cf   :  { %v1140_v19 = vpop.f32.mrf.mxu3 }
 0x8d0   :  { %v1141_v3 = vadd.f32 %v1140_v19, %v2181_v63  ;;  %v1173_v48 = vmul.f32 %v1165_v62, %v1122_v57  ;;  %v1180_v4 = vadd.f32 %v1172_v1, %v1139_v33 }
 0x8d2   :  { %v1158_v6 = vmul.f32 0.044715, %v1141_v3  ;;  %v1181_v54 = vadd.f32 %v1173_v48, %v1122_v57  ;;  %v1188_v9 = vmul.f32 0.7978846, %v1180_v4  ;;  %v1150_v34 = vmul.f32 0.5, %v1141_v3 }
 0x8d4   :  { %v1166_v7 = vmul.f32 %v1158_v6, %v1141_v3  ;;  %v1189_v8 = vmul.f32 0.7978846, %v1181_v54  ;;  %v1661_v56 = vpop.eup %1660 }
 0x8d5   :  { %v1203_v18 = vadd.f32 1.0, %v1661_v56 }
 0x8d6   :  { %1662 = vtanh.f32 %v1189_v8  ;;  %v1174_v11 = vmul.f32 %v1166_v7, %v1141_v3 }
 0x8d7   :  { %1664 = vtanh.f32 %v1188_v9  ;;  %v1211_v10 = vmul.f32 %v1203_v18, %v1147_v60 }
 0x8d8   :  { %v1182_v13 = vadd.f32 %v1174_v11, %v1141_v3 }
 0x8da   :  { %v1190_v16 = vmul.f32 0.7978846, %v1182_v13 }
 0x8dc   :  { %v1663_v20 = vpop.eup %1662  ;;  %1666 = vtanh.f32 %v1190_v16 }
 0x8dd   :  { %v1205_v63 = vadd.f32 1.0, %v1663_v20  ;;  %v1665_v25 = vpop.eup %1664 }
 0x8de   :  { %v1204_v31 = vadd.f32 1.0, %v1665_v25 }
 0x8df   :  { %v1213_v26 = vmul.f32 %v1205_v63, %v1149_v23 }
 0x8e0   :  { %v1212_v38 = vmul.f32 %v1204_v31, %v1148_v17 }
 0x8e1   :  { %v1217_v30 = vpack.c.bf16 %v1213_v26, %v1211_v10 }
 0x8e2   :  { %v1667_v32 = vpop.eup %1666 }
 0x8e3   :  { %1339 = vmatmul.bf16.gmra.mxu1 %v1217_v30  ;;  %v1206_v35 = vadd.f32 1.0, %v1667_v32 }
 0x8e5   :  { %v1214_v15 = vmul.f32 %v1206_v35, %v1150_v34 }
 0x8e7   :  { %v1218_v29 = vpack.c.bf16 %v1214_v15, %v1212_v38 }
 0x8e9   :  { %1493 = vmatmul.msk.bf16.gmra.mxu2 %vm1319_vm15, %v1218_v29 }
 0x91b   :  { %v1335_v40 = vpop.f32.mrf.mxu1 }
 0x91c   :  { %v1336_v41 = vadd.f32 %v1569_v12, %v1335_v40 }
 0x923   :  { %v1337_v22 = vpop.f32.mrf.mxu1 }
 0x924   :  { %v1338_v24 = vadd.f32 %v1569_v12, %v1337_v22 }
 0x927   :  { %v1354_v42 = vpop.f32.mrf.mxu2 }
 0x928   :  { %v1355_v14 = vadd.f32 %v1354_v42, %v1336_v41 }
 0x92a   :  { %v1364_v39 = vadd.f32 %v1355_v14, %v2033_v46 }
 0x92c   :  { %1368 = vst.msk [vmem:[%s2228_s13] sm:$0xff] %vm51_vm0, %v1364_v39 }
 0x92f   :  { %v1356_v43 = vpop.f32.mrf.mxu2 }
 0x930   :  { %v1357_v37 = vadd.f32 %v1356_v43, %v1338_v24 }
 0x932   :  { %v1365_v45 = vadd.f32 %v1357_v37, %v2040_v58 }
 0x934   :  { %1369 = vst.msk [vmem:[%s2228_s13 + $0x8] sm:$0xff] %vm51_vm0, %v1365_v45 }
 0x960   :  { %v1340_v47 = vpop.f32.mrf.mxu1 }
 0x961   :  { %v1341_v49 = vadd.f32 %v1569_v12, %v1340_v47 }
 0x968   :  { %v1342_v28 = vpop.f32.mrf.mxu1 }
 0x969   :  { %v1343_v50 = vadd.f32 %v1569_v12, %v1342_v28 }
 0x96c   :  { %v1359_v27 = vpop.f32.mrf.mxu2 }
 0x96d   :  { %v1360_v46 = vadd.f32 %v1359_v27, %v1341_v49 }
 0x96f   :  { %v1366_v2 = vadd.f32 %v1360_v46, %v2050_v0 }
 0x971   :  { %1370 = vst.msk [vmem:[%s2228_s13 + $0x10] sm:$0xff] %vm51_vm0, %v1366_v2 }
 0x974   :  { %v1361_v51 = vpop.f32.mrf.mxu2 }
 0x975   :  { %v1362_v58 = vadd.f32 %v1361_v51, %v1343_v50 }
 0x977   :  { %v1367_v21 = vadd.f32 %v1362_v58, %v2057_v5 }
 0x979   :  { %1371 = vst.msk [vmem:[%s2228_s13 + $0x18] sm:$0xff] %vm51_vm0, %v1367_v21 }

</bundles_post_ra>
